<compile_context>
chip_gen: v7x
topology: tpu7x:2x2x1
jax: 0.10.0
libtpu: 0.0.40
codegen_flags: <defaults>
</compile_context>

<pallas_src>
import jax
import jax.numpy as jnp
from jax.experimental import pallas as pl
from jax.experimental.pallas import tpu as pltpu


# (cout, cin, kernel, stride) -- static Python constants, never traced.
_LAYER_SPECS = (
    (32, 4, 8, 4),
    (64, 32, 4, 2),
    (64, 64, 3, 1),
)
_LANE = 128  # Cout padded to this so output stores are lane-dense


def _round_up(x, m):
    return ((x + m - 1) // m) * m


# ---------------------------------------------------------------------------
# Pallas kernel: one whole conv layer = sum of shifted matmuls + bias + ReLU
# ---------------------------------------------------------------------------
def _make_conv_kernel(offsets, m):
    """offsets (per-tap row shifts) and m (valid rows) are static ints."""

    def kernel(x_ref, w_ref, b_ref, o_ref):
        # x_ref: (M_pad, K) bf16 flattened stride-1 activation (zero row pad)
        # w_ref: (T, K, 128) bf16 per-tap weights
        # b_ref: (1, 128) f32 bias; o_ref: (m, 128) bf16/f32
        acc = jnp.dot(x_ref[pl.ds(offsets[0], m), :], w_ref[0],
                      preferred_element_type=jnp.float32)
        for t in range(1, len(offsets)):          # static loop: 4 / 4 / 9 taps
            acc = acc + jnp.dot(x_ref[pl.ds(offsets[t], m), :], w_ref[t],
                                preferred_element_type=jnp.float32)
        o_ref[...] = jnp.maximum(acc + b_ref[...], 0.0).astype(o_ref.dtype)

    return kernel


def _conv_layer_call(x2, w3, b2, offsets, m, out_dtype):
    mp, kdim = x2.shape
    t = w3.shape[0]
    return pl.pallas_call(
        _make_conv_kernel(offsets, m),
        out_shape=jax.ShapeDtypeStruct((m, _LANE), out_dtype),
        grid_spec=pltpu.PrefetchScalarGridSpec(
            num_scalar_prefetch=0,
            grid=(1,),                      # single step: everything in VMEM once
            in_specs=[
                pl.BlockSpec((mp, kdim), lambda i: (0, 0)),          # activation
                pl.BlockSpec((t, kdim, _LANE), lambda i: (0, 0, 0)), # tap weights
                pl.BlockSpec((1, _LANE), lambda i: (0, 0)),          # bias
            ],
            out_specs=pl.BlockSpec((m, _LANE), lambda i: (0, 0)),
        ),
        compiler_params=pltpu.CompilerParams(
            dimension_semantics=("arbitrary",)),
    )(x2, w3, b2)


# ---------------------------------------------------------------------------
# XLA glue: space-to-depth (one tiny transpose/layer) + flatten + row padding
# ---------------------------------------------------------------------------
def _space_to_depth(x, f):
    """(N,H,W,C) -> (N,H/f,W/f,f*f*C), new channel order (sub_h, sub_w, c)."""
    if f == 1:
        return x
    n, h, w, c = x.shape
    hs, ws = h // f, w // f
    x = x.reshape(n, hs, f, ws, f, c)
    x = jnp.transpose(x, (0, 1, 3, 2, 4, 5))
    return x.reshape(n, hs, ws, f * f * c)


def _conv2d_relu_nhwc(x, w3, b2, k, s, cout, out_dtype):
    """x: (N,H,W,Cin) -> (N,OH,OW,cout) with fused bias + ReLU."""
    n, h, w, _ = x.shape
    assert h % s == 0 and w % s == 0 and k % s == 0
    kk = k // s                               # effective window after s2d
    hs, ws = h // s, w // s
    xs = _space_to_depth(x, s)                # (N, hs, ws, s*s*Cin)
    m = n * hs * ws
    pad_rows = (kk - 1) * ws + (kk - 1)       # max shifted-slice overhang
    mp = _round_up(m + pad_rows, 8)
    x2 = xs.reshape(m, xs.shape[-1]).astype(jnp.bfloat16)
    x2 = jnp.pad(x2, ((0, mp - m), (0, 0)))
    offsets = tuple(a * ws + b for a in range(kk) for b in range(kk))
    y = _conv_layer_call(x2, w3, b2, offsets, m, out_dtype)   # (m, 128)
    oh, ow = hs - kk + 1, ws - kk + 1
    return y.reshape(n, hs, ws, _LANE)[:, :oh, :ow, :cout]


# ---------------------------------------------------------------------------
# ConvBase: deterministic parameter init, one-time weight prep, forward
# ---------------------------------------------------------------------------
def init_convbase_params(key):
    """PyTorch-equivalent init: list of (W in OIHW f32, b f32)."""
    params = []
    for li, (cout, cin, k, _s) in enumerate(_LAYER_SPECS):
        kw_key, kb_key = jax.random.split(jax.random.fold_in(key, li))
        fan_in = cin * k * k
        bound = 1.0 / (fan_in ** 0.5)
        w = jax.random.uniform(kw_key, (cout, cin, k, k), jnp.float32,
                               minval=-bound, maxval=bound)
        b = jax.random.uniform(kb_key, (cout,), jnp.float32,
                               minval=-bound, maxval=bound)
        params.append((w, b))
    return params


def prepare_params(params):
    """One-time: OIHW -> per-tap (k'*k', s*s*Cin, 128) bf16 weights matching the
    space-to-depth channel order, plus (1, 128) f32 bias."""
    prepped = []
    for (cout, cin, k, s), (w, b) in zip(_LAYER_SPECS, params):
        kk = k // s
        w_hwio = jnp.transpose(w, (2, 3, 1, 0))             # (kh, kw, cin, cout)
        w_r = w_hwio.reshape(kk, s, kk, s, cin, cout)       # (a, sh, b, sw, ci, co)
        w_r = jnp.transpose(w_r, (0, 2, 1, 3, 4, 5))        # (a, b, sh, sw, ci, co)
        w3 = w_r.reshape(kk * kk, s * s * cin, cout)
        w3 = jnp.pad(w3, ((0, 0), (0, 0), (0, _LANE - cout)))
        b2 = jnp.pad(b.reshape(1, cout), ((0, 0), (0, _LANE - cout)))
        prepped.append((w3.astype(jnp.bfloat16), b2.astype(jnp.float32)))
    return prepped


@jax.jit
def convbase_forward(x, prepped_params):
    """x: (N, 4, H, W) NCHW f32 -> (N, 64, H', W') NCHW f32."""
    x = jnp.transpose(x, (0, 2, 3, 1))                      # NCHW -> NHWC (once)
    n_layers = len(_LAYER_SPECS)
    for li, ((cout, _cin, k, s), (w3, b2)) in enumerate(
            zip(_LAYER_SPECS, prepped_params)):
        out_dtype = jnp.float32 if li == n_layers - 1 else jnp.bfloat16
        x = _conv2d_relu_nhwc(x, w3, b2, k, s, cout, out_dtype)
    return jnp.transpose(x, (0, 3, 1, 2))                   # NHWC -> NCHW (once)


def convbase_reference(x, params):
    """Pure-JAX f32 reference (lax.conv) for correctness checking."""
    for (_cout, _cin, _k, s), (w, b) in zip(_LAYER_SPECS, params):
        y = jax.lax.conv_general_dilated(
            x, w, window_strides=(s, s), padding="VALID",
            dimension_numbers=("NCHW", "OIHW", "NCHW"))
        x = jnp.maximum(y + b[None, :, None, None], 0.0)
    return x


if __name__ == "__main__":
    key = jax.random.PRNGKey(0)
    pkey, xkey = jax.random.split(key)

    params = init_convbase_params(pkey)     # PyTorch-layout f32 params
    prepped = prepare_params(params)        # kernel-layout bf16/f32 params

    # Canonical DQN input for this module: batch=2, 4 channels, 84x84 frames.
    x = jax.random.uniform(xkey, (2, 4, 84, 84), jnp.float32)

    out = jax.block_until_ready(convbase_forward(x, prepped))
    assert out.shape == (2, 64, 7, 7), out.shape

    ref = convbase_reference(x, params)
    # bf16 matmul inputs / intermediates with f32 accumulation -> relaxed tol.
    assert jnp.allclose(out, ref, rtol=2e-2, atol=2e-2), (
        float(jnp.max(jnp.abs(out - ref))))

    print("KERNEL_OK")
</pallas_src>

<mosaic_0001>
module attributes {stable_mosaic.version = 11 : i64} {
  func.func @kernel(%arg0: i32, %arg1: memref<904x64xbf16, #tpu.memory_space<vmem>>, %arg2: memref<4x64x128xbf16, #tpu.memory_space<vmem>>, %arg3: memref<1x128xf32, #tpu.memory_space<vmem>>, %arg4: memref<882x128xbf16, #tpu.memory_space<vmem>>) attributes {dimension_semantics = [#tpu.dimension_semantics<arbitrary>], iteration_bounds = array<i64: 1>, scalar_prefetch = 0 : i64, scratch_operands = 0 : i64, tpu.core_type = #tpu.core_type<tc>, window_params = [{pipeline_mode = #tpu.pipeline_mode<synchronous>, transform_indices = @transform_0, window_bounds = array<i64: 904, 64>}, {pipeline_mode = #tpu.pipeline_mode<synchronous>, transform_indices = @transform_1, window_bounds = array<i64: 4, 64, 128>}, {pipeline_mode = #tpu.pipeline_mode<synchronous>, transform_indices = @transform_2, window_bounds = array<i64: 1, 128>}, {pipeline_mode = #tpu.pipeline_mode<synchronous>, transform_indices = @transform_3, window_bounds = array<i64: 882, 128>}]} {
    %c0 = arith.constant 0 : index
    %c0_0 = arith.constant 0 : index
    %0 = vector.load %arg1[%c0, %c0_0] : memref<904x64xbf16, #tpu.memory_space<vmem>>, vector<882x64xbf16>
    %c0_1 = arith.constant 0 : index
    %c0_2 = arith.constant 0 : index
    %c0_3 = arith.constant 0 : index
    %1 = vector.load %arg2[%c0_1, %c0_2, %c0_3] : memref<4x64x128xbf16, #tpu.memory_space<vmem>>, vector<1x64x128xbf16>
    %2 = vector.shape_cast %1 : vector<1x64x128xbf16> to vector<64x128xbf16>
    %cst = arith.constant dense<0.000000e+00> : vector<882x128xf32>
    %3 = tpu.matmul %0, %2, %cst {dimension_numbers = #tpu.dot_dimension_numbers<[1], [0], [0], [1], [0, 0, 1, 1], [], []>} : vector<882x64xbf16>, vector<64x128xbf16>, vector<882x128xf32> -> vector<882x128xf32>
    %c1 = arith.constant 1 : index
    %c0_4 = arith.constant 0 : index
    %4 = vector.load %arg1[%c1, %c0_4] : memref<904x64xbf16, #tpu.memory_space<vmem>>, vector<882x64xbf16>
    %c1_5 = arith.constant 1 : index
    %c0_6 = arith.constant 0 : index
    %c0_7 = arith.constant 0 : index
    %5 = vector.load %arg2[%c1_5, %c0_6, %c0_7] : memref<4x64x128xbf16, #tpu.memory_space<vmem>>, vector<1x64x128xbf16>
    %6 = vector.shape_cast %5 : vector<1x64x128xbf16> to vector<64x128xbf16>
    %cst_8 = arith.constant dense<0.000000e+00> : vector<882x128xf32>
    %7 = tpu.matmul %4, %6, %cst_8 {dimension_numbers = #tpu.dot_dimension_numbers<[1], [0], [0], [1], [0, 0, 1, 1], [], []>} : vector<882x64xbf16>, vector<64x128xbf16>, vector<882x128xf32> -> vector<882x128xf32>
    %8 = arith.addf %3, %7 : vector<882x128xf32>
    %c21 = arith.constant 21 : index
    %c0_9 = arith.constant 0 : index
    %9 = vector.load %arg1[%c21, %c0_9] : memref<904x64xbf16, #tpu.memory_space<vmem>>, vector<882x64xbf16>
    %c2 = arith.constant 2 : index
    %c0_10 = arith.constant 0 : index
    %c0_11 = arith.constant 0 : index
    %10 = vector.load %arg2[%c2, %c0_10, %c0_11] : memref<4x64x128xbf16, #tpu.memory_space<vmem>>, vector<1x64x128xbf16>
    %11 = vector.shape_cast %10 : vector<1x64x128xbf16> to vector<64x128xbf16>
    %cst_12 = arith.constant dense<0.000000e+00> : vector<882x128xf32>
    %12 = tpu.matmul %9, %11, %cst_12 {dimension_numbers = #tpu.dot_dimension_numbers<[1], [0], [0], [1], [0, 0, 1, 1], [], []>} : vector<882x64xbf16>, vector<64x128xbf16>, vector<882x128xf32> -> vector<882x128xf32>
    %13 = arith.addf %8, %12 : vector<882x128xf32>
    %c22 = arith.constant 22 : index
    %c0_13 = arith.constant 0 : index
    %14 = vector.load %arg1[%c22, %c0_13] : memref<904x64xbf16, #tpu.memory_space<vmem>>, vector<882x64xbf16>
    %c3 = arith.constant 3 : index
    %c0_14 = arith.constant 0 : index
    %c0_15 = arith.constant 0 : index
    %15 = vector.load %arg2[%c3, %c0_14, %c0_15] : memref<4x64x128xbf16, #tpu.memory_space<vmem>>, vector<1x64x128xbf16>
    %16 = vector.shape_cast %15 : vector<1x64x128xbf16> to vector<64x128xbf16>
    %cst_16 = arith.constant dense<0.000000e+00> : vector<882x128xf32>
    %17 = tpu.matmul %14, %16, %cst_16 {dimension_numbers = #tpu.dot_dimension_numbers<[1], [0], [0], [1], [0, 0, 1, 1], [], []>} : vector<882x64xbf16>, vector<64x128xbf16>, vector<882x128xf32> -> vector<882x128xf32>
    %18 = arith.addf %13, %17 : vector<882x128xf32>
    %c0_17 = arith.constant 0 : index
    %c0_18 = arith.constant 0 : index
    %19 = vector.load %arg3[%c0_17, %c0_18] : memref<1x128xf32, #tpu.memory_space<vmem>>, vector<1x128xf32>
    %20 = vector.broadcast %19 : vector<1x128xf32> to vector<882x128xf32>
    %21 = arith.addf %18, %20 : vector<882x128xf32>
    %cst_19 = arith.constant 0.000000e+00 : f32
    %22 = vector.broadcast %cst_19 : f32 to vector<882x128xf32>
    %23 = arith.maximumf %21, %22 : vector<882x128xf32>
    %24 = arith.truncf %23 : vector<882x128xf32> to vector<882x128xbf16>
    %c0_20 = arith.constant 0 : index
    %c0_21 = arith.constant 0 : index
    %25 = vector.load %arg4[%c0_20, %c0_21] : memref<882x128xbf16, #tpu.memory_space<vmem>>, vector<882x128xbf16>
    tpu.vector_store %arg4[%c0_20, %c0_21], %24 {strides = array<i32>} : memref<882x128xbf16, #tpu.memory_space<vmem>>, vector<882x128xbf16>,
    return
  }
  func.func @transform_0(%arg0: i32) -> (i32, i32) {
    %c0_i32 = arith.constant 0 : i32
    %c0_i32_0 = arith.constant 0 : i32
    %c0_i32_1 = arith.constant 0 : i32
    return %c0_i32, %c0_i32_0 : i32, i32
  }
  func.func @transform_1(%arg0: i32) -> (i32, i32, i32) {
    %c0_i32 = arith.constant 0 : i32
    %c0_i32_0 = arith.constant 0 : i32
    %c0_i32_1 = arith.constant 0 : i32
    %c0_i32_2 = arith.constant 0 : i32
    return %c0_i32, %c0_i32_0, %c0_i32_1 : i32, i32, i32
  }
  func.func @transform_2(%arg0: i32) -> (i32, i32) {
    %c0_i32 = arith.constant 0 : i32
    %c0_i32_0 = arith.constant 0 : i32
    %c0_i32_1 = arith.constant 0 : i32
    return %c0_i32, %c0_i32_0 : i32, i32
  }
  func.func @transform_3(%arg0: i32) -> (i32, i32) {
    %c0_i32 = arith.constant 0 : i32
    %c0_i32_0 = arith.constant 0 : i32
    %c0_i32_1 = arith.constant 0 : i32
    return %c0_i32, %c0_i32_0 : i32, i32
  }
}

module attributes {stable_mosaic.version = 11 : i64} {
  func.func @kernel(%arg0: i32, %arg1: memref<216x128xbf16, #tpu.memory_space<vmem>>, %arg2: memref<4x128x128xbf16, #tpu.memory_space<vmem>>, %arg3: memref<1x128xf32, #tpu.memory_space<vmem>>, %arg4: memref<200x128xbf16, #tpu.memory_space<vmem>>) attributes {dimension_semantics = [#tpu.dimension_semantics<arbitrary>], iteration_bounds = array<i64: 1>, scalar_prefetch = 0 : i64, scratch_operands = 0 : i64, tpu.core_type = #tpu.core_type<tc>, window_params = [{pipeline_mode = #tpu.pipeline_mode<synchronous>, transform_indices = @transform_0, window_bounds = array<i64: 216, 128>}, {pipeline_mode = #tpu.pipeline_mode<synchronous>, transform_indices = @transform_1, window_bounds = array<i64: 4, 128, 128>}, {pipeline_mode = #tpu.pipeline_mode<synchronous>, transform_indices = @transform_2, window_bounds = array<i64: 1, 128>}, {pipeline_mode = #tpu.pipeline_mode<synchronous>, transform_indices = @transform_3, window_bounds = array<i64: 200, 128>}]} {
    %c0 = arith.constant 0 : index
    %c0_0 = arith.constant 0 : index
    %0 = vector.load %arg1[%c0, %c0_0] : memref<216x128xbf16, #tpu.memory_space<vmem>>, vector<200x128xbf16>
    %c0_1 = arith.constant 0 : index
    %c0_2 = arith.constant 0 : index
    %c0_3 = arith.constant 0 : index
    %1 = vector.load %arg2[%c0_1, %c0_2, %c0_3] : memref<4x128x128xbf16, #tpu.memory_space<vmem>>, vector<1x128x128xbf16>
    %2 = vector.shape_cast %1 : vector<1x128x128xbf16> to vector<128x128xbf16>
    %cst = arith.constant dense<0.000000e+00> : vector<200x128xf32>
    %3 = tpu.matmul %0, %2, %cst {dimension_numbers = #tpu.dot_dimension_numbers<[1], [0], [0], [1], [0, 0, 1, 1], [], []>} : vector<200x128xbf16>, vector<128x128xbf16>, vector<200x128xf32> -> vector<200x128xf32>
    %c1 = arith.constant 1 : index
    %c0_4 = arith.constant 0 : index
    %4 = vector.load %arg1[%c1, %c0_4] : memref<216x128xbf16, #tpu.memory_space<vmem>>, vector<200x128xbf16>
    %c1_5 = arith.constant 1 : index
    %c0_6 = arith.constant 0 : index
    %c0_7 = arith.constant 0 : index
    %5 = vector.load %arg2[%c1_5, %c0_6, %c0_7] : memref<4x128x128xbf16, #tpu.memory_space<vmem>>, vector<1x128x128xbf16>
    %6 = vector.shape_cast %5 : vector<1x128x128xbf16> to vector<128x128xbf16>
    %cst_8 = arith.constant dense<0.000000e+00> : vector<200x128xf32>
    %7 = tpu.matmul %4, %6, %cst_8 {dimension_numbers = #tpu.dot_dimension_numbers<[1], [0], [0], [1], [0, 0, 1, 1], [], []>} : vector<200x128xbf16>, vector<128x128xbf16>, vector<200x128xf32> -> vector<200x128xf32>
    %8 = arith.addf %3, %7 : vector<200x128xf32>
    %c10 = arith.constant 10 : index
    %c0_9 = arith.constant 0 : index
    %9 = vector.load %arg1[%c10, %c0_9] : memref<216x128xbf16, #tpu.memory_space<vmem>>, vector<200x128xbf16>
    %c2 = arith.constant 2 : index
    %c0_10 = arith.constant 0 : index
    %c0_11 = arith.constant 0 : index
    %10 = vector.load %arg2[%c2, %c0_10, %c0_11] : memref<4x128x128xbf16, #tpu.memory_space<vmem>>, vector<1x128x128xbf16>
    %11 = vector.shape_cast %10 : vector<1x128x128xbf16> to vector<128x128xbf16>
    %cst_12 = arith.constant dense<0.000000e+00> : vector<200x128xf32>
    %12 = tpu.matmul %9, %11, %cst_12 {dimension_numbers = #tpu.dot_dimension_numbers<[1], [0], [0], [1], [0, 0, 1, 1], [], []>} : vector<200x128xbf16>, vector<128x128xbf16>, vector<200x128xf32> -> vector<200x128xf32>
    %13 = arith.addf %8, %12 : vector<200x128xf32>
    %c11 = arith.constant 11 : index
    %c0_13 = arith.constant 0 : index
    %14 = vector.load %arg1[%c11, %c0_13] : memref<216x128xbf16, #tpu.memory_space<vmem>>, vector<200x128xbf16>
    %c3 = arith.constant 3 : index
    %c0_14 = arith.constant 0 : index
    %c0_15 = arith.constant 0 : index
    %15 = vector.load %arg2[%c3, %c0_14, %c0_15] : memref<4x128x128xbf16, #tpu.memory_space<vmem>>, vector<1x128x128xbf16>
    %16 = vector.shape_cast %15 : vector<1x128x128xbf16> to vector<128x128xbf16>
    %cst_16 = arith.constant dense<0.000000e+00> : vector<200x128xf32>
    %17 = tpu.matmul %14, %16, %cst_16 {dimension_numbers = #tpu.dot_dimension_numbers<[1], [0], [0], [1], [0, 0, 1, 1], [], []>} : vector<200x128xbf16>, vector<128x128xbf16>, vector<200x128xf32> -> vector<200x128xf32>
    %18 = arith.addf %13, %17 : vector<200x128xf32>
    %c0_17 = arith.constant 0 : index
    %c0_18 = arith.constant 0 : index
    %19 = vector.load %arg3[%c0_17, %c0_18] : memref<1x128xf32, #tpu.memory_space<vmem>>, vector<1x128xf32>
    %20 = vector.broadcast %19 : vector<1x128xf32> to vector<200x128xf32>
    %21 = arith.addf %18, %20 : vector<200x128xf32>
    %cst_19 = arith.constant 0.000000e+00 : f32
    %22 = vector.broadcast %cst_19 : f32 to vector<200x128xf32>
    %23 = arith.maximumf %21, %22 : vector<200x128xf32>
    %24 = arith.truncf %23 : vector<200x128xf32> to vector<200x128xbf16>
    %c0_20 = arith.constant 0 : index
    %c0_21 = arith.constant 0 : index
    %25 = vector.load %arg4[%c0_20, %c0_21] : memref<200x128xbf16, #tpu.memory_space<vmem>>, vector<200x128xbf16>
    tpu.vector_store %arg4[%c0_20, %c0_21], %24 {strides = array<i32>} : memref<200x128xbf16, #tpu.memory_space<vmem>>, vector<200x128xbf16>,
    return
  }
  func.func @transform_0(%arg0: i32) -> (i32, i32) {
    %c0_i32 = arith.constant 0 : i32
    %c0_i32_0 = arith.constant 0 : i32
    %c0_i32_1 = arith.constant 0 : i32
    return %c0_i32, %c0_i32_0 : i32, i32
  }
  func.func @transform_1(%arg0: i32) -> (i32, i32, i32) {
    %c0_i32 = arith.constant 0 : i32
    %c0_i32_0 = arith.constant 0 : i32
    %c0_i32_1 = arith.constant 0 : i32
    %c0_i32_2 = arith.constant 0 : i32
    return %c0_i32, %c0_i32_0, %c0_i32_1 : i32, i32, i32
  }
  func.func @transform_2(%arg0: i32) -> (i32, i32) {
    %c0_i32 = arith.constant 0 : i32
    %c0_i32_0 = arith.constant 0 : i32
    %c0_i32_1 = arith.constant 0 : i32
    return %c0_i32, %c0_i32_0 : i32, i32
  }
  func.func @transform_3(%arg0: i32) -> (i32, i32) {
    %c0_i32 = arith.constant 0 : i32
    %c0_i32_0 = arith.constant 0 : i32
    %c0_i32_1 = arith.constant 0 : i32
    return %c0_i32, %c0_i32_0 : i32, i32
  }
}

module attributes {stable_mosaic.version = 11 : i64} {
  func.func @kernel(%arg0: i32, %arg1: memref<184x64xbf16, #tpu.memory_space<vmem>>, %arg2: memref<9x64x128xbf16, #tpu.memory_space<vmem>>, %arg3: memref<1x128xf32, #tpu.memory_space<vmem>>, %arg4: memref<162x128xf32, #tpu.memory_space<vmem>>) attributes {dimension_semantics = [#tpu.dimension_semantics<arbitrary>], iteration_bounds = array<i64: 1>, scalar_prefetch = 0 : i64, scratch_operands = 0 : i64, tpu.core_type = #tpu.core_type<tc>, window_params = [{pipeline_mode = #tpu.pipeline_mode<synchronous>, transform_indices = @transform_0, window_bounds = array<i64: 184, 64>}, {pipeline_mode = #tpu.pipeline_mode<synchronous>, transform_indices = @transform_1, window_bounds = array<i64: 9, 64, 128>}, {pipeline_mode = #tpu.pipeline_mode<synchronous>, transform_indices = @transform_2, window_bounds = array<i64: 1, 128>}, {pipeline_mode = #tpu.pipeline_mode<synchronous>, transform_indices = @transform_3, window_bounds = array<i64: 162, 128>}]} {
    %c0 = arith.constant 0 : index
    %c0_0 = arith.constant 0 : index
    %0 = vector.load %arg1[%c0, %c0_0] : memref<184x64xbf16, #tpu.memory_space<vmem>>, vector<162x64xbf16>
    %c0_1 = arith.constant 0 : index
    %c0_2 = arith.constant 0 : index
    %c0_3 = arith.constant 0 : index
    %1 = vector.load %arg2[%c0_1, %c0_2, %c0_3] : memref<9x64x128xbf16, #tpu.memory_space<vmem>>, vector<1x64x128xbf16>
    %2 = vector.shape_cast %1 : vector<1x64x128xbf16> to vector<64x128xbf16>
    %cst = arith.constant dense<0.000000e+00> : vector<162x128xf32>
    %3 = tpu.matmul %0, %2, %cst {dimension_numbers = #tpu.dot_dimension_numbers<[1], [0], [0], [1], [0, 0, 1, 1], [], []>} : vector<162x64xbf16>, vector<64x128xbf16>, vector<162x128xf32> -> vector<162x128xf32>
    %c1 = arith.constant 1 : index
    %c0_4 = arith.constant 0 : index
    %4 = vector.load %arg1[%c1, %c0_4] : memref<184x64xbf16, #tpu.memory_space<vmem>>, vector<162x64xbf16>
    %c1_5 = arith.constant 1 : index
    %c0_6 = arith.constant 0 : index
    %c0_7 = arith.constant 0 : index
    %5 = vector.load %arg2[%c1_5, %c0_6, %c0_7] : memref<9x64x128xbf16, #tpu.memory_space<vmem>>, vector<1x64x128xbf16>
    %6 = vector.shape_cast %5 : vector<1x64x128xbf16> to vector<64x128xbf16>
    %cst_8 = arith.constant dense<0.000000e+00> : vector<162x128xf32>
    %7 = tpu.matmul %4, %6, %cst_8 {dimension_numbers = #tpu.dot_dimension_numbers<[1], [0], [0], [1], [0, 0, 1, 1], [], []>} : vector<162x64xbf16>, vector<64x128xbf16>, vector<162x128xf32> -> vector<162x128xf32>
    %8 = arith.addf %3, %7 : vector<162x128xf32>
    %c2 = arith.constant 2 : index
    %c0_9 = arith.constant 0 : index
    %9 = vector.load %arg1[%c2, %c0_9] : memref<184x64xbf16, #tpu.memory_space<vmem>>, vector<162x64xbf16>
    %c2_10 = arith.constant 2 : index
    %c0_11 = arith.constant 0 : index
    %c0_12 = arith.constant 0 : index
    %10 = vector.load %arg2[%c2_10, %c0_11, %c0_12] : memref<9x64x128xbf16, #tpu.memory_space<vmem>>, vector<1x64x128xbf16>
    %11 = vector.shape_cast %10 : vector<1x64x128xbf16> to vector<64x128xbf16>
    %cst_13 = arith.constant dense<0.000000e+00> : vector<162x128xf32>
    %12 = tpu.matmul %9, %11, %cst_13 {dimension_numbers = #tpu.dot_dimension_numbers<[1], [0], [0], [1], [0, 0, 1, 1], [], []>} : vector<162x64xbf16>, vector<64x128xbf16>, vector<162x128xf32> -> vector<162x128xf32>
    %13 = arith.addf %8, %12 : vector<162x128xf32>
    %c9 = arith.constant 9 : index
    %c0_14 = arith.constant 0 : index
    %14 = vector.load %arg1[%c9, %c0_14] : memref<184x64xbf16, #tpu.memory_space<vmem>>, vector<162x64xbf16>
    %c3 = arith.constant 3 : index
    %c0_15 = arith.constant 0 : index
    %c0_16 = arith.constant 0 : index
    %15 = vector.load %arg2[%c3, %c0_15, %c0_16] : memref<9x64x128xbf16, #tpu.memory_space<vmem>>, vector<1x64x128xbf16>
    %16 = vector.shape_cast %15 : vector<1x64x128xbf16> to vector<64x128xbf16>
    %cst_17 = arith.constant dense<0.000000e+00> : vector<162x128xf32>
    %17 = tpu.matmul %14, %16, %cst_17 {dimension_numbers = #tpu.dot_dimension_numbers<[1], [0], [0], [1], [0, 0, 1, 1], [], []>} : vector<162x64xbf16>, vector<64x128xbf16>, vector<162x128xf32> -> vector<162x128xf32>
    %18 = arith.addf %13, %17 : vector<162x128xf32>
    %c10 = arith.constant 10 : index
    %c0_18 = arith.constant 0 : index
    %19 = vector.load %arg1[%c10, %c0_18] : memref<184x64xbf16, #tpu.memory_space<vmem>>, vector<162x64xbf16>
    %c4 = arith.constant 4 : index
    %c0_19 = arith.constant 0 : index
    %c0_20 = arith.constant 0 : index
    %20 = vector.load %arg2[%c4, %c0_19, %c0_20] : memref<9x64x128xbf16, #tpu.memory_space<vmem>>, vector<1x64x128xbf16>
    %21 = vector.shape_cast %20 : vector<1x64x128xbf16> to vector<64x128xbf16>
    %cst_21 = arith.constant dense<0.000000e+00> : vector<162x128xf32>
    %22 = tpu.matmul %19, %21, %cst_21 {dimension_numbers = #tpu.dot_dimension_numbers<[1], [0], [0], [1], [0, 0, 1, 1], [], []>} : vector<162x64xbf16>, vector<64x128xbf16>, vector<162x128xf32> -> vector<162x128xf32>
    %23 = arith.addf %18, %22 : vector<162x128xf32>
    %c11 = arith.constant 11 : index
    %c0_22 = arith.constant 0 : index
    %24 = vector.load %arg1[%c11, %c0_22] : memref<184x64xbf16, #tpu.memory_space<vmem>>, vector<162x64xbf16>
    %c5 = arith.constant 5 : index
    %c0_23 = arith.constant 0 : index
    %c0_24 = arith.constant 0 : index
    %25 = vector.load %arg2[%c5, %c0_23, %c0_24] : memref<9x64x128xbf16, #tpu.memory_space<vmem>>, vector<1x64x128xbf16>
    %26 = vector.shape_cast %25 : vector<1x64x128xbf16> to vector<64x128xbf16>
    %cst_25 = arith.constant dense<0.000000e+00> : vector<162x128xf32>
    %27 = tpu.matmul %24, %26, %cst_25 {dimension_numbers = #tpu.dot_dimension_numbers<[1], [0], [0], [1], [0, 0, 1, 1], [], []>} : vector<162x64xbf16>, vector<64x128xbf16>, vector<162x128xf32> -> vector<162x128xf32>
    %28 = arith.addf %23, %27 : vector<162x128xf32>
    %c18 = arith.constant 18 : index
    %c0_26 = arith.constant 0 : index
    %29 = vector.load %arg1[%c18, %c0_26] : memref<184x64xbf16, #tpu.memory_space<vmem>>, vector<162x64xbf16>
    %c6 = arith.constant 6 : index
    %c0_27 = arith.constant 0 : index
    %c0_28 = arith.constant 0 : index
    %30 = vector.load %arg2[%c6, %c0_27, %c0_28] : memref<9x64x128xbf16, #tpu.memory_space<vmem>>, vector<1x64x128xbf16>
    %31 = vector.shape_cast %30 : vector<1x64x128xbf16> to vector<64x128xbf16>
    %cst_29 = arith.constant dense<0.000000e+00> : vector<162x128xf32>
    %32 = tpu.matmul %29, %31, %cst_29 {dimension_numbers = #tpu.dot_dimension_numbers<[1], [0], [0], [1], [0, 0, 1, 1], [], []>} : vector<162x64xbf16>, vector<64x128xbf16>, vector<162x128xf32> -> vector<162x128xf32>
    %33 = arith.addf %28, %32 : vector<162x128xf32>
    %c19 = arith.constant 19 : index
    %c0_30 = arith.constant 0 : index
    %34 = vector.load %arg1[%c19, %c0_30] : memref<184x64xbf16, #tpu.memory_space<vmem>>, vector<162x64xbf16>
    %c7 = arith.constant 7 : index
    %c0_31 = arith.constant 0 : index
    %c0_32 = arith.constant 0 : index
    %35 = vector.load %arg2[%c7, %c0_31, %c0_32] : memref<9x64x128xbf16, #tpu.memory_space<vmem>>, vector<1x64x128xbf16>
    %36 = vector.shape_cast %35 : vector<1x64x128xbf16> to vector<64x128xbf16>
    %cst_33 = arith.constant dense<0.000000e+00> : vector<162x128xf32>
    %37 = tpu.matmul %34, %36, %cst_33 {dimension_numbers = #tpu.dot_dimension_numbers<[1], [0], [0], [1], [0, 0, 1, 1], [], []>} : vector<162x64xbf16>, vector<64x128xbf16>, vector<162x128xf32> -> vector<162x128xf32>
    %38 = arith.addf %33, %37 : vector<162x128xf32>
    %c20 = arith.constant 20 : index
    %c0_34 = arith.constant 0 : index
    %39 = vector.load %arg1[%c20, %c0_34] : memref<184x64xbf16, #tpu.memory_space<vmem>>, vector<162x64xbf16>
    %c8 = arith.constant 8 : index
    %c0_35 = arith.constant 0 : index
    %c0_36 = arith.constant 0 : index
    %40 = vector.load %arg2[%c8, %c0_35, %c0_36] : memref<9x64x128xbf16, #tpu.memory_space<vmem>>, vector<1x64x128xbf16>
    %41 = vector.shape_cast %40 : vector<1x64x128xbf16> to vector<64x128xbf16>
    %cst_37 = arith.constant dense<0.000000e+00> : vector<162x128xf32>
    %42 = tpu.matmul %39, %41, %cst_37 {dimension_numbers = #tpu.dot_dimension_numbers<[1], [0], [0], [1], [0, 0, 1, 1], [], []>} : vector<162x64xbf16>, vector<64x128xbf16>, vector<162x128xf32> -> vector<162x128xf32>
    %43 = arith.addf %38, %42 : vector<162x128xf32>
    %c0_38 = arith.constant 0 : index
    %c0_39 = arith.constant 0 : index
    %44 = vector.load %arg3[%c0_38, %c0_39] : memref<1x128xf32, #tpu.memory_space<vmem>>, vector<1x128xf32>
    %45 = vector.broadcast %44 : vector<1x128xf32> to vector<162x128xf32>
    %46 = arith.addf %43, %45 : vector<162x128xf32>
    %cst_40 = arith.constant 0.000000e+00 : f32
    %47 = vector.broadcast %cst_40 : f32 to vector<162x128xf32>
    %48 = arith.maximumf %46, %47 : vector<162x128xf32>
    %c0_41 = arith.constant 0 : index
    %c0_42 = arith.constant 0 : index
    %49 = vector.load %arg4[%c0_41, %c0_42] : memref<162x128xf32, #tpu.memory_space<vmem>>, vector<162x128xf32>
    tpu.vector_store %arg4[%c0_41, %c0_42], %48 {strides = array<i32>} : memref<162x128xf32, #tpu.memory_space<vmem>>, vector<162x128xf32>,
    return
  }
  func.func @transform_0(%arg0: i32) -> (i32, i32) {
    %c0_i32 = arith.constant 0 : i32
    %c0_i32_0 = arith.constant 0 : i32
    %c0_i32_1 = arith.constant 0 : i32
    return %c0_i32, %c0_i32_0 : i32, i32
  }
  func.func @transform_1(%arg0: i32) -> (i32, i32, i32) {
    %c0_i32 = arith.constant 0 : i32
    %c0_i32_0 = arith.constant 0 : i32
    %c0_i32_1 = arith.constant 0 : i32
    %c0_i32_2 = arith.constant 0 : i32
    return %c0_i32, %c0_i32_0, %c0_i32_1 : i32, i32, i32
  }
  func.func @transform_2(%arg0: i32) -> (i32, i32) {
    %c0_i32 = arith.constant 0 : i32
    %c0_i32_0 = arith.constant 0 : i32
    %c0_i32_1 = arith.constant 0 : i32
    return %c0_i32, %c0_i32_0 : i32, i32
  }
  func.func @transform_3(%arg0: i32) -> (i32, i32) {
    %c0_i32 = arith.constant 0 : i32
    %c0_i32_0 = arith.constant 0 : i32
    %c0_i32_1 = arith.constant 0 : i32
    return %c0_i32, %c0_i32_0 : i32, i32
  }
}

</mosaic_0001>

<bundles_post_ra>
// kernel: convbase_forward.3
= control target key start
LH: loop header
LB: loop body
LE: loop exit
PB: predicated region body
PF: predicated region fallthrough
CT: control target
= control target key end

     0   :  { %vm422_vm0 = vsmask.f32 7424  ;;  %vm2561_vm1 = vsmask.f32 5376  ;;  %vm894_vm2 = vcmask 523264   ;;  %vm3861_vm3 = vcmask 1044480   ;;  %s9247_s1 = inlined_call_operand.vmem [shape: bf16[4,64,128], index: 1, kind: input, shape index: {}]   ;;  %s9248_s0 = inlined_call_operand.vmem [shape: bf16[904,64], index: 0, kind: input, shape index: {}]   ;;  %s9249_s2 = inlined_call_operand.vmem [shape: f32[1,128], index: 2, kind: input, shape index: {}]   ;;  %s9250_s3 = inlined_call_operand.vmem [shape: bf16[882,128], index: 3, kind: output, shape index: {}]  }
   0x1   :  { %v7519_v0 = vld [vmem:[%s9247_s1 + $0x20] sm:$0xff]   ;;  %v7521_v2 = vld [vmem:[%s9247_s1 + $0x28] sm:$0xff]   ;;  %v7523_v4 = vld [vmem:[%s9247_s1 + $0x30] sm:$0xff]  }
   0x2   :  { %v7520_v1 = vld [vmem:[%s9247_s1 + $0x40] sm:$0xff]   ;;  %6715 = vmatprep.subr.bf16.mxu1 %v7519_v0  ;;  %v7522_v3 = vld [vmem:[%s9247_s1 + $0x48] sm:$0xff]   ;;  %v7524_v5 = vld [vmem:[%s9247_s1 + $0x50] sm:$0xff]  }
   0x3   :  { %6955 = vmatprep.subr.bf16.mxu0 %v7520_v1  ;;  %6716 = vmatpush3.bf16.msra.mxu1 %v7519_v0  ;;  %v7525_v6 = vld [vmem:[%s9247_s1 + $0x38] sm:$0xff]   ;;  %v7527_v8 = vld [vmem:[%s9248_s0] sm:$0xff]   ;;  %v7528_v9 = vld [vmem:[%s9248_s0 + $0x8] sm:$0xff]  }
   0x4   :  { %6956 = vmatpush3.bf16.msra.mxu0 %v7520_v1  ;;  %6717 = vmatprep.subr.bf16.mxu1 %v7521_v2  ;;  %v7526_v7 = vld [vmem:[%s9247_s1 + $0x58] sm:$0xff]   ;;  %v2163_v10 = vld [vmem:[%s9248_s0 + $0x8] sm:$0xc]  ;;  %v2164_v11 = vld [vmem:[%s9248_s0 + $0xc] sm:$0xf]  ;;  %v424_v12 = vshrl.u32 %v7527_v8, 16 }
   0x5   :  { %6957 = vmatprep.subr.bf16.mxu0 %v7522_v3  ;;  %v426_v13 = vshll.u32 %v7527_v8, 16  ;;  %v431_v14 = vshll.u32 %v7528_v9, 16  ;;  %v435_v15 = vshrl.u32 %v7528_v9, 16  ;;  %v5738_v16 = vcombine.low %v2163_v10, %v2164_v11  ;;  %v7530_v17 = vld [vmem:[%s9248_s0 + $0x10] sm:$0xff]   ;;  %v7532_v21 = vld [vmem:[%s9247_s1] sm:$0xff]   ;;  %v7533_v29 = vld [vmem:[%s9248_s0 + $0x18] sm:$0xff]  }
   0x6   :  { %v7531_v20 = vld [vmem:[%s9248_s0 + $0x10] sm:$0xff]   ;;  %v2571_v24 = vshrl.u32 %v7530_v17, 16  ;;  %v2574_v25 = vshll.u32 %v7530_v17, 16  ;;  %v2580_v36 = vshrl.u32 %v7533_v29, 16  ;;  %v2583_v37 = vshll.u32 %v7533_v29, 16  ;;  %v7534_v38 = vld [vmem:[%s9247_s1 + $0x60] sm:$0xff]  }
   0x7   :  { %6718 = vmatpush3.bf16.msra.mxu1 %v7521_v2  ;;  %v428_v18 = vrot.slane %v426_v13, 1  ;;  %v433_v19 = vrot.slane %v431_v14, 1  ;;  %v2563_v22 = vshrl.u32 %v5738_v16, 16  ;;  %v2566_v23 = vshll.u32 %v5738_v16, 16  ;;  %v7535_v41 = vld [vmem:[%s9248_s0 + $0x18] sm:$0xff]   ;;  %v7536_v49 = vld [vmem:[%s9248_s0 + $0x20] sm:$0xff]  }
   0x8   :  { %6958 = vmatpush3.bf16.msra.mxu0 %v7522_v3  ;;  %6719 = vmatprep.subr.bf16.mxu1 %v7523_v4  ;;  %v439_v28 = vshll.u32 %v7531_v20, 16  ;;  %v2573_v32 = vrot.slane %v2571_v24, 2  ;;  %v2576_v33 = vrot.slane %v2574_v25, 3  ;;  %v443_v42 = vshrl.u32 %v7531_v20, 16  ;;  %v7537_v51 = vld [vmem:[%s9248_s0 + $0x20] sm:$0xff]   ;;  %v7538_v56 = vld [vmem:[%s9248_s0 + $0x28] sm:$0xff]  }
   0x9   :  { %6959 = vmatprep.subr.bf16.mxu0 %v7524_v5  ;;  %v429_v26 = vor.u32 %v428_v18, %v424_v12  ;;  %v437_v27 = vor.u32 %v435_v15, %v433_v19  ;;  %v2565_v30 = vrot.slane %v2563_v22, 2  ;;  %v2568_v31 = vrot.slane %v2566_v23, 3  ;;  %v7539_v59 = vld [vmem:[%s9248_s0 + $0x28] sm:$0xff]   ;;  %v7540_v61 = vld [vmem:[%s9248_s0 + $0x30] sm:$0xff]   ;;  %v7543_v22 = vld [vmem:[%s9248_s0 + $0x38] sm:$0xff]  }
   0xa   :  { %v441_v35 = vrot.slane %v439_v28, 1  ;;  %v2577_v40 = vor.u32 %v2576_v33, %v2573_v32  ;;  %v2582_v44 = vrot.slane %v2580_v36, 2  ;;  %v2585_v45 = vrot.slane %v2583_v37, 3  ;;  %v7541_v9 = vld [vmem:[%s9248_s0 + $0x30] sm:$0xff]   ;;  %v7544_v24 = vld [vmem:[%s9248_s0 + $0x40] sm:$0xff]  }
   0xb   :  { %6720 = vmatpush3.bf16.msra.mxu1 %v7523_v4  ;;  %v434_v34 = vsel %vm422_vm0, %v429_v26, %v433_v19  ;;  %v2569_v39 = vor.u32 %v2568_v31, %v2565_v30  ;;  %v447_v48 = vshll.u32 %v7535_v41, 16  ;;  %v451_v52 = vshrl.u32 %v7535_v41, 16  ;;  %v7542_v19 = vld [vmem:[%s9248_s0 + $0x38] sm:$0xff]   ;;  %v7545_v29 = vld [vmem:[%s9248_s0 + $0x40] sm:$0xff]  }
   0xc   :  { %6960 = vmatpush3.bf16.msra.mxu0 %v7524_v5  ;;  %6721 = vmatprep.subr.bf16.mxu1 %v7525_v6  ;;  %v442_v43 = vsel %vm422_vm0, %v437_v27, %v441_v35  ;;  %v445_v47 = vor.u32 %v443_v42, %v441_v35  ;;  %v2586_v50 = vor.u32 %v2585_v45, %v2582_v44  ;;  %v2589_v54 = vshrl.u32 %v7536_v49, 16 }
   0xd   :  { %6961 = vmatprep.subr.bf16.mxu0 %v7526_v7  ;;  %6723 = vmatprep.mubr.msk.bf16.mxu1 %vm894_vm2, %v434_v34  ;;  %v2578_v46 = vsel %vm2561_vm1, %v2569_v39, %v2577_v40  ;;  %v449_v53 = vrot.slane %v447_v48, 1  ;;  %v2592_v55 = vshll.u32 %v7536_v49, 16  ;;  %v455_v58 = vshll.u32 %v7537_v51, 16  ;;  %v7546_v34 = vld [vmem:[%s9248_s0 + $0x48] sm:$0xff]  }
   0xe   :  { %6963 = vmatprep.mubr.msk.bf16.mxu0 %vm894_vm2, %v2578_v46  ;;  %v2587_v57 = vsel %vm2561_vm1, %v2577_v40, %v2586_v50  ;;  %v459_v60 = vshrl.u32 %v7537_v51, 16  ;;  %v2591_v63 = vrot.slane %v2589_v54, 2  ;;  %v2598_v3 = vshrl.u32 %v7538_v56, 16  ;;  %v7547_v39 = vld [vmem:[%s9248_s0 + $0x48] sm:$0xff]  }
   0xf   :  { %6722 = vmatpush3.bf16.msra.mxu1 %v7525_v6  ;;  %v450_v62 = vsel %vm422_vm0, %v445_v47, %v449_v53  ;;  %v2594_v0 = vrot.slane %v2592_v55, 3  ;;  %v453_v1 = vor.u32 %v451_v52, %v449_v53  ;;  %v457_v2 = vrot.slane %v455_v58, 1 }
  0x10   :  { %6962 = vmatpush3.bf16.msra.mxu0 %v7526_v7  ;;  %6835 = vmatprep.subr.bf16.mxu1 %v7532_v21  ;;  %v2601_v4 = vshll.u32 %v7538_v56, 16  ;;  %v463_v5 = vshll.u32 %v7539_v59, 16  ;;  %v2607_v7 = vshrl.u32 %v7540_v61, 16  ;;  %v2610_v8 = vshll.u32 %v7540_v61, 16  ;;  %v7548_v56 = vld [vmem:[%s9248_s0 + $0x50] sm:$0xff]  }
  0x11   :  { %7075 = vmatprep.subr.bf16.mxu0 %v7534_v38  ;;  %v2595_v6 = vor.u32 %v2594_v0, %v2591_v63  ;;  %v467_v10 = vshrl.u32 %v7539_v59, 16  ;;  %v458_v11 = vsel %vm422_vm0, %v453_v1, %v457_v2  ;;  %v2600_v12 = vrot.slane %v2598_v3, 2 }
  0x12   :  { %6724 = vmatmul.mubr.msk.bf16.vlgmr.msra.gmra.mrb[0].mxu1 %vm894_vm2, %v442_v43  ;;  %v2603_v13 = vrot.slane %v2601_v4, 3  ;;  %v461_v14 = vor.u32 %v459_v60, %v457_v2  ;;  %v465_v16 = vrot.slane %v463_v5, 1  ;;  %v2609_v17 = vrot.slane %v2607_v7, 2  ;;  %v7551_v4 = vld [vmem:[%s9248_s0 + $0x58] sm:$0xff]   ;;  %v7552_v5 = vld [vmem:[%s9248_s0 + $0x60] sm:$0xff]  }
  0x13   :  { %6836 = vmatpush3.bf16.msra.mxu1 %v7532_v21  ;;  %6964 = vmatmul.mubr.msk.bf16.vlgmr.msra.gmra.mrb[0].mxu0 %vm894_vm2, %v2587_v57  ;;  %v2596_v15 = vsel %vm2561_vm1, %v2586_v50, %v2595_v6  ;;  %v2612_v18 = vrot.slane %v2610_v8, 3  ;;  %v471_v21 = vshll.u32 %v7541_v9, 16  ;;  %v475_v23 = vshrl.u32 %v7541_v9, 16  ;;  %v7549_v57 = vld [vmem:[%s9248_s0 + $0x50] sm:$0xff]  }
  0x14   :  { %7076 = vmatpush3.bf16.msra.mxu0 %v7534_v38  ;;  %6727 = vmatprep.mubr.msk.bf16.mxu1 %vm894_vm2, %v450_v62  ;;  %v2604_v20 = vor.u32 %v2603_v13, %v2600_v12  ;;  %v466_v25 = vsel %vm422_vm0, %v461_v14, %v465_v16  ;;  %v469_v27 = vor.u32 %v467_v10, %v465_v16  ;;  %v2616_v28 = vshrl.u32 %v7542_v19, 16  ;;  %v7550_v62 = vld [vmem:[%s9248_s0 + $0x58] sm:$0xff]  }
  0x15   :  { %6967 = vmatprep.mubr.msk.bf16.mxu0 %vm894_vm2, %v2596_v15  ;;  %v2613_v26 = vor.u32 %v2612_v18, %v2609_v17  ;;  %v473_v31 = vrot.slane %v471_v21, 1  ;;  %v2619_v32 = vshll.u32 %v7542_v19, 16  ;;  %v479_v33 = vshll.u32 %v7543_v22, 16 }
  0x16   :  { %v2605_v30 = vsel %vm2561_vm1, %v2595_v6, %v2604_v20  ;;  %v2618_v36 = vrot.slane %v2616_v28, 2  ;;  %v2625_v37 = vshrl.u32 %v7544_v24, 16  ;;  %v2628_v38 = vshll.u32 %v7544_v24, 16  ;;  %v7554_v24 = vld [vmem:[%s9248_s0 + $0x68] sm:$0xff]  }
  0x17   :  { %v2614_v35 = vsel %vm2561_vm1, %v2604_v20, %v2613_v26  ;;  %v474_v40 = vsel %vm422_vm0, %v469_v27, %v473_v31  ;;  %v2621_v41 = vrot.slane %v2619_v32, 3  ;;  %v477_v42 = vor.u32 %v475_v23, %v473_v31 }
  0x18   :  { %v481_v43 = vrot.slane %v479_v33, 1  ;;  %v2627_v44 = vrot.slane %v2625_v37, 2  ;;  %v2630_v45 = vrot.slane %v2628_v38, 3  ;;  %v483_v46 = vshrl.u32 %v7543_v22, 16  ;;  %v7553_v22 = vld [vmem:[%s9248_s0 + $0x60] sm:$0xff]   ;;  %v7556_v33 = vld [vmem:[%s9248_s0 + $0x70] sm:$0xff]  }
  0x19   :  { %v487_v47 = vshll.u32 %v7545_v29, 16  ;;  %v2622_v48 = vor.u32 %v2621_v41, %v2618_v36  ;;  %v2634_v50 = vshrl.u32 %v7546_v34, 16  ;;  %v2637_v51 = vshll.u32 %v7546_v34, 16 }
  0x1a   :  { %6728 = vmatmul.mubr.msk.bf16.gmra.mrb[4].mxu1 %vm894_vm2, %v458_v11  ;;  %v482_v49 = vsel %vm422_vm0, %v477_v42, %v481_v43  ;;  %v2631_v52 = vor.u32 %v2630_v45, %v2627_v44  ;;  %v485_v53 = vor.u32 %v483_v46, %v481_v43  ;;  %v491_v55 = vshrl.u32 %v7545_v29, 16  ;;  %v7555_v29 = vld [vmem:[%s9248_s0 + $0x68] sm:$0xff]   ;;  %v7557_v46 = vld [vmem:[%s9248_s0 + $0x70] sm:$0xff]  }
  0x1b   :  { %6731 = vmatprep.mubr.msk.bf16.mxu1 %vm894_vm2, %v466_v25  ;;  %6968 = vmatmul.mubr.msk.bf16.gmra.mrb[4].mxu0 %vm894_vm2, %v2605_v30  ;;  %v489_v54 = vrot.slane %v487_v47, 1  ;;  %v2623_v58 = vsel %vm2561_vm1, %v2613_v26, %v2622_v48  ;;  %v2636_v59 = vrot.slane %v2634_v50, 2  ;;  %v2639_v60 = vrot.slane %v2637_v51, 3  ;;  %v7558_v50 = vld [vmem:[%s9248_s0 + $0x78] sm:$0xff]  }
  0x1c   :  { %6971 = vmatprep.mubr.msk.bf16.mxu0 %vm894_vm2, %v2614_v35  ;;  %v495_v61 = vshll.u32 %v7547_v39, 16  ;;  %v2632_v63 = vsel %vm2561_vm1, %v2622_v48, %v2631_v52  ;;  %v2643_v1 = vshrl.u32 %v7548_v56, 16  ;;  %v2646_v3 = vshll.u32 %v7548_v56, 16 }
  0x1d   :  { %v493_v0 = vor.u32 %v491_v55, %v489_v54  ;;  %v503_v7 = vshll.u32 %v7549_v57, 16  ;;  %v2652_v8 = vshrl.u32 %v7550_v62, 16  ;;  %v2655_v9 = vshll.u32 %v7550_v62, 16  ;;  %v7559_v55 = vld [vmem:[%s9248_s0 + $0x78] sm:$0xff]   ;;  %v7562_v62 = vld [vmem:[%s9247_s1 + $0x8] sm:$0xff]  }
  0x1e   :  { %v497_v2 = vrot.slane %v495_v61, 1  ;;  %v2645_v6 = vrot.slane %v2643_v1, 2  ;;  %v490_v10 = vsel %vm422_vm0, %v485_v53, %v489_v54  ;;  %v2640_v11 = vor.u32 %v2639_v60, %v2636_v59  ;;  %v7560_v60 = vld [vmem:[%s9248_s0 + $0x80] sm:$0xff]   ;;  %6837 = vmatprep.subr.bf16.mxu1 %v7562_v62 }
  0x1f   :  { %v2648_v12 = vrot.slane %v2646_v3, 3  ;;  %v499_v13 = vshrl.u32 %v7547_v39, 16  ;;  %v2654_v15 = vrot.slane %v2652_v8, 2  ;;  %v2657_v16 = vrot.slane %v2655_v9, 3  ;;  %6838 = vmatpush3.bf16.msra.mxu1 %v7562_v62  ;;  %v7571_v62 = vld [vmem:[%s9248_s0 + $0xa0] sm:$0xff]  }
  0x20   :  { %v498_v14 = vsel %vm422_vm0, %v493_v0, %v497_v2  ;;  %v507_v17 = vshrl.u32 %v7549_v57, 16  ;;  %v511_v19 = vshll.u32 %v7551_v4, 16  ;;  %v2661_v20 = vshrl.u32 %v7552_v5, 16 }
  0x21   :  { %v2649_v18 = vor.u32 %v2648_v12, %v2645_v6  ;;  %v2664_v21 = vshll.u32 %v7552_v5, 16  ;;  %v505_v23 = vrot.slane %v503_v7, 1  ;;  %v2641_v25 = vsel %vm2561_vm1, %v2631_v52, %v2640_v11  ;;  %v7564_v6 = vld [vmem:[%s9247_s1 + $0x68] sm:$0xff]  }
  0x22   :  { %6732 = vmatmul.mubr.msk.bf16.gmra.mrb[8].mxu1 %vm894_vm2, %v474_v40  ;;  %v501_v26 = vor.u32 %v499_v13, %v497_v2  ;;  %v2663_v27 = vrot.slane %v2661_v20, 2  ;;  %v513_v32 = vrot.slane %v511_v19, 1  ;;  %v2658_v34 = vor.u32 %v2657_v16, %v2654_v15  ;;  %v7561_v2 = vld [vmem:[%s9248_s0 + $0x80] sm:$0xff]   ;;  %v7563_v12 = vld [vmem:[%s9248_s0 + $0x88] sm:$0xff]   ;;  %7077 = vmatprep.subr.bf16.mxu0 %v7564_v6  ;;  %v7566_v19 = vld [vmem:[%s9248_s0 + $0x90] sm:$0xff]  }
  0x23   :  { %6735 = vmatprep.mubr.msk.bf16.mxu1 %vm894_vm2, %v482_v49  ;;  %6972 = vmatmul.mubr.msk.bf16.gmra.mrb[8].mxu0 %vm894_vm2, %v2623_v58  ;;  %v2666_v28 = vrot.slane %v2664_v21, 3  ;;  %v2650_v30 = vsel %vm2561_vm1, %v2640_v11, %v2649_v18  ;;  %v509_v31 = vor.u32 %v507_v17, %v505_v23  ;;  %v515_v35 = vshrl.u32 %v7551_v4, 16 }
  0x24   :  { %6975 = vmatprep.mubr.msk.bf16.mxu0 %vm894_vm2, %v2632_v63  ;;  %v519_v36 = vshll.u32 %v7553_v22, 16  ;;  %v2670_v37 = vshrl.u32 %v7554_v24, 16  ;;  %v2673_v38 = vshll.u32 %v7554_v24, 16  ;;  %v506_v39 = vsel %vm422_vm0, %v501_v26, %v505_v23  ;;  %7078 = vmatpush3.bf16.msra.mxu0 %v7564_v6  ;;  %v7565_v24 = vld [vmem:[%s9248_s0 + $0x88] sm:$0xff]  }
  0x25   :  { %v2667_v40 = vor.u32 %v2666_v28, %v2663_v27  ;;  %v523_v41 = vshrl.u32 %v7553_v22, 16  ;;  %v527_v42 = vshll.u32 %v7555_v29, 16  ;;  %v514_v43 = vsel %vm422_vm0, %v509_v31, %v513_v32  ;;  %v7573_v6 = vld [vmem:[%s9248_s0 + $0xa8] sm:$0xff]  }
  0x26   :  { %v2679_v44 = vshrl.u32 %v7556_v33, 16  ;;  %v2682_v45 = vshll.u32 %v7556_v33, 16  ;;  %v2659_v47 = vsel %vm2561_vm1, %v2649_v18, %v2658_v34  ;;  %v517_v48 = vor.u32 %v515_v35, %v513_v32 }
  0x27   :  { %v521_v49 = vrot.slane %v519_v36, 1  ;;  %v2668_v51 = vsel %vm2561_vm1, %v2658_v34, %v2667_v40  ;;  %v2672_v52 = vrot.slane %v2670_v37, 2  ;;  %v2675_v53 = vrot.slane %v2673_v38, 3 }
  0x28   :  { %v529_v54 = vrot.slane %v527_v42, 1  ;;  %v2681_v57 = vrot.slane %v2679_v44, 2  ;;  %v2684_v58 = vrot.slane %v2682_v45, 3  ;;  %v531_v59 = vshrl.u32 %v7555_v29, 16  ;;  %v7569_v45 = vld [vmem:[%s9248_s0 + $0x98] sm:$0xff]  }
  0x29   :  { %v525_v56 = vor.u32 %v523_v41, %v521_v49  ;;  %v535_v61 = vshll.u32 %v7557_v46, 16  ;;  %v2688_v63 = vshrl.u32 %v7558_v50, 16  ;;  %v2691_v0 = vshll.u32 %v7558_v50, 16  ;;  %v7568_v41 = vld [vmem:[%s9248_s0 + $0x98] sm:$0xff]  }
  0x2a   :  { %6736 = vmatmul.mubr.msk.bf16.gmra.mrb[12].mxu1 %vm894_vm2, %v490_v10  ;;  %v539_v1 = vshrl.u32 %v7557_v46, 16  ;;  %v522_v3 = vsel %vm422_vm0, %v517_v48, %v521_v49  ;;  %v2676_v4 = vor.u32 %v2675_v53, %v2672_v52  ;;  %v543_v5 = vshll.u32 %v7559_v55, 16  ;;  %v7570_v49 = vld [vmem:[%s9248_s0 + $0xa0] sm:$0xff]  }
  0x2b   :  { %6739 = vmatprep.mubr.msk.bf16.mxu1 %vm894_vm2, %v498_v14  ;;  %6976 = vmatmul.mubr.msk.bf16.gmra.mrb[12].mxu0 %vm894_vm2, %v2641_v25  ;;  %v530_v7 = vsel %vm422_vm0, %v525_v56, %v529_v54  ;;  %v2685_v8 = vor.u32 %v2684_v58, %v2681_v57  ;;  %v2697_v9 = vshrl.u32 %v7560_v60, 16  ;;  %v2700_v10 = vshll.u32 %v7560_v60, 16 }
  0x2c   :  { %6979 = vmatprep.mubr.msk.bf16.mxu0 %vm894_vm2, %v2650_v30  ;;  %v537_v11 = vrot.slane %v535_v61, 1  ;;  %v533_v13 = vor.u32 %v531_v59, %v529_v54  ;;  %v2690_v14 = vrot.slane %v2688_v63, 2  ;;  %v2693_v15 = vrot.slane %v2691_v0, 3 }
  0x2d   :  { %v2677_v16 = vsel %vm2561_vm1, %v2667_v40, %v2676_v4  ;;  %v545_v18 = vrot.slane %v543_v5, 1  ;;  %v2686_v20 = vsel %vm2561_vm1, %v2676_v4, %v2685_v8  ;;  %v2699_v21 = vrot.slane %v2697_v9, 2 }
  0x2e   :  { %v541_v17 = vor.u32 %v539_v1, %v537_v11  ;;  %v2702_v22 = vrot.slane %v2700_v10, 3  ;;  %v551_v23 = vshll.u32 %v7561_v2, 16  ;;  %v547_v25 = vshrl.u32 %v7559_v55, 16 }
  0x2f   :  { %v2706_v26 = vshrl.u32 %v7563_v12, 16  ;;  %v538_v27 = vsel %vm422_vm0, %v533_v13, %v537_v11  ;;  %v2709_v28 = vshll.u32 %v7563_v12, 16  ;;  %v2694_v29 = vor.u32 %v2693_v15, %v2690_v14  ;;  %v7574_v11 = vld [vmem:[%s9248_s0 + $0xb0] sm:$0xff]  }
  0x30   :  { %v546_v30 = vsel %vm422_vm0, %v541_v17, %v545_v18  ;;  %v2715_v31 = vshrl.u32 %v7566_v19, 16  ;;  %v2718_v32 = vshll.u32 %v7566_v19, 16  ;;  %v2703_v33 = vor.u32 %v2702_v22, %v2699_v21 }
  0x31   :  { %v553_v34 = vrot.slane %v551_v23, 1  ;;  %v555_v35 = vshrl.u32 %v7561_v2, 16  ;;  %v559_v36 = vshll.u32 %v7565_v24, 16  ;;  %v549_v37 = vor.u32 %v547_v25, %v545_v18  ;;  %v7572_v2 = vld [vmem:[%s9248_s0 + $0xa8] sm:$0xff]   ;;  %v7575_v25 = vld [vmem:[%s9248_s0 + $0xb0] sm:$0xff]  }
  0x32   :  { %6740 = vmatmul.mubr.msk.bf16.gmra.mrb[16].mxu1 %vm894_vm2, %v506_v39  ;;  %v2708_v38 = vrot.slane %v2706_v26, 2  ;;  %v7567_v39 = vld [vmem:[%s9248_s0 + $0x90] sm:$0xff]   ;;  %v2711_v40 = vrot.slane %v2709_v28, 3  ;;  %v2695_v42 = vsel %vm2561_vm1, %v2685_v8, %v2694_v29  ;;  %v2720_v44 = vrot.slane %v2718_v32, 3  ;;  %v7576_v28 = vld [vmem:[%s9248_s0 + $0xb8] sm:$0xff]  }
  0x33   :  { %6743 = vmatprep.mubr.msk.bf16.mxu1 %vm894_vm2, %v514_v43  ;;  %6980 = vmatmul.mubr.msk.bf16.gmra.mrb[16].mxu0 %vm894_vm2, %v2659_v47  ;;  %v2717_v43 = vrot.slane %v2715_v31, 2  ;;  %v2704_v46 = vsel %vm2561_vm1, %v2694_v29, %v2703_v33  ;;  %v557_v47 = vor.u32 %v555_v35, %v553_v34  ;;  %v561_v48 = vrot.slane %v559_v36, 1  ;;  %v7577_v29 = vld [vmem:[%s9248_s0 + $0xb8] sm:$0xff]  }
  0x34   :  { %6983 = vmatprep.mubr.msk.bf16.mxu0 %vm894_vm2, %v2668_v51  ;;  %v554_v50 = vsel %vm422_vm0, %v549_v37, %v553_v34  ;;  %v2712_v51 = vor.u32 %v2711_v40, %v2708_v38  ;;  %v563_v52 = vshrl.u32 %v7565_v24, 16  ;;  %v567_v53 = vshll.u32 %v7567_v39, 16 }
  0x35   :  { %v2724_v54 = vshrl.u32 %v7568_v41, 16  ;;  %v2721_v55 = vor.u32 %v2720_v44, %v2717_v43  ;;  %v2727_v56 = vshll.u32 %v7568_v41, 16  ;;  %v571_v57 = vshrl.u32 %v7567_v39, 16 }
  0x36   :  { %v575_v58 = vshll.u32 %v7569_v45, 16  ;;  %v562_v59 = vsel %vm422_vm0, %v557_v47, %v561_v48  ;;  %v2733_v60 = vshrl.u32 %v7570_v49, 16  ;;  %v2736_v61 = vshll.u32 %v7570_v49, 16 }
  0x37   :  { %v565_v63 = vor.u32 %v563_v52, %v561_v48  ;;  %v569_v0 = vrot.slane %v567_v53, 1  ;;  %v2726_v1 = vrot.slane %v2724_v54, 2  ;;  %v2722_v4 = vsel %vm2561_vm1, %v2712_v51, %v2721_v55  ;;  %v7580_v54 = vld [vmem:[%s9248_s0 + $0xc8] sm:$0xff]  }
  0x38   :  { %v2729_v5 = vrot.slane %v2727_v56, 3  ;;  %v577_v8 = vrot.slane %v575_v58, 1  ;;  %v2735_v9 = vrot.slane %v2733_v60, 2  ;;  %v2738_v10 = vrot.slane %v2736_v61, 3  ;;  %v7582_v60 = vld [vmem:[%s9248_s0 + $0xd0] sm:$0xff]  }
  0x39   :  { %v583_v12 = vshll.u32 %v7571_v62, 16  ;;  %v570_v13 = vsel %vm422_vm0, %v565_v63, %v569_v0  ;;  %v579_v14 = vshrl.u32 %v7569_v45, 16  ;;  %v2742_v15 = vshrl.u32 %v7572_v2, 16 }
  0x3a   :  { %6744 = vmatmul.mubr.msk.bf16.gmra.mrb[20].mxu1 %vm894_vm2, %v522_v3  ;;  %v2713_v3 = vsel %vm2561_vm1, %v2703_v33, %v2712_v51  ;;  %v2745_v17 = vshll.u32 %v7572_v2, 16  ;;  %v587_v18 = vshrl.u32 %v7571_v62, 16  ;;  %v591_v19 = vshll.u32 %v7573_v6, 16  ;;  %v7578_v33 = vld [vmem:[%s9248_s0 + $0xc0] sm:$0xff]  }
  0x3b   :  { %6747 = vmatprep.mubr.msk.bf16.mxu1 %vm894_vm2, %v530_v7  ;;  %6984 = vmatmul.mubr.msk.bf16.gmra.mrb[20].mxu0 %vm894_vm2, %v2677_v16  ;;  %v573_v7 = vor.u32 %v571_v57, %v569_v0  ;;  %v2730_v16 = vor.u32 %v2729_v5, %v2726_v1  ;;  %v2739_v21 = vor.u32 %v2738_v10, %v2735_v9  ;;  %v2751_v22 = vshrl.u32 %v7574_v11, 16  ;;  %v7592_v0 = vld [vmem:[%s9247_s1 + $0x10] sm:$0xff]  }
  0x3c   :  { %6987 = vmatprep.mubr.msk.bf16.mxu0 %vm894_vm2, %v2686_v20  ;;  %v2754_v23 = vshll.u32 %v7574_v11, 16  ;;  %v585_v24 = vrot.slane %v583_v12, 1  ;;  %v581_v26 = vor.u32 %v579_v14, %v577_v8  ;;  %v2747_v31 = vrot.slane %v2745_v17, 3  ;;  %6839 = vmatprep.subr.bf16.mxu1 %v7592_v0 }
  0x3d   :  { %v578_v20 = vsel %vm422_vm0, %v573_v7, %v577_v8  ;;  %v2740_v34 = vsel %vm2561_vm1, %v2730_v16, %v2739_v21  ;;  %v593_v35 = vrot.slane %v591_v19, 1  ;;  %v2753_v36 = vrot.slane %v2751_v22, 2  ;;  %6840 = vmatpush3.bf16.msra.mxu1 %v7592_v0 }
  0x3e   :  { %v589_v32 = vor.u32 %v587_v18, %v585_v24  ;;  %v2756_v37 = vrot.slane %v2754_v23, 3  ;;  %v595_v38 = vshrl.u32 %v7573_v6, 16  ;;  %v586_v39 = vsel %vm422_vm0, %v581_v26, %v585_v24  ;;  %v7594_v18 = vld [vmem:[%s9247_s1 + $0x70] sm:$0xff]   ;;  %v7585_v23 = vld [vmem:[%s9248_s0 + $0xd8] sm:$0xff]   ;;  %v7586_v24 = vld [vmem:[%s9248_s0 + $0xe0] sm:$0xff]  }
  0x3f   :  { %v599_v40 = vshll.u32 %v7575_v25, 16  ;;  %v2760_v41 = vshrl.u32 %v7576_v28, 16  ;;  %v2763_v43 = vshll.u32 %v7576_v28, 16  ;;  %v607_v44 = vshll.u32 %v7577_v29, 16  ;;  %7079 = vmatprep.subr.bf16.mxu0 %v7594_v18 }
  0x40   :  { %v2769_v45 = vshrl.u32 %v7578_v33, 16  ;;  %v2757_v47 = vor.u32 %v2756_v37, %v2753_v36  ;;  %v603_v48 = vshrl.u32 %v7575_v25, 16  ;;  %v2772_v49 = vshll.u32 %v7578_v33, 16  ;;  %7080 = vmatpush3.bf16.msra.mxu0 %v7594_v18 }
  0x41   :  { %v597_v51 = vor.u32 %v595_v38, %v593_v35  ;;  %v601_v52 = vrot.slane %v599_v40, 1  ;;  %v2762_v53 = vrot.slane %v2760_v41, 2  ;;  %v2765_v57 = vrot.slane %v2763_v43, 3  ;;  %v7587_v40 = vld [vmem:[%s9248_s0 + $0xe0] sm:$0xff]   ;;  %v7588_v41 = vld [vmem:[%s9248_s0 + $0xe8] sm:$0xff]  }
  0x42   :  { %6748 = vmatmul.mubr.msk.bf16.gmra.mrb[24].mxu1 %vm894_vm2, %v538_v27  ;;  %v2744_v27 = vrot.slane %v2742_v15, 2  ;;  %v609_v58 = vrot.slane %v607_v44, 1  ;;  %v2774_v63 = vrot.slane %v2772_v49, 3  ;;  %v611_v1 = vshrl.u32 %v7577_v29, 16  ;;  %v7584_v15 = vld [vmem:[%s9248_s0 + $0xd8] sm:$0xff]   ;;  %v7590_v49 = vld [vmem:[%s9248_s0 + $0xf0] sm:$0xff]  }
  0x43   :  { %6751 = vmatprep.mubr.msk.bf16.mxu1 %vm894_vm2, %v546_v30  ;;  %6988 = vmatmul.mubr.msk.bf16.gmra.mrb[24].mxu0 %vm894_vm2, %v2695_v42  ;;  %v2731_v30 = vsel %vm2561_vm1, %v2721_v55, %v2730_v16  ;;  %v8016_v55 = vld [vmem:[%s9248_s0 + $0xc8] sm:$0xff]   ;;  %v605_v62 = vor.u32 %v603_v48, %v601_v52  ;;  %v602_v5 = vsel %vm422_vm0, %v597_v51, %v601_v52  ;;  %v2787_v11 = vshrl.u32 %v7582_v60, 16 }
  0x44   :  { %6991 = vmatprep.mubr.msk.bf16.mxu0 %vm894_vm2, %v2704_v46  ;;  %v2748_v42 = vor.u32 %v2747_v31, %v2744_v27  ;;  %v594_v46 = vsel %vm422_vm0, %v589_v32, %v593_v35  ;;  %v2766_v6 = vor.u32 %v2765_v57, %v2762_v53  ;;  %v623_v8 = vshll.u32 %v8016_v55, 16  ;;  %v7589_v48 = vld [vmem:[%s9248_s0 + $0xe8] sm:$0xff]  }
  0x45   :  { %v610_v9 = vsel %vm422_vm0, %v605_v62, %v609_v58  ;;  %v2790_v12 = vshll.u32 %v7582_v60, 16  ;;  %v613_v16 = vor.u32 %v611_v1, %v609_v58  ;;  %v2789_v26 = vrot.slane %v2787_v11, 2  ;;  %v7595_v11 = vld [vmem:[%s9248_s0 + $0xf8] sm:$0xff]  }
  0x46   :  { %v2749_v56 = vsel %vm2561_vm1, %v2739_v21, %v2748_v42  ;;  %v2758_v61 = vsel %vm2561_vm1, %v2748_v42, %v2757_v47  ;;  %v2767_v19 = vsel %vm2561_vm1, %v2757_v47, %v2766_v6  ;;  %v625_v22 = vrot.slane %v623_v8, 1 }
  0x47   :  { %v2792_v27 = vrot.slane %v2790_v12, 3  ;;  %v627_v29 = vshrl.u32 %v8016_v55, 16  ;;  %v2796_v31 = vshrl.u32 %v7584_v15, 16  ;;  %v639_v35 = vshll.u32 %v7585_v23, 16 }
  0x48   :  { %v2805_v38 = vshrl.u32 %v7586_v24, 16  ;;  %v2814_v55 = vshrl.u32 %v7588_v41, 16  ;;  %v2817_v57 = vshll.u32 %v7588_v41, 16  ;;  %v655_v60 = vshll.u32 %v7589_v48, 16  ;;  %v7600_v41 = vld [vmem:[%s9248_s0 + $0x110] sm:$0xff]  }
  0x49   :  { %v2793_v36 = vor.u32 %v2792_v27, %v2789_v26  ;;  %v2798_v43 = vrot.slane %v2796_v31, 2  ;;  %v641_v47 = vrot.slane %v639_v35, 1  ;;  %v651_v0 = vshrl.u32 %v7587_v40, 16 }
  0x4a   :  { %6752 = vmatmul.mubr.msk.bf16.gmra.mrb[28].mxu1 %vm894_vm2, %v554_v50  ;;  %v7579_v50 = vld [vmem:[%s9248_s0 + $0xc0] sm:$0xff]   ;;  %v2807_v52 = vrot.slane %v2805_v38, 2  ;;  %v2826_v1 = vshll.u32 %v7590_v49, 16 }
  0x4b   :  { %6755 = vmatprep.mubr.msk.bf16.mxu1 %vm894_vm2, %v562_v59  ;;  %6992 = vmatmul.mubr.msk.bf16.gmra.mrb[28].mxu0 %vm894_vm2, %v2713_v3  ;;  %v2771_v59 = vrot.slane %v2769_v45, 2  ;;  %v615_v2 = vshll.u32 %v7579_v50, 16  ;;  %v2778_v3 = vshrl.u32 %v7580_v54, 16  ;;  %v619_v7 = vshrl.u32 %v7579_v50, 16 }
  0x4c   :  { %6995 = vmatprep.mubr.msk.bf16.mxu0 %vm894_vm2, %v2722_v4  ;;  %v2781_v4 = vshll.u32 %v7580_v54, 16  ;;  %v629_v45 = vor.u32 %v627_v29, %v625_v22  ;;  %v647_v54 = vshll.u32 %v7587_v40, 16  ;;  %v7597_v29 = vld [vmem:[%s9248_s0 + $0x100] sm:$0xff]   ;;  %v7599_v40 = vld [vmem:[%s9248_s0 + $0x108] sm:$0xff]  }
  0x4d   :  { %v2775_v10 = vor.u32 %v2774_v63, %v2771_v59  ;;  %v617_v14 = vrot.slane %v615_v2, 1  ;;  %v2780_v17 = vrot.slane %v2778_v3, 2  ;;  %v7591_v2 = vld [vmem:[%s9248_s0 + $0xf0] sm:$0xff]  }
  0x4e   :  { %v649_v3 = vrot.slane %v647_v54, 1 }
  0x4f   :  { %v621_v21 = vor.u32 %v619_v7, %v617_v14  ;;  %v2776_v25 = vsel %vm2561_vm1, %v2766_v6, %v2775_v10  ;;  %v618_v28 = vsel %vm422_vm0, %v613_v16, %v617_v14  ;;  %v7593_v6 = vld [vmem:[%s9248_s0 + $0xf8] sm:$0xff]   ;;  %v2828_v14 = vrot.slane %v2826_v1, 3 }
  0x50   :  { %v659_v16 = vshrl.u32 %v7589_v48, 16 }
  0x51   :  { %v626_v33 = vsel %vm422_vm0, %v621_v21, %v625_v22  ;;  %v667_v22 = vshrl.u32 %v7591_v2, 16 }
  0x52   :  { %6756 = vmatmul.mubr.msk.bf16.gmra.mrb[32].mxu1 %vm894_vm2, %v570_v13  ;;  %v7583_v13 = vld [vmem:[%s9248_s0 + $0xd0] sm:$0xff]  }
  0x53   :  { %6759 = vmatprep.mubr.msk.bf16.mxu1 %vm894_vm2, %v578_v20  ;;  %6996 = vmatmul.mubr.msk.bf16.gmra.mrb[32].mxu0 %vm894_vm2, %v2731_v30  ;;  %v2783_v20 = vrot.slane %v2781_v4, 3  ;;  %v631_v30 = vshll.u32 %v7583_v13, 16  ;;  %v635_v37 = vshrl.u32 %v7583_v13, 16  ;;  %v2816_v4 = vrot.slane %v2814_v55, 2  ;;  %v7601_v55 = vld [vmem:[%s9248_s0 + $0x110] sm:$0xff]  }
  0x54   :  { %6999 = vmatprep.mubr.msk.bf16.mxu0 %vm894_vm2, %v2740_v34  ;;  %v2799_v34 = vshll.u32 %v7584_v15, 16  ;;  %v653_v13 = vor.u32 %v651_v0, %v649_v3  ;;  %v7596_v15 = vld [vmem:[%s9248_s0 + $0x100] sm:$0xff]  }
  0x55   :  { %v2784_v32 = vor.u32 %v2783_v20, %v2780_v17  ;;  %v633_v42 = vrot.slane %v631_v30, 1  ;;  %v663_v17 = vshll.u32 %v7591_v2, 16  ;;  %v2835_v20 = vshll.u32 %v7593_v6, 16 }
  0x56   :  { %v2841_v26 = vshrl.u32 %v7596_v15, 16  ;;  %v2844_v27 = vshll.u32 %v7596_v15, 16 }
  0x57   :  { %v2785_v44 = vsel %vm2561_vm1, %v2775_v10, %v2784_v32  ;;  %v2794_v50 = vsel %vm2561_vm1, %v2784_v32, %v2793_v36  ;;  %v637_v51 = vor.u32 %v635_v37, %v633_v42  ;;  %v634_v58 = vsel %vm422_vm0, %v629_v45, %v633_v42  ;;  %v7598_v32 = vld [vmem:[%s9248_s0 + $0x108] sm:$0xff]  }
  0x58   :  { %v2843_v38 = vrot.slane %v2841_v26, 2  ;;  %v679_v42 = vshll.u32 %v7597_v29, 16  ;;  %v2850_v45 = vshrl.u32 %v7598_v32, 16  ;;  %v2853_v48 = vshll.u32 %v7598_v32, 16 }
  0x59   :  { %v642_v62 = vsel %vm422_vm0, %v637_v51, %v641_v47  ;;  %v687_v51 = vshll.u32 %v7599_v40, 16 }
  0x5a   :  { %6760 = vmatmul.mubr.msk.bf16.gmra.mrb[36].mxu1 %vm894_vm2, %v586_v39  ;;  %v2808_v39 = vshll.u32 %v7586_v24, 16  ;;  %v681_v54 = vrot.slane %v679_v42, 1 }
  0x5b   :  { %6763 = vmatprep.mubr.msk.bf16.mxu1 %vm894_vm2, %v594_v46  ;;  %7000 = vmatmul.mubr.msk.bf16.gmra.mrb[36].mxu0 %vm894_vm2, %v2749_v56  ;;  %v2801_v46 = vrot.slane %v2799_v34, 3  ;;  %v643_v56 = vshrl.u32 %v7585_v23, 16  ;;  %v671_v23 = vshll.u32 %v7595_v11, 16  ;;  %v2837_v34 = vrot.slane %v2835_v20, 3 }
  0x5c   :  { %7003 = vmatprep.mubr.msk.bf16.mxu0 %vm894_vm2, %v2758_v61  ;;  %v2810_v53 = vrot.slane %v2808_v39, 3  ;;  %v2823_v61 = vshrl.u32 %v7590_v49, 16  ;;  %v2846_v39 = vrot.slane %v2844_v27, 3  ;;  %v683_v49 = vshrl.u32 %v7597_v29, 16 }
  0x5d   :  { %v2802_v59 = vor.u32 %v2801_v46, %v2798_v43  ;;  %v645_v8 = vor.u32 %v643_v56, %v641_v47  ;;  %v2852_v56 = vrot.slane %v2850_v45, 2  ;;  %v689_v0 = vrot.slane %v687_v51, 1  ;;  %v8172_v45 = vld [vmem:[%s9248_s0 + $0x130] sm:$0xff]  }
  0x5e   :  { %v2811_v63 = vor.u32 %v2810_v53, %v2807_v52  ;;  %v2825_v10 = vrot.slane %v2823_v61, 2  ;;  %v2859_v52 = vshrl.u32 %v7600_v41, 16  ;;  %v2862_v53 = vshll.u32 %v7600_v41, 16 }
  0x5f   :  { %v2803_v7 = vsel %vm2561_vm1, %v2793_v36, %v2802_v59  ;;  %v650_v21 = vsel %vm422_vm0, %v645_v8, %v649_v3  ;;  %v673_v36 = vrot.slane %v671_v23, 1  ;;  %v685_v61 = vor.u32 %v683_v49, %v681_v54  ;;  %v7604_v3 = vld [vmem:[%s9248_s0 + $0x120] sm:$0xff]   ;;  %v8149_v23 = vld [vmem:[%s9248_s0 + $0x128] sm:$0xff]  }
  0x60   :  { %v2812_v12 = vsel %vm2561_vm1, %v2802_v59, %v2811_v63  ;;  %v2861_v1 = vrot.slane %v2859_v52, 2  ;;  %v2864_v2 = vrot.slane %v2862_v53, 3  ;;  %v2877_v15 = vshrl.u32 %v7604_v3, 16  ;;  %v8185_v52 = vld [vmem:[%s9248_s0 + $0x138] sm:$0xff]  }
  0x62   :  { %6764 = vmatmul.mubr.msk.bf16.gmra.mrb[40].mxu1 %vm894_vm2, %v602_v5  ;;  %v2819_v5 = vrot.slane %v2817_v57, 3  ;;  %v7602_v57 = vld [vmem:[%s9248_s0 + $0x118] sm:$0xff]   ;;  %v2879_v29 = vrot.slane %v2877_v15, 2  ;;  %v8226_v15 = vld [vmem:[%s9248_s0 + $0x150] sm:$0xff]  }
  0x63   :  { %6767 = vmatprep.mubr.msk.bf16.mxu1 %vm894_vm2, %v610_v9  ;;  %7004 = vmatmul.mubr.msk.bf16.gmra.mrb[40].mxu0 %vm894_vm2, %v2767_v19  ;;  %v657_v9 = vrot.slane %v655_v60, 1  ;;  %v2832_v19 = vshrl.u32 %v7593_v6, 16  ;;  %v2855_v60 = vrot.slane %v2853_v48, 3  ;;  %v2868_v6 = vshrl.u32 %v7602_v57, 16  ;;  %v8178_v48 = vld [vmem:[%s9248_s0 + $0x138] sm:$0xff]  }
  0x64   :  { %7007 = vmatprep.mubr.msk.bf16.mxu0 %vm894_vm2, %v2776_v25  ;;  %v2820_v18 = vor.u32 %v2819_v5, %v2816_v4  ;;  %v2829_v25 = vor.u32 %v2828_v14, %v2825_v10  ;;  %v691_v4 = vshrl.u32 %v7599_v40, 16  ;;  %v695_v5 = vshll.u32 %v7601_v55, 16 }
  0x65   :  { %v658_v24 = vsel %vm422_vm0, %v653_v13, %v657_v9  ;;  %v661_v31 = vor.u32 %v659_v16, %v657_v9  ;;  %v2856_v9 = vor.u32 %v2855_v60, %v2852_v56  ;;  %v699_v10 = vshrl.u32 %v7601_v55, 16 }
  0x66   :  { %v2821_v30 = vsel %vm2561_vm1, %v2811_v63, %v2820_v18  ;;  %v2830_v37 = vsel %vm2561_vm1, %v2820_v18, %v2829_v25  ;;  %v690_v13 = vsel %vm422_vm0, %v685_v61, %v689_v0  ;;  %v2865_v14 = vor.u32 %v2864_v2, %v2861_v1  ;;  %v7606_v18 = vld [vmem:[%s9248_s0 + $0x128] sm:$0xff]  }
  0x67   :  { %v2880_v16 = vshll.u32 %v7604_v3, 16  ;;  %v693_v20 = vor.u32 %v691_v4, %v689_v0  ;;  %v723_v60 = vshrl.u32 %v8149_v23, 16  ;;  %v2904_v61 = vshrl.u32 %v8178_v48, 16 }
  0x68   :  { %v2866_v27 = vsel %vm2561_vm1, %v2856_v9, %v2865_v14  ;;  %v731_v0 = vshrl.u32 %v8172_v45, 16  ;;  %v735_v1 = vshll.u32 %v8185_v52, 16 }
  0x6a   :  { %6768 = vmatmul.mubr.msk.bf16.gmra.mrb[44].mxu1 %vm894_vm2, %v618_v28  ;;  %v665_v28 = vrot.slane %v663_v17, 1  ;;  %v697_v17 = vrot.slane %v695_v5, 1 }
  0x6b   :  { %6771 = vmatprep.mubr.msk.bf16.mxu1 %vm894_vm2, %v626_v33  ;;  %7008 = vmatmul.mubr.msk.bf16.gmra.mrb[44].mxu0 %vm894_vm2, %v2785_v44  ;;  %v2834_v33 = vrot.slane %v2832_v19, 2  ;;  %v675_v44 = vshrl.u32 %v7595_v11, 16  ;;  %v7622_v19 = vld [vmem:[%s9247_s1 + $0x18] sm:$0xff]  }
  0x6c   :  { %7011 = vmatprep.mubr.msk.bf16.mxu0 %vm894_vm2, %v2794_v50  ;;  %v669_v35 = vor.u32 %v667_v22, %v665_v28  ;;  %v666_v43 = vsel %vm422_vm0, %v661_v31, %v665_v28  ;;  %v2847_v50 = vor.u32 %v2846_v39, %v2843_v38  ;;  %v701_v26 = vor.u32 %v699_v10, %v697_v17  ;;  %v8160_v31 = vld [vmem:[%s9248_s0 + $0x130] sm:$0xff]  }
  0x6d   :  { %v2838_v46 = vor.u32 %v2837_v34, %v2834_v33  ;;  %v677_v59 = vor.u32 %v675_v44, %v673_v36  ;;  %6841 = vmatprep.subr.bf16.mxu1 %v7622_v19  ;;  %v698_v33 = vsel %vm422_vm0, %v693_v20, %v697_v17  ;;  %v719_v39 = vshll.u32 %v8149_v23, 16 }
  0x6e   :  { %v674_v47 = vsel %vm422_vm0, %v669_v35, %v673_v36  ;;  %6842 = vmatpush3.bf16.msra.mxu1 %v7622_v19  ;;  %v2886_v35 = vshrl.u32 %v7606_v18, 16  ;;  %v2895_v42 = vshrl.u32 %v8160_v31, 16  ;;  %v2906_v10 = vrot.slane %v2904_v61, 2 }
  0x6f   :  { %v2848_v63 = vsel %vm2561_vm1, %v2838_v46, %v2847_v50  ;;  %v682_v8 = vsel %vm422_vm0, %v677_v59, %v681_v54  ;;  %v721_v54 = vrot.slane %v719_v39, 1  ;;  %v737_v17 = vrot.slane %v735_v1, 1  ;;  %v8250_v39 = vld [vmem:[%s9248_s0 + $0x158] sm:$0xff]  }
  0x70   :  { %v2897_v55 = vrot.slane %v2895_v42, 2  ;;  %v739_v20 = vshrl.u32 %v8185_v52, 16 }
  0x72   :  { %6772 = vmatmul.mubr.msk.bf16.gmra.mrb[48].mxu1 %vm894_vm2, %v634_v58  ;;  %v2839_v58 = vsel %vm2561_vm1, %v2829_v25, %v2838_v46  ;;  %v2857_v25 = vsel %vm2561_vm1, %v2847_v50, %v2856_v9  ;;  %v725_v9 = vor.u32 %v723_v60, %v721_v54 }
  0x73   :  { %6775 = vmatprep.mubr.msk.bf16.mxu1 %vm894_vm2, %v642_v62  ;;  %7012 = vmatmul.mubr.msk.bf16.gmra.mrb[48].mxu0 %vm894_vm2, %v2803_v7  ;;  %v7603_v62 = vld [vmem:[%s9248_s0 + $0x118] sm:$0xff]   ;;  %v2871_v7 = vshll.u32 %v7602_v57, 16  ;;  %v8191_v57 = vld [vmem:[%s9248_s0 + $0x140] sm:$0xff]  }
  0x74   :  { %7015 = vmatprep.mubr.msk.bf16.mxu0 %vm894_vm2, %v2812_v12  ;;  %v703_v11 = vshll.u32 %v7603_v62, 16  ;;  %v7605_v12 = vld [vmem:[%s9248_s0 + $0x120] sm:$0xff]   ;;  %v707_v34 = vshrl.u32 %v7603_v62, 16  ;;  %v2913_v4 = vshrl.u32 %v8191_v57, 16  ;;  %v2916_v5 = vshll.u32 %v8191_v57, 16 }
  0x75   :  { %v2873_v22 = vrot.slane %v2871_v7, 3  ;;  %v711_v32 = vshll.u32 %v7605_v12, 16  ;;  %v715_v38 = vshrl.u32 %v7605_v12, 16  ;;  %v8208_v7 = vld [vmem:[%s9248_s0 + $0x140] sm:$0xff]  }
  0x76   :  { %v705_v28 = vrot.slane %v703_v11, 1  ;;  %v8219_v11 = vld [vmem:[%s9248_s0 + $0x148] sm:$0xff]   ;;  %v2918_v19 = vrot.slane %v2916_v5, 3 }
  0x77   :  { %v713_v44 = vrot.slane %v711_v32, 1 }
  0x78   :  { %v706_v40 = vsel %vm422_vm0, %v701_v26, %v705_v28  ;;  %v709_v46 = vor.u32 %v707_v34, %v705_v28  ;;  %v2931_v28 = vshrl.u32 %v8226_v15, 16  ;;  %v8244_v34 = vld [vmem:[%s9248_s0 + $0x150] sm:$0xff]  }
  0x79   :  { %v717_v51 = vor.u32 %v715_v38, %v713_v44 }
  0x7a   :  { %6776 = vmatmul.mubr.msk.bf16.gmra.mrb[52].mxu1 %vm894_vm2, %v650_v21  ;;  %v2870_v21 = vrot.slane %v2868_v6, 2  ;;  %v714_v59 = vsel %vm422_vm0, %v709_v46, %v713_v44  ;;  %v2933_v42 = vrot.slane %v2931_v28, 2  ;;  %v8258_v46 = vld [vmem:[%s9248_s0 + $0x158] sm:$0xff]  }
  0x7b   :  { %6779 = vmatprep.mubr.msk.bf16.mxu1 %vm894_vm2, %v658_v24  ;;  %7016 = vmatmul.mubr.msk.bf16.gmra.mrb[52].mxu0 %vm894_vm2, %v2821_v30  ;;  %v7624_v24 = vld [vmem:[%s9247_s1 + $0x78] sm:$0xff]   ;;  %v2882_v30 = vrot.slane %v2880_v16, 3  ;;  %v722_v2 = vsel %vm422_vm0, %v717_v51, %v721_v54  ;;  %v2940_v51 = vshrl.u32 %v8250_v39, 16  ;;  %v767_v60 = vshll.u32 %v8258_v46, 16 }
  0x7c   :  { %7019 = vmatprep.mubr.msk.bf16.mxu0 %vm894_vm2, %v2830_v37  ;;  %7081 = vmatprep.subr.bf16.mxu0 %v7624_v24  ;;  %v2874_v36 = vor.u32 %v2873_v22, %v2870_v21  ;;  %v2889_v37 = vshll.u32 %v7606_v18, 16  ;;  %v2915_v18 = vrot.slane %v2913_v4, 2  ;;  %v743_v21 = vshll.u32 %v8208_v7, 16 }
  0x7d   :  { %7082 = vmatpush3.bf16.msra.mxu0 %v7624_v24  ;;  %v2883_v41 = vor.u32 %v2882_v30, %v2879_v29  ;;  %v2934_v29 = vshll.u32 %v8226_v15, 16  ;;  %v2942_v1 = vrot.slane %v2940_v51, 2 }
  0x7e   :  { %v2875_v49 = vsel %vm2561_vm1, %v2865_v14, %v2874_v36  ;;  %v2891_v50 = vrot.slane %v2889_v37, 3  ;;  %v2919_v32 = vor.u32 %v2918_v19, %v2915_v18  ;;  %v771_v19 = vshrl.u32 %v8258_v46, 16 }
  0x7f   :  { %v2884_v53 = vsel %vm2561_vm1, %v2874_v36, %v2883_v41 }
  0x82   :  { %6780 = vmatmul.mubr.msk.bf16.gmra.mrb[56].mxu1 %vm894_vm2, %v666_v43  ;;  %v2898_v43 = vshll.u32 %v8160_v31, 16 }
  0x83   :  { %6783 = vmatprep.mubr.msk.bf16.mxu1 %vm894_vm2, %v674_v47  ;;  %7020 = vmatmul.mubr.msk.bf16.gmra.mrb[56].mxu0 %vm894_vm2, %v2839_v58  ;;  %v2888_v47 = vrot.slane %v2886_v35, 2  ;;  %v727_v58 = vshll.u32 %v8172_v45, 16  ;;  %v741_v35 = vor.u32 %v739_v20, %v737_v17 }
  0x84   :  { %7023 = vmatprep.mubr.msk.bf16.mxu0 %vm894_vm2, %v2848_v63  ;;  %v2900_v56 = vrot.slane %v2898_v43, 3  ;;  %v2907_v63 = vshll.u32 %v8178_v48, 16  ;;  %v2936_v43 = vrot.slane %v2934_v29, 3  ;;  %v8316_v29 = vld [vmem:[%s9248_s0 + $0x170] sm:$0xff]  }
  0x85   :  { %v2892_v62 = vor.u32 %v2891_v50, %v2888_v47  ;;  %v729_v6 = vrot.slane %v727_v58, 1  ;;  %v8263_v47 = vld [vmem:[%s9248_s0 + $0x160] sm:$0xff]   ;;  %v759_v50 = vshll.u32 %v8244_v34, 16  ;;  %v791_v51 = vshll.u32 %v8316_v29, 16 }
  0x86   :  { %v2901_v3 = vor.u32 %v2900_v56, %v2897_v55  ;;  %v2937_v58 = vor.u32 %v2936_v43, %v2933_v42  ;;  %v2949_v61 = vshrl.u32 %v8263_v47, 16 }
  0x87   :  { %v2893_v12 = vsel %vm2561_vm1, %v2883_v41, %v2892_v62  ;;  %v733_v14 = vor.u32 %v731_v0, %v729_v6  ;;  %v730_v23 = vsel %vm422_vm0, %v725_v9, %v729_v6  ;;  %v761_v0 = vrot.slane %v759_v50, 1  ;;  %v8289_v6 = vld [vmem:[%s9248_s0 + $0x168] sm:$0xff]   ;;  %v8294_v9 = vld [vmem:[%s9248_s0 + $0x170] sm:$0xff]  }
  0x88   :  { %v2902_v16 = vsel %vm2561_vm1, %v2892_v62, %v2901_v3  ;;  %v2952_v62 = vshll.u32 %v8263_v47, 16 }
  0x89   :  { %v738_v30 = vsel %vm422_vm0, %v733_v14, %v737_v17 }
  0x8a   :  { %6784 = vmatmul.mubr.msk.bf16.gmra.mrb[60].mxu1 %vm894_vm2, %v682_v8  ;;  %v8213_v8 = vld [vmem:[%s9248_s0 + $0x148] sm:$0xff]   ;;  %v2954_v14 = vrot.slane %v2952_v62, 3 }
  0x8b   :  { %6787 = vmatprep.mubr.msk.bf16.mxu1 %vm894_vm2, %v690_v13  ;;  %7024 = vmatmul.mubr.msk.bf16.gmra.mrb[60].mxu0 %vm894_vm2, %v2857_v25  ;;  %v2909_v13 = vrot.slane %v2907_v63, 3  ;;  %v2922_v22 = vshrl.u32 %v8213_v8, 16  ;;  %v2925_v24 = vshll.u32 %v8213_v8, 16  ;;  %v751_v25 = vshll.u32 %v8219_v11, 16 }
  0x8c   :  { %7027 = vmatprep.mubr.msk.bf16.mxu0 %vm894_vm2, %v2866_v27  ;;  %v747_v27 = vshrl.u32 %v8208_v7, 16 }
  0x8d   :  { %v2910_v26 = vor.u32 %v2909_v13, %v2906_v10  ;;  %v2924_v36 = vrot.slane %v2922_v22, 2  ;;  %v2927_v37 = vrot.slane %v2925_v24, 3  ;;  %v753_v38 = vrot.slane %v751_v25, 1 }
  0x8e   :  { %v2951_v13 = vrot.slane %v2949_v61, 2  ;;  %v2961_v22 = vshll.u32 %v8289_v6, 16  ;;  %v2970_v24 = vshll.u32 %v8294_v9, 16 }
  0x8f   :  { %v2920_v44 = vsel %vm2561_vm1, %v2910_v26, %v2919_v32  ;;  %v2928_v55 = vor.u32 %v2927_v37, %v2924_v36 }
  0x90   :  { %v2963_v37 = vrot.slane %v2961_v22, 3 }
  0x91   :  { %v2929_v4 = vsel %vm2561_vm1, %v2919_v32, %v2928_v55  ;;  %v2938_v5 = vsel %vm2561_vm1, %v2928_v55, %v2937_v58 }
  0x92   :  { %6788 = vmatmul.mubr.msk.bf16.gmra.mrb[64].mxu1 %vm894_vm2, %v698_v33  ;;  %v745_v33 = vrot.slane %v743_v21, 1  ;;  %v2958_v21 = vshrl.u32 %v8289_v6, 16 }
  0x93   :  { %6791 = vmatprep.mubr.msk.bf16.mxu1 %vm894_vm2, %v706_v40  ;;  %7028 = vmatmul.mubr.msk.bf16.gmra.mrb[64].mxu0 %vm894_vm2, %v2875_v49  ;;  %v2911_v40 = vsel %vm2561_vm1, %v2901_v3, %v2910_v26  ;;  %v755_v49 = vshrl.u32 %v8219_v11, 16  ;;  %v8281_v3 = vld [vmem:[%s9248_s0 + $0x160] sm:$0xff]   ;;  %v2955_v26 = vor.u32 %v2954_v14, %v2951_v13  ;;  %v8366_v14 = vld [vmem:[%s9248_s0 + $0x188] sm:$0xff]  }
  0x94   :  { %7031 = vmatprep.mubr.msk.bf16.mxu0 %vm894_vm2, %v2884_v53  ;;  %v749_v41 = vor.u32 %v747_v27, %v745_v33  ;;  %v2943_v53 = vshll.u32 %v8250_v39, 16  ;;  %v746_v54 = vsel %vm422_vm0, %v741_v35, %v745_v33  ;;  %v775_v20 = vshll.u32 %v8281_v3, 16  ;;  %v8323_v35 = vld [vmem:[%s9248_s0 + $0x178] sm:$0xff]  }
  0x95   :  { %v757_v63 = vor.u32 %v755_v49, %v753_v38  ;;  %v779_v27 = vshrl.u32 %v8281_v3, 16  ;;  %v2960_v36 = vrot.slane %v2958_v21, 2  ;;  %v8335_v49 = vld [vmem:[%s9248_s0 + $0x180] sm:$0xff]  }
  0x96   :  { %v754_v56 = vsel %vm422_vm0, %v749_v41, %v753_v38  ;;  %v777_v33 = vrot.slane %v775_v20, 1  ;;  %v2985_v62 = vshrl.u32 %v8335_v49, 16 }
  0x97   :  { %v762_v17 = vsel %vm422_vm0, %v757_v63, %v761_v0  ;;  %v2988_v63 = vshll.u32 %v8335_v49, 16 }
  0x98   :  { %v781_v42 = vor.u32 %v779_v27, %v777_v33  ;;  %v2987_v20 = vrot.slane %v2985_v62, 2 }
  0x99   :  { %v2990_v21 = vrot.slane %v2988_v63, 3  ;;  %v819_v63 = vshrl.u32 %v8366_v14, 16 }
  0x9a   :  { %6792 = vmatmul.mubr.msk.bf16.gmra.mrb[68].mxu1 %vm894_vm2, %v714_v59  ;;  %v763_v59 = vshrl.u32 %v8244_v34, 16 }
  0x9b   :  { %6795 = vmatprep.mubr.msk.bf16.mxu1 %vm894_vm2, %v722_v2  ;;  %7032 = vmatmul.mubr.msk.bf16.gmra.mrb[68].mxu0 %vm894_vm2, %v2893_v12  ;;  %v2945_v2 = vrot.slane %v2943_v53, 3  ;;  %v769_v12 = vrot.slane %v767_v60, 1  ;;  %v2976_v53 = vshrl.u32 %v8323_v35, 16 }
  0x9c   :  { %7035 = vmatprep.mubr.msk.bf16.mxu0 %vm894_vm2, %v2902_v16  ;;  %v765_v10 = vor.u32 %v763_v59, %v761_v0  ;;  %v8299_v16 = vld [vmem:[%s9248_s0 + $0x168] sm:$0xff]   ;;  %v795_v59 = vshrl.u32 %v8316_v29, 16 }
  0x9d   :  { %v2946_v18 = vor.u32 %v2945_v2, %v2942_v1  ;;  %v783_v28 = vshll.u32 %v8299_v16, 16  ;;  %v773_v32 = vor.u32 %v771_v19, %v769_v12  ;;  %v787_v50 = vshrl.u32 %v8299_v16, 16  ;;  %v8352_v2 = vld [vmem:[%s9248_s0 + $0x180] sm:$0xff]  }
  0x9e   :  { %v770_v25 = vsel %vm422_vm0, %v765_v10, %v769_v12  ;;  %v793_v1 = vrot.slane %v791_v51, 1  ;;  %v8358_v10 = vld [vmem:[%s9248_s0 + $0x188] sm:$0xff]  }
  0x9f   :  { %v2956_v41 = vsel %vm2561_vm1, %v2946_v18, %v2955_v26  ;;  %v785_v43 = vrot.slane %v783_v28, 1  ;;  %v778_v55 = vsel %vm422_vm0, %v773_v32, %v777_v33  ;;  %v2997_v27 = vshll.u32 %v8358_v10, 16 }
  0xa0   :  { %v811_v28 = vshrl.u32 %v8352_v2, 16 }
  0xa1   :  { %v786_v60 = vsel %vm422_vm0, %v781_v42, %v785_v43  ;;  %v789_v0 = vor.u32 %v787_v50, %v785_v43  ;;  %v2999_v43 = vrot.slane %v2997_v27, 3  ;;  %v8390_v50 = vld [vmem:[%s9248_s0 + $0x190] sm:$0xff]  }
  0xa2   :  { %6796 = vmatmul.mubr.msk.bf16.gmra.mrb[72].mxu1 %vm894_vm2, %v730_v23  ;;  %v2967_v23 = vshrl.u32 %v8294_v9, 16 }
  0xa3   :  { %6799 = vmatprep.mubr.msk.bf16.mxu1 %vm894_vm2, %v738_v30  ;;  %7036 = vmatmul.mubr.msk.bf16.gmra.mrb[72].mxu0 %vm894_vm2, %v2911_v40  ;;  %v2947_v30 = vsel %vm2561_vm1, %v2937_v58, %v2946_v18  ;;  %v2972_v40 = vrot.slane %v2970_v24, 3  ;;  %v797_v18 = vor.u32 %v795_v59, %v793_v1  ;;  %v794_v22 = vsel %vm422_vm0, %v789_v0, %v793_v1  ;;  %v8402_v59 = vld [vmem:[%s9248_s0 + $0x198] sm:$0xff]  }
  0xa4   :  { %7039 = vmatprep.mubr.msk.bf16.mxu0 %vm894_vm2, %v2920_v44  ;;  %v2969_v38 = vrot.slane %v2967_v23, 2  ;;  %v8330_v44 = vld [vmem:[%s9248_s0 + $0x178] sm:$0xff]   ;;  %v807_v23 = vshll.u32 %v8352_v2, 16  ;;  %v823_v0 = vshll.u32 %v8390_v50, 16 }
  0xa5   :  { %v799_v61 = vshll.u32 %v8330_v44, 16 }
  0xa6   :  { %v2973_v58 = vor.u32 %v2972_v40, %v2969_v38  ;;  %v809_v38 = vrot.slane %v807_v23, 1  ;;  %v8426_v23 = vld [vmem:[%s9248_s0 + $0x1a0] sm:$0xff]  }
  0xa7   :  { %v801_v19 = vrot.slane %v799_v61, 1 }
  0xa8   :  { %v813_v51 = vor.u32 %v811_v28, %v809_v38 }
  0xaa   :  { %6800 = vmatmul.mubr.msk.bf16.gmra.mrb[76].mxu1 %vm894_vm2, %v746_v54  ;;  %v2979_v54 = vshll.u32 %v8323_v35, 16 }
  0xab   :  { %6803 = vmatprep.mubr.msk.bf16.mxu1 %vm894_vm2, %v754_v56  ;;  %7040 = vmatmul.mubr.msk.bf16.gmra.mrb[76].mxu0 %vm894_vm2, %v2929_v4  ;;  %v2964_v56 = vor.u32 %v2963_v37, %v2960_v36  ;;  %v2978_v4 = vrot.slane %v2976_v53, 2  ;;  %v802_v36 = vsel %vm422_vm0, %v797_v18, %v801_v19  ;;  %v2991_v37 = vor.u32 %v2990_v21, %v2987_v20 }
  0xac   :  { %7043 = vmatprep.mubr.msk.bf16.mxu0 %vm894_vm2, %v2938_v5  ;;  %v2981_v5 = vrot.slane %v2979_v54, 3  ;;  %v831_v18 = vshll.u32 %v8402_v59, 16 }
  0xad   :  { %v2965_v12 = vsel %vm2561_vm1, %v2955_v26, %v2964_v56  ;;  %v2974_v13 = vsel %vm2561_vm1, %v2964_v56, %v2973_v58  ;;  %v2994_v26 = vshrl.u32 %v8358_v10, 16  ;;  %v8396_v56 = vld [vmem:[%s9248_s0 + $0x198] sm:$0xff]  }
  0xae   :  { %v2982_v24 = vor.u32 %v2981_v5, %v2978_v4  ;;  %v3012_v5 = vshrl.u32 %v8396_v56, 16 }
  0xaf   :  { %v2996_v42 = vrot.slane %v2994_v26, 2 }
  0xb0   :  { %v2983_v40 = vsel %vm2561_vm1, %v2973_v58, %v2982_v24  ;;  %v2992_v58 = vsel %vm2561_vm1, %v2982_v24, %v2991_v37  ;;  %v8431_v24 = vld [vmem:[%s9248_s0 + $0x1a8] sm:$0xff]   ;;  %v3014_v27 = vrot.slane %v3012_v5, 2 }
  0xb1   :  { %v3000_v62 = vor.u32 %v2999_v43, %v2996_v42  ;;  %v3030_v42 = vshrl.u32 %v8431_v24, 16  ;;  %v3033_v43 = vshll.u32 %v8431_v24, 16 }
  0xb2   :  { %6804 = vmatmul.mubr.msk.bf16.gmra.mrb[80].mxu1 %vm894_vm2, %v762_v17  ;;  %v8371_v17 = vld [vmem:[%s9248_s0 + $0x190] sm:$0xff]  }
  0xb3   :  { %6807 = vmatprep.mubr.msk.bf16.mxu1 %vm894_vm2, %v770_v25  ;;  %7044 = vmatmul.mubr.msk.bf16.gmra.mrb[80].mxu0 %vm894_vm2, %v2947_v30  ;;  %v803_v25 = vshrl.u32 %v8330_v44, 16  ;;  %v815_v30 = vshll.u32 %v8366_v14, 16  ;;  %v3003_v32 = vshrl.u32 %v8371_v17, 16  ;;  %v3006_v33 = vshll.u32 %v8371_v17, 16 }
  0xb4   :  { %7047 = vmatprep.mubr.msk.bf16.mxu0 %vm894_vm2, %v2956_v41  ;;  %v3001_v21 = vsel %vm2561_vm1, %v2991_v37, %v3000_v62  ;;  %v3032_v5 = vrot.slane %v3030_v42, 2 }
  0xb5   :  { %v805_v41 = vor.u32 %v803_v25, %v801_v19  ;;  %v817_v53 = vrot.slane %v815_v30, 1  ;;  %v3005_v54 = vrot.slane %v3003_v32, 2  ;;  %v8438_v30 = vld [vmem:[%s9248_s0 + $0x1b0] sm:$0xff]  }
  0xb7   :  { %v810_v61 = vsel %vm422_vm0, %v805_v41, %v809_v38  ;;  %v818_v1 = vsel %vm422_vm0, %v813_v51, %v817_v53  ;;  %v821_v26 = vor.u32 %v819_v63, %v817_v53  ;;  %v8443_v38 = vld [vmem:[%s9248_s0 + $0x1a8] sm:$0xff]   ;;  %v839_v41 = vshll.u32 %v8426_v23, 16 }
  0xb8   :  { %v847_v63 = vshll.u32 %v8443_v38, 16 }
  0xba   :  { %6808 = vmatmul.mubr.msk.bf16.gmra.mrb[84].mxu1 %vm894_vm2, %v778_v55  ;;  %v3008_v55 = vrot.slane %v3006_v33, 3  ;;  %v833_v33 = vrot.slane %v831_v18, 1 }
  0xbb   :  { %6811 = vmatprep.mubr.msk.bf16.mxu1 %vm894_vm2, %v786_v60  ;;  %7048 = vmatmul.mubr.msk.bf16.gmra.mrb[84].mxu0 %vm894_vm2, %v2965_v12  ;;  %v8407_v60 = vld [vmem:[%s9248_s0 + $0x1a0] sm:$0xff]   ;;  %v3015_v12 = vshll.u32 %v8396_v56, 16 }
  0xbc   :  { %7051 = vmatprep.mubr.msk.bf16.mxu0 %vm894_vm2, %v2974_v13  ;;  %v3009_v4 = vor.u32 %v3008_v55, %v3005_v54  ;;  %v827_v13 = vshrl.u32 %v8390_v50, 16  ;;  %v3021_v19 = vshrl.u32 %v8407_v60, 16  ;;  %v3024_v20 = vshll.u32 %v8407_v60, 16 }
  0xbd   :  { %v3017_v28 = vrot.slane %v3015_v12, 3  ;;  %v3039_v54 = vshrl.u32 %v8438_v30, 16  ;;  %v3042_v55 = vshll.u32 %v8438_v30, 16  ;;  %v3035_v12 = vrot.slane %v3033_v43, 3 }
  0xbe   :  { %v3010_v25 = vsel %vm2561_vm1, %v3000_v62, %v3009_v4  ;;  %v3026_v37 = vrot.slane %v3024_v20, 3  ;;  %v843_v62 = vshrl.u32 %v8426_v23, 16 }
  0xbf   :  { %v3018_v53 = vor.u32 %v3017_v28, %v3014_v27  ;;  %v3044_v20 = vrot.slane %v3042_v55, 3  ;;  %v7645_v27 = vld [vmem:[%s9248_s0 + $0x1b8] ss:$0 sps:$4 sm:$0x33]  }
  0xc1   :  { %v3019_v18 = vsel %vm2561_vm1, %v3009_v4, %v3018_v53  ;;  %v8477_v4 = vld [vmem:[%s9248_s0 + $0x1c0] ss:$0 sps:$4 sm:$0xff]  }
  0xc2   :  { %6812 = vmatmul.mubr.msk.bf16.gmra.mrb[88].mxu1 %vm894_vm2, %v794_v22  ;;  %v825_v22 = vrot.slane %v823_v0, 1 }
  0xc3   :  { %6815 = vmatprep.mubr.msk.bf16.mxu1 %vm894_vm2, %v802_v36  ;;  %7052 = vmatmul.mubr.msk.bf16.gmra.mrb[88].mxu0 %vm894_vm2, %v2983_v40  ;;  %v3023_v36 = vrot.slane %v3021_v19, 2  ;;  %v835_v40 = vshrl.u32 %v8402_v59, 16  ;;  %v3041_v19 = vrot.slane %v3039_v54, 2  ;;  %v3060_v54 = vshll.u32 %v8477_v4, 16 }
  0xc4   :  { %7055 = vmatprep.mubr.msk.bf16.mxu0 %vm894_vm2, %v2992_v58  ;;  %v829_v32 = vor.u32 %v827_v13, %v825_v22  ;;  %v826_v51 = vsel %vm422_vm0, %v821_v26, %v825_v22  ;;  %v8461_v13 = vld [vmem:[%s9248_s0 + $0x1b0] sm:$0xff]   ;;  %v849_v26 = vrot.slane %v847_v63, 1 }
  0xc5   :  { %v837_v0 = vor.u32 %v835_v40, %v833_v33  ;;  %v859_v42 = vshrl.u32 %v8461_v13, 16 }
  0xc6   :  { %v834_v58 = vsel %vm422_vm0, %v829_v32, %v833_v33  ;;  %v3036_v32 = vor.u32 %v3035_v12, %v3032_v5  ;;  %v851_v33 = vshrl.u32 %v8443_v38, 16 }
  0xc8   :  { %v853_v63 = vor.u32 %v851_v33, %v849_v26 }
  0xca   :  { %6816 = vmatmul.mubr.msk.bf16.gmra.mrb[92].mxu1 %vm894_vm2, %v810_v61  ;;  %v3027_v61 = vor.u32 %v3026_v37, %v3023_v36  ;;  %v855_v36 = vshll.u32 %v8461_v13, 16  ;;  %v3045_v37 = vor.u32 %v3044_v20, %v3041_v19  ;;  %v3062_v19 = vrot.slane %v3060_v54, 3 }
  0xcb   :  { %6819 = vmatprep.mubr.msk.bf16.mxu1 %vm894_vm2, %v818_v1  ;;  %7056 = vmatmul.mubr.msk.bf16.gmra.mrb[92].mxu0 %vm894_vm2, %v3001_v21  ;;  %v841_v1 = vrot.slane %v839_v41, 1  ;;  %v8468_v21 = vld [vmem:[%s9248_s0 + $0x1b8] sm:$0xff]  }
  0xcc   :  { %7059 = vmatprep.mubr.msk.bf16.mxu0 %vm894_vm2, %v3010_v25  ;;  %v3028_v22 = vsel %vm2561_vm1, %v3018_v53, %v3027_v61  ;;  %v3048_v40 = vshrl.u32 %v8468_v21, 16  ;;  %v3051_v41 = vshll.u32 %v8468_v21, 16  ;;  %v3057_v53 = vshrl.u32 %v8477_v4, 16 }
  0xcd   :  { %v845_v25 = vor.u32 %v843_v62, %v841_v1  ;;  %v842_v28 = vsel %vm422_vm0, %v837_v0, %v841_v1  ;;  %v3037_v55 = vsel %vm2561_vm1, %v3027_v61, %v3036_v32  ;;  %v3046_v62 = vsel %vm2561_vm1, %v3036_v32, %v3045_v37 }
  0xce   :  { %v3050_v0 = vrot.slane %v3048_v40, 2  ;;  %v3053_v1 = vrot.slane %v3051_v41, 3 }
  0xcf   :  { %v850_v43 = vsel %vm422_vm0, %v845_v25, %v849_v26  ;;  %v3848_v26 = vld [vmem:[%s9248_s0 + $0x8] sm:$0x8] }
  0xd2   :  { %6820 = vmatmul.mubr.msk.bf16.gmra.mrb[96].mxu1 %vm894_vm2, %v826_v51  ;;  %v863_v51 = vshll.u32 %v7645_v27, 16 }
  0xd3   :  { %6823 = vmatprep.mubr.msk.bf16.mxu1 %vm894_vm2, %v834_v58  ;;  %7060 = vmatmul.mubr.msk.bf16.gmra.mrb[96].mxu0 %vm894_vm2, %v3019_v18  ;;  %v857_v58 = vrot.slane %v855_v36, 1  ;;  %v3059_v18 = vrot.slane %v3057_v53, 2  ;;  %v7649_v36 = vld [vmem:[%s9248_s0 + $0xc] sm:$0xf]  ;;  %v7652_v53 = vld [vmem:[%s9248_s0 + $0x18] sm:$0xff]  }
  0xd4   :  { %7063 = vmatprep.mubr.msk.bf16.mxu0 %vm894_vm2, %v3028_v22  ;;  %v865_v12 = vrot.slane %v863_v51, 1  ;;  %v3054_v22 = vor.u32 %v3053_v1, %v3050_v0  ;;  %v5862_v40 = vcombine.low %v3848_v26, %v7649_v36  ;;  %v3865_v54 = vrot.slane %v7652_v53, 3  ;;  %v7655_v0 = vld [vmem:[%s9248_s0 + $0x10] sm:$0xff]   ;;  %v7660_v26 = vld [vmem:[%s9248_s0 + $0x38] sm:$0xff]   ;;  %v7662_v36 = vld [vmem:[%s9248_s0 + $0x28] sm:$0xff]  }
  0xd5   :  { %v861_v5 = vor.u32 %v859_v42, %v857_v58  ;;  %v858_v20 = vsel %vm422_vm0, %v853_v63, %v857_v58  ;;  %v3063_v25 = vor.u32 %v3062_v19, %v3059_v18  ;;  %v7657_v18 = vld [vmem:[%s9248_s0 + $0x30] sm:$0xff]   ;;  %v7666_v53 = vld [vmem:[%s9248_s0 + $0x38] sm:$0xff]  }
  0xd6   :  { %v3055_v32 = vsel %vm2561_vm1, %v3045_v37, %v3054_v22  ;;  %v3862_v42 = vrot.slane %v5862_v40, 3  ;;  %v3871_v19 = vrot.slane %v7657_v18, 3  ;;  %v7671_v18 = vld [vmem:[%s9248_s0 + $0x50] sm:$0xff]  }
  0xd7   :  { %v866_v61 = vsel %vm422_vm0, %v861_v5, %v865_v12  ;;  %v3064_v33 = vsel %vm2561_vm1, %v3054_v22, %v3063_v25  ;;  %v7656_v5 = vld [vmem:[%s9248_s0 + $0x28] sm:$0xff]  }
  0xda   :  { %6824 = vmatmul.mubr.msk.bf16.gmra.mrb[100].mxu1 %vm894_vm2, %v842_v28  ;;  %v867_v28 = vshrl.u32 %v7645_v27, 16  ;;  %v7650_v27 = vld [vmem:[%s9248_s0 + $0x10] sm:$0xff]  }
  0xdb   :  { %6827 = vmatprep.mubr.msk.bf16.mxu1 %vm894_vm2, %v850_v43  ;;  %7064 = vmatmul.mubr.msk.bf16.gmra.mrb[100].mxu0 %vm894_vm2, %v3037_v55  ;;  %v3863_v37 = vrot.slane %v7650_v27, 3  ;;  %v7651_v43 = vld [vmem:[%s9248_s0] sm:$0xff]   ;;  %v7664_v27 = vld [vmem:[%s9248_s0 + $0x48] sm:$0xff]  }
  0xdc   :  { %7067 = vmatprep.mubr.msk.bf16.mxu0 %vm894_vm2, %v3046_v62  ;;  %v869_v41 = vor.u32 %v867_v28, %v865_v12  ;;  %v7653_v55 = vld [vmem:[%s9248_s0 + $0x20] sm:$0xff]   ;;  %v7654_v62 = vld [vmem:[%s9248_s0 + $0x8] sm:$0xff]   ;;  %v3869_v12 = vrot.slane %v7656_v5, 3  ;;  %v3873_v28 = vrot.slane %v7660_v26, 3  ;;  %v7674_v26 = vld [vmem:[%s9248_s0 + $0x58] sm:$0xff]  }
  0xdd   :  { %v3864_v51 = vsel %vm3861_vm3, %v3862_v42, %v3863_v37  ;;  %v3867_v58 = vrot.slane %v7653_v55, 3  ;;  %v3866_v63 = vsel %vm3861_vm3, %v3863_v37, %v3865_v54  ;;  %v3877_v37 = vrot.slane %v7664_v27, 3  ;;  %v7667_v55 = vld [vmem:[%s9248_s0 + $0x40] sm:$0xff]   ;;  %v7670_v5 = vld [vmem:[%s9248_s0 + $0x48] sm:$0xff]  }
  0xde   :  { %v3874_v40 = vsel %vm3861_vm3, %v3871_v19, %v3873_v28  ;;  %v7678_v27 = vld [vmem:[%s9248_s0 + $0x68] sm:$0xff]  }
  0xdf   :  { %v3868_v1 = vsel %vm3861_vm3, %v3865_v54, %v3867_v58  ;;  %v3870_v22 = vsel %vm3861_vm3, %v3867_v58, %v3869_v12 }
  0xe2   :  { %6828 = vmatmul.mubr.msk.bf16.gmra.mrb[104].mxu1 %vm894_vm2, %v858_v20  ;;  %v7658_v20 = vld [vmem:[%s9248_s0 + $0x18] sm:$0xff]  }
  0xe3   :  { %6831 = vmatprep.mubr.msk.bf16.mxu1 %vm894_vm2, %v866_v61  ;;  %7068 = vmatmul.mubr.msk.bf16.gmra.mrb[104].mxu0 %vm894_vm2, %v3055_v32  ;;  %v7659_v61 = vld [vmem:[%s9248_s0 + $0x20] sm:$0xff]  }
  0xe4   :  { %7071 = vmatprep.mubr.msk.bf16.mxu0 %vm894_vm2, %v3064_v33  ;;  %v7661_v32 = vld [vmem:[%s9248_s0 + $0x40] sm:$0xff]  }
  0xe5   :  { %v3875_v33 = vrot.slane %v7661_v32, 3  ;;  %v7675_v32 = vld [vmem:[%s9248_s0 + $0x60] sm:$0xff]  }
  0xe7   :  { %v3876_v42 = vsel %vm3861_vm3, %v3873_v28, %v3875_v33  ;;  %v3878_v54 = vsel %vm3861_vm3, %v3875_v33, %v3877_v37 }
  0xea   :  { %6832 = vmatmul.mubr.msk.bf16.gmra.mrb[108].mxu1 %vm894_vm2, %v869_v41  ;;  %v7663_v41 = vld [vmem:[%s9248_s0 + $0x30] sm:$0xff]  }
  0xeb   :  { %6843 = vmatprep.mubr.msk.bf16.mxu1 %vm894_vm2, %v7651_v43  ;;  %7072 = vmatmul.mubr.msk.bf16.gmra.mrb[108].mxu0 %vm894_vm2, %v3063_v25  ;;  %v3872_v25 = vsel %vm3861_vm3, %v3869_v12, %v3871_v19  ;;  %v7665_v43 = vld [vmem:[%s9248_s0 + $0x50] sm:$0xff]  }
  0xec   :  { %7083 = vmatprep.mubr.msk.bf16.mxu0 %vm894_vm2, %v3864_v51  ;;  %v3879_v51 = vrot.slane %v7665_v43, 3  ;;  %v7679_v43 = vld [vmem:[%s9248_s0 + $0x70] sm:$0xff]  }
  0xee   :  { %v3880_v58 = vsel %vm3861_vm3, %v3877_v37, %v3879_v51 }
  0xf2   :  { %6844 = vmatmul.mubr.msk.bf16.vlgmr.msra.gmra.mrb[0].mxu1 %vm894_vm2, %v7654_v62  ;;  %v7668_v62 = vld [vmem:[%s9248_s0 + $0x58] sm:$0xff]  }
  0xf3   :  { %6847 = vmatprep.mubr.msk.bf16.mxu1 %vm894_vm2, %v7655_v0  ;;  %7084 = vmatmul.mubr.msk.bf16.vlgmr.msra.gmra.mrb[0].mxu0 %vm894_vm2, %v3866_v63  ;;  %v3881_v63 = vrot.slane %v7668_v62, 3  ;;  %v7669_v0 = vld [vmem:[%s9248_s0 + $0x60] sm:$0xff]   ;;  %v7682_v62 = vld [vmem:[%s9248_s0 + $0x78] sm:$0xff]  }
  0xf4   :  { %7087 = vmatprep.mubr.msk.bf16.mxu0 %vm894_vm2, %v3868_v1  ;;  %v3883_v1 = vrot.slane %v7669_v0, 3  ;;  %v7683_v0 = vld [vmem:[%s9248_s0 + $0x80] sm:$0xff]  }
  0xf5   :  { %v3882_v12 = vsel %vm3861_vm3, %v3879_v51, %v3881_v63 }
  0xf6   :  { %v3884_v19 = vsel %vm3861_vm3, %v3881_v63, %v3883_v1 }
  0xfa   :  { %6848 = vmatmul.mubr.msk.bf16.gmra.mrb[4].mxu1 %vm894_vm2, %v7658_v20  ;;  %v7672_v20 = vld [vmem:[%s9248_s0 + $0x68] sm:$0xff]  }
  0xfb   :  { %6851 = vmatprep.mubr.msk.bf16.mxu1 %vm894_vm2, %v7659_v61  ;;  %7088 = vmatmul.mubr.msk.bf16.gmra.mrb[4].mxu0 %vm894_vm2, %v3870_v22  ;;  %v3885_v22 = vrot.slane %v7672_v20, 3  ;;  %v7673_v61 = vld [vmem:[%s9248_s0 + $0x70] sm:$0xff]   ;;  %v7686_v20 = vld [vmem:[%s9248_s0 + $0x88] sm:$0xff]  }
  0xfc   :  { %7091 = vmatprep.mubr.msk.bf16.mxu0 %vm894_vm2, %v3872_v25  ;;  %v3887_v25 = vrot.slane %v7673_v61, 3  ;;  %v7687_v61 = vld [vmem:[%s9248_s0 + $0x90] sm:$0xff]  }
  0xfd   :  { %v3886_v28 = vsel %vm3861_vm3, %v3883_v1, %v3885_v22 }
  0xfe   :  { %v3888_v33 = vsel %vm3861_vm3, %v3885_v22, %v3887_v25 }
 0x102   :  { %6852 = vmatmul.mubr.msk.bf16.gmra.mrb[8].mxu1 %vm894_vm2, %v7662_v36  ;;  %v7676_v36 = vld [vmem:[%s9248_s0 + $0x78] sm:$0xff]  }
 0x103   :  { %6855 = vmatprep.mubr.msk.bf16.mxu1 %vm894_vm2, %v7663_v41  ;;  %7092 = vmatmul.mubr.msk.bf16.gmra.mrb[8].mxu0 %vm894_vm2, %v3874_v40  ;;  %v3889_v40 = vrot.slane %v7676_v36, 3  ;;  %v7677_v41 = vld [vmem:[%s9248_s0 + $0x80] sm:$0xff]   ;;  %v7690_v36 = vld [vmem:[%s9248_s0 + $0x98] sm:$0xff]  }
 0x104   :  { %7095 = vmatprep.mubr.msk.bf16.mxu0 %vm894_vm2, %v3876_v42  ;;  %v3891_v42 = vrot.slane %v7677_v41, 3  ;;  %v7691_v41 = vld [vmem:[%s9248_s0 + $0xa0] sm:$0xff]  }
 0x105   :  { %v3890_v37 = vsel %vm3861_vm3, %v3887_v25, %v3889_v40 }
 0x106   :  { %v3892_v51 = vsel %vm3861_vm3, %v3889_v40, %v3891_v42 }
 0x10a   :  { %6856 = vmatmul.mubr.msk.bf16.gmra.mrb[12].mxu1 %vm894_vm2, %v7666_v53  ;;  %v7680_v53 = vld [vmem:[%s9248_s0 + $0x88] sm:$0xff]  }
 0x10b   :  { %6859 = vmatprep.mubr.msk.bf16.mxu1 %vm894_vm2, %v7667_v55  ;;  %7096 = vmatmul.mubr.msk.bf16.gmra.mrb[12].mxu0 %vm894_vm2, %v3878_v54  ;;  %v3893_v54 = vrot.slane %v7680_v53, 3  ;;  %v7681_v55 = vld [vmem:[%s9248_s0 + $0x90] sm:$0xff]   ;;  %v7694_v53 = vld [vmem:[%s9248_s0 + $0xa8] sm:$0xff]  }
 0x10c   :  { %7099 = vmatprep.mubr.msk.bf16.mxu0 %vm894_vm2, %v3880_v58  ;;  %v3895_v58 = vrot.slane %v7681_v55, 3  ;;  %v7695_v55 = vld [vmem:[%s9248_s0 + $0xb0] sm:$0xff]  }
 0x10d   :  { %v3894_v63 = vsel %vm3861_vm3, %v3891_v42, %v3893_v54 }
 0x10e   :  { %v3896_v1 = vsel %vm3861_vm3, %v3893_v54, %v3895_v58 }
 0x112   :  { %6860 = vmatmul.mubr.msk.bf16.gmra.mrb[16].mxu1 %vm894_vm2, %v7670_v5  ;;  %v7684_v5 = vld [vmem:[%s9248_s0 + $0x98] sm:$0xff]  }
 0x113   :  { %6863 = vmatprep.mubr.msk.bf16.mxu1 %vm894_vm2, %v7671_v18  ;;  %7100 = vmatmul.mubr.msk.bf16.gmra.mrb[16].mxu0 %vm894_vm2, %v3882_v12  ;;  %v3897_v12 = vrot.slane %v7684_v5, 3  ;;  %v7685_v18 = vld [vmem:[%s9248_s0 + $0xa0] sm:$0xff]   ;;  %v7698_v5 = vld [vmem:[%s9248_s0 + $0xb8] sm:$0xff]  }
 0x114   :  { %7103 = vmatprep.mubr.msk.bf16.mxu0 %vm894_vm2, %v3884_v19  ;;  %v3899_v19 = vrot.slane %v7685_v18, 3  ;;  %v7699_v18 = vld [vmem:[%s9248_s0 + $0xc0] sm:$0xff]  }
 0x115   :  { %v3898_v22 = vsel %vm3861_vm3, %v3895_v58, %v3897_v12 }
 0x116   :  { %v3900_v25 = vsel %vm3861_vm3, %v3897_v12, %v3899_v19 }
 0x11a   :  { %6864 = vmatmul.mubr.msk.bf16.gmra.mrb[20].mxu1 %vm894_vm2, %v7674_v26  ;;  %v7688_v26 = vld [vmem:[%s9248_s0 + $0xa8] sm:$0xff]  }
 0x11b   :  { %6867 = vmatprep.mubr.msk.bf16.mxu1 %vm894_vm2, %v7675_v32  ;;  %7104 = vmatmul.mubr.msk.bf16.gmra.mrb[20].mxu0 %vm894_vm2, %v3886_v28  ;;  %v3901_v28 = vrot.slane %v7688_v26, 3  ;;  %v7689_v32 = vld [vmem:[%s9248_s0 + $0xb0] sm:$0xff]   ;;  %v7702_v26 = vld [vmem:[%s9248_s0 + $0xc8] sm:$0xff]  }
 0x11c   :  { %7107 = vmatprep.mubr.msk.bf16.mxu0 %vm894_vm2, %v3888_v33  ;;  %v3903_v33 = vrot.slane %v7689_v32, 3  ;;  %v7703_v32 = vld [vmem:[%s9248_s0 + $0xd0] sm:$0xff]  }
 0x11d   :  { %v3902_v40 = vsel %vm3861_vm3, %v3899_v19, %v3901_v28 }
 0x11e   :  { %v3904_v42 = vsel %vm3861_vm3, %v3901_v28, %v3903_v33 }
 0x122   :  { %6868 = vmatmul.mubr.msk.bf16.gmra.mrb[24].mxu1 %vm894_vm2, %v7678_v27  ;;  %v7692_v27 = vld [vmem:[%s9248_s0 + $0xb8] sm:$0xff]  }
 0x123   :  { %6871 = vmatprep.mubr.msk.bf16.mxu1 %vm894_vm2, %v7679_v43  ;;  %7108 = vmatmul.mubr.msk.bf16.gmra.mrb[24].mxu0 %vm894_vm2, %v3890_v37  ;;  %v3905_v37 = vrot.slane %v7692_v27, 3  ;;  %v7693_v43 = vld [vmem:[%s9248_s0 + $0xc0] sm:$0xff]   ;;  %v7706_v27 = vld [vmem:[%s9248_s0 + $0xd8] sm:$0xff]  }
 0x124   :  { %7111 = vmatprep.mubr.msk.bf16.mxu0 %vm894_vm2, %v3892_v51  ;;  %v3907_v51 = vrot.slane %v7693_v43, 3  ;;  %v7707_v43 = vld [vmem:[%s9248_s0 + $0xe0] sm:$0xff]  }
 0x125   :  { %v3906_v54 = vsel %vm3861_vm3, %v3903_v33, %v3905_v37 }
 0x126   :  { %v3908_v58 = vsel %vm3861_vm3, %v3905_v37, %v3907_v51 }
 0x12a   :  { %6872 = vmatmul.mubr.msk.bf16.gmra.mrb[28].mxu1 %vm894_vm2, %v7682_v62  ;;  %v7696_v62 = vld [vmem:[%s9248_s0 + $0xc8] sm:$0xff]  }
 0x12b   :  { %6875 = vmatprep.mubr.msk.bf16.mxu1 %vm894_vm2, %v7683_v0  ;;  %7112 = vmatmul.mubr.msk.bf16.gmra.mrb[28].mxu0 %vm894_vm2, %v3894_v63  ;;  %v3909_v63 = vrot.slane %v7696_v62, 3  ;;  %v7697_v0 = vld [vmem:[%s9248_s0 + $0xd0] sm:$0xff]   ;;  %v7710_v62 = vld [vmem:[%s9248_s0 + $0xe8] sm:$0xff]  }
 0x12c   :  { %7115 = vmatprep.mubr.msk.bf16.mxu0 %vm894_vm2, %v3896_v1  ;;  %v3911_v1 = vrot.slane %v7697_v0, 3  ;;  %v7711_v0 = vld [vmem:[%s9248_s0 + $0xf0] sm:$0xff]  }
 0x12d   :  { %v3910_v12 = vsel %vm3861_vm3, %v3907_v51, %v3909_v63 }
 0x12e   :  { %v3912_v19 = vsel %vm3861_vm3, %v3909_v63, %v3911_v1 }
 0x132   :  { %6876 = vmatmul.mubr.msk.bf16.gmra.mrb[32].mxu1 %vm894_vm2, %v7686_v20  ;;  %v7700_v20 = vld [vmem:[%s9248_s0 + $0xd8] sm:$0xff]  }
 0x133   :  { %6879 = vmatprep.mubr.msk.bf16.mxu1 %vm894_vm2, %v7687_v61  ;;  %7116 = vmatmul.mubr.msk.bf16.gmra.mrb[32].mxu0 %vm894_vm2, %v3898_v22  ;;  %v3913_v22 = vrot.slane %v7700_v20, 3  ;;  %v7701_v61 = vld [vmem:[%s9248_s0 + $0xe0] sm:$0xff]   ;;  %v7714_v20 = vld [vmem:[%s9248_s0 + $0xf8] sm:$0xff]  }
 0x134   :  { %7119 = vmatprep.mubr.msk.bf16.mxu0 %vm894_vm2, %v3900_v25  ;;  %v3915_v25 = vrot.slane %v7701_v61, 3  ;;  %v7715_v61 = vld [vmem:[%s9248_s0 + $0x100] sm:$0xff]  }
 0x135   :  { %v3914_v28 = vsel %vm3861_vm3, %v3911_v1, %v3913_v22 }
 0x136   :  { %v3916_v33 = vsel %vm3861_vm3, %v3913_v22, %v3915_v25 }
 0x13a   :  { %6880 = vmatmul.mubr.msk.bf16.gmra.mrb[36].mxu1 %vm894_vm2, %v7690_v36  ;;  %v7704_v36 = vld [vmem:[%s9248_s0 + $0xe8] sm:$0xff]  }
 0x13b   :  { %6883 = vmatprep.mubr.msk.bf16.mxu1 %vm894_vm2, %v7691_v41  ;;  %7120 = vmatmul.mubr.msk.bf16.gmra.mrb[36].mxu0 %vm894_vm2, %v3902_v40  ;;  %v3917_v40 = vrot.slane %v7704_v36, 3  ;;  %v7705_v41 = vld [vmem:[%s9248_s0 + $0xf0] sm:$0xff]   ;;  %v7718_v36 = vld [vmem:[%s9248_s0 + $0x108] sm:$0xff]  }
 0x13c   :  { %7123 = vmatprep.mubr.msk.bf16.mxu0 %vm894_vm2, %v3904_v42  ;;  %v3919_v42 = vrot.slane %v7705_v41, 3  ;;  %v7719_v41 = vld [vmem:[%s9248_s0 + $0x110] sm:$0xff]  }
 0x13d   :  { %v3918_v37 = vsel %vm3861_vm3, %v3915_v25, %v3917_v40 }
 0x13e   :  { %v3920_v51 = vsel %vm3861_vm3, %v3917_v40, %v3919_v42 }
 0x142   :  { %6884 = vmatmul.mubr.msk.bf16.gmra.mrb[40].mxu1 %vm894_vm2, %v7694_v53  ;;  %v7708_v53 = vld [vmem:[%s9248_s0 + $0xf8] sm:$0xff]  }
 0x143   :  { %6887 = vmatprep.mubr.msk.bf16.mxu1 %vm894_vm2, %v7695_v55  ;;  %7124 = vmatmul.mubr.msk.bf16.gmra.mrb[40].mxu0 %vm894_vm2, %v3906_v54  ;;  %v3921_v54 = vrot.slane %v7708_v53, 3  ;;  %v7709_v55 = vld [vmem:[%s9248_s0 + $0x100] sm:$0xff]  }
 0x144   :  { %7127 = vmatprep.mubr.msk.bf16.mxu0 %vm894_vm2, %v3908_v58  ;;  %v3923_v58 = vrot.slane %v7709_v55, 3 }
 0x145   :  { %v3922_v63 = vsel %vm3861_vm3, %v3919_v42, %v3921_v54 }
 0x146   :  { %v3924_v1 = vsel %vm3861_vm3, %v3921_v54, %v3923_v58  ;;  %v7722_v54 = vld [vmem:[%s9248_s0 + $0x120] sm:$0xff]  }
 0x14a   :  { %6888 = vmatmul.mubr.msk.bf16.gmra.mrb[44].mxu1 %vm894_vm2, %v7698_v5  ;;  %v7712_v5 = vld [vmem:[%s9248_s0 + $0x108] sm:$0xff]  }
 0x14b   :  { %6891 = vmatprep.mubr.msk.bf16.mxu1 %vm894_vm2, %v7699_v18  ;;  %7128 = vmatmul.mubr.msk.bf16.gmra.mrb[44].mxu0 %vm894_vm2, %v3910_v12  ;;  %v3925_v12 = vrot.slane %v7712_v5, 3  ;;  %v7713_v18 = vld [vmem:[%s9248_s0 + $0x110] sm:$0xff]   ;;  %v3945_v5 = vrot.slane %v8250_v39, 3  ;;  %v3951_v39 = vrot.slane %v8294_v9, 3  ;;  %v3957_v9 = vrot.slane %v8358_v10, 3 }
 0x14c   :  { %7131 = vmatprep.mubr.msk.bf16.mxu0 %vm894_vm2, %v3912_v19  ;;  %v3927_v19 = vrot.slane %v7713_v18, 3  ;;  %v3963_v10 = vrot.slane %v8407_v60, 3 }
 0x14d   :  { %v3926_v22 = vsel %vm3861_vm3, %v3923_v58, %v3925_v12  ;;  %v3939_v58 = vrot.slane %v8191_v57, 3  ;;  %v3943_v57 = vrot.slane %v8226_v15, 3  ;;  %v3949_v15 = vrot.slane %v8289_v6, 3 }
 0x14e   :  { %v3928_v25 = vsel %vm3861_vm3, %v3925_v12, %v3927_v19  ;;  %v3955_v6 = vrot.slane %v8335_v49, 3  ;;  %v3961_v49 = vrot.slane %v8396_v56, 3  ;;  %v3967_v56 = vrot.slane %v8438_v30, 3 }
 0x152   :  { %6892 = vmatmul.mubr.msk.bf16.gmra.mrb[48].mxu1 %vm894_vm2, %v7702_v26  ;;  %v7716_v26 = vld [vmem:[%s9248_s0 + $0x118] sm:$0xff]  }
 0x153   :  { %6895 = vmatprep.mubr.msk.bf16.mxu1 %vm894_vm2, %v7703_v32  ;;  %7132 = vmatmul.mubr.msk.bf16.gmra.mrb[48].mxu0 %vm894_vm2, %v3914_v28  ;;  %v3929_v28 = vrot.slane %v7716_v26, 3  ;;  %v7717_v32 = vld [vmem:[%s9248_s0 + $0x120] sm:$0xff]   ;;  %v7648_v26 = vld [vmem:[%s9248_s0 + $0x1b8] ss:$0 sps:$4 sm:$0x11]  }
 0x154   :  { %7135 = vmatprep.mubr.msk.bf16.mxu0 %vm894_vm2, %v3916_v33  ;;  %v3931_v33 = vrot.slane %v7717_v32, 3 }
 0x155   :  { %v3930_v40 = vsel %vm3861_vm3, %v3927_v19, %v3929_v28 }
 0x156   :  { %v3932_v42 = vsel %vm3861_vm3, %v3929_v28, %v3931_v33 }
 0x15a   :  { %6896 = vmatmul.mubr.msk.bf16.gmra.mrb[52].mxu1 %vm894_vm2, %v7706_v27  ;;  %v7720_v27 = vld [vmem:[%s9248_s0 + $0x128] sm:$0xff]  }
 0x15b   :  { %6899 = vmatprep.mubr.msk.bf16.mxu1 %vm894_vm2, %v7707_v43  ;;  %7136 = vmatmul.mubr.msk.bf16.gmra.mrb[52].mxu0 %vm894_vm2, %v3918_v37  ;;  %v3933_v37 = vrot.slane %v7720_v27, 3  ;;  %v3935_v43 = vrot.slane %v8160_v31, 3  ;;  %v3937_v31 = vrot.slane %v8178_v48, 3  ;;  %v3941_v48 = vrot.slane %v8213_v8, 3 }
 0x15c   :  { %7139 = vmatprep.mubr.msk.bf16.mxu0 %vm894_vm2, %v3920_v51  ;;  %v7721_v51 = vld [vmem:[%s9248_s0 + $0x118] sm:$0xff]   ;;  %v3947_v8 = vrot.slane %v8263_v47, 3  ;;  %v3953_v47 = vrot.slane %v8323_v35, 3  ;;  %v3959_v35 = vrot.slane %v8371_v17, 3  ;;  %v3965_v17 = vrot.slane %v8431_v24, 3 }
 0x15d   :  { %v3934_v53 = vsel %vm3861_vm3, %v3931_v33, %v3933_v37  ;;  %v3936_v55 = vsel %vm3861_vm3, %v3933_v37, %v3935_v43  ;;  %v3969_v24 = vrot.slane %v8468_v21, 3 }
 0x162   :  { %6900 = vmatmul.mubr.msk.bf16.gmra.mrb[56].mxu1 %vm894_vm2, %v7710_v62  ;;  %v7723_v62 = vld [vmem:[%s9248_s0 + $0x128] sm:$0xff]  }
 0x163   :  { %6903 = vmatprep.mubr.msk.bf16.mxu1 %vm894_vm2, %v7711_v0  ;;  %7140 = vmatmul.mubr.msk.bf16.gmra.mrb[56].mxu0 %vm894_vm2, %v3922_v63  ;;  %v3938_v63 = vsel %vm3861_vm3, %v3935_v43, %v3937_v31  ;;  %v3940_v0 = vsel %vm3861_vm3, %v3937_v31, %v3939_v58 }
 0x164   :  { %7143 = vmatprep.mubr.msk.bf16.mxu0 %vm894_vm2, %v3924_v1  ;;  %v3942_v1 = vsel %vm3861_vm3, %v3939_v58, %v3941_v48 }
 0x16a   :  { %6904 = vmatmul.mubr.msk.bf16.gmra.mrb[60].mxu1 %vm894_vm2, %v7714_v20 }
 0x16b   :  { %6907 = vmatprep.mubr.msk.bf16.mxu1 %vm894_vm2, %v7715_v61  ;;  %7144 = vmatmul.mubr.msk.bf16.gmra.mrb[60].mxu0 %vm894_vm2, %v3926_v22  ;;  %v3970_v22 = vsel %vm3861_vm3, %v3967_v56, %v3969_v24 }
 0x16c   :  { %7147 = vmatprep.mubr.msk.bf16.mxu0 %vm894_vm2, %v3928_v25 }
 0x172   :  { %6908 = vmatmul.mubr.msk.bf16.gmra.mrb[64].mxu1 %vm894_vm2, %v7718_v36 }
 0x173   :  { %6911 = vmatprep.mubr.msk.bf16.mxu1 %vm894_vm2, %v7719_v41  ;;  %7148 = vmatmul.mubr.msk.bf16.gmra.mrb[64].mxu0 %vm894_vm2, %v3930_v40 }
 0x174   :  { %7151 = vmatprep.mubr.msk.bf16.mxu0 %vm894_vm2, %v3932_v42 }
 0x17a   :  { %6912 = vmatmul.mubr.msk.bf16.gmra.mrb[68].mxu1 %vm894_vm2, %v7721_v51 }
 0x17b   :  { %6915 = vmatprep.mubr.msk.bf16.mxu1 %vm894_vm2, %v7722_v54  ;;  %7152 = vmatmul.mubr.msk.bf16.gmra.mrb[68].mxu0 %vm894_vm2, %v3934_v53 }
 0x17c   :  { %7155 = vmatprep.mubr.msk.bf16.mxu0 %vm894_vm2, %v3936_v55 }
 0x182   :  { %6916 = vmatmul.mubr.msk.bf16.gmra.mrb[72].mxu1 %vm894_vm2, %v7723_v62 }
 0x183   :  { %6919 = vmatprep.mubr.msk.bf16.mxu1 %vm894_vm2, %v8172_v45  ;;  %7156 = vmatmul.mubr.msk.bf16.gmra.mrb[72].mxu0 %vm894_vm2, %v3938_v63  ;;  %v3944_v45 = vsel %vm3861_vm3, %v3941_v48, %v3943_v57 }
 0x184   :  { %7159 = vmatprep.mubr.msk.bf16.mxu0 %vm894_vm2, %v3940_v0 }
 0x18a   :  { %6920 = vmatmul.mubr.msk.bf16.gmra.mrb[76].mxu1 %vm894_vm2, %v8185_v52  ;;  %v3946_v52 = vsel %vm3861_vm3, %v3943_v57, %v3945_v5 }
 0x18b   :  { %6923 = vmatprep.mubr.msk.bf16.mxu1 %vm894_vm2, %v8208_v7  ;;  %7160 = vmatmul.mubr.msk.bf16.gmra.mrb[76].mxu0 %vm894_vm2, %v3942_v1  ;;  %v3948_v7 = vsel %vm3861_vm3, %v3945_v5, %v3947_v8 }
 0x18c   :  { %7163 = vmatprep.mubr.msk.bf16.mxu0 %vm894_vm2, %v3944_v45 }
 0x192   :  { %6924 = vmatmul.mubr.msk.bf16.gmra.mrb[80].mxu1 %vm894_vm2, %v8219_v11  ;;  %v3950_v11 = vsel %vm3861_vm3, %v3947_v8, %v3949_v15 }
 0x193   :  { %6927 = vmatprep.mubr.msk.bf16.mxu1 %vm894_vm2, %v8244_v34  ;;  %7164 = vmatmul.mubr.msk.bf16.gmra.mrb[80].mxu0 %vm894_vm2, %v3946_v52  ;;  %v3952_v34 = vsel %vm3861_vm3, %v3949_v15, %v3951_v39 }
 0x194   :  { %7167 = vmatprep.mubr.msk.bf16.mxu0 %vm894_vm2, %v3948_v7 }
 0x19a   :  { %6928 = vmatmul.mubr.msk.bf16.gmra.mrb[84].mxu1 %vm894_vm2, %v8258_v46  ;;  %v3954_v46 = vsel %vm3861_vm3, %v3951_v39, %v3953_v47 }
 0x19b   :  { %6931 = vmatprep.mubr.msk.bf16.mxu1 %vm894_vm2, %v8281_v3  ;;  %7168 = vmatmul.mubr.msk.bf16.gmra.mrb[84].mxu0 %vm894_vm2, %v3950_v11  ;;  %v3956_v3 = vsel %vm3861_vm3, %v3953_v47, %v3955_v6 }
 0x19c   :  { %7171 = vmatprep.mubr.msk.bf16.mxu0 %vm894_vm2, %v3952_v34 }
 0x1a2   :  { %6932 = vmatmul.mubr.msk.bf16.gmra.mrb[88].mxu1 %vm894_vm2, %v8299_v16  ;;  %v3958_v16 = vsel %vm3861_vm3, %v3955_v6, %v3957_v9 }
 0x1a3   :  { %6935 = vmatprep.mubr.msk.bf16.mxu1 %vm894_vm2, %v8316_v29  ;;  %7172 = vmatmul.mubr.msk.bf16.gmra.mrb[88].mxu0 %vm894_vm2, %v3954_v46  ;;  %v3960_v29 = vsel %vm3861_vm3, %v3957_v9, %v3959_v35 }
 0x1a4   :  { %7175 = vmatprep.mubr.msk.bf16.mxu0 %vm894_vm2, %v3956_v3 }
 0x1aa   :  { %6936 = vmatmul.mubr.msk.bf16.gmra.mrb[92].mxu1 %vm894_vm2, %v8330_v44  ;;  %v3962_v44 = vsel %vm3861_vm3, %v3959_v35, %v3961_v49 }
 0x1ab   :  { %6939 = vmatprep.mubr.msk.bf16.mxu1 %vm894_vm2, %v8352_v2  ;;  %7176 = vmatmul.mubr.msk.bf16.gmra.mrb[92].mxu0 %vm894_vm2, %v3958_v16  ;;  %v3964_v2 = vsel %vm3861_vm3, %v3961_v49, %v3963_v10 }
 0x1ac   :  { %7179 = vmatprep.mubr.msk.bf16.mxu0 %vm894_vm2, %v3960_v29 }
 0x1b2   :  { %6940 = vmatmul.mubr.msk.bf16.gmra.mrb[96].mxu1 %vm894_vm2, %v8366_v14  ;;  %v3966_v14 = vsel %vm3861_vm3, %v3963_v10, %v3965_v17 }
 0x1b3   :  { %6943 = vmatprep.mubr.msk.bf16.mxu1 %vm894_vm2, %v8390_v50  ;;  %7180 = vmatmul.mubr.msk.bf16.gmra.mrb[96].mxu0 %vm894_vm2, %v3962_v44  ;;  %v3968_v50 = vsel %vm3861_vm3, %v3965_v17, %v3967_v56 }
 0x1b4   :  { %7183 = vmatprep.mubr.msk.bf16.mxu0 %vm894_vm2, %v3964_v2 }
 0x1ba   :  { %6944 = vmatmul.mubr.msk.bf16.gmra.mrb[100].mxu1 %vm894_vm2, %v8402_v59  ;;  %v3971_v59 = vrot.slane %v8477_v4, 3 }
 0x1bb   :  { %6947 = vmatprep.mubr.msk.bf16.mxu1 %vm894_vm2, %v8426_v23  ;;  %7184 = vmatmul.mubr.msk.bf16.gmra.mrb[100].mxu0 %vm894_vm2, %v3966_v14 }
 0x1bc   :  { %7187 = vmatprep.mubr.msk.bf16.mxu0 %vm894_vm2, %v3968_v50  ;;  %v3972_v21 = vsel %vm3861_vm3, %v3969_v24, %v3971_v59 }
 0x1bd   :  { %v8923_v60 = vpop.f32.mrb[108].mxu1 }
 0x1be   :  { %v8926_v12 = vpop.f32.mrb[109].mxu1  ;;  %v8933_v19 = vpop.f32.mrb[108].mxu0 }
 0x1bf   :  { %v6834_v18 = vpop.f32.mrb[110].mxu1  ;;  %v8935_v23 = vpop.f32.mrb[109].mxu0 }
 0x1c0   :  { %v8930_v30 = vpop.f32.mrb[111].mxu1  ;;  %v7074_v20 = vpop.f32.mrb[110].mxu0 }
 0x1c1   :  { %v8942_v61 = vpop.f32.mrb[111].mxu0 }
 0x1c2   :  { %6948 = vmatmul.mubr.msk.bf16.gmra.mrb[104].mxu1 %vm894_vm2, %v8443_v38 }
 0x1c3   :  { %6951 = vmatprep.mubr.msk.bf16.mxu1 %vm894_vm2, %v8461_v13  ;;  %7188 = vmatmul.mubr.msk.bf16.gmra.mrb[104].mxu0 %vm894_vm2, %v3970_v22  ;;  %v8953_v13 = vld [vmem:[%s9249_s2] ss:$0 sm:$0xff] }
 0x1c4   :  { %7191 = vmatprep.mubr.msk.bf16.mxu0 %vm894_vm2, %v3972_v21 }
 0x1c5   :  { %v6845_v25 = vpop.f32.mrb[0].mxu1 }
 0x1c6   :  { %v1717_v4 = vpop.f32.mrb[1].mxu1  ;;  %v7085_v32 = vpop.f32.mrb[0].mxu0 }
 0x1c7   :  { %v6846_v28 = vpop.f32.mrb[2].mxu1  ;;  %v7195_v33 = vadd.f32 %v7085_v32, %v6845_v25  ;;  %v4199_v36 = vpop.f32.mrb[1].mxu0 }
 0x1c8   :  { %v1720_v38 = vpop.f32.mrb[3].mxu1  ;;  %v7196_v40 = vadd.f32 %v4199_v36, %v1717_v4  ;;  %v7086_v41 = vpop.f32.mrb[2].mxu0 }
 0x1c9   :  { %v4765_v42 = vadd.f32 %v7195_v33, %v8953_v13  ;;  %v7197_v27 = vadd.f32 %v7086_v41, %v6846_v28  ;;  %v4202_v37 = vpop.f32.mrb[3].mxu0 }
 0x1ca   :  { %6952 = vmatmul.mubr.msk.bf16.gmra.mrb[112].mxu1 %vm894_vm2, %v7648_v26  ;;  %v4763_v43 = vadd.f32 %v7196_v40, %v8953_v13  ;;  %v7198_v51 = vadd.f32 %v4202_v37, %v1720_v38 }
 0x1cb   :  { %v4766_v54 = vadd.f32 %v7197_v27, %v8953_v13  ;;  %7192 = vmatmul.mubr.msk.bf16.gmra.mrb[112].mxu0 %vm894_vm2, %v3971_v59  ;;  %v4876_v62 = vmax.f32 %v4765_v42, 0.0 }
 0x1cc   :  { %v4764_v31 = vadd.f32 %v7198_v51, %v8953_v13  ;;  %v4874_v48 = vmax.f32 %v4763_v43, 0.0 }
 0x1cd   :  { %v6849_v53 = vpop.f32.mrb[4].mxu1  ;;  %v4877_v63 = vmax.f32 %v4766_v54, 0.0 }
 0x1ce   :  { %v1733_v55 = vpop.f32.mrb[5].mxu1  ;;  %v4875_v57 = vmax.f32 %v4764_v31, 0.0  ;;  %v7089_v1 = vpop.f32.mrb[4].mxu0 }
 0x1cf   :  { %v6850_v58 = vpop.f32.mrb[6].mxu1  ;;  %v6154_v45 = vpack.c.bf16 %v4877_v63, %v4876_v62  ;;  %v7199_v5 = vadd.f32 %v7089_v1, %v6849_v53  ;;  %v4215_v8 = vpop.f32.mrb[5].mxu0 }
 0x1d0   :  { %v1736_v0 = vpop.f32.mrb[7].mxu1  ;;  %v6149_v52 = vpack.c.bf16 %v4875_v57, %v4874_v48  ;;  %v7200_v7 = vadd.f32 %v4215_v8, %v1733_v55  ;;  %v7090_v15 = vpop.f32.mrb[6].mxu0 }
 0x1d1   :  { %6421 = vst [vmem:[%s9250_s3 + $0x8] sm:$0xff] %v6154_v45   ;;  %v4769_v39 = vadd.f32 %v7199_v5, %v8953_v13  ;;  %v7201_v11 = vadd.f32 %v7090_v15, %v6850_v58  ;;  %v4218_v34 = vpop.f32.mrb[7].mxu0 }
 0x1d2   :  { %6150 = vst [vmem:[%s9250_s3] sm:$0xff] %v6149_v52   ;;  %v4767_v47 = vadd.f32 %v7200_v7, %v8953_v13  ;;  %v7202_v6 = vadd.f32 %v4218_v34, %v1736_v0 }
 0x1d3   :  { %v4770_v3 = vadd.f32 %v7201_v11, %v8953_v13  ;;  %v4880_v29 = vmax.f32 %v4769_v39, 0.0 }
 0x1d4   :  { %v4768_v35 = vadd.f32 %v7202_v6, %v8953_v13  ;;  %v4878_v44 = vmax.f32 %v4767_v47, 0.0 }
 0x1d5   :  { %v6853_v46 = vpop.f32.mrb[8].mxu1  ;;  %v4881_v49 = vmax.f32 %v4770_v3, 0.0 }
 0x1d6   :  { %v1749_v9 = vpop.f32.mrb[9].mxu1  ;;  %v4879_v2 = vmax.f32 %v4768_v35, 0.0  ;;  %v7093_v17 = vpop.f32.mrb[8].mxu0 }
 0x1d7   :  { %v6854_v16 = vpop.f32.mrb[10].mxu1  ;;  %v6164_v56 = vpack.c.bf16 %v4881_v49, %v4880_v29  ;;  %v7203_v14 = vadd.f32 %v7093_v17, %v6853_v46  ;;  %v4231_v50 = vpop.f32.mrb[9].mxu0 }
 0x1d8   :  { %v1752_v10 = vpop.f32.mrb[11].mxu1  ;;  %v6159_v18 = vpack.c.bf16 %v4879_v2, %v4878_v44  ;;  %v7204_v24 = vadd.f32 %v4231_v50, %v1749_v9  ;;  %v7094_v59 = vpop.f32.mrb[10].mxu0 }
 0x1d9   :  { %6423 = vst [vmem:[%s9250_s3 + $0x18] sm:$0xff] %v6164_v56   ;;  %v4773_v20 = vadd.f32 %v7203_v14, %v8953_v13  ;;  %v7205_v22 = vadd.f32 %v7094_v59, %v6854_v16  ;;  %v4234_v21 = vpop.f32.mrb[11].mxu0 }
 0x1da   :  { %6422 = vst [vmem:[%s9250_s3 + $0x10] sm:$0xff] %v6159_v18   ;;  %v4771_v25 = vadd.f32 %v7204_v24, %v8953_v13  ;;  %v7206_v4 = vadd.f32 %v4234_v21, %v1752_v10 }
 0x1db   :  { %v4774_v28 = vadd.f32 %v7205_v22, %v8953_v13  ;;  %v4884_v36 = vmax.f32 %v4773_v20, 0.0 }
 0x1dc   :  { %v4772_v32 = vadd.f32 %v7206_v4, %v8953_v13  ;;  %v4882_v42 = vmax.f32 %v4771_v25, 0.0 }
 0x1dd   :  { %v6857_v26 = vpop.f32.mrb[12].mxu1  ;;  %v4885_v40 = vmax.f32 %v4774_v28, 0.0 }
 0x1de   :  { %v1765_v38 = vpop.f32.mrb[13].mxu1  ;;  %v4883_v27 = vmax.f32 %v4772_v32, 0.0  ;;  %v7097_v37 = vpop.f32.mrb[12].mxu0 }
 0x1df   :  { %v6858_v33 = vpop.f32.mrb[14].mxu1  ;;  %v6174_v43 = vpack.c.bf16 %v4885_v40, %v4884_v36  ;;  %v7207_v51 = vadd.f32 %v7097_v37, %v6857_v26  ;;  %v4247_v53 = vpop.f32.mrb[13].mxu0 }
 0x1e0   :  { %v1768_v41 = vpop.f32.mrb[15].mxu1  ;;  %v6169_v54 = vpack.c.bf16 %v4883_v27, %v4882_v42  ;;  %v7208_v55 = vadd.f32 %v4247_v53, %v1765_v38  ;;  %v7098_v31 = vpop.f32.mrb[14].mxu0 }
 0x1e1   :  { %6425 = vst [vmem:[%s9250_s3 + $0x28] sm:$0xff] %v6174_v43   ;;  %v4777_v58 = vadd.f32 %v7207_v51, %v8953_v13  ;;  %v7209_v62 = vadd.f32 %v7098_v31, %v6858_v33  ;;  %v4250_v63 = vpop.f32.mrb[15].mxu0 }
 0x1e2   :  { %6424 = vst [vmem:[%s9250_s3 + $0x20] sm:$0xff] %v6169_v54   ;;  %v4775_v0 = vadd.f32 %v7208_v55, %v8953_v13  ;;  %v7210_v48 = vadd.f32 %v4250_v63, %v1768_v41 }
 0x1e3   :  { %v4778_v1 = vadd.f32 %v7209_v62, %v8953_v13  ;;  %v4888_v52 = vmax.f32 %v4777_v58, 0.0 }
 0x1e4   :  { %v4776_v5 = vadd.f32 %v7210_v48, %v8953_v13  ;;  %v4886_v39 = vmax.f32 %v4775_v0, 0.0 }
 0x1e5   :  { %v6861_v57 = vpop.f32.mrb[16].mxu1  ;;  %v4889_v7 = vmax.f32 %v4778_v1, 0.0 }
 0x1e6   :  { %v1781_v45 = vpop.f32.mrb[17].mxu1  ;;  %v4887_v11 = vmax.f32 %v4776_v5, 0.0  ;;  %v7101_v34 = vpop.f32.mrb[16].mxu0 }
 0x1e7   :  { %v6862_v8 = vpop.f32.mrb[18].mxu1  ;;  %v6184_v47 = vpack.c.bf16 %v4889_v7, %v4888_v52  ;;  %v7211_v6 = vadd.f32 %v7101_v34, %v6861_v57  ;;  %v4263_v46 = vpop.f32.mrb[17].mxu0 }
 0x1e8   :  { %v1784_v15 = vpop.f32.mrb[19].mxu1  ;;  %v6179_v3 = vpack.c.bf16 %v4887_v11, %v4886_v39  ;;  %v7212_v9 = vadd.f32 %v4263_v46, %v1781_v45  ;;  %v7102_v35 = vpop.f32.mrb[18].mxu0 }
 0x1e9   :  { %6427 = vst [vmem:[%s9250_s3 + $0x38] sm:$0xff] %v6184_v47   ;;  %v4781_v16 = vadd.f32 %v7211_v6, %v8953_v13  ;;  %v7213_v29 = vadd.f32 %v7102_v35, %v6862_v8  ;;  %v4266_v49 = vpop.f32.mrb[19].mxu0 }
 0x1ea   :  { %6426 = vst [vmem:[%s9250_s3 + $0x30] sm:$0xff] %v6179_v3   ;;  %v4779_v10 = vadd.f32 %v7212_v9, %v8953_v13  ;;  %v7214_v44 = vadd.f32 %v4266_v49, %v1784_v15 }
 0x1eb   :  { %v4782_v17 = vadd.f32 %v7213_v29, %v8953_v13  ;;  %v4892_v18 = vmax.f32 %v4781_v16, 0.0 }
 0x1ec   :  { %v4780_v14 = vadd.f32 %v7214_v44, %v8953_v13  ;;  %v4890_v20 = vmax.f32 %v4779_v10, 0.0 }
 0x1ed   :  { %v6865_v2 = vpop.f32.mrb[20].mxu1  ;;  %v4893_v24 = vmax.f32 %v4782_v17, 0.0 }
 0x1ee   :  { %v1797_v56 = vpop.f32.mrb[21].mxu1  ;;  %v4891_v22 = vmax.f32 %v4780_v14, 0.0  ;;  %v7105_v21 = vpop.f32.mrb[20].mxu0 }
 0x1ef   :  { %v6866_v50 = vpop.f32.mrb[22].mxu1  ;;  %v6194_v25 = vpack.c.bf16 %v4893_v24, %v4892_v18  ;;  %v7215_v4 = vadd.f32 %v7105_v21, %v6865_v2  ;;  %v4279_v26 = vpop.f32.mrb[21].mxu0 }
 0x1f0   :  { %v1800_v59 = vpop.f32.mrb[23].mxu1  ;;  %v6189_v28 = vpack.c.bf16 %v4891_v22, %v4890_v20  ;;  %v7216_v38 = vadd.f32 %v4279_v26, %v1797_v56  ;;  %v7106_v32 = vpop.f32.mrb[22].mxu0 }
 0x1f1   :  { %6429 = vst [vmem:[%s9250_s3 + $0x48] sm:$0xff] %v6194_v25   ;;  %v4785_v33 = vadd.f32 %v7215_v4, %v8953_v13  ;;  %v7217_v36 = vadd.f32 %v7106_v32, %v6866_v50  ;;  %v4282_v40 = vpop.f32.mrb[23].mxu0 }
 0x1f2   :  { %6428 = vst [vmem:[%s9250_s3 + $0x40] sm:$0xff] %v6189_v28   ;;  %v4783_v41 = vadd.f32 %v7216_v38, %v8953_v13  ;;  %v7218_v42 = vadd.f32 %v4282_v40, %v1800_v59 }
 0x1f3   :  { %v4786_v37 = vadd.f32 %v7217_v36, %v8953_v13  ;;  %v4896_v54 = vmax.f32 %v4785_v33, 0.0 }
 0x1f4   :  { %v4784_v51 = vadd.f32 %v7218_v42, %v8953_v13  ;;  %v4894_v58 = vmax.f32 %v4783_v41, 0.0 }
 0x1f5   :  { %v6869_v27 = vpop.f32.mrb[24].mxu1  ;;  %v4897_v55 = vmax.f32 %v4786_v37, 0.0 }
 0x1f6   :  { %v1813_v43 = vpop.f32.mrb[25].mxu1  ;;  %v4895_v62 = vmax.f32 %v4784_v51, 0.0  ;;  %v7109_v63 = vpop.f32.mrb[24].mxu0 }
 0x1f7   :  { %v6870_v53 = vpop.f32.mrb[26].mxu1  ;;  %v6204_v0 = vpack.c.bf16 %v4897_v55, %v4896_v54  ;;  %v7219_v48 = vadd.f32 %v7109_v63, %v6869_v27  ;;  %v4295_v57 = vpop.f32.mrb[25].mxu0 }
 0x1f8   :  { %v1816_v31 = vpop.f32.mrb[27].mxu1  ;;  %v6199_v1 = vpack.c.bf16 %v4895_v62, %v4894_v58  ;;  %v7220_v45 = vadd.f32 %v4295_v57, %v1813_v43  ;;  %v7110_v5 = vpop.f32.mrb[26].mxu0 }
 0x1f9   :  { %6431 = vst [vmem:[%s9250_s3 + $0x58] sm:$0xff] %v6204_v0   ;;  %v4789_v8 = vadd.f32 %v7219_v48, %v8953_v13  ;;  %v7221_v52 = vadd.f32 %v7110_v5, %v6870_v53  ;;  %v4298_v7 = vpop.f32.mrb[27].mxu0 }
 0x1fa   :  { %6430 = vst [vmem:[%s9250_s3 + $0x50] sm:$0xff] %v6199_v1   ;;  %v4787_v15 = vadd.f32 %v7220_v45, %v8953_v13  ;;  %v7222_v39 = vadd.f32 %v4298_v7, %v1816_v31 }
 0x1fb   :  { %v4790_v34 = vadd.f32 %v7221_v52, %v8953_v13  ;;  %v4900_v3 = vmax.f32 %v4789_v8, 0.0 }
 0x1fc   :  { %v4788_v6 = vadd.f32 %v7222_v39, %v8953_v13  ;;  %v4898_v16 = vmax.f32 %v4787_v15, 0.0 }
 0x1fd   :  { %v6873_v11 = vpop.f32.mrb[28].mxu1  ;;  %v4901_v9 = vmax.f32 %v4790_v34, 0.0 }
 0x1fe   :  { %v1829_v47 = vpop.f32.mrb[29].mxu1  ;;  %v4899_v29 = vmax.f32 %v4788_v6, 0.0  ;;  %v7113_v49 = vpop.f32.mrb[28].mxu0 }
 0x1ff   :  { %v6874_v46 = vpop.f32.mrb[30].mxu1  ;;  %v6214_v10 = vpack.c.bf16 %v4901_v9, %v4900_v3  ;;  %v7223_v44 = vadd.f32 %v7113_v49, %v6873_v11  ;;  %v4311_v2 = vpop.f32.mrb[29].mxu0 }
 0x200   :  { %v1832_v35 = vpop.f32.mrb[31].mxu1  ;;  %v6209_v17 = vpack.c.bf16 %v4899_v29, %v4898_v16  ;;  %v7224_v56 = vadd.f32 %v4311_v2, %v1829_v47  ;;  %v7114_v14 = vpop.f32.mrb[30].mxu0 }
 0x201   :  { %6433 = vst [vmem:[%s9250_s3 + $0x68] sm:$0xff] %v6214_v10   ;;  %v4793_v50 = vadd.f32 %v7223_v44, %v8953_v13  ;;  %v7225_v18 = vadd.f32 %v7114_v14, %v6874_v46  ;;  %v4314_v24 = vpop.f32.mrb[31].mxu0 }
 0x202   :  { %6432 = vst [vmem:[%s9250_s3 + $0x60] sm:$0xff] %v6209_v17   ;;  %v4791_v59 = vadd.f32 %v7224_v56, %v8953_v13  ;;  %v7226_v20 = vadd.f32 %v4314_v24, %v1832_v35 }
 0x203   :  { %v4794_v21 = vadd.f32 %v7225_v18, %v8953_v13  ;;  %v4904_v28 = vmax.f32 %v4793_v50, 0.0 }
 0x204   :  { %v4792_v4 = vadd.f32 %v7226_v20, %v8953_v13  ;;  %v4902_v33 = vmax.f32 %v4791_v59, 0.0 }
 0x205   :  { %v6877_v22 = vpop.f32.mrb[32].mxu1  ;;  %v4905_v38 = vmax.f32 %v4794_v21, 0.0 }
 0x206   :  { %v1845_v25 = vpop.f32.mrb[33].mxu1  ;;  %v4903_v36 = vmax.f32 %v4792_v4, 0.0  ;;  %v7117_v40 = vpop.f32.mrb[32].mxu0 }
 0x207   :  { %v6878_v26 = vpop.f32.mrb[34].mxu1  ;;  %v6224_v41 = vpack.c.bf16 %v4905_v38, %v4904_v28  ;;  %v7227_v42 = vadd.f32 %v7117_v40, %v6877_v22  ;;  %v4327_v27 = vpop.f32.mrb[33].mxu0 }
 0x208   :  { %v1848_v32 = vpop.f32.mrb[35].mxu1  ;;  %v6219_v37 = vpack.c.bf16 %v4903_v36, %v4902_v33  ;;  %v7228_v43 = vadd.f32 %v4327_v27, %v1845_v25  ;;  %v7118_v51 = vpop.f32.mrb[34].mxu0 }
 0x209   :  { %6435 = vst [vmem:[%s9250_s3 + $0x78] sm:$0xff] %v6224_v41   ;;  %v4797_v53 = vadd.f32 %v7227_v42, %v8953_v13  ;;  %v7229_v54 = vadd.f32 %v7118_v51, %v6878_v26  ;;  %v4330_v55 = vpop.f32.mrb[35].mxu0 }
 0x20a   :  { %6434 = vst [vmem:[%s9250_s3 + $0x70] sm:$0xff] %v6219_v37   ;;  %v4795_v31 = vadd.f32 %v7228_v43, %v8953_v13  ;;  %v7230_v58 = vadd.f32 %v4330_v55, %v1848_v32 }
 0x20b   :  { %v4798_v63 = vadd.f32 %v7229_v54, %v8953_v13  ;;  %v4908_v1 = vmax.f32 %v4797_v53, 0.0 }
 0x20c   :  { %v4796_v48 = vadd.f32 %v7230_v58, %v8953_v13  ;;  %v4906_v8 = vmax.f32 %v4795_v31, 0.0 }
 0x20d   :  { %v6881_v62 = vpop.f32.mrb[36].mxu1  ;;  %v4909_v45 = vmax.f32 %v4798_v63, 0.0 }
 0x20e   :  { %v1861_v0 = vpop.f32.mrb[37].mxu1  ;;  %v4907_v52 = vmax.f32 %v4796_v48, 0.0  ;;  %v7121_v7 = vpop.f32.mrb[36].mxu0 }
 0x20f   :  { %v6882_v57 = vpop.f32.mrb[38].mxu1  ;;  %v6234_v15 = vpack.c.bf16 %v4909_v45, %v4908_v1  ;;  %v7231_v39 = vadd.f32 %v7121_v7, %v6881_v62  ;;  %v4343_v11 = vpop.f32.mrb[37].mxu0 }
 0x210   :  { %v1864_v5 = vpop.f32.mrb[39].mxu1  ;;  %v6229_v34 = vpack.c.bf16 %v4907_v52, %v4906_v8  ;;  %v7232_v47 = vadd.f32 %v4343_v11, %v1861_v0  ;;  %v7122_v6 = vpop.f32.mrb[38].mxu0 }
 0x211   :  { %6437 = vst [vmem:[%s9250_s3 + $0x88] sm:$0xff] %v6234_v15   ;;  %v4801_v46 = vadd.f32 %v7231_v39, %v8953_v13  ;;  %v7233_v3 = vadd.f32 %v7122_v6, %v6882_v57  ;;  %v4346_v9 = vpop.f32.mrb[39].mxu0 }
 0x212   :  { %6436 = vst [vmem:[%s9250_s3 + $0x80] sm:$0xff] %v6229_v34   ;;  %v4799_v35 = vadd.f32 %v7232_v47, %v8953_v13  ;;  %v7234_v16 = vadd.f32 %v4346_v9, %v1864_v5 }
 0x213   :  { %v4802_v49 = vadd.f32 %v7233_v3, %v8953_v13  ;;  %v4912_v17 = vmax.f32 %v4801_v46, 0.0 }
 0x214   :  { %v4800_v44 = vadd.f32 %v7234_v16, %v8953_v13  ;;  %v4910_v50 = vmax.f32 %v4799_v35, 0.0 }
 0x215   :  { %v6885_v29 = vpop.f32.mrb[40].mxu1  ;;  %v4913_v56 = vmax.f32 %v4802_v49, 0.0 }
 0x216   :  { %v1877_v10 = vpop.f32.mrb[41].mxu1  ;;  %v4911_v18 = vmax.f32 %v4800_v44, 0.0  ;;  %v7125_v24 = vpop.f32.mrb[40].mxu0 }
 0x217   :  { %v6886_v2 = vpop.f32.mrb[42].mxu1  ;;  %v6244_v59 = vpack.c.bf16 %v4913_v56, %v4912_v17  ;;  %v7235_v20 = vadd.f32 %v7125_v24, %v6885_v29  ;;  %v4359_v22 = vpop.f32.mrb[41].mxu0 }
 0x218   :  { %v1880_v14 = vpop.f32.mrb[43].mxu1  ;;  %v6239_v21 = vpack.c.bf16 %v4911_v18, %v4910_v50  ;;  %v7236_v25 = vadd.f32 %v4359_v22, %v1877_v10  ;;  %v7126_v4 = vpop.f32.mrb[42].mxu0 }
 0x219   :  { %6439 = vst [vmem:[%s9250_s3 + $0x98] sm:$0xff] %v6244_v59   ;;  %v4805_v26 = vadd.f32 %v7235_v20, %v8953_v13  ;;  %v7237_v28 = vadd.f32 %v7126_v4, %v6886_v2  ;;  %v4362_v38 = vpop.f32.mrb[43].mxu0 }
 0x21a   :  { %6438 = vst [vmem:[%s9250_s3 + $0x90] sm:$0xff] %v6239_v21   ;;  %v4803_v32 = vadd.f32 %v7236_v25, %v8953_v13  ;;  %v7238_v33 = vadd.f32 %v4362_v38, %v1880_v14 }
 0x21b   :  { %v4806_v40 = vadd.f32 %v7237_v28, %v8953_v13  ;;  %v4916_v37 = vmax.f32 %v4805_v26, 0.0 }
 0x21c   :  { %v4804_v42 = vadd.f32 %v7238_v33, %v8953_v13  ;;  %v4914_v53 = vmax.f32 %v4803_v32, 0.0 }
 0x21d   :  { %v6889_v36 = vpop.f32.mrb[44].mxu1  ;;  %v4917_v43 = vmax.f32 %v4806_v40, 0.0 }
 0x21e   :  { %v1893_v41 = vpop.f32.mrb[45].mxu1  ;;  %v4915_v54 = vmax.f32 %v4804_v42, 0.0  ;;  %v7129_v55 = vpop.f32.mrb[44].mxu0 }
 0x21f   :  { %v6890_v27 = vpop.f32.mrb[46].mxu1  ;;  %v6254_v31 = vpack.c.bf16 %v4917_v43, %v4916_v37  ;;  %v7239_v58 = vadd.f32 %v7129_v55, %v6889_v36  ;;  %v4375_v62 = vpop.f32.mrb[45].mxu0 }
 0x220   :  { %v1896_v51 = vpop.f32.mrb[47].mxu1  ;;  %v6249_v63 = vpack.c.bf16 %v4915_v54, %v4914_v53  ;;  %v7240_v0 = vadd.f32 %v4375_v62, %v1893_v41  ;;  %v7130_v48 = vpop.f32.mrb[46].mxu0 }
 0x221   :  { %6441 = vst [vmem:[%s9250_s3 + $0xa8] sm:$0xff] %v6254_v31   ;;  %v4809_v57 = vadd.f32 %v7239_v58, %v8953_v13  ;;  %v7241_v1 = vadd.f32 %v7130_v48, %v6890_v27  ;;  %v4378_v45 = vpop.f32.mrb[47].mxu0 }
 0x222   :  { %6440 = vst [vmem:[%s9250_s3 + $0xa0] sm:$0xff] %v6249_v63   ;;  %v4807_v5 = vadd.f32 %v7240_v0, %v8953_v13  ;;  %v7242_v8 = vadd.f32 %v4378_v45, %v1896_v51 }
 0x223   :  { %v4810_v7 = vadd.f32 %v7241_v1, %v8953_v13  ;;  %v4920_v34 = vmax.f32 %v4809_v57, 0.0 }
 0x224   :  { %v4808_v39 = vadd.f32 %v7242_v8, %v8953_v13  ;;  %v4918_v46 = vmax.f32 %v4807_v5, 0.0 }
 0x225   :  { %v6893_v52 = vpop.f32.mrb[48].mxu1  ;;  %v4921_v47 = vmax.f32 %v4810_v7, 0.0 }
 0x226   :  { %v1909_v15 = vpop.f32.mrb[49].mxu1  ;;  %v4919_v3 = vmax.f32 %v4808_v39, 0.0  ;;  %v7133_v9 = vpop.f32.mrb[48].mxu0 }
 0x227   :  { %v6894_v11 = vpop.f32.mrb[50].mxu1  ;;  %v6264_v35 = vpack.c.bf16 %v4921_v47, %v4920_v34  ;;  %v7243_v16 = vadd.f32 %v7133_v9, %v6893_v52  ;;  %v4391_v29 = vpop.f32.mrb[49].mxu0 }
 0x228   :  { %v1912_v6 = vpop.f32.mrb[51].mxu1  ;;  %v6259_v49 = vpack.c.bf16 %v4919_v3, %v4918_v46  ;;  %v7244_v10 = vadd.f32 %v4391_v29, %v1909_v15  ;;  %v7134_v44 = vpop.f32.mrb[50].mxu0 }
 0x229   :  { %6443 = vst [vmem:[%s9250_s3 + $0xb8] sm:$0xff] %v6264_v35   ;;  %v4813_v2 = vadd.f32 %v7243_v16, %v8953_v13  ;;  %v7245_v17 = vadd.f32 %v7134_v44, %v6894_v11  ;;  %v4394_v56 = vpop.f32.mrb[51].mxu0 }
 0x22a   :  { %6442 = vst [vmem:[%s9250_s3 + $0xb0] sm:$0xff] %v6259_v49   ;;  %v4811_v14 = vadd.f32 %v7244_v10, %v8953_v13  ;;  %v7246_v50 = vadd.f32 %v4394_v56, %v1912_v6 }
 0x22b   :  { %v4814_v24 = vadd.f32 %v7245_v17, %v8953_v13  ;;  %v4924_v21 = vmax.f32 %v4813_v2, 0.0 }
 0x22c   :  { %v4812_v20 = vadd.f32 %v7246_v50, %v8953_v13  ;;  %v4922_v26 = vmax.f32 %v4811_v14, 0.0 }
 0x22d   :  { %v6897_v18 = vpop.f32.mrb[52].mxu1  ;;  %v4925_v25 = vmax.f32 %v4814_v24, 0.0 }
 0x22e   :  { %v1925_v59 = vpop.f32.mrb[53].mxu1  ;;  %v4923_v28 = vmax.f32 %v4812_v20, 0.0  ;;  %v7137_v38 = vpop.f32.mrb[52].mxu0 }
 0x22f   :  { %v6898_v22 = vpop.f32.mrb[54].mxu1  ;;  %v6274_v32 = vpack.c.bf16 %v4925_v25, %v4924_v21  ;;  %v7247_v33 = vadd.f32 %v7137_v38, %v6897_v18  ;;  %v4407_v36 = vpop.f32.mrb[53].mxu0 }
 0x230   :  { %v1928_v4 = vpop.f32.mrb[55].mxu1  ;;  %v6269_v40 = vpack.c.bf16 %v4923_v28, %v4922_v26  ;;  %v7248_v41 = vadd.f32 %v4407_v36, %v1925_v59  ;;  %v7138_v42 = vpop.f32.mrb[54].mxu0 }
 0x231   :  { %6445 = vst [vmem:[%s9250_s3 + $0xc8] sm:$0xff] %v6274_v32   ;;  %v4817_v27 = vadd.f32 %v7247_v33, %v8953_v13  ;;  %v7249_v37 = vadd.f32 %v7138_v42, %v6898_v22  ;;  %v4410_v43 = vpop.f32.mrb[55].mxu0 }
 0x232   :  { %6444 = vst [vmem:[%s9250_s3 + $0xc0] sm:$0xff] %v6269_v40   ;;  %v4815_v51 = vadd.f32 %v7248_v41, %v8953_v13  ;;  %v7250_v53 = vadd.f32 %v4410_v43, %v1928_v4 }
 0x233   :  { %v4818_v55 = vadd.f32 %v7249_v37, %v8953_v13  ;;  %v4928_v63 = vmax.f32 %v4817_v27, 0.0 }
 0x234   :  { %v4816_v58 = vadd.f32 %v7250_v53, %v8953_v13  ;;  %v4926_v57 = vmax.f32 %v4815_v51, 0.0 }
 0x235   :  { %v6901_v54 = vpop.f32.mrb[56].mxu1  ;;  %v4929_v0 = vmax.f32 %v4818_v55, 0.0 }
 0x236   :  { %v1941_v31 = vpop.f32.mrb[57].mxu1  ;;  %v4927_v1 = vmax.f32 %v4816_v58, 0.0  ;;  %v7141_v45 = vpop.f32.mrb[56].mxu0 }
 0x237   :  { %v6902_v62 = vpop.f32.mrb[58].mxu1  ;;  %v6284_v5 = vpack.c.bf16 %v4929_v0, %v4928_v63  ;;  %v7251_v8 = vadd.f32 %v7141_v45, %v6901_v54  ;;  %v4423_v52 = vpop.f32.mrb[57].mxu0 }
 0x238   :  { %v1944_v48 = vpop.f32.mrb[59].mxu1  ;;  %v6279_v7 = vpack.c.bf16 %v4927_v1, %v4926_v57  ;;  %v7252_v15 = vadd.f32 %v4423_v52, %v1941_v31  ;;  %v7142_v39 = vpop.f32.mrb[58].mxu0 }
 0x239   :  { %6447 = vst [vmem:[%s9250_s3 + $0xd8] sm:$0xff] %v6284_v5   ;;  %v4821_v11 = vadd.f32 %v7251_v8, %v8953_v13  ;;  %v7253_v34 = vadd.f32 %v7142_v39, %v6902_v62  ;;  %v4426_v47 = vpop.f32.mrb[59].mxu0 }
 0x23a   :  { %6446 = vst [vmem:[%s9250_s3 + $0xd0] sm:$0xff] %v6279_v7   ;;  %v4819_v6 = vadd.f32 %v7252_v15, %v8953_v13  ;;  %v7254_v46 = vadd.f32 %v4426_v47, %v1944_v48 }
 0x23b   :  { %v4822_v9 = vadd.f32 %v7253_v34, %v8953_v13  ;;  %v4932_v49 = vmax.f32 %v4821_v11, 0.0 }
 0x23c   :  { %v4820_v16 = vadd.f32 %v7254_v46, %v8953_v13  ;;  %v4930_v2 = vmax.f32 %v4819_v6, 0.0 }
 0x23d   :  { %v6905_v3 = vpop.f32.mrb[60].mxu1  ;;  %v4933_v10 = vmax.f32 %v4822_v9, 0.0 }
 0x23e   :  { %v1957_v35 = vpop.f32.mrb[61].mxu1  ;;  %v4931_v17 = vmax.f32 %v4820_v16, 0.0  ;;  %v7145_v56 = vpop.f32.mrb[60].mxu0 }
 0x23f   :  { %v6906_v29 = vpop.f32.mrb[62].mxu1  ;;  %v6294_v14 = vpack.c.bf16 %v4933_v10, %v4932_v49  ;;  %v7255_v50 = vadd.f32 %v7145_v56, %v6905_v3  ;;  %v4439_v18 = vpop.f32.mrb[61].mxu0 }
 0x240   :  { %v1960_v44 = vpop.f32.mrb[63].mxu1  ;;  %v6289_v24 = vpack.c.bf16 %v4931_v17, %v4930_v2  ;;  %v7256_v59 = vadd.f32 %v4439_v18, %v1957_v35  ;;  %v7146_v20 = vpop.f32.mrb[62].mxu0 }
 0x241   :  { %6449 = vst [vmem:[%s9250_s3 + $0xe8] sm:$0xff] %v6294_v14   ;;  %v4825_v22 = vadd.f32 %v7255_v50, %v8953_v13  ;;  %v7257_v21 = vadd.f32 %v7146_v20, %v6906_v29  ;;  %v4442_v25 = vpop.f32.mrb[63].mxu0 }
 0x242   :  { %6448 = vst [vmem:[%s9250_s3 + $0xe0] sm:$0xff] %v6289_v24   ;;  %v4823_v4 = vadd.f32 %v7256_v59, %v8953_v13  ;;  %v7258_v26 = vadd.f32 %v4442_v25, %v1960_v44 }
 0x243   :  { %v4826_v38 = vadd.f32 %v7257_v21, %v8953_v13  ;;  %v4936_v40 = vmax.f32 %v4825_v22, 0.0 }
 0x244   :  { %v4824_v33 = vadd.f32 %v7258_v26, %v8953_v13  ;;  %v4934_v27 = vmax.f32 %v4823_v4, 0.0 }
 0x245   :  { %v6909_v28 = vpop.f32.mrb[64].mxu1  ;;  %v4937_v41 = vmax.f32 %v4826_v38, 0.0 }
 0x246   :  { %v1973_v32 = vpop.f32.mrb[65].mxu1  ;;  %v4935_v37 = vmax.f32 %v4824_v33, 0.0  ;;  %v7149_v43 = vpop.f32.mrb[64].mxu0 }
 0x247   :  { %v6910_v36 = vpop.f32.mrb[66].mxu1  ;;  %v6304_v51 = vpack.c.bf16 %v4937_v41, %v4936_v40  ;;  %v7259_v53 = vadd.f32 %v7149_v43, %v6909_v28  ;;  %v4455_v54 = vpop.f32.mrb[65].mxu0 }
 0x248   :  { %v1976_v42 = vpop.f32.mrb[67].mxu1  ;;  %v6299_v55 = vpack.c.bf16 %v4935_v37, %v4934_v27  ;;  %v7260_v31 = vadd.f32 %v4455_v54, %v1973_v32  ;;  %v7150_v58 = vpop.f32.mrb[66].mxu0 }
 0x249   :  { %6451 = vst [vmem:[%s9250_s3 + $0xf8] sm:$0xff] %v6304_v51   ;;  %v4829_v62 = vadd.f32 %v7259_v53, %v8953_v13  ;;  %v7261_v63 = vadd.f32 %v7150_v58, %v6910_v36  ;;  %v4458_v0 = vpop.f32.mrb[67].mxu0 }
 0x24a   :  { %6450 = vst [vmem:[%s9250_s3 + $0xf0] sm:$0xff] %v6299_v55   ;;  %v4827_v48 = vadd.f32 %v7260_v31, %v8953_v13  ;;  %v7262_v57 = vadd.f32 %v4458_v0, %v1976_v42 }
 0x24b   :  { %v4830_v45 = vadd.f32 %v7261_v63, %v8953_v13  ;;  %v4940_v7 = vmax.f32 %v4829_v62, 0.0 }
 0x24c   :  { %v4828_v8 = vadd.f32 %v7262_v57, %v8953_v13  ;;  %v4938_v11 = vmax.f32 %v4827_v48, 0.0 }
 0x24d   :  { %v6913_v1 = vpop.f32.mrb[68].mxu1  ;;  %v4941_v15 = vmax.f32 %v4830_v45, 0.0 }
 0x24e   :  { %v1989_v5 = vpop.f32.mrb[69].mxu1  ;;  %v4939_v34 = vmax.f32 %v4828_v8, 0.0  ;;  %v7153_v47 = vpop.f32.mrb[68].mxu0 }
 0x24f   :  { %v6914_v52 = vpop.f32.mrb[70].mxu1  ;;  %v6314_v6 = vpack.c.bf16 %v4941_v15, %v4940_v7  ;;  %v7263_v46 = vadd.f32 %v7153_v47, %v6913_v1  ;;  %v4471_v3 = vpop.f32.mrb[69].mxu0 }
 0x250   :  { %v1992_v39 = vpop.f32.mrb[71].mxu1  ;;  %v6309_v9 = vpack.c.bf16 %v4939_v34, %v4938_v11  ;;  %v7264_v35 = vadd.f32 %v4471_v3, %v1989_v5  ;;  %v7154_v16 = vpop.f32.mrb[70].mxu0 }
 0x251   :  { %6453 = vst [vmem:[%s9250_s3 + $0x108] sm:$0xff] %v6314_v6   ;;  %v4833_v29 = vadd.f32 %v7263_v46, %v8953_v13  ;;  %v7265_v49 = vadd.f32 %v7154_v16, %v6914_v52  ;;  %v4474_v10 = vpop.f32.mrb[71].mxu0 }
 0x252   :  { %6452 = vst [vmem:[%s9250_s3 + $0x100] sm:$0xff] %v6309_v9   ;;  %v4831_v44 = vadd.f32 %v7264_v35, %v8953_v13  ;;  %v7266_v2 = vadd.f32 %v4474_v10, %v1992_v39 }
 0x253   :  { %v4834_v56 = vadd.f32 %v7265_v49, %v8953_v13  ;;  %v4944_v24 = vmax.f32 %v4833_v29, 0.0 }
 0x254   :  { %v4832_v50 = vadd.f32 %v7266_v2, %v8953_v13  ;;  %v4942_v22 = vmax.f32 %v4831_v44, 0.0 }
 0x255   :  { %v6917_v17 = vpop.f32.mrb[72].mxu1  ;;  %v4945_v59 = vmax.f32 %v4834_v56, 0.0 }
 0x256   :  { %v2005_v14 = vpop.f32.mrb[73].mxu1  ;;  %v4943_v21 = vmax.f32 %v4832_v50, 0.0  ;;  %v7157_v25 = vpop.f32.mrb[72].mxu0 }
 0x257   :  { %v6918_v18 = vpop.f32.mrb[74].mxu1  ;;  %v6324_v4 = vpack.c.bf16 %v4945_v59, %v4944_v24  ;;  %v7267_v26 = vadd.f32 %v7157_v25, %v6917_v17  ;;  %v4487_v28 = vpop.f32.mrb[73].mxu0 }
 0x258   :  { %v2008_v20 = vpop.f32.mrb[75].mxu1  ;;  %v6319_v38 = vpack.c.bf16 %v4943_v21, %v4942_v22  ;;  %v7268_v32 = vadd.f32 %v4487_v28, %v2005_v14  ;;  %v7158_v33 = vpop.f32.mrb[74].mxu0 }
 0x259   :  { %6455 = vst [vmem:[%s9250_s3 + $0x118] sm:$0xff] %v6324_v4   ;;  %v4837_v36 = vadd.f32 %v7267_v26, %v8953_v13  ;;  %v7269_v40 = vadd.f32 %v7158_v33, %v6918_v18  ;;  %v4490_v41 = vpop.f32.mrb[75].mxu0 }
 0x25a   :  { %6454 = vst [vmem:[%s9250_s3 + $0x110] sm:$0xff] %v6319_v38   ;;  %v4835_v42 = vadd.f32 %v7268_v32, %v8953_v13  ;;  %v7270_v27 = vadd.f32 %v4490_v41, %v2008_v20 }
 0x25b   :  { %v4838_v43 = vadd.f32 %v7269_v40, %v8953_v13  ;;  %v4948_v55 = vmax.f32 %v4837_v36, 0.0 }
 0x25c   :  { %v4836_v53 = vadd.f32 %v7270_v27, %v8953_v13  ;;  %v4946_v62 = vmax.f32 %v4835_v42, 0.0 }
 0x25d   :  { %v6921_v37 = vpop.f32.mrb[76].mxu1  ;;  %v4949_v31 = vmax.f32 %v4838_v43, 0.0 }
 0x25e   :  { %v2021_v51 = vpop.f32.mrb[77].mxu1  ;;  %v4947_v63 = vmax.f32 %v4836_v53, 0.0  ;;  %v7161_v0 = vpop.f32.mrb[76].mxu0 }
 0x25f   :  { %v6922_v54 = vpop.f32.mrb[78].mxu1  ;;  %v6334_v48 = vpack.c.bf16 %v4949_v31, %v4948_v55  ;;  %v7271_v57 = vadd.f32 %v7161_v0, %v6921_v37  ;;  %v4503_v1 = vpop.f32.mrb[77].mxu0 }
 0x260   :  { %v2024_v58 = vpop.f32.mrb[79].mxu1  ;;  %v6329_v45 = vpack.c.bf16 %v4947_v63, %v4946_v62  ;;  %v7272_v5 = vadd.f32 %v4503_v1, %v2021_v51  ;;  %v7162_v8 = vpop.f32.mrb[78].mxu0 }
 0x261   :  { %6457 = vst [vmem:[%s9250_s3 + $0x128] sm:$0xff] %v6334_v48   ;;  %v4841_v52 = vadd.f32 %v7271_v57, %v8953_v13  ;;  %v7273_v7 = vadd.f32 %v7162_v8, %v6922_v54  ;;  %v4506_v15 = vpop.f32.mrb[79].mxu0 }
 0x262   :  { %6456 = vst [vmem:[%s9250_s3 + $0x120] sm:$0xff] %v6329_v45   ;;  %v4839_v39 = vadd.f32 %v7272_v5, %v8953_v13  ;;  %v7274_v11 = vadd.f32 %v4506_v15, %v2024_v58  ;;  %v9171_v58 = vld [vmem:[%s9249_s2] ss:$0 sm:$0xff] }
 0x263   :  { %v4842_v47 = vadd.f32 %v7273_v7, %v8953_v13  ;;  %v4952_v9 = vmax.f32 %v4841_v52, 0.0 }
 0x264   :  { %v4840_v46 = vadd.f32 %v7274_v11, %v8953_v13  ;;  %v4950_v29 = vmax.f32 %v4839_v39, 0.0 }
 0x265   :  { %v6925_v34 = vpop.f32.mrb[80].mxu1  ;;  %v4953_v35 = vmax.f32 %v4842_v47, 0.0 }
 0x266   :  { %v2037_v6 = vpop.f32.mrb[81].mxu1  ;;  %v4951_v49 = vmax.f32 %v4840_v46, 0.0  ;;  %v7165_v10 = vpop.f32.mrb[80].mxu0 }
 0x267   :  { %v6926_v3 = vpop.f32.mrb[82].mxu1  ;;  %v6344_v44 = vpack.c.bf16 %v4953_v35, %v4952_v9  ;;  %v7275_v2 = vadd.f32 %v7165_v10, %v6925_v34  ;;  %v4519_v17 = vpop.f32.mrb[81].mxu0 }
 0x268   :  { %v2040_v16 = vpop.f32.mrb[83].mxu1  ;;  %v6339_v56 = vpack.c.bf16 %v4951_v49, %v4950_v29  ;;  %v7276_v14 = vadd.f32 %v4519_v17, %v2037_v6  ;;  %v7166_v50 = vpop.f32.mrb[82].mxu0 }
 0x269   :  { %6459 = vst [vmem:[%s9250_s3 + $0x138] sm:$0xff] %v6344_v44   ;;  %v4845_v18 = vadd.f32 %v7275_v2, %v8953_v13  ;;  %v7277_v24 = vadd.f32 %v7166_v50, %v6926_v3  ;;  %v4522_v59 = vpop.f32.mrb[83].mxu0 }
 0x26a   :  { %6458 = vst [vmem:[%s9250_s3 + $0x130] sm:$0xff] %v6339_v56   ;;  %v4843_v20 = vadd.f32 %v7276_v14, %v8953_v13  ;;  %v7278_v22 = vadd.f32 %v4522_v59, %v2040_v16 }
 0x26b   :  { %v4846_v25 = vadd.f32 %v7277_v24, %v8953_v13  ;;  %v4956_v38 = vmax.f32 %v4845_v18, 0.0 }
 0x26c   :  { %v4844_v26 = vadd.f32 %v7278_v22, %v8953_v13  ;;  %v4954_v36 = vmax.f32 %v4843_v20, 0.0 }
 0x26d   :  { %v6929_v21 = vpop.f32.mrb[84].mxu1  ;;  %v4957_v32 = vmax.f32 %v4846_v25, 0.0 }
 0x26e   :  { %v2053_v4 = vpop.f32.mrb[85].mxu1  ;;  %v4955_v40 = vmax.f32 %v4844_v26, 0.0  ;;  %v7169_v41 = vpop.f32.mrb[84].mxu0 }
 0x26f   :  { %v6930_v28 = vpop.f32.mrb[86].mxu1  ;;  %v6354_v42 = vpack.c.bf16 %v4957_v32, %v4956_v38  ;;  %v7279_v27 = vadd.f32 %v7169_v41, %v6929_v21  ;;  %v4535_v37 = vpop.f32.mrb[85].mxu0 }
 0x270   :  { %v2056_v33 = vpop.f32.mrb[87].mxu1  ;;  %v6349_v43 = vpack.c.bf16 %v4955_v40, %v4954_v36  ;;  %v7280_v51 = vadd.f32 %v4535_v37, %v2053_v4  ;;  %v7170_v53 = vpop.f32.mrb[86].mxu0 }
 0x271   :  { %6461 = vst [vmem:[%s9250_s3 + $0x148] sm:$0xff] %v6354_v42   ;;  %v4849_v54 = vadd.f32 %v7279_v27, %v8953_v13  ;;  %v7281_v55 = vadd.f32 %v7170_v53, %v6930_v28  ;;  %v4538_v31 = vpop.f32.mrb[87].mxu0 }
 0x272   :  { %6460 = vst [vmem:[%s9250_s3 + $0x140] sm:$0xff] %v6349_v43   ;;  %v4847_v62 = vadd.f32 %v9171_v58, %v7280_v51  ;;  %v7282_v63 = vadd.f32 %v4538_v31, %v2056_v33 }
 0x273   :  { %v4850_v48 = vadd.f32 %v9171_v58, %v7281_v55  ;;  %v4960_v45 = vmax.f32 %v4849_v54, 0.0 }
 0x274   :  { %v4848_v13 = vadd.f32 %v9171_v58, %v7282_v63  ;;  %v4958_v52 = vmax.f32 %v4847_v62, 0.0 }
 0x275   :  { %v6933_v0 = vpop.f32.mrb[88].mxu1  ;;  %v4961_v5 = vmax.f32 %v4850_v48, 0.0 }
 0x276   :  { %v2069_v57 = vpop.f32.mrb[89].mxu1  ;;  %v4959_v7 = vmax.f32 %v4848_v13, 0.0  ;;  %v7173_v15 = vpop.f32.mrb[88].mxu0 }
 0x277   :  { %v6934_v1 = vpop.f32.mrb[90].mxu1  ;;  %v6364_v39 = vpack.c.bf16 %v4961_v5, %v4960_v45  ;;  %v7283_v11 = vadd.f32 %v7173_v15, %v6933_v0  ;;  %v4551_v34 = vpop.f32.mrb[89].mxu0 }
 0x278   :  { %v2072_v8 = vpop.f32.mrb[91].mxu1  ;;  %v6359_v47 = vpack.c.bf16 %v4959_v7, %v4958_v52  ;;  %v7284_v6 = vadd.f32 %v4551_v34, %v2069_v57  ;;  %v7174_v46 = vpop.f32.mrb[90].mxu0 }
 0x279   :  { %6463 = vst [vmem:[%s9250_s3 + $0x158] sm:$0xff] %v6364_v39   ;;  %v4853_v3 = vadd.f32 %v9171_v58, %v7283_v11  ;;  %v7285_v9 = vadd.f32 %v7174_v46, %v6934_v1  ;;  %v4554_v35 = vpop.f32.mrb[91].mxu0 }
 0x27a   :  { %6462 = vst [vmem:[%s9250_s3 + $0x150] sm:$0xff] %v6359_v47   ;;  %v4851_v16 = vadd.f32 %v9171_v58, %v7284_v6  ;;  %v7286_v29 = vadd.f32 %v4554_v35, %v2072_v8 }
 0x27b   :  { %v4854_v10 = vadd.f32 %v9171_v58, %v7285_v9  ;;  %v4964_v56 = vmax.f32 %v4853_v3, 0.0 }
 0x27c   :  { %v4852_v2 = vadd.f32 %v9171_v58, %v7286_v29  ;;  %v4962_v18 = vmax.f32 %v4851_v16, 0.0 }
 0x27d   :  { %v6937_v49 = vpop.f32.mrb[92].mxu1  ;;  %v4965_v14 = vmax.f32 %v4854_v10, 0.0 }
 0x27e   :  { %v2085_v44 = vpop.f32.mrb[93].mxu1  ;;  %v4963_v24 = vmax.f32 %v4852_v2, 0.0  ;;  %v7177_v59 = vpop.f32.mrb[92].mxu0 }
 0x27f   :  { %v6938_v17 = vpop.f32.mrb[94].mxu1  ;;  %v6374_v20 = vpack.c.bf16 %v4965_v14, %v4964_v56  ;;  %v7287_v22 = vadd.f32 %v7177_v59, %v6937_v49  ;;  %v4567_v21 = vpop.f32.mrb[93].mxu0 }
 0x280   :  { %v2088_v50 = vpop.f32.mrb[95].mxu1  ;;  %v6369_v25 = vpack.c.bf16 %v4963_v24, %v4962_v18  ;;  %v7288_v4 = vadd.f32 %v4567_v21, %v2085_v44  ;;  %v7178_v26 = vpop.f32.mrb[94].mxu0 }
 0x281   :  { %6465 = vst [vmem:[%s9250_s3 + $0x168] sm:$0xff] %v6374_v20   ;;  %v4857_v28 = vadd.f32 %v9171_v58, %v7287_v22  ;;  %v7289_v38 = vadd.f32 %v7178_v26, %v6938_v17  ;;  %v4570_v32 = vpop.f32.mrb[95].mxu0 }
 0x282   :  { %6464 = vst [vmem:[%s9250_s3 + $0x160] sm:$0xff] %v6369_v25   ;;  %v4855_v33 = vadd.f32 %v9171_v58, %v7288_v4  ;;  %v7290_v36 = vadd.f32 %v4570_v32, %v2088_v50 }
 0x283   :  { %v4858_v41 = vadd.f32 %v9171_v58, %v7289_v38  ;;  %v4968_v43 = vmax.f32 %v4857_v28, 0.0 }
 0x284   :  { %v4856_v27 = vadd.f32 %v9171_v58, %v7290_v36  ;;  %v4966_v54 = vmax.f32 %v4855_v33, 0.0 }
 0x285   :  { %v6941_v40 = vpop.f32.mrb[96].mxu1  ;;  %v4969_v51 = vmax.f32 %v4858_v41, 0.0 }
 0x286   :  { %v2101_v42 = vpop.f32.mrb[97].mxu1  ;;  %v4967_v55 = vmax.f32 %v4856_v27, 0.0  ;;  %v7181_v31 = vpop.f32.mrb[96].mxu0 }
 0x287   :  { %v6942_v37 = vpop.f32.mrb[98].mxu1  ;;  %v6384_v62 = vpack.c.bf16 %v4969_v51, %v4968_v43  ;;  %v7291_v63 = vadd.f32 %v7181_v31, %v6941_v40  ;;  %v4583_v0 = vpop.f32.mrb[97].mxu0 }
 0x288   :  { %v2104_v53 = vpop.f32.mrb[99].mxu1  ;;  %v6379_v48 = vpack.c.bf16 %v4967_v55, %v4966_v54  ;;  %v7292_v57 = vadd.f32 %v4583_v0, %v2101_v42  ;;  %v7182_v13 = vpop.f32.mrb[98].mxu0 }
 0x289   :  { %6467 = vst [vmem:[%s9250_s3 + $0x178] sm:$0xff] %v6384_v62   ;;  %v4861_v1 = vadd.f32 %v9171_v58, %v7291_v63  ;;  %v7293_v45 = vadd.f32 %v7182_v13, %v6942_v37  ;;  %v4586_v5 = vpop.f32.mrb[99].mxu0 }
 0x28a   :  { %6466 = vst [vmem:[%s9250_s3 + $0x170] sm:$0xff] %v6379_v48   ;;  %v4859_v8 = vadd.f32 %v9171_v58, %v7292_v57  ;;  %v7294_v52 = vadd.f32 %v4586_v5, %v2104_v53 }
 0x28b   :  { %v4862_v15 = vadd.f32 %v9171_v58, %v7293_v45  ;;  %v4972_v47 = vmax.f32 %v4861_v1, 0.0 }
 0x28c   :  { %v4860_v11 = vadd.f32 %v9171_v58, %v7294_v52  ;;  %v4970_v3 = vmax.f32 %v4859_v8, 0.0 }
 0x28d   :  { %v6945_v7 = vpop.f32.mrb[100].mxu1  ;;  %v4973_v6 = vmax.f32 %v4862_v15, 0.0 }
 0x28e   :  { %v2117_v39 = vpop.f32.mrb[101].mxu1  ;;  %v4971_v9 = vmax.f32 %v4860_v11, 0.0  ;;  %v7185_v35 = vpop.f32.mrb[100].mxu0 }
 0x28f   :  { %v6946_v34 = vpop.f32.mrb[102].mxu1  ;;  %v6394_v16 = vpack.c.bf16 %v4973_v6, %v4972_v47  ;;  %v7295_v29 = vadd.f32 %v7185_v35, %v6945_v7  ;;  %v4599_v49 = vpop.f32.mrb[101].mxu0 }
 0x290   :  { %v2120_v46 = vpop.f32.mrb[103].mxu1  ;;  %v6389_v10 = vpack.c.bf16 %v4971_v9, %v4970_v3  ;;  %v7296_v44 = vadd.f32 %v4599_v49, %v2117_v39  ;;  %v7186_v2 = vpop.f32.mrb[102].mxu0 }
 0x291   :  { %6469 = vst [vmem:[%s9250_s3 + $0x188] sm:$0xff] %v6394_v16   ;;  %v4865_v17 = vadd.f32 %v9171_v58, %v7295_v29  ;;  %v7297_v56 = vadd.f32 %v7186_v2, %v6946_v34  ;;  %v4602_v14 = vpop.f32.mrb[103].mxu0 }
 0x292   :  { %6468 = vst [vmem:[%s9250_s3 + $0x180] sm:$0xff] %v6389_v10   ;;  %v4863_v50 = vadd.f32 %v9171_v58, %v7296_v44  ;;  %v7298_v18 = vadd.f32 %v4602_v14, %v2120_v46 }
 0x293   :  { %v4866_v59 = vadd.f32 %v9171_v58, %v7297_v56  ;;  %v4976_v25 = vmax.f32 %v4865_v17, 0.0 }
 0x294   :  { %v4864_v22 = vadd.f32 %v9171_v58, %v7298_v18  ;;  %v4974_v28 = vmax.f32 %v4863_v50, 0.0 }
 0x295   :  { %v6949_v24 = vpop.f32.mrb[104].mxu1  ;;  %v4977_v4 = vmax.f32 %v4866_v59, 0.0 }
 0x296   :  { %v2133_v20 = vpop.f32.mrb[105].mxu1  ;;  %v4975_v38 = vmax.f32 %v4864_v22, 0.0  ;;  %v7189_v32 = vpop.f32.mrb[104].mxu0 }
 0x297   :  { %v6950_v21 = vpop.f32.mrb[106].mxu1  ;;  %v6404_v33 = vpack.c.bf16 %v4977_v4, %v4976_v25  ;;  %v7299_v36 = vadd.f32 %v7189_v32, %v6949_v24  ;;  %v4615_v40 = vpop.f32.mrb[105].mxu0 }
 0x298   :  { %v2136_v26 = vpop.f32.mrb[107].mxu1  ;;  %v6399_v41 = vpack.c.bf16 %v4975_v38, %v4974_v28  ;;  %v7300_v42 = vadd.f32 %v4615_v40, %v2133_v20  ;;  %v7190_v27 = vpop.f32.mrb[106].mxu0 }
 0x299   :  { %6471 = vst [vmem:[%s9250_s3 + $0x198] sm:$0xff] %v6404_v33   ;;  %v4869_v37 = vadd.f32 %v9171_v58, %v7299_v36  ;;  %v7301_v43 = vadd.f32 %v7190_v27, %v6950_v21  ;;  %v4618_v51 = vpop.f32.mrb[107].mxu0 }
 0x29a   :  { %6470 = vst [vmem:[%s9250_s3 + $0x190] sm:$0xff] %v6399_v41   ;;  %v4867_v53 = vadd.f32 %v9171_v58, %v7300_v42  ;;  %v7302_v54 = vadd.f32 %v4618_v51, %v2136_v26 }
 0x29b   :  { %v4870_v31 = vadd.f32 %v9171_v58, %v7301_v43  ;;  %v4980_v13 = vmax.f32 %v4869_v37, 0.0 }
 0x29c   :  { %v4868_v0 = vadd.f32 %v9171_v58, %v7302_v54  ;;  %v4978_v8 = vmax.f32 %v4867_v53, 0.0 }
 0x29d   :  { %v6953_v55 = vpop.f32.mrb[112].mxu1  ;;  %v4981_v1 = vmax.f32 %v4870_v31, 0.0 }
 0x29e   :  { %v2158_v62 = vadd.f32 %v6953_v55, %v8923_v60  ;;  %v2149_v63 = vpop.f32.mrb[113].mxu1  ;;  %v4979_v52 = vmax.f32 %v4868_v0, 0.0  ;;  %v7193_v7 = vpop.f32.mrb[112].mxu0 }
 0x29f   :  { %v2150_v48 = vadd.f32 %v2149_v63, %v8926_v12  ;;  %v6954_v57 = vpop.f32.mrb[114].mxu1  ;;  %v6414_v11 = vpack.c.bf16 %v4981_v1, %v4980_v13  ;;  %v4631_v34 = vpop.f32.mrb[113].mxu0 }
 0x2a0   :  { %v3847_v45 = vadd.f32 %v8933_v19, %v2158_v62  ;;  %v2152_v5 = vpop.f32.mrb[115].mxu1  ;;  %v6409_v47 = vpack.c.bf16 %v4979_v52, %v4978_v8  ;;  %v7194_v46 = vpop.f32.mrb[114].mxu0 }
 0x2a1   :  { %v2153_v15 = vadd.f32 %v2152_v5, %v8930_v30  ;;  %v3845_v39 = vadd.f32 %v8935_v23, %v2150_v48  ;;  %6473 = vst [vmem:[%s9250_s3 + $0x1a8] sm:$0xff] %v6414_v11   ;;  %v4634_v3 = vpop.f32.mrb[115].mxu0 }
 0x2a2   :  { %v4755_v60 = vadd.f32 %v7193_v7, %v3847_v45  ;;  %6472 = vst [vmem:[%s9250_s3 + $0x1a0] sm:$0xff] %v6409_v47  }
 0x2a3   :  { %v4753_v6 = vadd.f32 %v4631_v34, %v3845_v39  ;;  %v3846_v12 = vadd.f32 %v8942_v61, %v2153_v15 }
 0x2a4   :  { %v4873_v19 = vadd.f32 %v9171_v58, %v4755_v60 }
 0x2a5   :  { %v4871_v30 = vadd.f32 %v9171_v58, %v4753_v6  ;;  %v4754_v23 = vadd.f32 %v4634_v3, %v3846_v12 }
 0x2a6   :  { %v4984_v9 = vmax.f32 %v4873_v19, 0.0 }
 0x2a7   :  { %v4872_v35 = vadd.f32 %v9171_v58, %v4754_v23  ;;  %v4982_v29 = vmax.f32 %v4871_v30, 0.0 }
 0x2a8   :  { %v6145_v16 = vpack.c.bf16 %v4984_v9, %v4984_v9 }
 0x2a9   :  { %v4983_v61 = vmax.f32 %v4872_v35, 0.0 }
 0x2aa   :  { %5540 = vst [vmem:[%s9250_s3 + $0x1b8] sm:$0x1] %v6145_v16 }
 0x2ab   :  { %v6419_v49 = vpack.c.bf16 %v4983_v61, %v4982_v29 }
 0x2ad   :  { %6474 = vst [vmem:[%s9250_s3 + $0x1b0] sm:$0xff] %v6419_v49  }

// kernel: convbase_forward.4
= control target key start
LH: loop header
LB: loop body
LE: loop exit
PB: predicated region body
PF: predicated region fallthrough
CT: control target
= control target key end

     0   :  { %v2189_v0 = vmov 0.0   ;;  %vm2190_vm0 = vmmov 0   ;;  %vm139_vm1 = vsmask.f32 7424  ;;  %vm746_vm2 = vcmask 1046528   ;;  %s2710_s1 = inlined_call_operand.vmem [shape: bf16[4,128,128], index: 1, kind: input, shape index: {}]   ;;  %s2711_s0 = inlined_call_operand.vmem [shape: bf16[216,128], index: 0, kind: input, shape index: {}]   ;;  %s2712_s2 = inlined_call_operand.vmem [shape: f32[1,128], index: 2, kind: input, shape index: {}]   ;;  %s2713_s3 = inlined_call_operand.vmem [shape: bf16[200,128], index: 3, kind: output, shape index: {}]  }
   0x1   :  { %1855 = vmatprep.subr.bf16.mxu0 %v2189_v0  ;;  %1923 = vmatprep.subr.bf16.mxu1 %v2189_v0  ;;  %v2129_v1 = vld [vmem:[%s2710_s1 + $0x40] sm:$0xff]   ;;  %v2131_v3 = vld [vmem:[%s2710_s1 + $0x48] sm:$0xff]   ;;  %v2133_v5 = vld [vmem:[%s2710_s1 + $0x50] sm:$0xff]   ;;  %vm1015_vm3 = vsmask.f32 6400 }
   0x2   :  { %v2130_v2 = vld [vmem:[%s2710_s1] sm:$0xff]   ;;  %1871 = vmatprep.mubr.msk.bf16.mxu0 %vm2190_vm0, %v2189_v0  ;;  %1939 = vmatprep.mubr.msk.bf16.mxu1 %vm2190_vm0, %v2189_v0  ;;  %v2132_v4 = vld [vmem:[%s2710_s1 + $0x8] sm:$0xff]   ;;  %v2134_v6 = vld [vmem:[%s2710_s1 + $0x10] sm:$0xff]  }
   0x3   :  { %1856 = vmatpush3.bf16.msra.mxu0 %v2129_v1  ;;  %1924 = vmatpush3.bf16.msra.mxu1 %v2130_v2  ;;  %v2135_v7 = vld [vmem:[%s2710_s1 + $0x58] sm:$0xff]   ;;  %v2137_v9 = vld [vmem:[%s2710_s1 + $0x60] sm:$0xff]   ;;  %v2139_v11 = vld [vmem:[%s2710_s1 + $0x68] sm:$0xff]  }
   0x4   :  { %1857 = vmatprep.subr.bf16.mxu0 %v2189_v0  ;;  %1925 = vmatprep.subr.bf16.mxu1 %v2189_v0  ;;  %v2136_v8 = vld [vmem:[%s2710_s1 + $0x18] sm:$0xff]   ;;  %v2138_v10 = vld [vmem:[%s2710_s1 + $0x20] sm:$0xff]   ;;  %v2146_v13 = vld [vmem:[%s2711_s0 + $0x8] sm:$0xff]  }
   0x5   :  { %v2145_v12 = vld [vmem:[%s2711_s0] sm:$0xff]   ;;  %v2140_v14 = vld [vmem:[%s2710_s1 + $0x28] sm:$0xff]   ;;  %v2141_v16 = vld [vmem:[%s2710_s1 + $0x70] sm:$0xff]   ;;  %v148_v19 = vshll.u32 %v2146_v13, 16  ;;  %v152_v28 = vshrl.u32 %v2146_v13, 16 }
   0x6   :  { %v143_v15 = vshll.u32 %v2145_v12, 16  ;;  %v141_v17 = vshrl.u32 %v2145_v12, 16  ;;  %v2142_v20 = vld [vmem:[%s2710_s1 + $0x30] sm:$0xff]   ;;  %v2143_v21 = vld [vmem:[%s2710_s1 + $0x78] sm:$0xff]   ;;  %v2147_v26 = vld [vmem:[%s2710_s1 + $0x80] sm:$0xff]  }
   0x7   :  { %1858 = vmatpush3.bf16.msra.mxu0 %v2131_v3  ;;  %1926 = vmatpush3.bf16.msra.mxu1 %v2132_v4  ;;  %v150_v23 = vrot.slane %v148_v19, 1  ;;  %v2149_v24 = vld [vmem:[%s2711_s0 + $0x10] sm:$0xff]   ;;  %v2144_v25 = vld [vmem:[%s2710_s1 + $0x38] sm:$0xff]   ;;  %v2148_v30 = vld [vmem:[%s2710_s1 + $0xc0] sm:$0xff]  }
   0x8   :  { %1859 = vmatprep.subr.bf16.mxu0 %v2189_v0  ;;  %1927 = vmatprep.subr.bf16.mxu1 %v2189_v0  ;;  %v145_v18 = vrot.slane %v143_v15, 1  ;;  %v156_v29 = vshll.u32 %v2149_v24, 16  ;;  %v2150_v31 = vld [vmem:[%s2710_s1 + $0x88] sm:$0xff]   ;;  %v2151_v34 = vld [vmem:[%s2711_s0 + $0x18] sm:$0xff]   ;;  %v160_v37 = vshrl.u32 %v2149_v24, 16  ;;  %v2154_v39 = vld [vmem:[%s2710_s1 + $0x90] sm:$0xff]  }
   0x9   :  { %v154_v32 = vor.u32 %v152_v28, %v150_v23  ;;  %v2152_v35 = vld [vmem:[%s2710_s1 + $0xc8] sm:$0xff]   ;;  %v164_v38 = vshll.u32 %v2151_v34, 16  ;;  %v2155_v40 = vld [vmem:[%s2710_s1 + $0xd0] sm:$0xff]   ;;  %v2153_v43 = vld [vmem:[%s2711_s0 + $0x20] sm:$0xff]   ;;  %v168_v47 = vshrl.u32 %v2151_v34, 16 }
   0xa   :  { %v146_v22 = vor.u32 %v145_v18, %v141_v17  ;;  %v158_v33 = vrot.slane %v156_v29, 1  ;;  %v2158_v44 = vld [vmem:[%s2710_s1 + $0x98] sm:$0xff]   ;;  %v172_v48 = vshll.u32 %v2153_v43, 16  ;;  %v2161_v49 = vld [vmem:[%s2710_s1 + $0xa0] sm:$0xff]   ;;  %v2156_v53 = vld [vmem:[%s2711_s0 + $0x28] sm:$0xff]   ;;  %v176_v57 = vshrl.u32 %v2153_v43, 16 }
   0xb   :  { %1860 = vmatpush3.bf16.msra.mxu0 %v2133_v5  ;;  %1928 = vmatpush3.bf16.msra.mxu1 %v2134_v6  ;;  %v166_v42 = vrot.slane %v164_v38, 1  ;;  %v2159_v45 = vld [vmem:[%s2710_s1 + $0xd8] sm:$0xff]   ;;  %v2162_v50 = vld [vmem:[%s2710_s1 + $0xe0] sm:$0xff]   ;;  %v2165_v54 = vld [vmem:[%s2710_s1 + $0xa8] sm:$0xff]   ;;  %v180_v58 = vshll.u32 %v2156_v53, 16  ;;  %v184_v4 = vshrl.u32 %v2156_v53, 16 }
   0xc   :  { %1861 = vmatprep.subr.bf16.mxu0 %v2189_v0  ;;  %1929 = vmatprep.subr.bf16.mxu1 %v2189_v0  ;;  %v151_v27 = vsel %vm139_vm1, %v146_v22, %v150_v23  ;;  %v159_v36 = vsel %vm139_vm1, %v154_v32, %v158_v33  ;;  %v162_v41 = vor.u32 %v160_v37, %v158_v33  ;;  %v174_v52 = vrot.slane %v172_v48, 1  ;;  %v2166_v55 = vld [vmem:[%s2710_s1 + $0xe8] sm:$0xff]   ;;  %v2168_v59 = vld [vmem:[%s2710_s1 + $0xb0] sm:$0xff]   ;;  %v2172_v1 = vld [vmem:[%s2710_s1 + $0xb8] sm:$0xff]  }
   0xd   :  { %v170_v51 = vor.u32 %v168_v47, %v166_v42  ;;  %v2170_v60 = vld [vmem:[%s2710_s1 + $0xf0] sm:$0xff]   ;;  %v182_v62 = vrot.slane %v180_v58, 1  ;;  %v2173_v2 = vld [vmem:[%s2710_s1 + $0xf8] sm:$0xff]   ;;  %v56_v37 = vld [vmem:[%s2711_s0 + $0x64] sm:$0x1] }
   0xe   :  { %v167_v46 = vsel %vm139_vm1, %v162_v41, %v166_v42  ;;  %v178_v61 = vor.u32 %v176_v57, %v174_v52  ;;  %v2157_v63 = vld [vmem:[%s2711_s0 + $0x30] sm:$0xff]   ;;  %v2169_v32 = vld [vmem:[%s2711_s0 + $0x58] sm:$0xff]   ;;  %v2175_v47 = vld [vmem:[%s2711_s0 + $0x4] sm:$0xfe]  }
   0xf   :  { %1862 = vmatpush3.bf16.msra.mxu0 %v2135_v7  ;;  %1930 = vmatpush3.bf16.msra.mxu1 %v2136_v8  ;;  %v175_v56 = vsel %vm139_vm1, %v170_v51, %v174_v52  ;;  %v188_v5 = vshll.u32 %v2157_v63, 16  ;;  %v186_v6 = vor.u32 %v184_v4, %v182_v62  ;;  %v2160_v8 = vld [vmem:[%s2711_s0 + $0x38] sm:$0xff]   ;;  %v232_v42 = vshrl.u32 %v2169_v32, 16  ;;  %v2176_v48 = vld [vmem:[%s2711_s0 + $0xc] sm:$0xff]  }
  0x10   :  { %1863 = vmatprep.subr.bf16.mxu0 %v2189_v0  ;;  %1931 = vmatprep.subr.bf16.mxu1 %v2189_v0  ;;  %v183_v3 = vsel %vm139_vm1, %v178_v61, %v182_v62  ;;  %v1020_v51 = vshll.u32 %v2175_v47, 16  ;;  %v1025_v52 = vshrl.u32 %v2176_v48, 16  ;;  %v747_v61 = vrot.slane %v2175_v47, 1 }
  0x11   :  { %v190_v7 = vrot.slane %v188_v5, 1  ;;  %v748_v62 = vrot.slane %v2176_v48, 1 }
  0x12   :  { %v1022_v57 = vrot.slane %v1020_v51, 2  ;;  %v1027_v58 = vrot.slane %v1025_v52, 1 }
  0x13   :  { %1864 = vmatpush3.bf16.msra.mxu0 %v2137_v9  ;;  %1932 = vmatpush3.bf16.msra.mxu1 %v2138_v10  ;;  %v191_v9 = vsel %vm139_vm1, %v186_v6, %v190_v7  ;;  %v192_v10 = vshrl.u32 %v2157_v63, 16  ;;  %v749_v4 = vsel %vm746_vm2, %v747_v61, %v748_v62 }
  0x14   :  { %1865 = vmatprep.subr.bf16.mxu0 %v2189_v0  ;;  %1933 = vmatprep.subr.bf16.mxu1 %v2189_v0 }
  0x17   :  { %1866 = vmatpush3.bf16.msra.mxu0 %v2139_v11  ;;  %1934 = vmatpush3.bf16.msra.mxu1 %v2140_v14  ;;  %v196_v11 = vshll.u32 %v2160_v8, 16  ;;  %v2163_v14 = vld [vmem:[%s2711_s0 + $0x40] sm:$0xff]  }
  0x18   :  { %1867 = vmatprep.subr.bf16.mxu0 %v2189_v0  ;;  %1935 = vmatprep.subr.bf16.mxu1 %v2189_v0  ;;  %v204_v17 = vshll.u32 %v2163_v14, 16  ;;  %v208_v22 = vshrl.u32 %v2163_v14, 16 }
  0x1a   :  { %v206_v19 = vrot.slane %v204_v17, 1  ;;  %v2179_v17 = vld [vmem:[%s2711_s0 + $0x24] sm:$0xff]  }
  0x1b   :  { %1868 = vmatpush3.bf16.msra.mxu0 %v2141_v16  ;;  %1936 = vmatpush3.bf16.msra.mxu1 %v2142_v20  ;;  %v200_v16 = vshrl.u32 %v2160_v8, 16  ;;  %v2164_v20 = vld [vmem:[%s2711_s0 + $0x48] sm:$0xff]  }
  0x1c   :  { %1869 = vmatprep.subr.bf16.mxu0 %v2189_v0  ;;  %1937 = vmatprep.subr.bf16.mxu1 %v2189_v0  ;;  %v212_v23 = vshll.u32 %v2164_v20, 16  ;;  %v216_v28 = vshrl.u32 %v2164_v20, 16 }
  0x1f   :  { %1870 = vmatpush3.bf16.msra.mxu0 %v2143_v21  ;;  %1938 = vmatpush3.bf16.msra.mxu1 %v2144_v25  ;;  %v214_v25 = vrot.slane %v212_v23, 1 }
  0x20   :  { %1991 = vmatprep.subr.bf16.mxu0 %v2189_v0  ;;  %2059 = vmatprep.subr.bf16.mxu1 %v2189_v0 }
  0x22   :  { %1872 = vmatmul.mubr.bf16.vlgmr.msra.gmra.mrb[0].mxu0 %v151_v27  ;;  %1940 = vmatmul.mubr.bf16.vlgmr.msra.gmra.mrb[0].mxu1 %v2145_v12  ;;  %v194_v12 = vor.u32 %v192_v10, %v190_v7 }
  0x23   :  { %1992 = vmatpush3.bf16.msra.mxu0 %v2147_v26  ;;  %2060 = vmatpush3.bf16.msra.mxu1 %v2148_v30  ;;  %v2167_v26 = vld [vmem:[%s2711_s0 + $0x50] sm:$0xff]   ;;  %v218_v30 = vor.u32 %v216_v28, %v214_v25 }
  0x24   :  { %1875 = vmatprep.mubr.msk.bf16.mxu0 %vm2190_vm0, %v2189_v0  ;;  %1943 = vmatprep.mubr.msk.bf16.mxu1 %vm2190_vm0, %v2189_v0  ;;  %v220_v29 = vshll.u32 %v2167_v26, 16 }
  0x25   :  { %1993 = vmatprep.subr.bf16.mxu0 %v2189_v0  ;;  %2061 = vmatprep.subr.bf16.mxu1 %v2189_v0 }
  0x27   :  { %1994 = vmatpush3.bf16.msra.mxu0 %v2150_v31  ;;  %2062 = vmatpush3.bf16.msra.mxu1 %v2152_v35  ;;  %v222_v31 = vrot.slane %v220_v29, 1  ;;  %v228_v35 = vshll.u32 %v2169_v32, 16 }
  0x28   :  { %1995 = vmatprep.subr.bf16.mxu0 %v2189_v0  ;;  %2063 = vmatprep.subr.bf16.mxu1 %v2189_v0 }
  0x29   :  { %v223_v33 = vsel %vm139_vm1, %v218_v30, %v222_v31 }
  0x2a   :  { %1876 = vmatmul.mubr.bf16.gmra.mrb[4].mxu0 %v159_v36  ;;  %1944 = vmatmul.mubr.bf16.gmra.mrb[4].mxu1 %v2146_v13  ;;  %v198_v13 = vrot.slane %v196_v11, 1  ;;  %v39_v36 = vld [vmem:[%s2711_s0 + $0x60] sm:$0xf] }
  0x2b   :  { %1879 = vmatprep.mubr.msk.bf16.mxu0 %vm2190_vm0, %v2189_v0  ;;  %1947 = vmatprep.mubr.msk.bf16.mxu1 %vm2190_vm0, %v2189_v0 }
  0x2c   :  { %1996 = vmatpush3.bf16.msra.mxu0 %v2154_v39  ;;  %2064 = vmatpush3.bf16.msra.mxu1 %v2155_v40  ;;  %v199_v15 = vsel %vm139_vm1, %v194_v12, %v198_v13  ;;  %v202_v18 = vor.u32 %v200_v16, %v198_v13  ;;  %v230_v39 = vrot.slane %v228_v35, 1  ;;  %v1569_v40 = vcombine.low %v39_v36, %v56_v37  ;;  %v2181_v35 = vld [vmem:[%s2711_s0 + $0x34] sm:$0xff]  }
  0x2d   :  { %1997 = vmatprep.subr.bf16.mxu0 %v2189_v0  ;;  %2065 = vmatprep.subr.bf16.mxu1 %v2189_v0 }
  0x2e   :  { %v207_v21 = vsel %vm139_vm1, %v202_v18, %v206_v19 }
  0x30   :  { %1998 = vmatpush3.bf16.msra.mxu0 %v2158_v44  ;;  %2066 = vmatpush3.bf16.msra.mxu1 %v2159_v45  ;;  %v234_v44 = vor.u32 %v232_v42, %v230_v39 }
  0x31   :  { %1999 = vmatprep.subr.bf16.mxu0 %v2189_v0  ;;  %2067 = vmatprep.subr.bf16.mxu1 %v2189_v0 }
  0x32   :  { %1880 = vmatmul.mubr.bf16.gmra.mrb[8].mxu0 %v167_v46  ;;  %1948 = vmatmul.mubr.bf16.gmra.mrb[8].mxu1 %v2149_v24  ;;  %v210_v24 = vor.u32 %v208_v22, %v206_v19 }
  0x33   :  { %1883 = vmatprep.mubr.msk.bf16.mxu0 %vm2190_vm0, %v2189_v0  ;;  %1951 = vmatprep.mubr.msk.bf16.mxu1 %vm2190_vm0, %v2189_v0 }
  0x34   :  { %2000 = vmatpush3.bf16.msra.mxu0 %v2161_v49  ;;  %2068 = vmatpush3.bf16.msra.mxu1 %v2162_v50  ;;  %v215_v27 = vsel %vm139_vm1, %v210_v24, %v214_v25  ;;  %v240_v49 = vshrl.u32 %v1569_v40, 16  ;;  %v1017_v50 = vshrl.u32 %v2175_v47, 16 }
  0x35   :  { %2001 = vmatprep.subr.bf16.mxu0 %v2189_v0  ;;  %2069 = vmatprep.subr.bf16.mxu1 %v2189_v0 }
  0x38   :  { %2002 = vmatpush3.bf16.msra.mxu0 %v2165_v54  ;;  %2070 = vmatpush3.bf16.msra.mxu1 %v2166_v55  ;;  %v1578_v55 = vcombine.low %v39_v36, %v39_v36 }
  0x39   :  { %2003 = vmatprep.subr.bf16.mxu0 %v2189_v0  ;;  %2071 = vmatprep.subr.bf16.mxu1 %v2189_v0 }
  0x3a   :  { %1884 = vmatmul.mubr.bf16.gmra.mrb[12].mxu0 %v175_v56  ;;  %1952 = vmatmul.mubr.bf16.gmra.mrb[12].mxu1 %v2151_v34  ;;  %v224_v34 = vshrl.u32 %v2167_v26, 16  ;;  %v1019_v56 = vrot.slane %v1017_v50, 1 }
  0x3b   :  { %1887 = vmatprep.mubr.msk.bf16.mxu0 %vm2190_vm0, %v2189_v0  ;;  %1955 = vmatprep.mubr.msk.bf16.mxu1 %vm2190_vm0, %v2189_v0 }
  0x3c   :  { %2004 = vmatpush3.bf16.msra.mxu0 %v2168_v59  ;;  %2072 = vmatpush3.bf16.msra.mxu1 %v2170_v60  ;;  %v226_v38 = vor.u32 %v224_v34, %v222_v31  ;;  %v2177_v60 = vld [vmem:[%s2711_s0 + $0x14] sm:$0xff]  }
  0x3d   :  { %2005 = vmatprep.subr.bf16.mxu0 %v2189_v0  ;;  %2073 = vmatprep.subr.bf16.mxu1 %v2189_v0 }
  0x3e   :  { %v231_v41 = vsel %vm139_vm1, %v226_v38, %v230_v39  ;;  %v1070_v38 = vshrl.u32 %v2181_v35, 16  ;;  %v1073_v39 = vshll.u32 %v2181_v35, 16 }
  0x40   :  { %2006 = vmatpush3.bf16.msra.mxu0 %v2172_v1  ;;  %2074 = vmatpush3.bf16.msra.mxu1 %v2173_v2  ;;  %v1034_v2 = vshrl.u32 %v2177_v60, 16  ;;  %v1072_v42 = vrot.slane %v1070_v38, 1 }
  0x42   :  { %1888 = vmatmul.mubr.bf16.gmra.mrb[16].mxu0 %v183_v3  ;;  %1956 = vmatmul.mubr.bf16.gmra.mrb[16].mxu1 %v2153_v43  ;;  %v236_v43 = vshll.u32 %v1569_v40, 16  ;;  %v1037_v3 = vshll.u32 %v2177_v60, 16  ;;  %v1036_v6 = vrot.slane %v1034_v2, 1 }
  0x43   :  { %1891 = vmatprep.mubr.msk.bf16.mxu0 %vm2190_vm0, %v2189_v0  ;;  %1959 = vmatprep.mubr.msk.bf16.mxu1 %vm2190_vm0, %v2189_v0 }
  0x44   :  { %v238_v45 = vrot.slane %v236_v43, 1  ;;  %v1039_v7 = vrot.slane %v1037_v3, 2  ;;  %v1075_v43 = vrot.slane %v1073_v39, 2 }
  0x46   :  { %v239_v46 = vsel %vm139_vm1, %v234_v44, %v238_v45  ;;  %v242_v54 = vor.u32 %v240_v49, %v238_v45  ;;  %v1040_v10 = vor.u32 %v1039_v7, %v1036_v6  ;;  %v2182_v44 = vld [vmem:[%s2711_s0 + $0x3c] sm:$0xff]   ;;  %v758_v45 = vrot.slane %v2181_v35, 1 }
  0x47   :  { %v1079_v47 = vshrl.u32 %v2182_v44, 16 }
  0x49   :  { %v1081_v51 = vrot.slane %v1079_v47, 1 }
  0x4a   :  { %1892 = vmatmul.mubr.bf16.gmra.mrb[20].mxu0 %v191_v9  ;;  %1960 = vmatmul.mubr.bf16.gmra.mrb[20].mxu1 %v2156_v53  ;;  %v1028_v53 = vshll.u32 %v2176_v48, 16  ;;  %v750_v9 = vrot.slane %v2177_v60, 1  ;;  %v1082_v48 = vshll.u32 %v2182_v44, 16 }
  0x4b   :  { %1895 = vmatprep.mubr.msk.bf16.mxu0 %vm2190_vm0, %v2189_v0  ;;  %1963 = vmatprep.mubr.msk.bf16.mxu1 %vm2190_vm0, %v2189_v0 }
  0x4c   :  { %v1030_v59 = vrot.slane %v1028_v53, 2  ;;  %v751_v13 = vsel %vm746_vm2, %v748_v62, %v750_v9  ;;  %v1084_v52 = vrot.slane %v1082_v48, 2  ;;  %v2183_v53 = vld [vmem:[%s2711_s0 + $0x44] sm:$0xff]   ;;  %v2184_v62 = vld [vmem:[%s2711_s0 + $0x4c] sm:$0xff]  }
  0x4d   :  { %v1097_v2 = vshrl.u32 %v2184_v62, 16  ;;  %v1100_v3 = vshll.u32 %v2184_v62, 16 }
  0x4e   :  { %v1031_v1 = vor.u32 %v1030_v59, %v1027_v58 }
  0x4f   :  { %v1099_v6 = vrot.slane %v1097_v2, 1  ;;  %v1102_v7 = vrot.slane %v1100_v3, 2 }
  0x52   :  { %1896 = vmatmul.mubr.bf16.gmra.mrb[24].mxu0 %v199_v15  ;;  %1964 = vmatmul.mubr.bf16.gmra.mrb[24].mxu1 %v2157_v63  ;;  %v1023_v63 = vor.u32 %v1022_v57, %v1019_v56  ;;  %v1088_v56 = vshrl.u32 %v2183_v53, 16  ;;  %v1091_v57 = vshll.u32 %v2183_v53, 16 }
  0x53   :  { %1899 = vmatprep.mubr.msk.bf16.mxu0 %vm2190_vm0, %v2189_v0  ;;  %1967 = vmatprep.mubr.msk.bf16.mxu1 %vm2190_vm0, %v2189_v0 }
  0x54   :  { %v1032_v5 = vsel %vm1015_vm3, %v1023_v63, %v1031_v1  ;;  %v1090_v60 = vrot.slane %v1088_v56, 1  ;;  %v1093_v61 = vrot.slane %v1091_v57, 2  ;;  %v762_v63 = vrot.slane %v2183_v53, 1 }
  0x5a   :  { %1900 = vmatmul.mubr.bf16.gmra.mrb[28].mxu0 %v207_v21  ;;  %1968 = vmatmul.mubr.bf16.gmra.mrb[28].mxu1 %v2160_v8  ;;  %v2178_v8 = vld [vmem:[%s2711_s0 + $0x1c] sm:$0xff]   ;;  %v1055_v21 = vshll.u32 %v2179_v17, 16 }
  0x5b   :  { %1903 = vmatprep.mubr.msk.bf16.mxu0 %vm2190_vm0, %v2189_v0  ;;  %1971 = vmatprep.mubr.msk.bf16.mxu1 %vm2190_vm0, %v2189_v0  ;;  %v1043_v11 = vshrl.u32 %v2178_v8, 16  ;;  %v1046_v12 = vshll.u32 %v2178_v8, 16  ;;  %v752_v18 = vrot.slane %v2178_v8, 1  ;;  %v2185_v8 = vld [vmem:[%s2711_s0 + $0x54] sm:$0xff]  }
  0x5c   :  { %v1057_v25 = vrot.slane %v1055_v21, 2 }
  0x5d   :  { %v1045_v15 = vrot.slane %v1043_v11, 1  ;;  %v1048_v16 = vrot.slane %v1046_v12, 2  ;;  %v753_v22 = vsel %vm746_vm2, %v750_v9, %v752_v18  ;;  %v764_v9 = vrot.slane %v2184_v62, 1 }
  0x5e   :  { %v1106_v11 = vshrl.u32 %v2185_v8, 16  ;;  %v1109_v12 = vshll.u32 %v2185_v8, 16 }
  0x5f   :  { %v1049_v19 = vor.u32 %v1048_v16, %v1045_v15 }
  0x60   :  { %v1108_v15 = vrot.slane %v1106_v11, 1  ;;  %v1111_v16 = vrot.slane %v1109_v12, 2 }
  0x61   :  { %v1050_v23 = vsel %vm1015_vm3, %v1040_v10, %v1049_v19 }
  0x62   :  { %1904 = vmatmul.mubr.bf16.gmra.mrb[32].mxu0 %v215_v27  ;;  %1972 = vmatmul.mubr.bf16.gmra.mrb[32].mxu1 %v2163_v14  ;;  %v1041_v14 = vsel %vm1015_vm3, %v1031_v1, %v1040_v10  ;;  %v754_v27 = vrot.slane %v2179_v17, 1  ;;  %v1094_v1 = vor.u32 %v1093_v61, %v1090_v60  ;;  %v1103_v10 = vor.u32 %v1102_v7, %v1099_v6 }
  0x63   :  { %1907 = vmatprep.mubr.msk.bf16.mxu0 %vm2190_vm0, %v2189_v0  ;;  %1975 = vmatprep.mubr.msk.bf16.mxu1 %vm2190_vm0, %v2189_v0 }
  0x64   :  { %v755_v31 = vsel %vm746_vm2, %v752_v18, %v754_v27  ;;  %v766_v18 = vrot.slane %v2185_v8, 1 }
  0x6a   :  { %1908 = vmatmul.mubr.bf16.gmra.mrb[36].mxu0 %v223_v33  ;;  %1976 = vmatmul.mubr.bf16.gmra.mrb[36].mxu1 %v2164_v20  ;;  %v1052_v20 = vshrl.u32 %v2179_v17, 16  ;;  %v2186_v17 = vld [vmem:[%s2711_s0 + $0x5c] sm:$0xff]  }
  0x6b   :  { %1911 = vmatprep.mubr.msk.bf16.mxu0 %vm2190_vm0, %v2189_v0  ;;  %1979 = vmatprep.mubr.msk.bf16.mxu1 %vm2190_vm0, %v2189_v0  ;;  %v1118_v21 = vshll.u32 %v2186_v17, 16 }
  0x6c   :  { %v1054_v24 = vrot.slane %v1052_v20, 1  ;;  %v1115_v20 = vshrl.u32 %v2186_v17, 16 }
  0x6e   :  { %v1058_v28 = vor.u32 %v1057_v25, %v1054_v24  ;;  %v767_v24 = vsel %vm746_vm2, %v764_v9, %v766_v18 }
  0x72   :  { %1912 = vmatmul.mubr.bf16.gmra.mrb[40].mxu0 %v231_v41  ;;  %1980 = vmatmul.mubr.bf16.gmra.mrb[40].mxu1 %v2167_v26  ;;  %v2180_v26 = vld [vmem:[%s2711_s0 + $0x2c] sm:$0xff]  }
  0x73   :  { %1915 = vmatprep.mubr.msk.bf16.mxu0 %vm2190_vm0, %v2189_v0  ;;  %1983 = vmatprep.mubr.msk.bf16.mxu1 %vm2190_vm0, %v2189_v0  ;;  %v1061_v29 = vshrl.u32 %v2180_v26, 16  ;;  %v1064_v30 = vshll.u32 %v2180_v26, 16  ;;  %v756_v36 = vrot.slane %v2180_v26, 1  ;;  %v1117_v26 = vrot.slane %v1115_v20, 1 }
  0x75   :  { %v1063_v33 = vrot.slane %v1061_v29, 1  ;;  %v1066_v34 = vrot.slane %v1064_v30, 2  ;;  %v757_v40 = vsel %vm746_vm2, %v754_v27, %v756_v36  ;;  %v759_v49 = vsel %vm746_vm2, %v756_v36, %v758_v45 }
  0x76   :  { %v1120_v27 = vrot.slane %v1118_v21, 2  ;;  %v768_v29 = vrot.slane %v2186_v17, 1 }
  0x77   :  { %v1067_v37 = vor.u32 %v1066_v34, %v1063_v33 }
  0x78   :  { %v1121_v30 = vor.u32 %v1120_v27, %v1117_v26  ;;  %v769_v34 = vsel %vm746_vm2, %v766_v18, %v768_v29 }
  0x79   :  { %v1068_v41 = vsel %vm1015_vm3, %v1058_v28, %v1067_v37 }
  0x7a   :  { %1916 = vmatmul.mubr.bf16.gmra.mrb[44].mxu0 %v239_v46  ;;  %1984 = vmatmul.mubr.bf16.gmra.mrb[44].mxu1 %v2169_v32  ;;  %v1059_v32 = vsel %vm1015_vm3, %v1049_v19, %v1058_v28  ;;  %v1076_v46 = vor.u32 %v1075_v43, %v1072_v42  ;;  %v1112_v19 = vor.u32 %v1111_v16, %v1108_v15 }
  0x7b   :  { %1919 = vmatprep.mubr.msk.bf16.mxu0 %vm2190_vm0, %v2189_v0  ;;  %1987 = vmatprep.mubr.msk.bf16.mxu1 %vm2190_vm0, %v2189_v0 }
  0x7c   :  { %v1077_v50 = vsel %vm1015_vm3, %v1067_v37, %v1076_v46  ;;  %v1113_v25 = vsel %vm1015_vm3, %v1103_v10, %v1112_v19  ;;  %v1122_v36 = vsel %vm1015_vm3, %v1112_v19, %v1121_v30 }
  0x82   :  { %1920 = vmatmul.mubr.bf16.gmra.mrb[48].mxu0 %v242_v54  ;;  %1988 = vmatmul.mubr.bf16.gmra.mrb[48].mxu1 %v1578_v55  ;;  %v760_v54 = vrot.slane %v2182_v44, 1  ;;  %v1085_v55 = vor.u32 %v1084_v52, %v1081_v51 }
  0x83   :  { %2007 = vmatprep.mubr.msk.bf16.mxu0 %vm2190_vm0, %v2189_v0  ;;  %2075 = vmatprep.mubr.msk.bf16.mxu1 %vm2190_vm0, %v2189_v0 }
  0x84   :  { %v761_v58 = vsel %vm746_vm2, %v758_v45, %v760_v54  ;;  %v1086_v59 = vsel %vm1015_vm3, %v1076_v46, %v1085_v55 }
  0x8a   :  { %2008 = vmatmul.mubr.bf16.vlgmr.msra.gmra.mrb[52].mxu0 %v749_v4  ;;  %2076 = vmatmul.mubr.bf16.vlgmr.msra.gmra.mrb[52].mxu1 %v1032_v5  ;;  %v763_v4 = vsel %vm746_vm2, %v760_v54, %v762_v63  ;;  %v1095_v5 = vsel %vm1015_vm3, %v1085_v55, %v1094_v1 }
  0x8b   :  { %2011 = vmatprep.mubr.msk.bf16.mxu0 %vm2190_vm0, %v2189_v0  ;;  %2079 = vmatprep.mubr.msk.bf16.mxu1 %vm2190_vm0, %v2189_v0 }
  0x92   :  { %2012 = vmatmul.mubr.bf16.gmra.mrb[56].mxu0 %v751_v13  ;;  %2080 = vmatmul.mubr.bf16.gmra.mrb[56].mxu1 %v1041_v14  ;;  %v765_v13 = vsel %vm746_vm2, %v762_v63, %v764_v9  ;;  %v1104_v14 = vsel %vm1015_vm3, %v1094_v1, %v1103_v10 }
  0x93   :  { %2015 = vmatprep.mubr.msk.bf16.mxu0 %vm2190_vm0, %v2189_v0  ;;  %2083 = vmatprep.mubr.msk.bf16.mxu1 %vm2190_vm0, %v2189_v0 }
  0x9a   :  { %2016 = vmatmul.mubr.bf16.gmra.mrb[60].mxu0 %v753_v22  ;;  %2084 = vmatmul.mubr.bf16.gmra.mrb[60].mxu1 %v1050_v23  ;;  %v662_v22 = vld [vmem:[%s2711_s0 + $0x64] sm:$0xf]  ;;  %v994_v23 = vld [vmem:[%s2711_s0 + $0x68] sm:$0x3] }
  0x9b   :  { %2019 = vmatprep.mubr.msk.bf16.mxu0 %vm2190_vm0, %v2189_v0  ;;  %2087 = vmatprep.mubr.msk.bf16.mxu1 %vm2190_vm0, %v2189_v0  ;;  %v1640_v28 = vcombine.low %v662_v22, %v994_v23 }
  0x9d   :  { %v1127_v33 = vshll.u32 %v1640_v28, 16 }
  0x9f   :  { %v1129_v38 = vrot.slane %v1127_v33, 2 }
  0xa2   :  { %2020 = vmatmul.mubr.bf16.gmra.mrb[64].mxu0 %v755_v31  ;;  %2088 = vmatmul.mubr.bf16.gmra.mrb[64].mxu1 %v1059_v32  ;;  %v663_v31 = vld [vmem:[%s2711_s0 + $0x68] sm:$0x1]  ;;  %v1124_v32 = vshrl.u32 %v1640_v28, 16 }
  0xa3   :  { %2023 = vmatprep.mubr.msk.bf16.mxu0 %vm2190_vm0, %v2189_v0  ;;  %2091 = vmatprep.mubr.msk.bf16.mxu1 %vm2190_vm0, %v2189_v0  ;;  %v1615_v35 = vcombine.low %v662_v22, %v663_v31 }
  0xa4   :  { %v1126_v37 = vrot.slane %v1124_v32, 1 }
  0xa5   :  { %v770_v39 = vrot.slane %v1615_v35, 1 }
  0xaa   :  { %2024 = vmatmul.mubr.bf16.gmra.mrb[68].mxu0 %v757_v40  ;;  %2092 = vmatmul.mubr.bf16.gmra.mrb[68].mxu1 %v1068_v41  ;;  %v1130_v40 = vor.u32 %v1129_v38, %v1126_v37  ;;  %v771_v41 = vsel %vm746_vm2, %v768_v29, %v770_v39 }
  0xab   :  { %2027 = vmatprep.mubr.msk.bf16.mxu0 %vm2190_vm0, %v2189_v0  ;;  %2095 = vmatprep.mubr.msk.bf16.mxu1 %vm2190_vm0, %v2189_v0 }
  0xac   :  { %v1131_v42 = vsel %vm1015_vm3, %v1121_v30, %v1130_v40 }
  0xb2   :  { %2028 = vmatmul.mubr.bf16.gmra.mrb[72].mxu0 %v759_v49  ;;  %2096 = vmatmul.mubr.bf16.gmra.mrb[72].mxu1 %v1077_v50 }
  0xb3   :  { %2031 = vmatprep.mubr.msk.bf16.mxu0 %vm2190_vm0, %v2189_v0  ;;  %2099 = vmatprep.mubr.msk.bf16.mxu1 %vm2190_vm0, %v2189_v0 }
  0xba   :  { %2032 = vmatmul.mubr.bf16.gmra.mrb[76].mxu0 %v761_v58  ;;  %2100 = vmatmul.mubr.bf16.gmra.mrb[76].mxu1 %v1086_v59 }
  0xbb   :  { %2035 = vmatprep.mubr.msk.bf16.mxu0 %vm2190_vm0, %v2189_v0  ;;  %2103 = vmatprep.mubr.msk.bf16.mxu1 %vm2190_vm0, %v2189_v0 }
  0xc2   :  { %2036 = vmatmul.mubr.bf16.gmra.mrb[80].mxu0 %v763_v4  ;;  %2104 = vmatmul.mubr.bf16.gmra.mrb[80].mxu1 %v1095_v5 }
  0xc3   :  { %2039 = vmatprep.mubr.msk.bf16.mxu0 %vm2190_vm0, %v2189_v0  ;;  %2107 = vmatprep.mubr.msk.bf16.mxu1 %vm2190_vm0, %v2189_v0 }
  0xca   :  { %2040 = vmatmul.mubr.bf16.gmra.mrb[84].mxu0 %v765_v13  ;;  %2108 = vmatmul.mubr.bf16.gmra.mrb[84].mxu1 %v1104_v14 }
  0xcb   :  { %2043 = vmatprep.mubr.msk.bf16.mxu0 %vm2190_vm0, %v2189_v0  ;;  %2111 = vmatprep.mubr.msk.bf16.mxu1 %vm2190_vm0, %v2189_v0 }
  0xd2   :  { %2044 = vmatmul.mubr.bf16.gmra.mrb[88].mxu0 %v767_v24  ;;  %2112 = vmatmul.mubr.bf16.gmra.mrb[88].mxu1 %v1113_v25 }
  0xd3   :  { %2047 = vmatprep.mubr.msk.bf16.mxu0 %vm2190_vm0, %v2189_v0  ;;  %2115 = vmatprep.mubr.msk.bf16.mxu1 %vm2190_vm0, %v2189_v0 }
  0xda   :  { %2048 = vmatmul.mubr.bf16.gmra.mrb[92].mxu0 %v769_v34  ;;  %2116 = vmatmul.mubr.bf16.gmra.mrb[92].mxu1 %v1122_v36 }
  0xdb   :  { %2051 = vmatprep.mubr.msk.bf16.mxu0 %vm2190_vm0, %v2189_v0  ;;  %2119 = vmatprep.mubr.msk.bf16.mxu1 %vm2190_vm0, %v2189_v0 }
  0xe2   :  { %2052 = vmatmul.mubr.bf16.gmra.mrb[96].mxu0 %v771_v41  ;;  %2120 = vmatmul.mubr.bf16.gmra.mrb[96].mxu1 %v1131_v42 }
  0xe3   :  { %2055 = vmatprep.mubr.msk.bf16.mxu0 %vm2190_vm0, %v2189_v0  ;;  %2123 = vmatprep.mubr.msk.bf16.mxu1 %vm2190_vm0, %v2189_v0 }
  0xea   :  { %2056 = vmatmul.mubr.bf16.gmra.mrb[100].mxu0 %v770_v39  ;;  %2124 = vmatmul.mubr.bf16.gmra.mrb[100].mxu1 %v1130_v40 }
  0xf5   :  { %v338_v43 = vpop.f32.mrb[0].mxu0  ;;  %v536_v44 = vpop.f32.mrb[0].mxu1 }
  0xf6   :  { %v1873_v45 = vpop.f32.mrb[1].mxu0  ;;  %v2566_v46 = vadd.f32 %v536_v44, %v338_v43  ;;  %v1941_v47 = vpop.f32.mrb[1].mxu1 }
  0xf7   :  { %v341_v48 = vpop.f32.mrb[2].mxu0  ;;  %v539_v49 = vpop.f32.mrb[2].mxu1 }
  0xf8   :  { %v1874_v50 = vpop.f32.mrb[3].mxu0  ;;  %v2568_v51 = vadd.f32 %v539_v49, %v341_v48  ;;  %v1942_v52 = vpop.f32.mrb[3].mxu1 }
  0xfd   :  { %v346_v53 = vpop.f32.mrb[4].mxu0  ;;  %v544_v54 = vpop.f32.mrb[4].mxu1 }
  0xfe   :  { %v1877_v55 = vpop.f32.mrb[5].mxu0  ;;  %v2570_v56 = vadd.f32 %v544_v54, %v346_v53  ;;  %v1945_v0 = vpop.f32.mrb[5].mxu1 }
  0xff   :  { %v349_v57 = vpop.f32.mrb[6].mxu0  ;;  %v547_v58 = vpop.f32.mrb[6].mxu1 }
 0x100   :  { %v1878_v59 = vpop.f32.mrb[7].mxu0  ;;  %v2572_v60 = vadd.f32 %v547_v58, %v349_v57  ;;  %v1946_v61 = vpop.f32.mrb[7].mxu1 }
 0x105   :  { %v354_v62 = vpop.f32.mrb[8].mxu0  ;;  %v552_v63 = vpop.f32.mrb[8].mxu1 }
 0x106   :  { %v1881_v1 = vpop.f32.mrb[9].mxu0  ;;  %v2574_v2 = vadd.f32 %v552_v63, %v354_v62  ;;  %v1949_v3 = vpop.f32.mrb[9].mxu1 }
 0x107   :  { %v357_v4 = vpop.f32.mrb[10].mxu0  ;;  %v555_v5 = vpop.f32.mrb[10].mxu1 }
 0x108   :  { %v1882_v6 = vpop.f32.mrb[11].mxu0  ;;  %v2576_v7 = vadd.f32 %v555_v5, %v357_v4  ;;  %v1950_v8 = vpop.f32.mrb[11].mxu1 }
 0x10d   :  { %v362_v9 = vpop.f32.mrb[12].mxu0  ;;  %v560_v10 = vpop.f32.mrb[12].mxu1 }
 0x10e   :  { %v1885_v11 = vpop.f32.mrb[13].mxu0  ;;  %v2578_v12 = vadd.f32 %v560_v10, %v362_v9  ;;  %v1953_v13 = vpop.f32.mrb[13].mxu1 }
 0x10f   :  { %v365_v14 = vpop.f32.mrb[14].mxu0  ;;  %v563_v15 = vpop.f32.mrb[14].mxu1 }
 0x110   :  { %v1886_v16 = vpop.f32.mrb[15].mxu0  ;;  %v2580_v17 = vadd.f32 %v563_v15, %v365_v14  ;;  %v1954_v18 = vpop.f32.mrb[15].mxu1 }
 0x115   :  { %v370_v19 = vpop.f32.mrb[16].mxu0  ;;  %v568_v20 = vpop.f32.mrb[16].mxu1 }
 0x116   :  { %v1889_v21 = vpop.f32.mrb[17].mxu0  ;;  %v2582_v22 = vadd.f32 %v568_v20, %v370_v19  ;;  %v1957_v23 = vpop.f32.mrb[17].mxu1 }
 0x117   :  { %v373_v24 = vpop.f32.mrb[18].mxu0  ;;  %v571_v25 = vpop.f32.mrb[18].mxu1 }
 0x118   :  { %v1890_v26 = vpop.f32.mrb[19].mxu0  ;;  %v2584_v27 = vadd.f32 %v571_v25, %v373_v24  ;;  %v1958_v28 = vpop.f32.mrb[19].mxu1 }
 0x11d   :  { %v378_v29 = vpop.f32.mrb[20].mxu0  ;;  %v576_v30 = vpop.f32.mrb[20].mxu1 }
 0x11e   :  { %v1893_v31 = vpop.f32.mrb[21].mxu0  ;;  %v2586_v32 = vadd.f32 %v576_v30, %v378_v29  ;;  %v1961_v33 = vpop.f32.mrb[21].mxu1 }
 0x11f   :  { %v381_v34 = vpop.f32.mrb[22].mxu0  ;;  %v579_v35 = vpop.f32.mrb[22].mxu1 }
 0x120   :  { %v1894_v36 = vpop.f32.mrb[23].mxu0  ;;  %v2588_v37 = vadd.f32 %v579_v35, %v381_v34  ;;  %v1962_v38 = vpop.f32.mrb[23].mxu1 }
 0x125   :  { %v386_v39 = vpop.f32.mrb[24].mxu0  ;;  %v584_v40 = vpop.f32.mrb[24].mxu1 }
 0x126   :  { %v1897_v41 = vpop.f32.mrb[25].mxu0  ;;  %v2590_v42 = vadd.f32 %v584_v40, %v386_v39  ;;  %v1965_v43 = vpop.f32.mrb[25].mxu1 }
 0x127   :  { %v389_v44 = vpop.f32.mrb[26].mxu0  ;;  %v587_v45 = vpop.f32.mrb[26].mxu1 }
 0x128   :  { %v1898_v47 = vpop.f32.mrb[27].mxu0  ;;  %v2592_v48 = vadd.f32 %v587_v45, %v389_v44  ;;  %v1966_v49 = vpop.f32.mrb[27].mxu1 }
 0x12d   :  { %v394_v50 = vpop.f32.mrb[28].mxu0  ;;  %v592_v52 = vpop.f32.mrb[28].mxu1 }
 0x12e   :  { %v1901_v53 = vpop.f32.mrb[29].mxu0  ;;  %v2594_v54 = vadd.f32 %v592_v52, %v394_v50  ;;  %v1969_v55 = vpop.f32.mrb[29].mxu1 }
 0x12f   :  { %v397_v0 = vpop.f32.mrb[30].mxu0  ;;  %v595_v57 = vpop.f32.mrb[30].mxu1 }
 0x130   :  { %v1902_v58 = vpop.f32.mrb[31].mxu0  ;;  %v2596_v59 = vadd.f32 %v595_v57, %v397_v0  ;;  %v1970_v61 = vpop.f32.mrb[31].mxu1 }
 0x135   :  { %v402_v62 = vpop.f32.mrb[32].mxu0  ;;  %v600_v63 = vpop.f32.mrb[32].mxu1 }
 0x136   :  { %v1905_v1 = vpop.f32.mrb[33].mxu0  ;;  %v2598_v3 = vadd.f32 %v600_v63, %v402_v62  ;;  %v1973_v4 = vpop.f32.mrb[33].mxu1 }
 0x137   :  { %v405_v5 = vpop.f32.mrb[34].mxu0  ;;  %v603_v6 = vpop.f32.mrb[34].mxu1 }
 0x138   :  { %v1906_v8 = vpop.f32.mrb[35].mxu0  ;;  %v2600_v9 = vadd.f32 %v603_v6, %v405_v5  ;;  %v1974_v10 = vpop.f32.mrb[35].mxu1  ;;  %v2620_v6 = vld [vmem:[%s2712_s2] ss:$0 sm:$0xff] }
 0x13d   :  { %v410_v11 = vpop.f32.mrb[36].mxu0  ;;  %v608_v13 = vpop.f32.mrb[36].mxu1 }
 0x13e   :  { %v1909_v14 = vpop.f32.mrb[37].mxu0  ;;  %v2602_v15 = vadd.f32 %v608_v13, %v410_v11  ;;  %v1977_v16 = vpop.f32.mrb[37].mxu1 }
 0x13f   :  { %v413_v18 = vpop.f32.mrb[38].mxu0  ;;  %v611_v19 = vpop.f32.mrb[38].mxu1 }
 0x140   :  { %v1910_v20 = vpop.f32.mrb[39].mxu0  ;;  %v2604_v21 = vadd.f32 %v611_v19, %v413_v18  ;;  %v1978_v23 = vpop.f32.mrb[39].mxu1 }
 0x145   :  { %v418_v24 = vpop.f32.mrb[40].mxu0  ;;  %v616_v25 = vpop.f32.mrb[40].mxu1 }
 0x146   :  { %v1913_v26 = vpop.f32.mrb[41].mxu0  ;;  %v2606_v28 = vadd.f32 %v616_v25, %v418_v24  ;;  %v1981_v29 = vpop.f32.mrb[41].mxu1 }
 0x147   :  { %v421_v30 = vpop.f32.mrb[42].mxu0  ;;  %v619_v31 = vpop.f32.mrb[42].mxu1 }
 0x148   :  { %v1914_v33 = vpop.f32.mrb[43].mxu0  ;;  %v2608_v34 = vadd.f32 %v619_v31, %v421_v30  ;;  %v1982_v35 = vpop.f32.mrb[43].mxu1 }
 0x14d   :  { %v426_v36 = vpop.f32.mrb[44].mxu0  ;;  %v624_v38 = vpop.f32.mrb[44].mxu1 }
 0x14e   :  { %v1917_v39 = vpop.f32.mrb[45].mxu0  ;;  %v2610_v40 = vadd.f32 %v624_v38, %v426_v36  ;;  %v1985_v41 = vpop.f32.mrb[45].mxu1 }
 0x14f   :  { %v429_v43 = vpop.f32.mrb[46].mxu0  ;;  %v627_v44 = vpop.f32.mrb[46].mxu1 }
 0x150   :  { %v1918_v45 = vpop.f32.mrb[47].mxu0  ;;  %v2612_v47 = vadd.f32 %v627_v44, %v429_v43  ;;  %v1986_v49 = vpop.f32.mrb[47].mxu1 }
 0x155   :  { %v434_v50 = vpop.f32.mrb[48].mxu0  ;;  %v632_v52 = vpop.f32.mrb[48].mxu1 }
 0x156   :  { %v1921_v53 = vpop.f32.mrb[49].mxu0  ;;  %v2614_v55 = vadd.f32 %v632_v52, %v434_v50  ;;  %v1989_v0 = vpop.f32.mrb[49].mxu1 }
 0x157   :  { %v437_v57 = vpop.f32.mrb[50].mxu0  ;;  %v635_v58 = vpop.f32.mrb[50].mxu1 }
 0x158   :  { %v1922_v61 = vpop.f32.mrb[51].mxu0  ;;  %v1990_v62 = vpop.f32.mrb[51].mxu1 }
 0x15d   :  { %v867_v63 = vpop.f32.mrb[52].mxu0  ;;  %v1227_v4 = vpop.f32.mrb[52].mxu1 }
 0x15e   :  { %v969_v1 = vadd.f32 %v867_v63, %v2566_v46  ;;  %v2009_v5 = vpop.f32.mrb[53].mxu0  ;;  %v2077_v8 = vpop.f32.mrb[53].mxu1 }
 0x15f   :  { %v870_v10 = vpop.f32.mrb[54].mxu0  ;;  %v1230_v14 = vpop.f32.mrb[54].mxu1 }
 0x160   :  { %v1329_v11 = vadd.f32 %v1227_v4, %v969_v1  ;;  %v970_v13 = vadd.f32 %v870_v10, %v2568_v51  ;;  %v2010_v16 = vpop.f32.mrb[55].mxu0  ;;  %v2078_v18 = vpop.f32.mrb[55].mxu1 }
 0x162   :  { %v1361_v19 = vadd.f32 %v2620_v6, %v1329_v11  ;;  %v1330_v20 = vadd.f32 %v1230_v14, %v970_v13 }
 0x164   :  { %v1362_v46 = vadd.f32 %v2620_v6, %v1330_v20  ;;  %v1386_v24 = vmax.f32 %v1361_v19, 0.0 }
 0x165   :  { %v875_v23 = vpop.f32.mrb[56].mxu0  ;;  %v1235_v29 = vpop.f32.mrb[56].mxu1 }
 0x166   :  { %v1387_v25 = vmax.f32 %v1362_v46, 0.0  ;;  %v971_v26 = vadd.f32 %v875_v23, %v2570_v56  ;;  %v2013_v30 = vpop.f32.mrb[57].mxu0  ;;  %v2081_v31 = vpop.f32.mrb[57].mxu1 }
 0x167   :  { %v878_v33 = vpop.f32.mrb[58].mxu0  ;;  %v1238_v38 = vpop.f32.mrb[58].mxu1 }
 0x168   :  { %v1703_v35 = vpack.c.bf16 %v1387_v25, %v1386_v24  ;;  %v1331_v36 = vadd.f32 %v1235_v29, %v971_v26  ;;  %v972_v51 = vadd.f32 %v878_v33, %v2572_v60  ;;  %v2014_v39 = vpop.f32.mrb[59].mxu0  ;;  %v2082_v41 = vpop.f32.mrb[59].mxu1 }
 0x16a   :  { %1704 = vst [vmem:[%s2713_s3] sm:$0xff] %v1703_v35   ;;  %v1363_v43 = vadd.f32 %v2620_v6, %v1331_v36  ;;  %v1332_v44 = vadd.f32 %v1238_v38, %v972_v51 }
 0x16c   :  { %v1364_v56 = vadd.f32 %v2620_v6, %v1332_v44  ;;  %v1388_v49 = vmax.f32 %v1363_v43, 0.0 }
 0x16d   :  { %v883_v45 = vpop.f32.mrb[60].mxu0  ;;  %v1243_v53 = vpop.f32.mrb[60].mxu1 }
 0x16e   :  { %v1389_v50 = vmax.f32 %v1364_v56, 0.0  ;;  %v973_v52 = vadd.f32 %v883_v45, %v2574_v2  ;;  %v2017_v0 = vpop.f32.mrb[61].mxu0  ;;  %v2085_v60 = vpop.f32.mrb[61].mxu1 }
 0x16f   :  { %v886_v57 = vpop.f32.mrb[62].mxu0  ;;  %v1246_v63 = vpop.f32.mrb[62].mxu1 }
 0x170   :  { %v1708_v58 = vpack.c.bf16 %v1389_v50, %v1388_v49  ;;  %v1333_v61 = vadd.f32 %v1243_v53, %v973_v52  ;;  %v974_v62 = vadd.f32 %v886_v57, %v2576_v7  ;;  %v2018_v1 = vpop.f32.mrb[63].mxu0  ;;  %v2086_v4 = vpop.f32.mrb[63].mxu1 }
 0x172   :  { %1760 = vst [vmem:[%s2713_s3 + $0x8] sm:$0xff] %v1708_v58   ;;  %v1365_v5 = vadd.f32 %v2620_v6, %v1333_v61  ;;  %v1334_v8 = vadd.f32 %v1246_v63, %v974_v62 }
 0x174   :  { %v1366_v2 = vadd.f32 %v2620_v6, %v1334_v8  ;;  %v1390_v11 = vmax.f32 %v1365_v5, 0.0 }
 0x175   :  { %v891_v10 = vpop.f32.mrb[64].mxu0  ;;  %v1251_v16 = vpop.f32.mrb[64].mxu1 }
 0x176   :  { %v1391_v13 = vmax.f32 %v1366_v2, 0.0  ;;  %v975_v14 = vadd.f32 %v891_v10, %v2578_v12  ;;  %v2021_v18 = vpop.f32.mrb[65].mxu0  ;;  %v2089_v7 = vpop.f32.mrb[65].mxu1 }
 0x177   :  { %v894_v19 = vpop.f32.mrb[66].mxu0  ;;  %v1254_v24 = vpop.f32.mrb[66].mxu1 }
 0x178   :  { %v1713_v20 = vpack.c.bf16 %v1391_v13, %v1390_v11  ;;  %v1335_v46 = vadd.f32 %v1251_v16, %v975_v14  ;;  %v976_v23 = vadd.f32 %v894_v19, %v2580_v17  ;;  %v2022_v25 = vpop.f32.mrb[67].mxu0  ;;  %v2090_v26 = vpop.f32.mrb[67].mxu1 }
 0x17a   :  { %1761 = vst [vmem:[%s2713_s3 + $0x10] sm:$0xff] %v1713_v20   ;;  %v1367_v29 = vadd.f32 %v2620_v6, %v1335_v46  ;;  %v1336_v30 = vadd.f32 %v1254_v24, %v976_v23 }
 0x17c   :  { %v1368_v12 = vadd.f32 %v2620_v6, %v1336_v30  ;;  %v1392_v33 = vmax.f32 %v1367_v29, 0.0 }
 0x17d   :  { %v899_v31 = vpop.f32.mrb[68].mxu0  ;;  %v1259_v51 = vpop.f32.mrb[68].mxu1 }
 0x17e   :  { %v1393_v35 = vmax.f32 %v1368_v12, 0.0  ;;  %v977_v36 = vadd.f32 %v899_v31, %v2582_v22  ;;  %v2025_v38 = vpop.f32.mrb[69].mxu0  ;;  %v2093_v17 = vpop.f32.mrb[69].mxu1 }
 0x17f   :  { %v902_v39 = vpop.f32.mrb[70].mxu0  ;;  %v1262_v56 = vpop.f32.mrb[70].mxu1 }
 0x180   :  { %v1718_v41 = vpack.c.bf16 %v1393_v35, %v1392_v33  ;;  %v1337_v43 = vadd.f32 %v1259_v51, %v977_v36  ;;  %v978_v44 = vadd.f32 %v902_v39, %v2584_v27  ;;  %v2026_v45 = vpop.f32.mrb[71].mxu0  ;;  %v2094_v49 = vpop.f32.mrb[71].mxu1 }
 0x182   :  { %1762 = vst [vmem:[%s2713_s3 + $0x18] sm:$0xff] %v1718_v41   ;;  %v1369_v50 = vadd.f32 %v2620_v6, %v1337_v43  ;;  %v1338_v52 = vadd.f32 %v1262_v56, %v978_v44 }
 0x184   :  { %v1370_v22 = vadd.f32 %v2620_v6, %v1338_v52  ;;  %v1394_v0 = vmax.f32 %v1369_v50, 0.0 }
 0x185   :  { %v907_v53 = vpop.f32.mrb[72].mxu0  ;;  %v1267_v58 = vpop.f32.mrb[72].mxu1 }
 0x186   :  { %v1395_v60 = vmax.f32 %v1370_v22, 0.0  ;;  %v979_v57 = vadd.f32 %v907_v53, %v2586_v32  ;;  %v2029_v61 = vpop.f32.mrb[73].mxu0  ;;  %v2097_v27 = vpop.f32.mrb[73].mxu1 }
 0x187   :  { %v910_v62 = vpop.f32.mrb[74].mxu0  ;;  %v1270_v5 = vpop.f32.mrb[74].mxu1 }
 0x188   :  { %v1723_v63 = vpack.c.bf16 %v1395_v60, %v1394_v0  ;;  %v1339_v1 = vadd.f32 %v1267_v58, %v979_v57  ;;  %v980_v4 = vadd.f32 %v910_v62, %v2588_v37  ;;  %v2030_v8 = vpop.f32.mrb[75].mxu0  ;;  %v2098_v2 = vpop.f32.mrb[75].mxu1 }
 0x18a   :  { %1763 = vst [vmem:[%s2713_s3 + $0x20] sm:$0xff] %v1723_v63   ;;  %v1371_v10 = vadd.f32 %v2620_v6, %v1339_v1  ;;  %v1340_v11 = vadd.f32 %v1270_v5, %v980_v4 }
 0x18c   :  { %v1372_v32 = vadd.f32 %v2620_v6, %v1340_v11  ;;  %v1396_v14 = vmax.f32 %v1371_v10, 0.0 }
 0x18d   :  { %v915_v13 = vpop.f32.mrb[76].mxu0  ;;  %v1275_v7 = vpop.f32.mrb[76].mxu1 }
 0x18e   :  { %v1397_v16 = vmax.f32 %v1372_v32, 0.0  ;;  %v981_v18 = vadd.f32 %v915_v13, %v2590_v42  ;;  %v2033_v19 = vpop.f32.mrb[77].mxu0  ;;  %v2101_v37 = vpop.f32.mrb[77].mxu1 }
 0x18f   :  { %v918_v20 = vpop.f32.mrb[78].mxu0  ;;  %v1278_v25 = vpop.f32.mrb[78].mxu1 }
 0x190   :  { %v1728_v46 = vpack.c.bf16 %v1397_v16, %v1396_v14  ;;  %v1341_v23 = vadd.f32 %v1275_v7, %v981_v18  ;;  %v982_v24 = vadd.f32 %v918_v20, %v2592_v48  ;;  %v2034_v26 = vpop.f32.mrb[79].mxu0  ;;  %v2102_v29 = vpop.f32.mrb[79].mxu1 }
 0x192   :  { %1764 = vst [vmem:[%s2713_s3 + $0x28] sm:$0xff] %v1728_v46   ;;  %v1373_v30 = vadd.f32 %v2620_v6, %v1341_v23  ;;  %v1342_v12 = vadd.f32 %v1278_v25, %v982_v24 }
 0x194   :  { %v1374_v42 = vadd.f32 %v2620_v6, %v1342_v12  ;;  %v1398_v33 = vmax.f32 %v1373_v30, 0.0 }
 0x195   :  { %v923_v31 = vpop.f32.mrb[80].mxu0  ;;  %v1283_v51 = vpop.f32.mrb[80].mxu1 }
 0x196   :  { %v1399_v35 = vmax.f32 %v1374_v42, 0.0  ;;  %v983_v36 = vadd.f32 %v923_v31, %v2594_v54  ;;  %v2037_v38 = vpop.f32.mrb[81].mxu0  ;;  %v2105_v48 = vpop.f32.mrb[81].mxu1 }
 0x197   :  { %v926_v17 = vpop.f32.mrb[82].mxu0  ;;  %v1286_v44 = vpop.f32.mrb[82].mxu1 }
 0x198   :  { %v1733_v39 = vpack.c.bf16 %v1399_v35, %v1398_v33  ;;  %v1343_v41 = vadd.f32 %v1283_v51, %v983_v36  ;;  %v984_v43 = vadd.f32 %v926_v17, %v2596_v59  ;;  %v2038_v56 = vpop.f32.mrb[83].mxu0  ;;  %v2106_v45 = vpop.f32.mrb[83].mxu1 }
 0x19a   :  { %1765 = vst [vmem:[%s2713_s3 + $0x30] sm:$0xff] %v1733_v39   ;;  %v1375_v49 = vadd.f32 %v2620_v6, %v1343_v41  ;;  %v1344_v50 = vadd.f32 %v1286_v44, %v984_v43 }
 0x19c   :  { %v1376_v54 = vadd.f32 %v2620_v6, %v1344_v50  ;;  %v1400_v22 = vmax.f32 %v1375_v49, 0.0 }
 0x19d   :  { %v931_v52 = vpop.f32.mrb[84].mxu0  ;;  %v1291_v60 = vpop.f32.mrb[84].mxu1 }
 0x19e   :  { %v1401_v53 = vmax.f32 %v1376_v54, 0.0  ;;  %v985_v0 = vadd.f32 %v931_v52, %v2598_v3  ;;  %v2041_v57 = vpop.f32.mrb[85].mxu0  ;;  %v2109_v59 = vpop.f32.mrb[85].mxu1 }
 0x19f   :  { %v934_v58 = vpop.f32.mrb[86].mxu0  ;;  %v1294_v63 = vpop.f32.mrb[86].mxu1 }
 0x1a0   :  { %v1738_v61 = vpack.c.bf16 %v1401_v53, %v1400_v22  ;;  %v1345_v27 = vadd.f32 %v1291_v60, %v985_v0  ;;  %v986_v62 = vadd.f32 %v934_v58, %v2600_v9  ;;  %v2042_v1 = vpop.f32.mrb[87].mxu0  ;;  %v2110_v4 = vpop.f32.mrb[87].mxu1 }
 0x1a2   :  { %1766 = vst [vmem:[%s2713_s3 + $0x38] sm:$0xff] %v1738_v61   ;;  %v1377_v5 = vadd.f32 %v2620_v6, %v1345_v27  ;;  %v1346_v8 = vadd.f32 %v1294_v63, %v986_v62 }
 0x1a4   :  { %v1378_v3 = vadd.f32 %v2620_v6, %v1346_v8  ;;  %v1402_v10 = vmax.f32 %v1377_v5, 0.0 }
 0x1a5   :  { %v939_v2 = vpop.f32.mrb[88].mxu0  ;;  %v1299_v13 = vpop.f32.mrb[88].mxu1 }
 0x1a6   :  { %v1403_v11 = vmax.f32 %v1378_v3, 0.0  ;;  %v987_v32 = vadd.f32 %v939_v2, %v2602_v15  ;;  %v2045_v14 = vpop.f32.mrb[89].mxu0  ;;  %v2113_v9 = vpop.f32.mrb[89].mxu1 }
 0x1a7   :  { %v942_v16 = vpop.f32.mrb[90].mxu0  ;;  %v1302_v37 = vpop.f32.mrb[90].mxu1 }
 0x1a8   :  { %v1743_v18 = vpack.c.bf16 %v1403_v11, %v1402_v10  ;;  %v1347_v7 = vadd.f32 %v1299_v13, %v987_v32  ;;  %v988_v19 = vadd.f32 %v942_v16, %v2604_v21  ;;  %v2046_v20 = vpop.f32.mrb[91].mxu0  ;;  %v2114_v46 = vpop.f32.mrb[91].mxu1 }
 0x1aa   :  { %1767 = vst [vmem:[%s2713_s3 + $0x40] sm:$0xff] %v1743_v18   ;;  %v1379_v23 = vadd.f32 %v2620_v6, %v1347_v7  ;;  %v1348_v24 = vadd.f32 %v1302_v37, %v988_v19 }
 0x1ac   :  { %v1380_v15 = vadd.f32 %v2620_v6, %v1348_v24  ;;  %v1404_v26 = vmax.f32 %v1379_v23, 0.0 }
 0x1ad   :  { %v947_v25 = vpop.f32.mrb[92].mxu0  ;;  %v1307_v12 = vpop.f32.mrb[92].mxu1 }
 0x1ae   :  { %v1405_v29 = vmax.f32 %v1380_v15, 0.0  ;;  %v989_v30 = vadd.f32 %v947_v25, %v2606_v28  ;;  %v2049_v42 = vpop.f32.mrb[93].mxu0  ;;  %v2117_v21 = vpop.f32.mrb[93].mxu1 }
 0x1af   :  { %v950_v31 = vpop.f32.mrb[94].mxu0  ;;  %v1310_v51 = vpop.f32.mrb[94].mxu1 }
 0x1b0   :  { %v1748_v33 = vpack.c.bf16 %v1405_v29, %v1404_v26  ;;  %v1349_v35 = vadd.f32 %v1307_v12, %v989_v30  ;;  %v990_v36 = vadd.f32 %v950_v31, %v2608_v34  ;;  %v2050_v38 = vpop.f32.mrb[95].mxu0  ;;  %v2118_v48 = vpop.f32.mrb[95].mxu1 }
 0x1b2   :  { %1768 = vst [vmem:[%s2713_s3 + $0x48] sm:$0xff] %v1748_v33   ;;  %v1381_v17 = vadd.f32 %v2620_v6, %v1349_v35  ;;  %v1350_v39 = vadd.f32 %v1310_v51, %v990_v36 }
 0x1b4   :  { %v1382_v28 = vadd.f32 %v2620_v6, %v1350_v39  ;;  %v1406_v43 = vmax.f32 %v1381_v17, 0.0 }
 0x1b5   :  { %v955_v41 = vpop.f32.mrb[96].mxu0  ;;  %v1315_v45 = vpop.f32.mrb[96].mxu1 }
 0x1b6   :  { %v1407_v44 = vmax.f32 %v1382_v28, 0.0  ;;  %v991_v56 = vadd.f32 %v955_v41, %v2610_v40  ;;  %v2053_v49 = vpop.f32.mrb[97].mxu0  ;;  %v2121_v34 = vpop.f32.mrb[97].mxu1 }
 0x1b7   :  { %v958_v50 = vpop.f32.mrb[98].mxu0  ;;  %v1318_v53 = vpop.f32.mrb[98].mxu1 }
 0x1b8   :  { %v1753_v54 = vpack.c.bf16 %v1407_v44, %v1406_v43  ;;  %v1351_v52 = vadd.f32 %v1315_v45, %v991_v56  ;;  %v992_v22 = vadd.f32 %v958_v50, %v2612_v47  ;;  %v2054_v0 = vpop.f32.mrb[99].mxu0  ;;  %v2122_v60 = vpop.f32.mrb[99].mxu1 }
 0x1ba   :  { %1769 = vst [vmem:[%s2713_s3 + $0x50] sm:$0xff] %v1753_v54   ;;  %v1383_v57 = vadd.f32 %v2620_v6, %v1351_v52  ;;  %v1352_v59 = vadd.f32 %v1318_v53, %v992_v22 }
 0x1bc   :  { %v1384_v40 = vadd.f32 %v2620_v6, %v1352_v59  ;;  %v1408_v61 = vmax.f32 %v1383_v57, 0.0 }
 0x1bd   :  { %v963_v58 = vpop.f32.mrb[100].mxu0  ;;  %v1323_v63 = vpop.f32.mrb[100].mxu1 }
 0x1be   :  { %v1409_v27 = vmax.f32 %v1384_v40, 0.0  ;;  %v993_v62 = vadd.f32 %v963_v58, %v2614_v55  ;;  %v2057_v1 = vpop.f32.mrb[101].mxu0  ;;  %v2125_v47 = vpop.f32.mrb[101].mxu1 }
 0x1bf   :  { %v966_v4 = vpop.f32.mrb[102].mxu0  ;;  %v1326_v3 = vpop.f32.mrb[102].mxu1 }
 0x1c0   :  { %v1758_v5 = vpack.c.bf16 %v1409_v27, %v1408_v61  ;;  %v1353_v8 = vadd.f32 %v1323_v63, %v993_v62  ;;  %v2058_v2 = vpop.f32.mrb[103].mxu0  ;;  %v2126_v10 = vpop.f32.mrb[103].mxu1 }
 0x1c2   :  { %1770 = vst [vmem:[%s2713_s3 + $0x58] sm:$0xff] %v1758_v5   ;;  %v1385_v11 = vadd.f32 %v2620_v6, %v1353_v8 }
 0x1c4   :  { %v1410_v32 = vmax.f32 %v1385_v11, 0.0 }
 0x1c6   :  { %v1699_v13 = vpack.c.bf16 %v1410_v32, %v1410_v32 }
 0x1c8   :  { %1536 = vst [vmem:[%s2713_s3 + $0x60] sm:$0xf] %v1699_v13 }

// kernel: convbase_forward.5
= control target key start
LH: loop header
LB: loop body
LE: loop exit
PB: predicated region body
PF: predicated region fallthrough
CT: control target
= control target key end

     0   :  { %v3486_v0 = vmov 0.0   ;;  %vm3487_vm0 = vmmov 0   ;;  %vm107_vm1 = vsmask.f32 7424  ;;  %vm219_vm2 = vcmask 523264   ;;  %s4760_s1 = inlined_call_operand.vmem [shape: bf16[9,64,128], index: 1, kind: input, shape index: {}]   ;;  %s4761_s0 = inlined_call_operand.vmem [shape: bf16[184,64], index: 0, kind: input, shape index: {}]   ;;  %s4762_s2 = inlined_call_operand.vmem [shape: f32[1,128], index: 2, kind: input, shape index: {}]   ;;  %s4763_s3 = inlined_call_operand.vmem [shape: f32[162,128], index: 3, kind: output, shape index: {}]  }
   0x1   :  { %2933 = vmatprep.subr.bf16.mxu0 %v3486_v0  ;;  %3401 = vmatprep.subr.bf16.mxu1 %v3486_v0  ;;  %v3411_v1 = vld [vmem:[%s4760_s1 + $0x20] sm:$0xff]   ;;  %v3412_v2 = vld [vmem:[%s4760_s1 + $0x28] sm:$0xff]   ;;  %v3413_v3 = vld [vmem:[%s4760_s1 + $0x30] sm:$0xff]   ;;  %vm556_vm3 = vcmask 1046528   ;;  %vm1389_vm4 = vsmask.f32 6400 }
   0x2   :  { %2941 = vmatprep.mubr.msk.bf16.mxu0 %vm3487_vm0, %v3486_v0  ;;  %2965 = vmatprep.mubr.msk.bf16.mxu1 %vm3487_vm0, %v3486_v0  ;;  %v15_v4 = vld [vmem:[%s4761_s0] sm:$0xf]  ;;  %v3531_v5 = vld [vmem:[%s4761_s0 + $0x4] sm:$0xf]  ;;  %v3539_v7 = vld [vmem:[%s4761_s0 + $0x8] sm:$0xff]   ;;  %vm2265_vm5 = vcmask 1045504  }
   0x3   :  { %2934 = vmatpush3.bf16.msra.mxu0 %v3411_v1  ;;  %3405 = vmatpush3.bf16.msra.mxu1 %v3411_v1  ;;  %v3534_v6 = vcombine.low %v15_v4, %v3531_v5  ;;  %v116_v10 = vshll.u32 %v3539_v7, 16  ;;  %v3549_v11 = vld [vmem:[%s4761_s0 + $0x30] sm:$0xff]   ;;  %v3554_v12 = vld [vmem:[%s4761_s0 + $0x38] sm:$0xff]   ;;  %v3574_v22 = vld [vmem:[%s4761_s0 + $0x40] sm:$0xff]   ;;  %v120_v25 = vshrl.u32 %v3539_v7, 16 }
   0x4   :  { %2935 = vmatprep.subr.bf16.mxu0 %v3486_v0  ;;  %3402 = vmatprep.subr.bf16.mxu1 %v3486_v0  ;;  %v3414_v13 = vld [vmem:[%s4760_s1 + $0x38] sm:$0xff]   ;;  %v156_v15 = vshll.u32 %v3549_v11, 16  ;;  %v160_v16 = vshrl.u32 %v3549_v11, 16  ;;  %v164_v18 = vshll.u32 %v3554_v12, 16  ;;  %v3569_v21 = vld [vmem:[%s4761_s0 + $0x10] sm:$0xff]   ;;  %v3419_v27 = vld [vmem:[%s4760_s1 + $0x40] sm:$0xff]  }
   0x5   :  { %v109_v8 = vshrl.u32 %v3534_v6, 16  ;;  %v111_v9 = vshll.u32 %v3534_v6, 16  ;;  %v118_v17 = vrot.slane %v116_v10, 1  ;;  %v124_v28 = vshll.u32 %v3569_v21, 16  ;;  %v3420_v32 = vld [vmem:[%s4760_s1] sm:$0xff]   ;;  %v3594_v33 = vld [vmem:[%s4761_s0 + $0x18] sm:$0xff]  }
   0x6   :  { %v3564_v20 = vrot.slane %v156_v15, 1  ;;  %v166_v23 = vrot.slane %v164_v18, 1  ;;  %v168_v29 = vshrl.u32 %v3554_v12, 16  ;;  %v172_v30 = vshll.u32 %v3574_v22, 16  ;;  %v3599_v34 = vld [vmem:[%s4761_s0 + $0x48] sm:$0xff]   ;;  %v3429_v47 = vld [vmem:[%s4760_s1 + $0x50] sm:$0xff]  }
   0x7   :  { %2936 = vmatpush3.bf16.msra.mxu0 %v3412_v2  ;;  %3406 = vmatpush3.bf16.msra.mxu1 %v3412_v2  ;;  %v113_v14 = vrot.slane %v111_v9, 1  ;;  %v122_v35 = vor.u32 %v120_v25, %v118_v17  ;;  %v126_v36 = vrot.slane %v124_v28, 1  ;;  %v3423_v39 = vld [vmem:[%s4760_s1 + $0x48] sm:$0xff]   ;;  %v128_v41 = vshrl.u32 %v3569_v21, 16  ;;  %v3430_v48 = vld [vmem:[%s4760_s1 + $0x10] sm:$0xff]   ;;  %v3638_v53 = vld [vmem:[%s4761_s0 + $0x20] sm:$0xff]  }
   0x8   :  { %2937 = vmatprep.subr.bf16.mxu0 %v3486_v0  ;;  %3403 = vmatprep.subr.bf16.mxu1 %v3486_v0  ;;  %v162_v24 = vor.u32 %v160_v16, %v3564_v20  ;;  %v170_v37 = vor.u32 %v168_v29, %v166_v23  ;;  %v174_v38 = vrot.slane %v172_v30, 1  ;;  %v3426_v40 = vld [vmem:[%s4760_s1 + $0x8] sm:$0xff]   ;;  %v132_v42 = vshll.u32 %v3594_v33, 16  ;;  %v3643_v54 = vld [vmem:[%s4761_s0 + $0x50] ss:$0 sps:$4 sm:$0x33]  }
   0x9   :  { %v114_v19 = vor.u32 %v113_v14, %v109_v8  ;;  %v180_v43 = vshll.u32 %v3599_v34, 16  ;;  %v127_v44 = vsel %vm107_vm1, %v122_v35, %v126_v36  ;;  %v176_v46 = vshrl.u32 %v3574_v22, 16  ;;  %v3432_v55 = vld [vmem:[%s4760_s1 + $0x18] sm:$0xff]   ;;  %v3670_v4 = vld [vmem:[%s4761_s0 + $0x28] sm:$0xff]   ;;  %v3439_v30 = vld [vmem:[%s4760_s1 + $0x70] sm:$0xff]  }
   0xa   :  { %v167_v31 = vsel %vm107_vm1, %v162_v24, %v166_v23  ;;  %v175_v45 = vsel %vm107_vm1, %v170_v37, %v174_v38  ;;  %v134_v49 = vrot.slane %v132_v42, 1  ;;  %v130_v51 = vor.u32 %v128_v41, %v126_v36  ;;  %v3433_v56 = vld [vmem:[%s4760_s1 + $0x58] sm:$0xff]   ;;  %v543_v24 = vld [vmem:[%s4761_s0] sm:$0xe]  ;;  %v3437_v29 = vld [vmem:[%s4760_s1 + $0x68] sm:$0xff]  }
   0xb   :  { %2938 = vmatpush3.bf16.msra.mxu0 %v3413_v3  ;;  %3407 = vmatpush3.bf16.msra.mxu1 %v3413_v3  ;;  %v119_v26 = vsel %vm107_vm1, %v114_v19, %v118_v17  ;;  %v182_v50 = vrot.slane %v180_v43, 1  ;;  %v178_v52 = vor.u32 %v176_v46, %v174_v38  ;;  %v136_v57 = vshrl.u32 %v3594_v33, 16  ;;  %v3440_v36 = vld [vmem:[%s4760_s1 + $0x90] sm:$0xff]   ;;  %v3442_v38 = vld [vmem:[%s4760_s1 + $0x98] sm:$0xff]   ;;  %v1144_v41 = vld [vmem:[%s4761_s0 + $0x4] sm:$0xe] }
   0xc   :  { %2939 = vmatprep.subr.bf16.mxu0 %v3486_v0  ;;  %3404 = vmatprep.subr.bf16.mxu1 %v3486_v0  ;;  %v184_v58 = vshrl.u32 %v3599_v34, 16  ;;  %v135_v59 = vsel %vm107_vm1, %v130_v51, %v134_v49  ;;  %v140_v61 = vshll.u32 %v3638_v53, 16  ;;  %v188_v62 = vshll.u32 %v3643_v54, 16  ;;  %v3780_v43 = vld [vmem:[%s4761_s0 + $0xc] sm:$0xff]  }
   0xd   :  { %v183_v60 = vsel %vm107_vm1, %v178_v52, %v182_v50  ;;  %v138_v63 = vor.u32 %v136_v57, %v134_v49  ;;  %v144_v10 = vshrl.u32 %v3638_v53, 16  ;;  %v192_v14 = vshrl.u32 %v3643_v54, 16  ;;  %v3805_v57 = vld [vmem:[%s4761_s0 + $0x14] sm:$0xff]  }
   0xe   :  { %v142_v1 = vrot.slane %v140_v61, 1  ;;  %v186_v2 = vor.u32 %v184_v58, %v182_v50  ;;  %v190_v3 = vrot.slane %v188_v62, 1  ;;  %v152_v19 = vshrl.u32 %v3670_v4, 16 }
   0xf   :  { %2940 = vmatpush3.bf16.msra.mxu0 %v3414_v13  ;;  %3408 = vmatpush3.bf16.msra.mxu1 %v3414_v13  ;;  %v148_v13 = vshll.u32 %v3670_v4, 16  ;;  %v558_v28 = vrot.slane %v3539_v7, 1  ;;  %v562_v37 = vrot.slane %v3594_v33, 1  ;;  %v570_v61 = vrot.slane %v3554_v12, 1 }
  0x10   :  { %3037 = vmatprep.subr.bf16.mxu0 %v3486_v0  ;;  %2985 = vmatprep.subr.bf16.mxu1 %v3486_v0  ;;  %v143_v8 = vsel %vm107_vm1, %v138_v63, %v142_v1  ;;  %v191_v9 = vsel %vm107_vm1, %v186_v2, %v190_v3  ;;  %v146_v15 = vor.u32 %v144_v10, %v142_v1  ;;  %v875_v62 = vshll.u32 %v3805_v57, 16  ;;  %v776_v10 = vld [vmem:[%s4761_s0 + $0x4] sm:$0xf] }
  0x11   :  { %v150_v16 = vrot.slane %v148_v13, 1  ;;  %v194_v17 = vor.u32 %v192_v14, %v190_v3  ;;  %v879_v63 = vshrl.u32 %v3805_v57, 16 }
  0x12   :  { %2942 = vmatmul.mubr.msk.bf16.vlgmr.msra.gmra.mrb[0].mxu0 %vm219_vm2, %v119_v26  ;;  %2966 = vmatmul.mubr.msk.bf16.vlgmr.msra.gmra.mrb[0].mxu1 %vm219_vm2, %v167_v31  ;;  %v3434_v26 = vld [vmem:[%s4760_s1 + $0x60] sm:$0xff]   ;;  %v560_v31 = vrot.slane %v3569_v21, 1  ;;  %v1403_v2 = vrot.slane %v875_v62, 2 }
  0x13   :  { %3038 = vmatpush3.bf16.msra.mxu0 %v3419_v27  ;;  %2945 = vmatprep.mubr.msk.bf16.mxu0 %vm3487_vm0, %v3486_v0  ;;  %v151_v18 = vsel %vm107_vm1, %v146_v15, %v150_v16  ;;  %v154_v23 = vor.u32 %v152_v19, %v150_v16  ;;  %v2617_v27 = vcombine.low %v543_v24, %v3531_v5  ;;  %v3436_v5 = vld [vmem:[%s4760_s1 + $0x80] sm:$0xff]   ;;  %v1402_v1 = vrot.slane %v879_v63, 1  ;;  %v3443_v16 = vld [vmem:[%s4761_s0 + $0x50] ss:$0 sps:$4 sm:$0x11]  }
  0x14   :  { %2969 = vmatprep.mubr.msk.bf16.mxu1 %vm3487_vm0, %v3486_v0  ;;  %2986 = vmatpush3.bf16.msra.mxu1 %v3420_v32  ;;  %v3438_v32 = vld [vmem:[%s4760_s1 + $0x88] sm:$0xff]   ;;  %v561_v35 = vsel %vm556_vm3, %v558_v28, %v560_v31  ;;  %v3446_v24 = vld [vmem:[%s4760_s1 + $0xa0] sm:$0xff]  }
  0x15   :  { %3039 = vmatprep.subr.bf16.mxu0 %v3486_v0  ;;  %2987 = vmatprep.subr.bf16.mxu1 %v3486_v0  ;;  %v159_v25 = vsel %vm107_vm1, %v154_v23, %v3564_v20  ;;  %v557_v20 = vrot.slane %v2617_v27, 1 }
  0x17   :  { %3040 = vmatpush3.bf16.msra.mxu0 %v3423_v39  ;;  %v564_v39 = vrot.slane %v3638_v53, 1 }
  0x18   :  { %2988 = vmatpush3.bf16.msra.mxu1 %v3426_v40  ;;  %3041 = vmatprep.subr.bf16.mxu0 %v3486_v0 }
  0x19   :  { %2989 = vmatprep.subr.bf16.mxu1 %v3486_v0  ;;  %v565_v40 = vsel %vm556_vm3, %v562_v37, %v564_v39 }
  0x1a   :  { %2946 = vmatmul.mubr.msk.bf16.gmra.mrb[4].mxu0 %vm219_vm2, %v127_v44  ;;  %2970 = vmatmul.mubr.msk.bf16.gmra.mrb[4].mxu1 %vm219_vm2, %v175_v45  ;;  %v777_v44 = vld [vmem:[%s4761_s0 + $0x8] sm:$0xf]  ;;  %v871_v45 = vshrl.u32 %v3780_v43, 16 }
  0x1b   :  { %2949 = vmatprep.mubr.msk.bf16.mxu0 %vm3487_vm0, %v3486_v0  ;;  %2973 = vmatprep.mubr.msk.bf16.mxu1 %vm3487_vm0, %v3486_v0  ;;  %v3786_v46 = vcombine.low %v1144_v41, %v777_v44  ;;  %v2641_v14 = vcombine.low %v776_v10, %v777_v44 }
  0x1c   :  { %3042 = vmatpush3.bf16.msra.mxu0 %v3429_v47  ;;  %2990 = vmatpush3.bf16.msra.mxu1 %v3430_v48  ;;  %v568_v47 = vrot.slane %v3549_v11, 1  ;;  %v867_v48 = vshll.u32 %v3780_v43, 16  ;;  %v1398_v49 = vrot.slane %v871_v45, 1 }
  0x1d   :  { %2991 = vmatprep.subr.bf16.mxu1 %v3486_v0  ;;  %3043 = vmatprep.subr.bf16.mxu0 %v3486_v0  ;;  %v1391_v50 = vshrl.u32 %v3786_v46, 16  ;;  %v1394_v51 = vshll.u32 %v3786_v46, 16  ;;  %v862_v15 = vshll.u32 %v2641_v14, 16  ;;  %v1157_v27 = vrot.slane %v3786_v46, 1  ;;  %v3943_v46 = vld [vmem:[%s4761_s0 + $0x2c] sm:$0xff]  }
  0x1e   :  { %v571_v3 = vsel %vm556_vm3, %v568_v47, %v570_v61 }
  0x1f   :  { %v1393_v52 = vrot.slane %v1391_v50, 1  ;;  %v864_v19 = vrot.slane %v862_v15, 1 }
  0x20   :  { %2992 = vmatpush3.bf16.msra.mxu1 %v3432_v55  ;;  %3044 = vmatpush3.bf16.msra.mxu0 %v3433_v56  ;;  %v1399_v55 = vrot.slane %v867_v48, 2 }
  0x21   :  { %3089 = vmatprep.subr.bf16.mxu1 %v3486_v0  ;;  %3141 = vmatprep.subr.bf16.mxu0 %v3486_v0 }
  0x22   :  { %2950 = vmatmul.mubr.msk.bf16.gmra.mrb[8].mxu0 %vm219_vm2, %v135_v59  ;;  %2974 = vmatmul.mubr.msk.bf16.gmra.mrb[8].mxu1 %vm219_vm2, %v183_v60  ;;  %v1400_v59 = vor.u32 %v1399_v55, %v1398_v49 }
  0x23   :  { %2953 = vmatprep.mubr.msk.bf16.mxu0 %vm3487_vm0, %v3486_v0  ;;  %2977 = vmatprep.mubr.msk.bf16.mxu1 %vm3487_vm0, %v3486_v0 }
  0x2a   :  { %2954 = vmatmul.mubr.msk.bf16.gmra.mrb[12].mxu0 %vm219_vm2, %v143_v8  ;;  %2978 = vmatmul.mubr.msk.bf16.gmra.mrb[12].mxu1 %vm219_vm2, %v191_v9  ;;  %v572_v8 = vrot.slane %v3574_v22, 1 }
  0x2b   :  { %2957 = vmatprep.mubr.msk.bf16.mxu0 %vm3487_vm0, %v3486_v0  ;;  %2981 = vmatprep.mubr.msk.bf16.mxu1 %vm3487_vm0, %v3486_v0 }
  0x2c   :  { %v573_v9 = vsel %vm556_vm3, %v570_v61, %v572_v8 }
  0x32   :  { %2958 = vmatmul.mubr.msk.bf16.gmra.mrb[16].mxu0 %vm219_vm2, %v151_v18  ;;  %2982 = vmatmul.mubr.msk.bf16.gmra.mrb[16].mxu1 %vm219_vm2, %v194_v17  ;;  %v860_v18 = vshrl.u32 %v2641_v14, 16 }
  0x33   :  { %2961 = vmatprep.mubr.msk.bf16.mxu0 %vm3487_vm0, %v3486_v0  ;;  %2993 = vmatprep.mubr.msk.bf16.mxu1 %vm3487_vm0, %v3486_v0 }
  0x3a   :  { %2962 = vmatmul.mubr.msk.bf16.gmra.mrb[20].mxu0 %vm219_vm2, %v159_v25  ;;  %2994 = vmatmul.mubr.msk.bf16.vlgmr.msra.gmra.mrb[20].mxu1 %vm219_vm2, %v3534_v6  ;;  %v559_v6 = vsel %vm556_vm3, %v557_v20, %v558_v28  ;;  %v1158_v28 = vrot.slane %v3780_v43, 1  ;;  %v3883_v20 = vld [vmem:[%s4761_s0 + $0x1c] sm:$0xff]  }
  0x3b   :  { %2997 = vmatprep.mubr.msk.bf16.mxu1 %vm3487_vm0, %v3486_v0  ;;  %3045 = vmatprep.mubr.msk.bf16.mxu0 %vm3487_vm0, %v3486_v0 }
  0x3c   :  { %3090 = vmatpush3.bf16.msra.mxu1 %v3434_v26  ;;  %v877_v26 = vrot.slane %v875_v62, 1 }
  0x3d   :  { %3091 = vmatprep.subr.bf16.mxu1 %v3486_v0 }
  0x40   :  { %3092 = vmatpush3.bf16.msra.mxu1 %v3437_v29  ;;  %v3452_v29 = vld [vmem:[%s4760_s1 + $0xa8] sm:$0xff]  }
  0x41   :  { %3093 = vmatprep.subr.bf16.mxu1 %v3486_v0 }
  0x42   :  { %2998 = vmatmul.mubr.msk.bf16.gmra.mrb[24].mxu1 %vm219_vm2, %v3539_v7  ;;  %3046 = vmatmul.mubr.msk.bf16.vlgmr.msra.gmra.mrb[24].mxu0 %vm219_vm2, %v559_v6  ;;  %v3441_v7 = vld [vmem:[%s4760_s1 + $0x78] sm:$0xff]   ;;  %v1159_v6 = vsel %vm556_vm3, %v1157_v27, %v1158_v28 }
  0x43   :  { %3142 = vmatpush3.bf16.msra.mxu0 %v3436_v5  ;;  %3001 = vmatprep.mubr.msk.bf16.mxu1 %vm3487_vm0, %v3486_v0 }
  0x44   :  { %3049 = vmatprep.mubr.msk.bf16.mxu0 %vm3487_vm0, %v3486_v0  ;;  %3143 = vmatprep.subr.bf16.mxu0 %v3486_v0 }
  0x45   :  { %3094 = vmatpush3.bf16.msra.mxu1 %v3439_v30  ;;  %v3449_v30 = vld [vmem:[%s4760_s1 + $0xc0] sm:$0xff]  }
  0x46   :  { %3095 = vmatprep.subr.bf16.mxu1 %v3486_v0 }
  0x47   :  { %3144 = vmatpush3.bf16.msra.mxu0 %v3438_v32  ;;  %v3457_v32 = vld [vmem:[%s4760_s1 + $0xb0] sm:$0xff]  }
  0x48   :  { %3145 = vmatprep.subr.bf16.mxu0 %v3486_v0 }
  0x49   :  { %3096 = vmatpush3.bf16.msra.mxu1 %v3441_v7  ;;  %v881_v7 = vor.u32 %v879_v63, %v877_v26 }
  0x4a   :  { %3002 = vmatmul.mubr.msk.bf16.gmra.mrb[28].mxu1 %vm219_vm2, %v3569_v21  ;;  %3050 = vmatmul.mubr.msk.bf16.gmra.mrb[28].mxu0 %vm219_vm2, %v561_v35  ;;  %v563_v21 = vsel %vm556_vm3, %v560_v31, %v562_v37  ;;  %v883_v31 = vshll.u32 %v3883_v20, 16  ;;  %v3909_v37 = vld [vmem:[%s4761_s0 + $0x24] sm:$0xff]  }
  0x4b   :  { %3005 = vmatprep.mubr.msk.bf16.mxu1 %vm3487_vm0, %v3486_v0  ;;  %3053 = vmatprep.mubr.msk.bf16.mxu0 %vm3487_vm0, %v3486_v0  ;;  %v891_v41 = vshll.u32 %v3909_v37, 16  ;;  %v895_v50 = vshrl.u32 %v3909_v37, 16  ;;  %v1164_v55 = vrot.slane %v3909_v37, 1 }
  0x4c   :  { %3146 = vmatpush3.bf16.msra.mxu0 %v3440_v36  ;;  %3193 = vmatprep.subr.bf16.mxu1 %v3486_v0  ;;  %v885_v35 = vrot.slane %v883_v31, 1  ;;  %v1160_v36 = vrot.slane %v3805_v57, 1 }
  0x4d   :  { %3147 = vmatprep.subr.bf16.mxu0 %v3486_v0  ;;  %v893_v44 = vrot.slane %v891_v41, 1 }
  0x50   :  { %3148 = vmatpush3.bf16.msra.mxu0 %v3442_v38  ;;  %v3453_v38 = vld [vmem:[%s4760_s1 + $0xc8] sm:$0xff]  }
  0x51   :  { %3245 = vmatprep.subr.bf16.mxu0 %v3486_v0 }
  0x52   :  { %3006 = vmatmul.mubr.msk.bf16.gmra.mrb[32].mxu1 %vm219_vm2, %v3594_v33  ;;  %3054 = vmatmul.mubr.msk.bf16.gmra.mrb[32].mxu0 %vm219_vm2, %v563_v21  ;;  %v566_v33 = vrot.slane %v3670_v4, 1  ;;  %v3462_v21 = vld [vmem:[%s4760_s1 + $0xb8] sm:$0xff]  }
  0x53   :  { %3009 = vmatprep.mubr.msk.bf16.mxu1 %vm3487_vm0, %v3486_v0  ;;  %3057 = vmatprep.mubr.msk.bf16.mxu0 %vm3487_vm0, %v3486_v0 }
  0x54   :  { %v567_v42 = vsel %vm556_vm3, %v564_v39, %v566_v33  ;;  %v569_v56 = vsel %vm556_vm3, %v566_v33, %v568_v47  ;;  %v886_v39 = vsel %vm107_vm1, %v881_v7, %v885_v35  ;;  %v887_v33 = vshrl.u32 %v3883_v20, 16  ;;  %v3463_v47 = vld [vmem:[%s4760_s1 + $0xd8] sm:$0xff]  }
  0x56   :  { %v889_v43 = vor.u32 %v887_v33, %v885_v35 }
  0x5a   :  { %3010 = vmatmul.mubr.msk.bf16.gmra.mrb[36].mxu1 %vm219_vm2, %v3638_v53  ;;  %3058 = vmatmul.mubr.msk.bf16.gmra.mrb[36].mxu0 %vm219_vm2, %v565_v40  ;;  %v1396_v53 = vrot.slane %v1394_v51, 2  ;;  %v1161_v40 = vsel %vm556_vm3, %v1158_v28, %v1160_v36  ;;  %v899_v51 = vshll.u32 %v3943_v46, 16 }
  0x5b   :  { %3013 = vmatprep.mubr.msk.bf16.mxu1 %vm3487_vm0, %v3486_v0  ;;  %3061 = vmatprep.mubr.msk.bf16.mxu0 %vm3487_vm0, %v3486_v0 }
  0x5c   :  { %v1397_v58 = vor.u32 %v1396_v53, %v1393_v52  ;;  %v897_v52 = vor.u32 %v895_v50, %v893_v44  ;;  %v901_v53 = vrot.slane %v899_v51, 1 }
  0x5e   :  { %v3808_v60 = vsel %vm1389_vm4, %v1397_v58, %v1400_v59  ;;  %v902_v57 = vsel %vm107_vm1, %v897_v52, %v901_v53 }
  0x62   :  { %3014 = vmatmul.mubr.msk.bf16.gmra.mrb[40].mxu1 %vm219_vm2, %v3670_v4  ;;  %3062 = vmatmul.mubr.msk.bf16.gmra.mrb[40].mxu0 %vm219_vm2, %v567_v42  ;;  %v3821_v4 = vor.u32 %v1403_v2, %v1402_v1  ;;  %v3458_v42 = vld [vmem:[%s4760_s1 + $0xd0] sm:$0xff]   ;;  %v1166_v1 = vrot.slane %v3943_v46, 1  ;;  %v3989_v2 = vld [vmem:[%s4761_s0 + $0x3c] sm:$0xff]  }
  0x63   :  { %3017 = vmatprep.mubr.msk.bf16.mxu1 %vm3487_vm0, %v3486_v0  ;;  %3065 = vmatprep.mubr.msk.bf16.mxu0 %vm3487_vm0, %v3486_v0 }
  0x6a   :  { %3018 = vmatmul.mubr.msk.bf16.gmra.mrb[44].mxu1 %vm219_vm2, %v3549_v11  ;;  %3066 = vmatmul.mubr.msk.bf16.gmra.mrb[44].mxu0 %vm219_vm2, %v569_v56  ;;  %v3825_v11 = vsel %vm1389_vm4, %v1400_v59, %v3821_v4  ;;  %v3969_v56 = vld [vmem:[%s4761_s0 + $0x34] sm:$0xff]   ;;  %v903_v59 = vshrl.u32 %v3943_v46, 16 }
  0x6b   :  { %3021 = vmatprep.mubr.msk.bf16.mxu1 %vm3487_vm0, %v3486_v0  ;;  %3069 = vmatprep.mubr.msk.bf16.mxu0 %vm3487_vm0, %v3486_v0  ;;  %v907_v61 = vshll.u32 %v3969_v56, 16  ;;  %v1168_v14 = vrot.slane %v3969_v56, 1 }
  0x6c   :  { %v905_v62 = vor.u32 %v903_v59, %v901_v53 }
  0x6d   :  { %v909_v63 = vrot.slane %v907_v61, 1 }
  0x72   :  { %3022 = vmatmul.mubr.msk.bf16.gmra.mrb[48].mxu1 %vm219_vm2, %v3554_v12  ;;  %3070 = vmatmul.mubr.msk.bf16.gmra.mrb[48].mxu0 %vm219_vm2, %v571_v3  ;;  %v574_v12 = vrot.slane %v3599_v34, 1  ;;  %v910_v3 = vsel %vm107_vm1, %v905_v62, %v909_v63 }
  0x73   :  { %3025 = vmatprep.mubr.msk.bf16.mxu1 %vm3487_vm0, %v3486_v0  ;;  %3073 = vmatprep.mubr.msk.bf16.mxu0 %vm3487_vm0, %v3486_v0 }
  0x74   :  { %v575_v13 = vsel %vm556_vm3, %v572_v8, %v574_v12  ;;  %v1167_v8 = vsel %vm556_vm3, %v1164_v55, %v1166_v1 }
  0x7a   :  { %3026 = vmatmul.mubr.msk.bf16.gmra.mrb[52].mxu1 %vm219_vm2, %v3574_v22  ;;  %3074 = vmatmul.mubr.msk.bf16.gmra.mrb[52].mxu0 %vm219_vm2, %v573_v9  ;;  %v576_v22 = vrot.slane %v3643_v54, 1  ;;  %v869_v54 = vrot.slane %v867_v48, 1  ;;  %v894_v48 = vsel %vm107_vm1, %v889_v43, %v893_v44  ;;  %v911_v9 = vshrl.u32 %v3969_v56, 16 }
  0x7b   :  { %3029 = vmatprep.mubr.msk.bf16.mxu1 %vm3487_vm0, %v3486_v0  ;;  %3077 = vmatprep.mubr.msk.bf16.mxu0 %vm3487_vm0, %v3486_v0 }
  0x7c   :  { %v577_v17 = vsel %vm556_vm3, %v574_v12, %v576_v22  ;;  %v873_v25 = vor.u32 %v871_v45, %v869_v54  ;;  %v1162_v45 = vrot.slane %v3883_v20, 1  ;;  %v915_v12 = vshll.u32 %v3989_v2, 16 }
  0x7d   :  { %v913_v10 = vor.u32 %v911_v9, %v909_v63  ;;  %v4098_v63 = vld [vmem:[%s4761_s0 + $0x10] sm:$0xff]  }
  0x7e   :  { %v878_v5 = vsel %vm107_vm1, %v873_v25, %v877_v26  ;;  %v1163_v49 = vsel %vm556_vm3, %v1160_v36, %v1162_v45  ;;  %v1165_v58 = vsel %vm556_vm3, %v1162_v45, %v1164_v55 }
  0x82   :  { %3030 = vmatmul.mubr.msk.bf16.gmra.mrb[56].mxu1 %vm219_vm2, %v3599_v34  ;;  %3078 = vmatmul.mubr.msk.bf16.gmra.mrb[56].mxu0 %vm219_vm2, %v575_v13  ;;  %v865_v34 = vor.u32 %v864_v19, %v860_v18  ;;  %v917_v13 = vrot.slane %v915_v12, 1 }
  0x83   :  { %3033 = vmatprep.mubr.msk.bf16.mxu1 %vm3487_vm0, %v3486_v0  ;;  %3081 = vmatprep.mubr.msk.bf16.mxu0 %vm3487_vm0, %v3486_v0 }
  0x84   :  { %v870_v23 = vsel %vm107_vm1, %v865_v34, %v869_v54  ;;  %v918_v15 = vsel %vm107_vm1, %v913_v10, %v917_v13  ;;  %v1170_v54 = vrot.slane %v3989_v2, 1 }
  0x86   :  { %v1171_v25 = vsel %vm556_vm3, %v1168_v14, %v1170_v54 }
  0x8a   :  { %3034 = vmatmul.mubr.msk.bf16.gmra.mrb[60].mxu1 %vm219_vm2, %v3443_v16  ;;  %3082 = vmatmul.mubr.msk.bf16.gmra.mrb[60].mxu0 %vm219_vm2, %v577_v17  ;;  %v1169_v16 = vsel %vm556_vm3, %v1166_v1, %v1168_v14  ;;  %v919_v17 = vshrl.u32 %v3989_v2, 16  ;;  %v3470_v14 = vld [vmem:[%s4760_s1 + $0xe8] sm:$0xff]  }
  0x8b   :  { %3085 = vmatprep.mubr.msk.bf16.mxu0 %vm3487_vm0, %v3486_v0  ;;  %3097 = vmatprep.mubr.msk.bf16.mxu1 %vm3487_vm0, %v3486_v0 }
  0x8c   :  { %v921_v19 = vor.u32 %v919_v17, %v917_v13  ;;  %v1725_v13 = vrot.slane %v4098_v63, 1 }
  0x92   :  { %3086 = vmatmul.mubr.msk.bf16.gmra.mrb[64].mxu0 %vm219_vm2, %v576_v22  ;;  %3098 = vmatmul.mubr.msk.bf16.vlgmr.msra.gmra.mrb[64].mxu1 %vm219_vm2, %v870_v23  ;;  %v4009_v22 = vld [vmem:[%s4761_s0 + $0x44] sm:$0xff]   ;;  %v4029_v23 = vld [vmem:[%s4761_s0 + $0x4c] sm:$0xff]  }
  0x93   :  { %3101 = vmatprep.mubr.msk.bf16.mxu1 %vm3487_vm0, %v3486_v0  ;;  %3149 = vmatprep.mubr.msk.bf16.mxu0 %vm3487_vm0, %v3486_v0  ;;  %v923_v18 = vshll.u32 %v4009_v22, 16  ;;  %v927_v26 = vshrl.u32 %v4009_v22, 16  ;;  %v931_v27 = vshll.u32 %v4029_v23, 16  ;;  %v935_v7 = vshrl.u32 %v4029_v23, 16 }
  0x94   :  { %3194 = vmatpush3.bf16.msra.mxu1 %v3446_v24 }
  0x95   :  { %3195 = vmatprep.subr.bf16.mxu1 %v3486_v0  ;;  %v925_v34 = vrot.slane %v923_v18, 1 }
  0x97   :  { %v926_v24 = vsel %vm107_vm1, %v921_v19, %v925_v34  ;;  %v929_v28 = vor.u32 %v927_v26, %v925_v34 }
  0x98   :  { %3196 = vmatpush3.bf16.msra.mxu1 %v3452_v29  ;;  %v933_v29 = vrot.slane %v931_v27, 1 }
  0x99   :  { %3197 = vmatprep.subr.bf16.mxu1 %v3486_v0 }
  0x9a   :  { %3102 = vmatmul.mubr.msk.bf16.gmra.mrb[68].mxu1 %vm219_vm2, %v878_v5  ;;  %3150 = vmatmul.mubr.msk.bf16.vlgmr.msra.gmra.mrb[68].mxu0 %vm219_vm2, %v1159_v6  ;;  %v1172_v5 = vrot.slane %v4009_v22, 1  ;;  %v3461_v6 = vld [vmem:[%s4761_s0 + $0x54] ss:$0 sps:$4 sm:$0x33]   ;;  %v937_v36 = vor.u32 %v935_v7, %v933_v29 }
  0x9b   :  { %3246 = vmatpush3.bf16.msra.mxu0 %v3449_v30  ;;  %3105 = vmatprep.mubr.msk.bf16.mxu1 %vm3487_vm0, %v3486_v0  ;;  %v934_v30 = vsel %vm107_vm1, %v929_v28, %v933_v29  ;;  %v939_v35 = vshll.u32 %v3461_v6, 16  ;;  %v1176_v43 = vrot.slane %v3461_v6, 1  ;;  %v1406_v28 = vrot.slane %v887_v33, 1  ;;  %v3471_v33 = vld [vmem:[%s4760_s1 + $0x108] sm:$0xff]  }
  0x9c   :  { %3153 = vmatprep.mubr.msk.bf16.mxu0 %vm3487_vm0, %v3486_v0  ;;  %3247 = vmatprep.subr.bf16.mxu0 %v3486_v0  ;;  %v1407_v29 = vrot.slane %v883_v31, 2 }
  0x9d   :  { %3198 = vmatpush3.bf16.msra.mxu1 %v3457_v32  ;;  %v1173_v32 = vsel %vm556_vm3, %v1170_v54, %v1172_v5 }
  0x9e   :  { %3199 = vmatprep.subr.bf16.mxu1 %v3486_v0  ;;  %v1408_v20 = vor.u32 %v1407_v29, %v1406_v28  ;;  %v4209_v28 = vld [vmem:[%s4761_s0 + $0x28] sm:$0xff]  }
  0x9f   :  { %3248 = vmatpush3.bf16.msra.mxu0 %v3453_v38  ;;  %v941_v38 = vrot.slane %v939_v35, 1 }
  0xa0   :  { %3249 = vmatprep.subr.bf16.mxu0 %v3486_v0 }
  0xa1   :  { %3200 = vmatpush3.bf16.msra.mxu1 %v3462_v21  ;;  %v1174_v21 = vrot.slane %v4029_v23, 1 }
  0xa2   :  { %3106 = vmatmul.mubr.msk.bf16.gmra.mrb[72].mxu1 %vm219_vm2, %v886_v39  ;;  %3154 = vmatmul.mubr.msk.bf16.gmra.mrb[72].mxu0 %vm219_vm2, %v1161_v40  ;;  %v942_v39 = vsel %vm107_vm1, %v937_v36, %v941_v38  ;;  %v3481_v36 = vld [vmem:[%s4760_s1 + $0xf8] sm:$0xff]  }
  0xa3   :  { %3109 = vmatprep.mubr.msk.bf16.mxu1 %vm3487_vm0, %v3486_v0  ;;  %3157 = vmatprep.mubr.msk.bf16.mxu0 %vm3487_vm0, %v3486_v0  ;;  %v1175_v40 = vsel %vm556_vm3, %v1172_v5, %v1174_v21  ;;  %v1177_v45 = vsel %vm556_vm3, %v1174_v21, %v1176_v43  ;;  %v4135_v5 = vld [vmem:[%s4761_s0 + $0x18] sm:$0xff]  }
  0xa4   :  { %3250 = vmatpush3.bf16.msra.mxu0 %v3458_v42  ;;  %3297 = vmatprep.subr.bf16.mxu1 %v3486_v0  ;;  %v943_v42 = vshrl.u32 %v3461_v6, 16  ;;  %v1727_v31 = vrot.slane %v4135_v5, 1 }
  0xa5   :  { %3251 = vmatprep.subr.bf16.mxu0 %v3486_v0 }
  0xa6   :  { %v945_v44 = vor.u32 %v943_v42, %v941_v38  ;;  %v1728_v42 = vsel %vm556_vm3, %v1725_v13, %v1727_v31 }
  0xa8   :  { %3252 = vmatpush3.bf16.msra.mxu0 %v3463_v47  ;;  %v1641_v47 = vld [vmem:[%s4761_s0 + $0x8] sm:$0xe] }
  0xa9   :  { %3349 = vmatprep.subr.bf16.mxu0 %v3486_v0 }
  0xaa   :  { %3110 = vmatmul.mubr.msk.bf16.gmra.mrb[76].mxu1 %vm219_vm2, %v894_v48  ;;  %3158 = vmatmul.mubr.msk.bf16.gmra.mrb[76].mxu0 %vm219_vm2, %v1163_v49  ;;  %v4082_v48 = vld [vmem:[%s4761_s0 + $0xc] sm:$0xf] }
  0xab   :  { %3113 = vmatprep.mubr.msk.bf16.mxu1 %vm3487_vm0, %v3486_v0  ;;  %3161 = vmatprep.mubr.msk.bf16.mxu0 %vm3487_vm0, %v3486_v0  ;;  %v4093_v62 = vcombine.low %v1641_v47, %v4082_v48  ;;  %v4175_v47 = vld [vmem:[%s4761_s0 + $0x20] sm:$0xff]  }
  0xad   :  { %v1724_v10 = vrot.slane %v4093_v62, 1 }
  0xaf   :  { %v1726_v54 = vsel %vm556_vm3, %v1724_v10, %v1725_v13 }
  0xb2   :  { %3114 = vmatmul.mubr.msk.bf16.gmra.mrb[80].mxu1 %vm219_vm2, %v902_v57  ;;  %3162 = vmatmul.mubr.msk.bf16.gmra.mrb[80].mxu0 %vm219_vm2, %v1165_v58 }
  0xb3   :  { %3117 = vmatprep.mubr.msk.bf16.mxu1 %vm3487_vm0, %v3486_v0  ;;  %3165 = vmatprep.mubr.msk.bf16.mxu0 %vm3487_vm0, %v3486_v0 }
  0xba   :  { %3118 = vmatmul.mubr.msk.bf16.gmra.mrb[84].mxu1 %vm219_vm2, %v910_v3  ;;  %3166 = vmatmul.mubr.msk.bf16.gmra.mrb[84].mxu0 %vm219_vm2, %v1167_v8  ;;  %v3464_v8 = vld [vmem:[%s4760_s1 + $0xe0] sm:$0xff]  }
  0xbb   :  { %3121 = vmatprep.mubr.msk.bf16.mxu1 %vm3487_vm0, %v3486_v0  ;;  %3169 = vmatprep.mubr.msk.bf16.mxu0 %vm3487_vm0, %v3486_v0 }
  0xc2   :  { %3122 = vmatmul.mubr.msk.bf16.gmra.mrb[88].mxu1 %vm219_vm2, %v918_v15  ;;  %3170 = vmatmul.mubr.msk.bf16.gmra.mrb[88].mxu0 %vm219_vm2, %v1169_v16 }
  0xc3   :  { %3125 = vmatprep.mubr.msk.bf16.mxu1 %vm3487_vm0, %v3486_v0  ;;  %3173 = vmatprep.mubr.msk.bf16.mxu0 %vm3487_vm0, %v3486_v0 }
  0xca   :  { %3126 = vmatmul.mubr.msk.bf16.gmra.mrb[92].mxu1 %vm219_vm2, %v926_v24  ;;  %3174 = vmatmul.mubr.msk.bf16.gmra.mrb[92].mxu0 %vm219_vm2, %v1171_v25  ;;  %v3467_v25 = vld [vmem:[%s4760_s1 + $0x100] sm:$0xff]  }
  0xcb   :  { %3129 = vmatprep.mubr.msk.bf16.mxu1 %vm3487_vm0, %v3486_v0  ;;  %3177 = vmatprep.mubr.msk.bf16.mxu0 %vm3487_vm0, %v3486_v0 }
  0xd2   :  { %3130 = vmatmul.mubr.msk.bf16.gmra.mrb[96].mxu1 %vm219_vm2, %v934_v30  ;;  %3178 = vmatmul.mubr.msk.bf16.gmra.mrb[96].mxu0 %vm219_vm2, %v1173_v32  ;;  %v3475_v32 = vld [vmem:[%s4760_s1 + $0xf0] sm:$0xff]  }
  0xd3   :  { %3133 = vmatprep.mubr.msk.bf16.mxu1 %vm3487_vm0, %v3486_v0  ;;  %3181 = vmatprep.mubr.msk.bf16.mxu0 %vm3487_vm0, %v3486_v0 }
  0xda   :  { %3134 = vmatmul.mubr.msk.bf16.gmra.mrb[100].mxu1 %vm219_vm2, %v942_v39  ;;  %3182 = vmatmul.mubr.msk.bf16.gmra.mrb[100].mxu0 %vm219_vm2, %v1175_v40  ;;  %v1409_v40 = vsel %vm1389_vm4, %v3821_v4, %v1408_v20  ;;  %v3476_v4 = vld [vmem:[%s4760_s1 + $0x110] sm:$0xff]  }
  0xdb   :  { %3137 = vmatprep.mubr.msk.bf16.mxu1 %vm3487_vm0, %v3486_v0  ;;  %3185 = vmatprep.mubr.msk.bf16.mxu0 %vm3487_vm0, %v3486_v0 }
  0xe2   :  { %3138 = vmatmul.mubr.msk.bf16.gmra.mrb[104].mxu1 %vm219_vm2, %v945_v44  ;;  %3186 = vmatmul.mubr.msk.bf16.gmra.mrb[104].mxu0 %vm219_vm2, %v1177_v45  ;;  %v1410_v44 = vrot.slane %v895_v50, 1  ;;  %v1411_v45 = vrot.slane %v891_v41, 2  ;;  %v1729_v41 = vrot.slane %v4175_v47, 1  ;;  %v3482_v50 = vld [vmem:[%s4760_s1 + $0x118] sm:$0xff]  }
  0xe3   :  { %3189 = vmatprep.mubr.msk.bf16.mxu0 %vm3487_vm0, %v3486_v0  ;;  %3201 = vmatprep.mubr.msk.bf16.mxu1 %vm3487_vm0, %v3486_v0 }
  0xe4   :  { %v1412_v37 = vor.u32 %v1411_v45, %v1410_v44 }
  0xe5   :  { %v4084_v49 = vpop.f32.mrb[0].mxu0  ;;  %v4086_v52 = vpop.f32.mrb[0].mxu1 }
  0xe6   :  { %v2943_v53 = vpop.f32.mrb[1].mxu0  ;;  %v2967_v55 = vpop.f32.mrb[1].mxu1 }
  0xe7   :  { %v4088_v57 = vpop.f32.mrb[2].mxu0  ;;  %v4090_v58 = vpop.f32.mrb[2].mxu1 }
  0xe8   :  { %v2944_v1 = vpop.f32.mrb[3].mxu0  ;;  %v2968_v3 = vpop.f32.mrb[3].mxu1 }
  0xea   :  { %3190 = vmatmul.mubr.msk.bf16.gmra.mrb[108].mxu0 %vm219_vm2, %v1176_v43  ;;  %3202 = vmatmul.mubr.msk.bf16.vlgmr.msra.gmra.mrb[108].mxu1 %vm219_vm2, %v3808_v60 }
  0xeb   :  { %3205 = vmatprep.mubr.msk.bf16.mxu1 %vm3487_vm0, %v3486_v0  ;;  %3253 = vmatprep.mubr.msk.bf16.mxu0 %vm3487_vm0, %v3486_v0 }
  0xec   :  { %3298 = vmatpush3.bf16.msra.mxu1 %v3464_v8 }
  0xed   :  { %v4115_v15 = vpop.f32.mrb[4].mxu0  ;;  %v4117_v16 = vpop.f32.mrb[4].mxu1  ;;  %3299 = vmatprep.subr.bf16.mxu1 %v3486_v0 }
  0xee   :  { %v2947_v60 = vpop.f32.mrb[5].mxu0  ;;  %v2971_v19 = vpop.f32.mrb[5].mxu1 }
  0xef   :  { %v4120_v34 = vpop.f32.mrb[6].mxu0  ;;  %v4123_v24 = vpop.f32.mrb[6].mxu1  ;;  %v1730_v60 = vsel %vm556_vm3, %v1727_v31, %v1729_v41 }
  0xf0   :  { %v2948_v6 = vpop.f32.mrb[7].mxu0  ;;  %v2972_v30 = vpop.f32.mrb[7].mxu1  ;;  %3300 = vmatpush3.bf16.msra.mxu1 %v3470_v14  ;;  %v1413_v14 = vsel %vm1389_vm4, %v1408_v20, %v1412_v37 }
  0xf1   :  { %3301 = vmatprep.subr.bf16.mxu1 %v3486_v0 }
  0xf2   :  { %3206 = vmatmul.mubr.msk.bf16.gmra.mrb[112].mxu1 %vm219_vm2, %v3825_v11  ;;  %3254 = vmatmul.mubr.msk.bf16.vlgmr.msra.gmra.mrb[112].mxu0 %vm219_vm2, %v1726_v54  ;;  %v1414_v54 = vrot.slane %v903_v59, 1 }
  0xf3   :  { %3350 = vmatpush3.bf16.msra.mxu0 %v3467_v25  ;;  %3209 = vmatprep.mubr.msk.bf16.mxu1 %vm3487_vm0, %v3486_v0  ;;  %v1415_v25 = vrot.slane %v899_v51, 2  ;;  %v1731_v51 = vrot.slane %v4209_v28, 1 }
  0xf4   :  { %3257 = vmatprep.mubr.msk.bf16.mxu0 %vm3487_vm0, %v3486_v0  ;;  %3351 = vmatprep.subr.bf16.mxu0 %v3486_v0 }
  0xf5   :  { %v4153_v35 = vpop.f32.mrb[8].mxu0  ;;  %v4155_v11 = vpop.f32.mrb[8].mxu1  ;;  %3302 = vmatpush3.bf16.msra.mxu1 %v3475_v32  ;;  %v1416_v46 = vor.u32 %v1415_v25, %v1414_v54  ;;  %v4256_v54 = vld [vmem:[%s4761_s0 + $0x38] sm:$0xff]  }
  0xf6   :  { %v2951_v38 = vpop.f32.mrb[9].mxu0  ;;  %v2975_v21 = vpop.f32.mrb[9].mxu1  ;;  %3303 = vmatprep.subr.bf16.mxu1 %v3486_v0 }
  0xf7   :  { %v4161_v39 = vpop.f32.mrb[10].mxu0  ;;  %v4166_v43 = vpop.f32.mrb[10].mxu1  ;;  %3352 = vmatpush3.bf16.msra.mxu0 %v3471_v33  ;;  %v1417_v33 = vsel %vm1389_vm4, %v1412_v37, %v1416_v46  ;;  %v1418_v21 = vrot.slane %v911_v9, 1 }
  0xf8   :  { %v2952_v53 = vpop.f32.mrb[11].mxu0  ;;  %v2976_v55 = vpop.f32.mrb[11].mxu1  ;;  %3353 = vmatprep.subr.bf16.mxu0 %v3486_v0 }
  0xf9   :  { %3304 = vmatpush3.bf16.msra.mxu1 %v3481_v36  ;;  %v1732_v36 = vsel %vm556_vm3, %v1729_v41, %v1731_v51 }
  0xfa   :  { %3210 = vmatmul.mubr.msk.bf16.gmra.mrb[116].mxu1 %vm219_vm2, %v1409_v40  ;;  %3258 = vmatmul.mubr.msk.bf16.gmra.mrb[116].mxu0 %vm219_vm2, %v1728_v42  ;;  %v1419_v40 = vrot.slane %v907_v61, 2  ;;  %v4233_v42 = vld [vmem:[%s4761_s0 + $0x30] sm:$0xff]  }
  0xfb   :  { %3213 = vmatprep.mubr.msk.bf16.mxu1 %vm3487_vm0, %v3486_v0  ;;  %3261 = vmatprep.mubr.msk.bf16.mxu0 %vm3487_vm0, %v3486_v0  ;;  %v1733_v56 = vrot.slane %v4233_v42, 1 }
  0xfc   :  { %3354 = vmatpush3.bf16.msra.mxu0 %v3476_v4  ;;  %v1420_v9 = vor.u32 %v1419_v40, %v1418_v21  ;;  %v1426_v21 = vrot.slane %v927_v26, 1  ;;  %v1427_v40 = vrot.slane %v923_v18, 2 }
  0xfd   :  { %v4191_v1 = vpop.f32.mrb[12].mxu0  ;;  %v4193_v3 = vpop.f32.mrb[12].mxu1  ;;  %3355 = vmatprep.subr.bf16.mxu0 %v3486_v0 }
  0xfe   :  { %v2955_v8 = vpop.f32.mrb[13].mxu0  ;;  %v2979_v10 = vpop.f32.mrb[13].mxu1  ;;  %v1428_v22 = vor.u32 %v1427_v40, %v1426_v21 }
  0xff   :  { %v4196_v13 = vpop.f32.mrb[14].mxu0  ;;  %v4200_v19 = vpop.f32.mrb[14].mxu1  ;;  %v1421_v8 = vsel %vm1389_vm4, %v1416_v46, %v1420_v9  ;;  %v1734_v10 = vsel %vm556_vm3, %v1731_v51, %v1733_v56 }
 0x100   :  { %v2956_v29 = vpop.f32.mrb[15].mxu0  ;;  %v2980_v6 = vpop.f32.mrb[15].mxu1  ;;  %3356 = vmatpush3.bf16.msra.mxu0 %v3482_v50 }
 0x102   :  { %3214 = vmatmul.mubr.msk.bf16.gmra.mrb[120].mxu1 %vm219_vm2, %v1413_v14  ;;  %3262 = vmatmul.mubr.msk.bf16.gmra.mrb[120].mxu0 %vm219_vm2, %v1730_v60  ;;  %v1422_v14 = vrot.slane %v919_v17, 1  ;;  %v1423_v60 = vrot.slane %v915_v12, 2  ;;  %v1735_v12 = vrot.slane %v4256_v54, 1 }
 0x103   :  { %3217 = vmatprep.mubr.msk.bf16.mxu1 %vm3487_vm0, %v3486_v0  ;;  %3265 = vmatprep.mubr.msk.bf16.mxu0 %vm3487_vm0, %v3486_v0 }
 0x104   :  { %v1424_v2 = vor.u32 %v1423_v60, %v1422_v14 }
 0x105   :  { %v4218_v59 = vpop.f32.mrb[16].mxu0  ;;  %v4220_v30 = vpop.f32.mrb[16].mxu1 }
 0x106   :  { %v2959_v32 = vpop.f32.mrb[17].mxu0  ;;  %v2983_v20 = vpop.f32.mrb[17].mxu1  ;;  %v1429_v60 = vsel %vm1389_vm4, %v1424_v2, %v1428_v22 }
 0x107   :  { %v4222_v31 = vpop.f32.mrb[18].mxu0  ;;  %v370_v38 = vpop.f32.mrb[18].mxu1 }
 0x108   :  { %v2960_v44 = vpop.f32.mrb[19].mxu0  ;;  %v2984_v45 = vpop.f32.mrb[19].mxu1  ;;  %v1736_v38 = vsel %vm556_vm3, %v1733_v56, %v1735_v12 }
 0x10a   :  { %3218 = vmatmul.mubr.msk.bf16.gmra.mrb[124].mxu1 %vm219_vm2, %v1417_v33  ;;  %3266 = vmatmul.mubr.msk.bf16.gmra.mrb[124].mxu0 %vm219_vm2, %v1732_v36  ;;  %v1425_v36 = vsel %vm1389_vm4, %v1420_v9, %v1424_v2 }
 0x10b   :  { %3221 = vmatprep.mubr.msk.bf16.mxu1 %vm3487_vm0, %v3486_v0  ;;  %3269 = vmatprep.mubr.msk.bf16.mxu0 %vm3487_vm0, %v3486_v0 }
 0x10d   :  { %v4242_v61 = vpop.f32.mrb[20].mxu0  ;;  %v457_v53 = vpop.f32.mrb[20].mxu1 }
 0x10e   :  { %v458_v55 = vadd.f32 %v457_v53, %v4084_v49  ;;  %v2963_v4 = vpop.f32.mrb[21].mxu0  ;;  %v2995_v37 = vpop.f32.mrb[21].mxu1 }
 0x10f   :  { %v4245_v41 = vpop.f32.mrb[22].mxu0  ;;  %v460_v50 = vpop.f32.mrb[22].mxu1 }
 0x110   :  { %v461_v49 = vadd.f32 %v460_v50, %v4088_v57  ;;  %v2964_v25 = vpop.f32.mrb[23].mxu0  ;;  %v2996_v29 = vpop.f32.mrb[23].mxu1  ;;  %v1430_v50 = vrot.slane %v935_v7, 1 }
 0x111   :  { %v3479_v25 = vld [vmem:[%s4761_s0 + $0x54] ss:$0 sps:$4 sm:$0x77]  }
 0x112   :  { %3222 = vmatmul.mubr.msk.bf16.gmra.mrb[128].mxu1 %vm219_vm2, %v1421_v8  ;;  %3270 = vmatmul.mubr.msk.bf16.gmra.mrb[128].mxu0 %vm219_vm2, %v1734_v10  ;;  %v1431_v8 = vrot.slane %v931_v27, 2 }
 0x113   :  { %3225 = vmatprep.mubr.msk.bf16.mxu1 %vm3487_vm0, %v3486_v0  ;;  %3273 = vmatprep.mubr.msk.bf16.mxu0 %vm3487_vm0, %v3486_v0 }
 0x114   :  { %v1432_v2 = vor.u32 %v1431_v8, %v1430_v50 }
 0x115   :  { %v465_v17 = vpop.f32.mrb[24].mxu1  ;;  %v669_v6 = vpop.f32.mrb[24].mxu0 }
 0x116   :  { %v466_v46 = vadd.f32 %v465_v17, %v4115_v15  ;;  %v4267_v57 = vadd.f32 %v669_v6, %v458_v55  ;;  %v2999_v51 = vpop.f32.mrb[25].mxu1  ;;  %v3047_v32 = vpop.f32.mrb[25].mxu0  ;;  %v4278_v15 = vld [vmem:[%s4761_s0 + $0x40] sm:$0xff]   ;;  %v1435_v17 = vshrl.u32 %v3479_v25, 16  ;;  %v1438_v6 = vshll.u32 %v3479_v25, 16 }
 0x117   :  { %v468_v20 = vpop.f32.mrb[26].mxu1  ;;  %v672_v33 = vpop.f32.mrb[26].mxu0  ;;  %v1737_v18 = vrot.slane %v4278_v15, 1  ;;  %v1433_v21 = vsel %vm1389_vm4, %v1428_v22, %v1432_v2 }
 0x118   :  { %v469_v44 = vadd.f32 %v468_v20, %v4120_v34  ;;  %v4281_v45 = vadd.f32 %v672_v33, %v461_v49  ;;  %v3048_v53 = vpop.f32.mrb[27].mxu0  ;;  %v3000_v55 = vpop.f32.mrb[27].mxu1 }
 0x119   :  { %v1738_v49 = vsel %vm556_vm3, %v1735_v12, %v1737_v18  ;;  %v1440_v53 = vrot.slane %v1438_v6, 2  ;;  %v4325_v55 = vld [vmem:[%s4761_s0 + $0x50] sm:$0xff]  }
 0x11a   :  { %3226 = vmatmul.mubr.msk.bf16.gmra.mrb[132].mxu1 %vm219_vm2, %v1425_v36  ;;  %3274 = vmatmul.mubr.msk.bf16.gmra.mrb[132].mxu0 %vm219_vm2, %v1736_v38 }
 0x11b   :  { %3229 = vmatprep.mubr.msk.bf16.mxu1 %vm3487_vm0, %v3486_v0  ;;  %3277 = vmatprep.mubr.msk.bf16.mxu0 %vm3487_vm0, %v3486_v0 }
 0x11d   :  { %v473_v26 = vpop.f32.mrb[28].mxu1  ;;  %v677_v9 = vpop.f32.mrb[28].mxu0 }
 0x11e   :  { %v474_v34 = vadd.f32 %v473_v26, %v4153_v35  ;;  %v4291_v56 = vadd.f32 %v677_v9, %v466_v46  ;;  %v3003_v4 = vpop.f32.mrb[29].mxu1  ;;  %v3051_v37 = vpop.f32.mrb[29].mxu0  ;;  %v4302_v35 = vld [vmem:[%s4761_s0 + $0x48] sm:$0xff]  }
 0x11f   :  { %v476_v10 = vpop.f32.mrb[30].mxu1  ;;  %v680_v14 = vpop.f32.mrb[30].mxu0  ;;  %v1739_v12 = vrot.slane %v4302_v35, 1 }
 0x120   :  { %v477_v7 = vadd.f32 %v476_v10, %v4161_v39  ;;  %v4308_v29 = vadd.f32 %v680_v14, %v469_v44  ;;  %v3052_v23 = vpop.f32.mrb[31].mxu0  ;;  %v3004_v27 = vpop.f32.mrb[31].mxu1  ;;  %v1437_v44 = vrot.slane %v1435_v17, 1  ;;  %v3483_v14 = vld [vmem:[%s4761_s0 + $0x58] ss:$0 sps:$4 sm:$0x33]  }
 0x121   :  { %v1740_v40 = vsel %vm556_vm3, %v1737_v18, %v1739_v12  ;;  %v1741_v18 = vrot.slane %v4325_v55, 1  ;;  %v1743_v6 = vrot.slane %v3483_v14, 1 }
 0x122   :  { %3230 = vmatmul.mubr.msk.bf16.gmra.mrb[136].mxu1 %vm219_vm2, %v1429_v60  ;;  %3278 = vmatmul.mubr.msk.bf16.gmra.mrb[136].mxu0 %vm219_vm2, %v1738_v49  ;;  %v1441_v22 = vor.u32 %v1440_v53, %v1437_v44 }
 0x123   :  { %3233 = vmatprep.mubr.msk.bf16.mxu1 %vm3487_vm0, %v3486_v0  ;;  %3281 = vmatprep.mubr.msk.bf16.mxu0 %vm3487_vm0, %v3486_v0 }
 0x124   :  { %v1442_v25 = vsel %vm1389_vm4, %v1432_v2, %v1441_v22  ;;  %v1957_v2 = vshrl.u32 %v4093_v62, 16 }
 0x125   :  { %v481_v39 = vpop.f32.mrb[32].mxu1  ;;  %v685_v46 = vpop.f32.mrb[32].mxu0 }
 0x126   :  { %v482_v51 = vadd.f32 %v481_v39, %v4191_v1  ;;  %v4318_v32 = vadd.f32 %v685_v46, %v474_v34  ;;  %v3007_v20 = vpop.f32.mrb[33].mxu1  ;;  %v3055_v33 = vpop.f32.mrb[33].mxu0  ;;  %v1968_v39 = vshll.u32 %v4098_v63, 16  ;;  %v1959_v53 = vrot.slane %v1957_v2, 1 }
 0x127   :  { %v484_v36 = vpop.f32.mrb[34].mxu1  ;;  %v688_v38 = vpop.f32.mrb[34].mxu0 }
 0x128   :  { %v485_v26 = vadd.f32 %v484_v36, %v4196_v13  ;;  %v4328_v1 = vadd.f32 %v688_v38, %v477_v7  ;;  %v3056_v9 = vpop.f32.mrb[35].mxu0  ;;  %v3008_v34 = vpop.f32.mrb[35].mxu1  ;;  %v1742_v7 = vsel %vm556_vm3, %v1739_v12, %v1741_v18  ;;  %v1960_v12 = vshll.u32 %v4093_v62, 16 }
 0x129   :  { %v1970_v62 = vrot.slane %v1968_v39, 2 }
 0x12a   :  { %3234 = vmatmul.mubr.msk.bf16.gmra.mrb[140].mxu1 %vm219_vm2, %v1433_v21  ;;  %3282 = vmatmul.mubr.msk.bf16.gmra.mrb[140].mxu0 %vm219_vm2, %v1740_v40  ;;  %v1744_v21 = vsel %vm556_vm3, %v1741_v18, %v1743_v6  ;;  %v1977_v18 = vshll.u32 %v4135_v5, 16 }
 0x12b   :  { %3237 = vmatprep.mubr.msk.bf16.mxu1 %vm3487_vm0, %v3486_v0  ;;  %3285 = vmatprep.mubr.msk.bf16.mxu0 %vm3487_vm0, %v3486_v0 }
 0x12d   :  { %v489_v4 = vpop.f32.mrb[36].mxu1  ;;  %v693_v37 = vpop.f32.mrb[36].mxu0 }
 0x12e   :  { %v490_v13 = vadd.f32 %v489_v4, %v4218_v59  ;;  %v4338_v50 = vadd.f32 %v693_v37, %v482_v51  ;;  %v3011_v8 = vpop.f32.mrb[37].mxu1  ;;  %v3059_v10 = vpop.f32.mrb[37].mxu0 }
 0x12f   :  { %v492_v60 = vpop.f32.mrb[38].mxu1  ;;  %v696_v49 = vpop.f32.mrb[38].mxu0  ;;  %v2252_v10 = vld [vmem:[%s4761_s0 + $0x8] sm:$0xc] }
 0x130   :  { %v493_v23 = vadd.f32 %v492_v60, %v4222_v31  ;;  %v4346_v27 = vadd.f32 %v696_v49, %v485_v26  ;;  %v3060_v17 = vpop.f32.mrb[39].mxu0  ;;  %v3012_v59 = vpop.f32.mrb[39].mxu1  ;;  %v1965_v31 = vshrl.u32 %v4098_v63, 16  ;;  %v1962_v26 = vrot.slane %v1960_v12, 2 }
 0x131   :  { %v1979_v17 = vrot.slane %v1977_v18, 2 }
 0x132   :  { %3238 = vmatmul.mubr.msk.bf16.gmra.mrb[144].mxu1 %vm219_vm2, %v1442_v25  ;;  %3286 = vmatmul.mubr.msk.bf16.gmra.mrb[144].mxu0 %vm219_vm2, %v1742_v7  ;;  %v1967_v9 = vrot.slane %v1965_v31, 1  ;;  %v2781_v31 = vcombine.low %v2252_v10, %v4082_v48  ;;  %v2267_v48 = vrot.slane %v4098_v63, 2 }
 0x133   :  { %3241 = vmatprep.mubr.msk.bf16.mxu1 %vm3487_vm0, %v3486_v0  ;;  %3289 = vmatprep.mubr.msk.bf16.mxu0 %vm3487_vm0, %v3486_v0 }
 0x135   :  { %v497_v46 = vpop.f32.mrb[40].mxu1  ;;  %v701_v51 = vpop.f32.mrb[40].mxu0 }
 0x136   :  { %v498_v20 = vadd.f32 %v497_v46, %v4242_v61  ;;  %v4359_v33 = vadd.f32 %v701_v51, %v490_v13  ;;  %v3015_v36 = vpop.f32.mrb[41].mxu1  ;;  %v3063_v38 = vpop.f32.mrb[41].mxu0  ;;  %v1974_v61 = vshrl.u32 %v4135_v5, 16  ;;  %v1963_v13 = vor.u32 %v1962_v26, %v1959_v53 }
 0x137   :  { %v500_v40 = vpop.f32.mrb[42].mxu1  ;;  %v704_v44 = vpop.f32.mrb[42].mxu0  ;;  %v1986_v38 = vshll.u32 %v4175_v47, 16 }
 0x138   :  { %v501_v34 = vadd.f32 %v500_v40, %v4245_v41  ;;  %v4363_v4 = vadd.f32 %v704_v44, %v493_v23  ;;  %v3064_v37 = vpop.f32.mrb[43].mxu0  ;;  %v3016_v8 = vpop.f32.mrb[43].mxu1  ;;  %v1971_v41 = vor.u32 %v1970_v62, %v1967_v9  ;;  %v1976_v23 = vrot.slane %v1974_v61, 1 }
 0x139   :  { %v1988_v8 = vrot.slane %v1986_v38, 2 }
 0x13a   :  { %3242 = vmatmul.mubr.msk.bf16.gmra.mrb[148].mxu1 %vm219_vm2, %v1441_v22  ;;  %3290 = vmatmul.mubr.msk.bf16.gmra.mrb[148].mxu0 %vm219_vm2, %v1744_v21  ;;  %v1972_v12 = vsel %vm1389_vm4, %v1963_v13, %v1971_v41 }
 0x13b   :  { %3293 = vmatprep.mubr.msk.bf16.mxu0 %vm3487_vm0, %v3486_v0  ;;  %3305 = vmatprep.mubr.msk.bf16.mxu1 %vm3487_vm0, %v3486_v0 }
 0x13d   :  { %v505_v14 = vpop.f32.mrb[44].mxu1  ;;  %v709_v22 = vpop.f32.mrb[44].mxu0 }
 0x13e   :  { %v506_v60 = vadd.f32 %v505_v14, %v4086_v52  ;;  %v4377_v49 = vadd.f32 %v709_v22, %v498_v20  ;;  %v3019_v25 = vpop.f32.mrb[45].mxu1  ;;  %v3067_v7 = vpop.f32.mrb[45].mxu0  ;;  %v1980_v52 = vor.u32 %v1979_v17, %v1976_v23  ;;  %v2266_v20 = vrot.slane %v2781_v31, 2 }
 0x13f   :  { %v508_v59 = vpop.f32.mrb[46].mxu1  ;;  %v712_v2 = vpop.f32.mrb[46].mxu0  ;;  %v1992_v14 = vshrl.u32 %v4209_v28, 16 }
 0x140   :  { %v509_v39 = vadd.f32 %v508_v59, %v4090_v58  ;;  %v4382_v46 = vadd.f32 %v712_v2, %v501_v34  ;;  %v3068_v51 = vpop.f32.mrb[47].mxu0  ;;  %v3020_v36 = vpop.f32.mrb[47].mxu1  ;;  %v1983_v58 = vshrl.u32 %v4175_v47, 16  ;;  %v1981_v34 = vsel %vm1389_vm4, %v1971_v41, %v1980_v52 }
 0x141   :  { %v2268_v37 = vsel %vm2265_vm5, %v2266_v20, %v2267_v48  ;;  %v2269_v41 = vrot.slane %v4135_v5, 2 }
 0x142   :  { %3294 = vmatmul.mubr.msk.bf16.gmra.mrb[152].mxu0 %vm219_vm2, %v1743_v6  ;;  %3306 = vmatmul.mubr.msk.bf16.vlgmr.msra.gmra.mrb[152].mxu1 %vm219_vm2, %v1972_v12  ;;  %v1985_v63 = vrot.slane %v1983_v58, 1 }
 0x143   :  { %3309 = vmatprep.mubr.msk.bf16.mxu1 %vm3487_vm0, %v3486_v0  ;;  %3357 = vmatprep.mubr.msk.bf16.mxu0 %vm3487_vm0, %v3486_v0  ;;  %v2270_v31 = vsel %vm2265_vm5, %v2267_v48, %v2269_v41  ;;  %v2001_v48 = vshrl.u32 %v4233_v42, 16 }
 0x145   :  { %v513_v21 = vpop.f32.mrb[48].mxu1  ;;  %v717_v40 = vpop.f32.mrb[48].mxu0 }
 0x146   :  { %v514_v6 = vadd.f32 %v513_v21, %v4117_v16  ;;  %v4394_v44 = vadd.f32 %v717_v40, %v506_v60  ;;  %v3023_v53 = vpop.f32.mrb[49].mxu1  ;;  %v3071_v26 = vpop.f32.mrb[49].mxu0  ;;  %v1989_v16 = vor.u32 %v1988_v8, %v1985_v63  ;;  %v2003_v63 = vrot.slane %v2001_v48, 1 }
 0x147   :  { %v516_v9 = vpop.f32.mrb[50].mxu1  ;;  %v720_v62 = vpop.f32.mrb[50].mxu0 }
 0x148   :  { %v517_v61 = vadd.f32 %v516_v9, %v4123_v24  ;;  %v4399_v18 = vadd.f32 %v720_v62, %v509_v39  ;;  %v3072_v13 = vpop.f32.mrb[51].mxu0  ;;  %v3024_v10 = vpop.f32.mrb[51].mxu1  ;;  %v1995_v24 = vshll.u32 %v4209_v28, 16  ;;  %v1990_v12 = vsel %vm1389_vm4, %v1980_v52, %v1989_v16 }
 0x149   :  { %v1994_v39 = vrot.slane %v1992_v14, 1  ;;  %v2271_v52 = vrot.slane %v4175_v47, 2 }
 0x14a   :  { %3310 = vmatmul.mubr.msk.bf16.gmra.mrb[156].mxu1 %vm219_vm2, %v1981_v34  ;;  %3358 = vmatmul.mubr.msk.bf16.vlgmr.msra.gmra.mrb[156].mxu0 %vm219_vm2, %v2268_v37  ;;  %v1997_v5 = vrot.slane %v1995_v24, 2 }
 0x14b   :  { %3313 = vmatprep.mubr.msk.bf16.mxu1 %vm3487_vm0, %v3486_v0  ;;  %3361 = vmatprep.mubr.msk.bf16.mxu0 %vm3487_vm0, %v3486_v0  ;;  %v2272_v37 = vsel %vm2265_vm5, %v2269_v41, %v2271_v52  ;;  %v2010_v41 = vshrl.u32 %v4256_v54, 16 }
 0x14d   :  { %v521_v22 = vpop.f32.mrb[52].mxu1  ;;  %v725_v60 = vpop.f32.mrb[52].mxu0 }
 0x14e   :  { %v522_v25 = vadd.f32 %v521_v22, %v4155_v11  ;;  %v4411_v7 = vadd.f32 %v725_v60, %v514_v6  ;;  %v3027_v23 = vpop.f32.mrb[53].mxu1  ;;  %v3075_v17 = vpop.f32.mrb[53].mxu0  ;;  %v1998_v11 = vor.u32 %v1997_v5, %v1994_v39 }
 0x14f   :  { %v524_v59 = vpop.f32.mrb[54].mxu1  ;;  %v728_v2 = vpop.f32.mrb[54].mxu0 }
 0x150   :  { %v525_v51 = vadd.f32 %v524_v59, %v4166_v43  ;;  %v4416_v36 = vadd.f32 %v728_v2, %v517_v61  ;;  %v3076_v20 = vpop.f32.mrb[55].mxu0  ;;  %v3028_v58 = vpop.f32.mrb[55].mxu1  ;;  %v2004_v43 = vshll.u32 %v4233_v42, 16  ;;  %v1999_v34 = vsel %vm1389_vm4, %v1989_v16, %v1998_v11 }
 0x151   :  { %v2273_v16 = vrot.slane %v4209_v28, 2  ;;  %v2275_v20 = vrot.slane %v4233_v42, 2  ;;  %v2019_v58 = vshrl.u32 %v4278_v15, 16 }
 0x152   :  { %3314 = vmatmul.mubr.msk.bf16.gmra.mrb[160].mxu1 %vm219_vm2, %v1990_v12  ;;  %3362 = vmatmul.mubr.msk.bf16.gmra.mrb[160].mxu0 %vm219_vm2, %v2270_v31  ;;  %v2006_v47 = vrot.slane %v2004_v43, 2  ;;  %v2012_v31 = vrot.slane %v2010_v41, 1 }
 0x153   :  { %3317 = vmatprep.mubr.msk.bf16.mxu1 %vm3487_vm0, %v3486_v0  ;;  %3365 = vmatprep.mubr.msk.bf16.mxu0 %vm3487_vm0, %v3486_v0  ;;  %v2274_v2 = vsel %vm2265_vm5, %v2271_v52, %v2273_v16 }
 0x155   :  { %v529_v38 = vpop.f32.mrb[56].mxu1  ;;  %v733_v21 = vpop.f32.mrb[56].mxu0 }
 0x156   :  { %v530_v40 = vadd.f32 %v529_v38, %v4193_v3  ;;  %v4428_v6 = vadd.f32 %v733_v21, %v522_v25  ;;  %v3031_v53 = vpop.f32.mrb[57].mxu1  ;;  %v3079_v26 = vpop.f32.mrb[57].mxu0  ;;  %v2007_v3 = vor.u32 %v2006_v47, %v2003_v63 }
 0x157   :  { %v532_v9 = vpop.f32.mrb[58].mxu1  ;;  %v736_v62 = vpop.f32.mrb[58].mxu0 }
 0x158   :  { %v533_v8 = vadd.f32 %v532_v9, %v4200_v19  ;;  %v4433_v61 = vadd.f32 %v736_v62, %v525_v51  ;;  %v3080_v13 = vpop.f32.mrb[59].mxu0  ;;  %v3032_v10 = vpop.f32.mrb[59].mxu1  ;;  %v2013_v19 = vshll.u32 %v4256_v54, 16  ;;  %v2008_v59 = vsel %vm1389_vm4, %v1998_v11, %v2007_v3 }
 0x159   :  { %v2022_v11 = vshll.u32 %v4278_v15, 16  ;;  %v2276_v62 = vsel %vm2265_vm5, %v2273_v16, %v2275_v20  ;;  %v2028_v13 = vshrl.u32 %v4302_v35, 16  ;;  %v2031_v10 = vshll.u32 %v4302_v35, 16 }
 0x15a   :  { %3318 = vmatmul.mubr.msk.bf16.gmra.mrb[164].mxu1 %vm219_vm2, %v1999_v34  ;;  %3366 = vmatmul.mubr.msk.bf16.gmra.mrb[164].mxu0 %vm219_vm2, %v2272_v37  ;;  %v2015_v28 = vrot.slane %v2013_v19, 2  ;;  %v2021_v34 = vrot.slane %v2019_v58, 1 }
 0x15b   :  { %3321 = vmatprep.mubr.msk.bf16.mxu1 %vm3487_vm0, %v3486_v0  ;;  %3369 = vmatprep.mubr.msk.bf16.mxu0 %vm3487_vm0, %v3486_v0  ;;  %v2024_v42 = vrot.slane %v2022_v11, 2 }
 0x15d   :  { %v537_v14 = vpop.f32.mrb[60].mxu1  ;;  %v741_v24 = vpop.f32.mrb[60].mxu0 }
 0x15e   :  { %v538_v22 = vadd.f32 %v537_v14, %v4220_v30  ;;  %v4445_v60 = vadd.f32 %v741_v24, %v530_v40  ;;  %v3083_v25 = vpop.f32.mrb[61].mxu0  ;;  %v3035_v23 = vpop.f32.mrb[61].mxu1  ;;  %v2016_v30 = vor.u32 %v2015_v28, %v2012_v31 }
 0x15f   :  { %v744_v17 = vpop.f32.mrb[62].mxu0  ;;  %v540_v12 = vpop.f32.mrb[62].mxu1 }
 0x160   :  { %v4449_v39 = vadd.f32 %v744_v17, %v533_v8  ;;  %v3084_v5 = vpop.f32.mrb[63].mxu0  ;;  %v3036_v51 = vpop.f32.mrb[63].mxu1  ;;  %v2017_v9 = vsel %vm1389_vm4, %v2007_v3, %v2016_v30  ;;  %v2277_v8 = vrot.slane %v4256_v54, 2  ;;  %v2030_v17 = vrot.slane %v2028_v13, 1 }
 0x161   :  { %v2033_v54 = vrot.slane %v2031_v10, 2  ;;  %v2279_v5 = vrot.slane %v4278_v15, 2  ;;  %v4500_v15 = vld [vmem:[%s4761_s0 + $0x58] ss:$0 sps:$4 sm:$0x77]  }
 0x162   :  { %3322 = vmatmul.mubr.msk.bf16.gmra.mrb[168].mxu1 %vm219_vm2, %v2008_v59  ;;  %3370 = vmatmul.mubr.msk.bf16.gmra.mrb[168].mxu0 %vm219_vm2, %v2274_v2  ;;  %v2278_v23 = vsel %vm2265_vm5, %v2275_v20, %v2277_v8 }
 0x163   :  { %3325 = vmatprep.mubr.msk.bf16.mxu1 %vm3487_vm0, %v3486_v0  ;;  %3373 = vmatprep.mubr.msk.bf16.mxu0 %vm3487_vm0, %v3486_v0  ;;  %v2034_v28 = vor.u32 %v2033_v54, %v2030_v17  ;;  %v2283_v54 = vrot.slane %v4325_v55, 2 }
 0x165   :  { %v749_v52 = vpop.f32.mrb[64].mxu0  ;;  %v1037_v48 = vpop.f32.mrb[64].mxu1 }
 0x166   :  { %v4460_v43 = vadd.f32 %v749_v52, %v538_v22  ;;  %v1123_v38 = vadd.f32 %v1037_v48, %v4267_v57  ;;  %v3087_v21 = vpop.f32.mrb[65].mxu0  ;;  %v3099_v40 = vpop.f32.mrb[65].mxu1  ;;  %v2025_v57 = vor.u32 %v2024_v42, %v2021_v34 }
 0x167   :  { %v752_v53 = vpop.f32.mrb[66].mxu0  ;;  %v1040_v26 = vpop.f32.mrb[66].mxu1 }
 0x168   :  { %v1124_v37 = vadd.f32 %v1040_v26, %v4281_v45  ;;  %v3088_v63 = vpop.f32.mrb[67].mxu0  ;;  %v3100_v47 = vpop.f32.mrb[67].mxu1  ;;  %v2026_v25 = vsel %vm1389_vm4, %v2016_v30, %v2025_v57  ;;  %v2035_v40 = vsel %vm1389_vm4, %v2025_v57, %v2034_v28  ;;  %v2280_v53 = vsel %vm2265_vm5, %v2277_v8, %v2279_v5 }
 0x169   :  { %v2046_v63 = vshrl.u32 %v4500_v15, 16 }
 0x16a   :  { %3326 = vmatmul.mubr.msk.bf16.gmra.mrb[172].mxu1 %vm219_vm2, %v2017_v9  ;;  %3374 = vmatmul.mubr.msk.bf16.gmra.mrb[172].mxu0 %vm219_vm2, %v2276_v62 }
 0x16b   :  { %3329 = vmatprep.mubr.msk.bf16.mxu1 %vm3487_vm0, %v3486_v0  ;;  %3377 = vmatprep.mubr.msk.bf16.mxu0 %vm3487_vm0, %v3486_v0 }
 0x16d   :  { %v1045_v45 = vpop.f32.mrb[68].mxu1  ;;  %v1269_v3 = vpop.f32.mrb[68].mxu0 }
 0x16e   :  { %v1125_v16 = vadd.f32 %v1045_v45, %v4291_v56  ;;  %v4476_v41 = vadd.f32 %v1269_v3, %v1123_v38  ;;  %v3103_v19 = vpop.f32.mrb[69].mxu1  ;;  %v3151_v14 = vpop.f32.mrb[69].mxu0  ;;  %v2037_v56 = vshrl.u32 %v4325_v55, 16 }
 0x16f   :  { %v1048_v24 = vpop.f32.mrb[70].mxu1  ;;  %v1272_v22 = vpop.f32.mrb[70].mxu0 }
 0x170   :  { %v1126_v59 = vadd.f32 %v1048_v24, %v4308_v29  ;;  %v4481_v2 = vadd.f32 %v1272_v22, %v1124_v37  ;;  %v3152_v12 = vpop.f32.mrb[71].mxu0  ;;  %v3104_v31 = vpop.f32.mrb[71].mxu1  ;;  %v2040_v29 = vshll.u32 %v4325_v55, 16  ;;  %v2039_v48 = vrot.slane %v2037_v56, 1 }
 0x171   :  { %v2281_v37 = vrot.slane %v4302_v35, 2  ;;  %v2048_v24 = vrot.slane %v2046_v63, 1 }
 0x172   :  { %3330 = vmatmul.mubr.msk.bf16.gmra.mrb[176].mxu1 %vm219_vm2, %v2026_v25  ;;  %3378 = vmatmul.mubr.msk.bf16.gmra.mrb[176].mxu0 %vm219_vm2, %v2278_v23  ;;  %v2042_v26 = vrot.slane %v2040_v29, 2 }
 0x173   :  { %3333 = vmatprep.mubr.msk.bf16.mxu1 %vm3487_vm0, %v3486_v0  ;;  %3381 = vmatprep.mubr.msk.bf16.mxu0 %vm3487_vm0, %v3486_v0  ;;  %v2282_v14 = vsel %vm2265_vm5, %v2279_v5, %v2281_v37 }
 0x174   :  { %v2043_v42 = vor.u32 %v2042_v26, %v2039_v48 }
 0x175   :  { %v1053_v51 = vpop.f32.mrb[72].mxu1  ;;  %v1277_v30 = vpop.f32.mrb[72].mxu0 }
 0x176   :  { %v1127_v20 = vadd.f32 %v1053_v51, %v4318_v32  ;;  %v4493_v58 = vadd.f32 %v1277_v30, %v1125_v16  ;;  %v3107_v11 = vpop.f32.mrb[73].mxu1  ;;  %v3155_v52 = vpop.f32.mrb[73].mxu0  ;;  %v2044_v19 = vsel %vm1389_vm4, %v2034_v28, %v2043_v42  ;;  %v2284_v30 = vsel %vm2265_vm5, %v2281_v37, %v2283_v54 }
 0x177   :  { %v1056_v38 = vpop.f32.mrb[74].mxu1  ;;  %v1280_v21 = vpop.f32.mrb[74].mxu0 }
 0x178   :  { %v1128_v9 = vadd.f32 %v1056_v38, %v4328_v1  ;;  %v4503_v32 = vadd.f32 %v1280_v21, %v1126_v59  ;;  %v3156_v62 = vpop.f32.mrb[75].mxu0  ;;  %v3108_v34 = vpop.f32.mrb[75].mxu1  ;;  %v2049_v1 = vshll.u32 %v4500_v15, 16 }
 0x17a   :  { %3334 = vmatmul.mubr.msk.bf16.gmra.mrb[180].mxu1 %vm219_vm2, %v2035_v40  ;;  %3382 = vmatmul.mubr.msk.bf16.gmra.mrb[180].mxu0 %vm219_vm2, %v2280_v53  ;;  %v2051_v35 = vrot.slane %v2049_v1, 2 }
 0x17b   :  { %3337 = vmatprep.mubr.msk.bf16.mxu1 %vm3487_vm0, %v3486_v0  ;;  %3385 = vmatprep.mubr.msk.bf16.mxu0 %vm3487_vm0, %v3486_v0 }
 0x17d   :  { %v1061_v47 = vpop.f32.mrb[76].mxu1  ;;  %v1285_v57 = vpop.f32.mrb[76].mxu0 }
 0x17e   :  { %v1129_v8 = vadd.f32 %v1061_v47, %v4338_v50  ;;  %v4515_v13 = vadd.f32 %v1285_v57, %v1127_v20  ;;  %v3111_v10 = vpop.f32.mrb[77].mxu1  ;;  %v3159_v45 = vpop.f32.mrb[77].mxu0  ;;  %v2052_v50 = vor.u32 %v2051_v35, %v2048_v24 }
 0x17f   :  { %v1064_v3 = vpop.f32.mrb[78].mxu1  ;;  %v1288_v16 = vpop.f32.mrb[78].mxu0 }
 0x180   :  { %v1130_v22 = vadd.f32 %v1064_v3, %v4346_v27  ;;  %v4520_v25 = vadd.f32 %v1288_v16, %v1128_v9  ;;  %v3160_v23 = vpop.f32.mrb[79].mxu0  ;;  %v3112_v17 = vpop.f32.mrb[79].mxu1  ;;  %v2053_v51 = vsel %vm1389_vm4, %v2043_v42, %v2052_v50 }
 0x182   :  { %3338 = vmatmul.mubr.msk.bf16.gmra.mrb[184].mxu1 %vm219_vm2, %v2044_v19  ;;  %3386 = vmatmul.mubr.msk.bf16.gmra.mrb[184].mxu0 %vm219_vm2, %v2282_v14 }
 0x183   :  { %3341 = vmatprep.mubr.msk.bf16.mxu1 %vm3487_vm0, %v3486_v0  ;;  %3389 = vmatprep.mubr.msk.bf16.mxu0 %vm3487_vm0, %v3486_v0 }
 0x185   :  { %v1069_v59 = vpop.f32.mrb[80].mxu1  ;;  %v1293_v12 = vpop.f32.mrb[80].mxu0 }
 0x186   :  { %v1131_v27 = vadd.f32 %v1069_v59, %v4359_v33  ;;  %v4530_v31 = vadd.f32 %v1293_v12, %v1129_v8  ;;  %v3115_v56 = vpop.f32.mrb[81].mxu1  ;;  %v3163_v28 = vpop.f32.mrb[81].mxu0  ;;  %v2285_v33 = vrot.slane %v4500_v15, 2 }
 0x187   :  { %v1072_v5 = vpop.f32.mrb[82].mxu1  ;;  %v1296_v29 = vpop.f32.mrb[82].mxu0 }
 0x188   :  { %v1132_v20 = vadd.f32 %v1072_v5, %v4363_v4  ;;  %v4535_v11 = vadd.f32 %v1296_v29, %v1130_v22  ;;  %v3164_v52 = vpop.f32.mrb[83].mxu0  ;;  %v3116_v55 = vpop.f32.mrb[83].mxu1  ;;  %v2286_v62 = vsel %vm2265_vm5, %v2283_v54, %v2285_v33 }
 0x18a   :  { %3342 = vmatmul.mubr.msk.bf16.gmra.mrb[188].mxu1 %vm219_vm2, %v2053_v51  ;;  %3390 = vmatmul.mubr.msk.bf16.gmra.mrb[188].mxu0 %vm219_vm2, %v2284_v30 }
 0x18b   :  { %3345 = vmatprep.mubr.msk.bf16.mxu1 %vm3487_vm0, %v3486_v0  ;;  %3393 = vmatprep.mubr.msk.bf16.mxu0 %vm3487_vm0, %v3486_v0 }
 0x18d   :  { %v1077_v48 = vpop.f32.mrb[84].mxu1  ;;  %v1301_v38 = vpop.f32.mrb[84].mxu0 }
 0x18e   :  { %v1133_v4 = vadd.f32 %v1077_v48, %v4377_v49  ;;  %v4545_v21 = vadd.f32 %v1301_v38, %v1131_v27  ;;  %v3119_v40 = vpop.f32.mrb[85].mxu1  ;;  %v3167_v53 = vpop.f32.mrb[85].mxu0 }
 0x18f   :  { %v1080_v26 = vpop.f32.mrb[86].mxu1  ;;  %v1304_v9 = vpop.f32.mrb[86].mxu0 }
 0x190   :  { %v1134_v34 = vadd.f32 %v1080_v26, %v4382_v46  ;;  %v4549_v42 = vadd.f32 %v1304_v9, %v1132_v20  ;;  %v3168_v37 = vpop.f32.mrb[87].mxu0  ;;  %v3120_v63 = vpop.f32.mrb[87].mxu1 }
 0x192   :  { %3346 = vmatmul.mubr.msk.bf16.gmra.mrb[192].mxu1 %vm219_vm2, %v2052_v50  ;;  %3394 = vmatmul.mubr.msk.bf16.gmra.mrb[192].mxu0 %vm219_vm2, %v2286_v62 }
 0x193   :  { %3397 = vmatprep.mubr.msk.bf16.mxu0 %vm3487_vm0, %v3486_v0 }
 0x195   :  { %v1085_v49 = vpop.f32.mrb[88].mxu1  ;;  %v1309_v15 = vpop.f32.mrb[88].mxu0 }
 0x196   :  { %v1135_v1 = vadd.f32 %v1085_v49, %v4394_v44  ;;  %v4556_v47 = vadd.f32 %v1309_v15, %v1133_v4  ;;  %v3123_v57 = vpop.f32.mrb[89].mxu1  ;;  %v3171_v8 = vpop.f32.mrb[89].mxu0 }
 0x197   :  { %v1088_v46 = vpop.f32.mrb[90].mxu1  ;;  %v1312_v10 = vpop.f32.mrb[90].mxu0 }
 0x198   :  { %v1136_v45 = vadd.f32 %v1088_v46, %v4399_v18  ;;  %v4559_v3 = vadd.f32 %v1312_v10, %v1134_v34  ;;  %v3172_v16 = vpop.f32.mrb[91].mxu0  ;;  %v3124_v19 = vpop.f32.mrb[91].mxu1 }
 0x19a   :  { %3398 = vmatmul.mubr.msk.bf16.gmra.mrb[196].mxu0 %vm219_vm2, %v2285_v33 }
 0x19d   :  { %v1093_v14 = vpop.f32.mrb[92].mxu1  ;;  %v1317_v0 = vpop.f32.mrb[92].mxu0 }
 0x19e   :  { %v1137_v24 = vadd.f32 %v1093_v14, %v4411_v7  ;;  %v4563_v35 = vadd.f32 %v1317_v0, %v1135_v1  ;;  %v3127_v44 = vpop.f32.mrb[93].mxu1  ;;  %v3175_v22 = vpop.f32.mrb[93].mxu0 }
 0x19f   :  { %v1096_v23 = vpop.f32.mrb[94].mxu1  ;;  %v1320_v17 = vpop.f32.mrb[94].mxu0 }
 0x1a0   :  { %v1138_v50 = vadd.f32 %v1096_v23, %v4416_v36  ;;  %v4566_v54 = vadd.f32 %v1320_v17, %v1136_v45  ;;  %v3176_v18 = vpop.f32.mrb[95].mxu0  ;;  %v3128_v59 = vpop.f32.mrb[95].mxu1 }
 0x1a5   :  { %v1101_v12 = vpop.f32.mrb[96].mxu1  ;;  %v1325_v27 = vpop.f32.mrb[96].mxu0 }
 0x1a6   :  { %v1139_v56 = vadd.f32 %v1101_v12, %v4428_v6  ;;  %v4569_v28 = vadd.f32 %v1325_v27, %v1137_v24  ;;  %v3131_v5 = vpop.f32.mrb[97].mxu1  ;;  %v3179_v7 = vpop.f32.mrb[97].mxu0 }
 0x1a7   :  { %v1104_v29 = vpop.f32.mrb[98].mxu1  ;;  %v1328_v51 = vpop.f32.mrb[98].mxu0 }
 0x1a8   :  { %v1140_v30 = vadd.f32 %v1104_v29, %v4433_v61  ;;  %v4572_v20 = vadd.f32 %v1328_v51, %v1138_v50  ;;  %v3180_v52 = vpop.f32.mrb[99].mxu0  ;;  %v3132_v36 = vpop.f32.mrb[99].mxu1 }
 0x1ad   :  { %v1109_v55 = vpop.f32.mrb[100].mxu1  ;;  %v1333_v33 = vpop.f32.mrb[100].mxu0 }
 0x1ae   :  { %v1141_v48 = vadd.f32 %v1109_v55, %v4445_v60  ;;  %v4575_v38 = vadd.f32 %v1333_v33, %v1139_v56  ;;  %v3135_v4 = vpop.f32.mrb[101].mxu1  ;;  %v3183_v6 = vpop.f32.mrb[101].mxu0 }
 0x1af   :  { %v1112_v40 = vpop.f32.mrb[102].mxu1  ;;  %v1336_v53 = vpop.f32.mrb[102].mxu0 }
 0x1b0   :  { %v1142_v26 = vadd.f32 %v1112_v40, %v4449_v39  ;;  %v4578_v9 = vadd.f32 %v1336_v53, %v1140_v30  ;;  %v3184_v62 = vpop.f32.mrb[103].mxu0  ;;  %v3136_v61 = vpop.f32.mrb[103].mxu1 }
 0x1b5   :  { %v1117_v34 = vpop.f32.mrb[104].mxu1  ;;  %v1341_v37 = vpop.f32.mrb[104].mxu0 }
 0x1b6   :  { %v1143_v63 = vadd.f32 %v1117_v34, %v4460_v43  ;;  %v4581_v49 = vadd.f32 %v1341_v37, %v1141_v48  ;;  %v3187_v15 = vpop.f32.mrb[105].mxu0  ;;  %v3139_v60 = vpop.f32.mrb[105].mxu1 }
 0x1b7   :  { %v1344_v1 = vpop.f32.mrb[106].mxu0  ;;  %v1120_v57 = vpop.f32.mrb[106].mxu1 }
 0x1b8   :  { %v4583_v8 = vadd.f32 %v1344_v1, %v1142_v26  ;;  %v3188_v46 = vpop.f32.mrb[107].mxu0  ;;  %v3140_v10 = vpop.f32.mrb[107].mxu1 }
 0x1bd   :  { %v1349_v45 = vpop.f32.mrb[108].mxu0  ;;  %v1534_v39 = vpop.f32.mrb[108].mxu1 }
 0x1be   :  { %v4585_v16 = vadd.f32 %v1349_v45, %v1143_v63  ;;  %v1620_v19 = vadd.f32 %v1534_v39, %v4476_v41  ;;  %v3191_v14 = vpop.f32.mrb[109].mxu0  ;;  %v3203_v0 = vpop.f32.mrb[109].mxu1 }
 0x1bf   :  { %v1352_v24 = vpop.f32.mrb[110].mxu0  ;;  %v1537_v43 = vpop.f32.mrb[110].mxu1 }
 0x1c0   :  { %v1621_v44 = vadd.f32 %v1537_v43, %v4481_v2  ;;  %v3192_v22 = vpop.f32.mrb[111].mxu0  ;;  %v3204_v23 = vpop.f32.mrb[111].mxu1 }
 0x1c5   :  { %v1542_v17 = vpop.f32.mrb[112].mxu1  ;;  %v1836_v50 = vpop.f32.mrb[112].mxu0 }
 0x1c6   :  { %v1622_v18 = vadd.f32 %v1542_v17, %v4493_v58  ;;  %v4590_v59 = vadd.f32 %v1836_v50, %v1620_v19  ;;  %v3207_v12 = vpop.f32.mrb[113].mxu1  ;;  %v3255_v27 = vpop.f32.mrb[113].mxu0 }
 0x1c7   :  { %v1545_v56 = vpop.f32.mrb[114].mxu1  ;;  %v1839_v5 = vpop.f32.mrb[114].mxu0 }
 0x1c8   :  { %v1623_v41 = vadd.f32 %v1545_v56, %v4503_v32  ;;  %v4593_v7 = vadd.f32 %v1839_v5, %v1621_v44  ;;  %v3256_v29 = vpop.f32.mrb[115].mxu0  ;;  %v3208_v51 = vpop.f32.mrb[115].mxu1 }
 0x1cd   :  { %v1550_v30 = vpop.f32.mrb[116].mxu1  ;;  %v1844_v2 = vpop.f32.mrb[116].mxu0 }
 0x1ce   :  { %v1624_v52 = vadd.f32 %v1550_v30, %v4515_v13  ;;  %v4596_v36 = vadd.f32 %v1844_v2, %v1622_v18  ;;  %v3211_v55 = vpop.f32.mrb[117].mxu1  ;;  %v3259_v58 = vpop.f32.mrb[117].mxu0 }
 0x1cf   :  { %v1553_v33 = vpop.f32.mrb[118].mxu1  ;;  %v1847_v48 = vpop.f32.mrb[118].mxu0 }
 0x1d0   :  { %v1625_v4 = vadd.f32 %v1553_v33, %v4520_v25  ;;  %v4599_v6 = vadd.f32 %v1847_v48, %v1623_v41  ;;  %v3260_v40 = vpop.f32.mrb[119].mxu0  ;;  %v3212_v32 = vpop.f32.mrb[119].mxu1 }
 0x1d5   :  { %v1558_v53 = vpop.f32.mrb[120].mxu1  ;;  %v1852_v26 = vpop.f32.mrb[120].mxu0 }
 0x1d6   :  { %v1626_v62 = vadd.f32 %v1558_v53, %v4530_v31  ;;  %v4602_v61 = vadd.f32 %v1852_v26, %v1624_v52  ;;  %v3215_v34 = vpop.f32.mrb[121].mxu1  ;;  %v3263_v13 = vpop.f32.mrb[121].mxu0 }
 0x1d7   :  { %v1561_v37 = vpop.f32.mrb[122].mxu1  ;;  %v1855_v63 = vpop.f32.mrb[122].mxu0 }
 0x1d8   :  { %v1627_v15 = vadd.f32 %v1561_v37, %v4535_v11  ;;  %v4605_v60 = vadd.f32 %v1855_v63, %v1625_v4  ;;  %v3264_v1 = vpop.f32.mrb[123].mxu0  ;;  %v3216_v25 = vpop.f32.mrb[123].mxu1 }
 0x1dd   :  { %v1566_v57 = vpop.f32.mrb[124].mxu1  ;;  %v1860_v46 = vpop.f32.mrb[124].mxu0 }
 0x1de   :  { %v1628_v10 = vadd.f32 %v1566_v57, %v4545_v21  ;;  %v4608_v45 = vadd.f32 %v1860_v46, %v1626_v62  ;;  %v3219_v39 = vpop.f32.mrb[125].mxu1  ;;  %v3267_v31 = vpop.f32.mrb[125].mxu0 }
 0x1df   :  { %v1569_v19 = vpop.f32.mrb[126].mxu1  ;;  %v1863_v14 = vpop.f32.mrb[126].mxu0 }
 0x1e0   :  { %v1629_v0 = vadd.f32 %v1569_v19, %v4549_v42  ;;  %v4611_v24 = vadd.f32 %v1863_v14, %v1627_v15  ;;  %v3268_v43 = vpop.f32.mrb[127].mxu0  ;;  %v3220_v11 = vpop.f32.mrb[127].mxu1 }
 0x1e5   :  { %v1574_v44 = vpop.f32.mrb[128].mxu1  ;;  %v1868_v22 = vpop.f32.mrb[128].mxu0 }
 0x1e6   :  { %v1630_v23 = vadd.f32 %v1574_v44, %v4556_v47  ;;  %v4614_v17 = vadd.f32 %v1868_v22, %v1628_v10  ;;  %v3223_v50 = vpop.f32.mrb[129].mxu1  ;;  %v3271_v21 = vpop.f32.mrb[129].mxu0 }
 0x1e7   :  { %v1577_v18 = vpop.f32.mrb[130].mxu1  ;;  %v1871_v12 = vpop.f32.mrb[130].mxu0 }
 0x1e8   :  { %v1631_v27 = vadd.f32 %v1577_v18, %v4559_v3  ;;  %v4617_v56 = vadd.f32 %v1871_v12, %v1629_v0  ;;  %v3272_v5 = vpop.f32.mrb[131].mxu0  ;;  %v3224_v42 = vpop.f32.mrb[131].mxu1 }
 0x1ed   :  { %v1582_v41 = vpop.f32.mrb[132].mxu1  ;;  %v1876_v29 = vpop.f32.mrb[132].mxu0 }
 0x1ee   :  { %v1632_v51 = vadd.f32 %v1582_v41, %v4563_v35  ;;  %v4620_v30 = vadd.f32 %v1876_v29, %v1630_v23  ;;  %v3227_v2 = vpop.f32.mrb[133].mxu1  ;;  %v3275_v47 = vpop.f32.mrb[133].mxu0 }
 0x1ef   :  { %v1585_v52 = vpop.f32.mrb[134].mxu1  ;;  %v1879_v55 = vpop.f32.mrb[134].mxu0 }
 0x1f0   :  { %v1633_v58 = vadd.f32 %v1585_v52, %v4566_v54  ;;  %v4623_v33 = vadd.f32 %v1879_v55, %v1631_v27  ;;  %v3276_v48 = vpop.f32.mrb[135].mxu0  ;;  %v3228_v3 = vpop.f32.mrb[135].mxu1 }
 0x1f5   :  { %v1590_v4 = vpop.f32.mrb[136].mxu1  ;;  %v1884_v40 = vpop.f32.mrb[136].mxu0 }
 0x1f6   :  { %v1634_v32 = vadd.f32 %v1590_v4, %v4569_v28  ;;  %v4626_v53 = vadd.f32 %v1884_v40, %v1632_v51  ;;  %v3231_v26 = vpop.f32.mrb[137].mxu1  ;;  %v3279_v35 = vpop.f32.mrb[137].mxu0 }
 0x1f7   :  { %v1593_v62 = vpop.f32.mrb[138].mxu1  ;;  %v1887_v34 = vpop.f32.mrb[138].mxu0 }
 0x1f8   :  { %v1635_v13 = vadd.f32 %v1593_v62, %v4572_v20  ;;  %v4629_v37 = vadd.f32 %v1887_v34, %v1633_v58  ;;  %v3280_v63 = vpop.f32.mrb[139].mxu0  ;;  %v3232_v54 = vpop.f32.mrb[139].mxu1 }
 0x1f9   :  { %v4655_v63 = vld [vmem:[%s4762_s2] ss:$0 sm:$0xff] }
 0x1fd   :  { %v1598_v15 = vpop.f32.mrb[140].mxu1  ;;  %v1892_v1 = vpop.f32.mrb[140].mxu0 }
 0x1fe   :  { %v1636_v25 = vadd.f32 %v1598_v15, %v4575_v38  ;;  %v4632_v57 = vadd.f32 %v1892_v1, %v1634_v32  ;;  %v3235_v46 = vpop.f32.mrb[141].mxu1  ;;  %v3283_v28 = vpop.f32.mrb[141].mxu0 }
 0x1ff   :  { %v1601_v10 = vpop.f32.mrb[142].mxu1  ;;  %v1895_v39 = vpop.f32.mrb[142].mxu0 }
 0x200   :  { %v1637_v31 = vadd.f32 %v1601_v10, %v4578_v9  ;;  %v4635_v19 = vadd.f32 %v1895_v39, %v1635_v13  ;;  %v3284_v14 = vpop.f32.mrb[143].mxu0  ;;  %v3236_v20 = vpop.f32.mrb[143].mxu1 }
 0x205   :  { %v1606_v0 = vpop.f32.mrb[144].mxu1  ;;  %v1900_v43 = vpop.f32.mrb[144].mxu0 }
 0x206   :  { %v1638_v11 = vadd.f32 %v1606_v0, %v4581_v49  ;;  %v4638_v44 = vadd.f32 %v1900_v43, %v1636_v25  ;;  %v3239_v22 = vpop.f32.mrb[145].mxu1  ;;  %v3287_v38 = vpop.f32.mrb[145].mxu0 }
 0x207   :  { %v1609_v23 = vpop.f32.mrb[146].mxu1  ;;  %v1903_v50 = vpop.f32.mrb[146].mxu0 }
 0x208   :  { %v1639_v21 = vadd.f32 %v1609_v23, %v4583_v8  ;;  %v4641_v18 = vadd.f32 %v1903_v50, %v1637_v31  ;;  %v3288_v12 = vpop.f32.mrb[147].mxu0  ;;  %v3240_v9 = vpop.f32.mrb[147].mxu1 }
 0x20d   :  { %v1614_v27 = vpop.f32.mrb[148].mxu1  ;;  %v1908_v5 = vpop.f32.mrb[148].mxu0 }
 0x20e   :  { %v1640_v42 = vadd.f32 %v1614_v27, %v4585_v16  ;;  %v4644_v41 = vadd.f32 %v1908_v5, %v1638_v11  ;;  %v3291_v29 = vpop.f32.mrb[149].mxu0  ;;  %v3243_v49 = vpop.f32.mrb[149].mxu1 }
 0x20f   :  { %v1911_v51 = vpop.f32.mrb[150].mxu0  ;;  %v1617_v2 = vpop.f32.mrb[150].mxu1 }
 0x210   :  { %v4646_v47 = vadd.f32 %v1911_v51, %v1639_v21  ;;  %v3292_v52 = vpop.f32.mrb[151].mxu0  ;;  %v3244_v55 = vpop.f32.mrb[151].mxu1 }
 0x215   :  { %v1916_v58 = vpop.f32.mrb[152].mxu0  ;;  %v2145_v8 = vpop.f32.mrb[152].mxu1 }
 0x216   :  { %v4648_v48 = vadd.f32 %v1916_v58, %v1640_v42  ;;  %v2231_v3 = vadd.f32 %v2145_v8, %v4590_v59  ;;  %v3295_v4 = vpop.f32.mrb[153].mxu0  ;;  %v3307_v40 = vpop.f32.mrb[153].mxu1 }
 0x217   :  { %v1919_v32 = vpop.f32.mrb[154].mxu0  ;;  %v2148_v16 = vpop.f32.mrb[154].mxu1 }
 0x218   :  { %v2232_v26 = vadd.f32 %v2148_v16, %v4593_v7  ;;  %v3296_v35 = vpop.f32.mrb[155].mxu0  ;;  %v3308_v62 = vpop.f32.mrb[155].mxu1 }
 0x21d   :  { %v2153_v34 = vpop.f32.mrb[156].mxu1  ;;  %v2378_v13 = vpop.f32.mrb[156].mxu0 }
 0x21e   :  { %v2233_v54 = vadd.f32 %v2153_v34, %v4596_v36  ;;  %v2464_v15 = vadd.f32 %v2378_v13, %v2231_v3  ;;  %v3311_v1 = vpop.f32.mrb[157].mxu1  ;;  %v3359_v59 = vpop.f32.mrb[157].mxu0 }
 0x21f   :  { %v2156_v25 = vpop.f32.mrb[158].mxu1  ;;  %v2381_v46 = vpop.f32.mrb[158].mxu0 }
 0x220   :  { %v2492_v28 = vadd.f32 %v4655_v63, %v2464_v15  ;;  %v2234_v7 = vadd.f32 %v2156_v25, %v4599_v6  ;;  %v2465_v10 = vadd.f32 %v2381_v46, %v2232_v26  ;;  %v3360_v39 = vpop.f32.mrb[159].mxu0  ;;  %v3312_v31 = vpop.f32.mrb[159].mxu1 }
 0x222   :  { %v2513_v14 = vmax.f32 %v2492_v28, 0.0  ;;  %v2493_v20 = vadd.f32 %v4655_v63, %v2465_v10 }
 0x224   :  { %2534 = vst [vmem:[%s4763_s3] sm:$0xff] %v2513_v14  ;;  %v2514_v36 = vmax.f32 %v2493_v20, 0.0 }
 0x225   :  { %v2161_v0 = vpop.f32.mrb[160].mxu1  ;;  %v2386_v43 = vpop.f32.mrb[160].mxu0 }
 0x226   :  { %2535 = vst [vmem:[%s4763_s3 + $0x8] sm:$0xff] %v2514_v36  ;;  %v2235_v11 = vadd.f32 %v2161_v0, %v4602_v61  ;;  %v2466_v6 = vadd.f32 %v2386_v43, %v2233_v54  ;;  %v3315_v22 = vpop.f32.mrb[161].mxu1  ;;  %v3363_v38 = vpop.f32.mrb[161].mxu0 }
 0x227   :  { %v2164_v23 = vpop.f32.mrb[162].mxu1  ;;  %v2389_v50 = vpop.f32.mrb[162].mxu0 }
 0x228   :  { %v2494_v21 = vadd.f32 %v4655_v63, %v2466_v6  ;;  %v2236_v12 = vadd.f32 %v2164_v23, %v4605_v60  ;;  %v2467_v9 = vadd.f32 %v2389_v50, %v2234_v7  ;;  %v3364_v27 = vpop.f32.mrb[163].mxu0  ;;  %v3316_v5 = vpop.f32.mrb[163].mxu1 }
 0x22a   :  { %v2515_v42 = vmax.f32 %v2494_v21, 0.0  ;;  %v2495_v29 = vadd.f32 %v4655_v63, %v2467_v9 }
 0x22c   :  { %2536 = vst [vmem:[%s4763_s3 + $0x10] sm:$0xff] %v2515_v42  ;;  %v2516_v61 = vmax.f32 %v2495_v29, 0.0 }
 0x22d   :  { %v2169_v49 = vpop.f32.mrb[164].mxu1  ;;  %v2394_v51 = vpop.f32.mrb[164].mxu0 }
 0x22e   :  { %2537 = vst [vmem:[%s4763_s3 + $0x18] sm:$0xff] %v2516_v61  ;;  %v2237_v2 = vadd.f32 %v2169_v49, %v4608_v45  ;;  %v2468_v60 = vadd.f32 %v2394_v51, %v2235_v11  ;;  %v3319_v52 = vpop.f32.mrb[165].mxu1  ;;  %v3367_v55 = vpop.f32.mrb[165].mxu0 }
 0x22f   :  { %v2172_v58 = vpop.f32.mrb[166].mxu1  ;;  %v2397_v8 = vpop.f32.mrb[166].mxu0 }
 0x230   :  { %v2496_v3 = vadd.f32 %v4655_v63, %v2468_v60  ;;  %v2238_v4 = vadd.f32 %v2172_v58, %v4611_v24  ;;  %v2469_v40 = vadd.f32 %v2397_v8, %v2236_v12  ;;  %v3368_v32 = vpop.f32.mrb[167].mxu0  ;;  %v3320_v16 = vpop.f32.mrb[167].mxu1 }
 0x232   :  { %v2517_v26 = vmax.f32 %v2496_v3, 0.0  ;;  %v2497_v35 = vadd.f32 %v4655_v63, %v2469_v40 }
 0x234   :  { %2538 = vst [vmem:[%s4763_s3 + $0x20] sm:$0xff] %v2517_v26  ;;  %v2518_v45 = vmax.f32 %v2497_v35, 0.0 }
 0x235   :  { %v2177_v62 = vpop.f32.mrb[168].mxu1  ;;  %v2402_v34 = vpop.f32.mrb[168].mxu0 }
 0x236   :  { %2539 = vst [vmem:[%s4763_s3 + $0x28] sm:$0xff] %v2518_v45  ;;  %v2239_v13 = vadd.f32 %v2177_v62, %v4614_v17  ;;  %v2470_v24 = vadd.f32 %v2402_v34, %v2237_v2  ;;  %v3323_v54 = vpop.f32.mrb[169].mxu1  ;;  %v3371_v15 = vpop.f32.mrb[169].mxu0 }
 0x237   :  { %v2180_v1 = vpop.f32.mrb[170].mxu1  ;;  %v2405_v59 = vpop.f32.mrb[170].mxu0 }
 0x238   :  { %v2498_v25 = vadd.f32 %v4655_v63, %v2470_v24  ;;  %v2240_v46 = vadd.f32 %v2180_v1, %v4617_v56  ;;  %v2471_v28 = vadd.f32 %v2405_v59, %v2238_v4  ;;  %v3372_v7 = vpop.f32.mrb[171].mxu0  ;;  %v3324_v10 = vpop.f32.mrb[171].mxu1 }
 0x23a   :  { %v2519_v39 = vmax.f32 %v2498_v25, 0.0  ;;  %v2499_v31 = vadd.f32 %v4655_v63, %v2471_v28 }
 0x23c   :  { %2540 = vst [vmem:[%s4763_s3 + $0x30] sm:$0xff] %v2519_v39  ;;  %v2520_v17 = vmax.f32 %v2499_v31, 0.0 }
 0x23d   :  { %v2185_v14 = vpop.f32.mrb[172].mxu1  ;;  %v2410_v20 = vpop.f32.mrb[172].mxu0 }
 0x23e   :  { %2541 = vst [vmem:[%s4763_s3 + $0x38] sm:$0xff] %v2520_v17  ;;  %v2241_v36 = vadd.f32 %v2185_v14, %v4620_v30  ;;  %v2472_v56 = vadd.f32 %v2410_v20, %v2239_v13  ;;  %v3327_v0 = vpop.f32.mrb[173].mxu1  ;;  %v3375_v43 = vpop.f32.mrb[173].mxu0 }
 0x23f   :  { %v2188_v11 = vpop.f32.mrb[174].mxu1  ;;  %v2413_v6 = vpop.f32.mrb[174].mxu0 }
 0x240   :  { %v2500_v22 = vadd.f32 %v4655_v63, %v2472_v56  ;;  %v2242_v38 = vadd.f32 %v2188_v11, %v4623_v33  ;;  %v2473_v23 = vadd.f32 %v2413_v6, %v2240_v46  ;;  %v3376_v50 = vpop.f32.mrb[175].mxu0  ;;  %v3328_v21 = vpop.f32.mrb[175].mxu1 }
 0x242   :  { %v2521_v12 = vmax.f32 %v2500_v22, 0.0  ;;  %v2501_v9 = vadd.f32 %v4655_v63, %v2473_v23 }
 0x244   :  { %2542 = vst [vmem:[%s4763_s3 + $0x40] sm:$0xff] %v2521_v12  ;;  %v2522_v30 = vmax.f32 %v2501_v9, 0.0 }
 0x245   :  { %v2193_v27 = vpop.f32.mrb[176].mxu1  ;;  %v2418_v5 = vpop.f32.mrb[176].mxu0 }
 0x246   :  { %2543 = vst [vmem:[%s4763_s3 + $0x48] sm:$0xff] %v2522_v30  ;;  %v2243_v42 = vadd.f32 %v2193_v27, %v4626_v53  ;;  %v2474_v33 = vadd.f32 %v2418_v5, %v2241_v36  ;;  %v3331_v29 = vpop.f32.mrb[177].mxu1  ;;  %v3379_v61 = vpop.f32.mrb[177].mxu0 }
 0x247   :  { %v2196_v49 = vpop.f32.mrb[178].mxu1  ;;  %v2421_v51 = vpop.f32.mrb[178].mxu0 }
 0x248   :  { %v2502_v2 = vadd.f32 %v4655_v63, %v2474_v33  ;;  %v2244_v60 = vadd.f32 %v2196_v49, %v4629_v37  ;;  %v2475_v52 = vadd.f32 %v2421_v51, %v2242_v38  ;;  %v3380_v55 = vpop.f32.mrb[179].mxu0  ;;  %v3332_v58 = vpop.f32.mrb[179].mxu1 }
 0x24a   :  { %v2523_v8 = vmax.f32 %v2502_v2, 0.0  ;;  %v2503_v3 = vadd.f32 %v4655_v63, %v2475_v52 }
 0x24c   :  { %2544 = vst [vmem:[%s4763_s3 + $0x50] sm:$0xff] %v2523_v8  ;;  %v2524_v53 = vmax.f32 %v2503_v3, 0.0 }
 0x24d   :  { %v2201_v4 = vpop.f32.mrb[180].mxu1  ;;  %v2426_v40 = vpop.f32.mrb[180].mxu0 }
 0x24e   :  { %2545 = vst [vmem:[%s4763_s3 + $0x58] sm:$0xff] %v2524_v53  ;;  %v2245_v32 = vadd.f32 %v2201_v4, %v4632_v57  ;;  %v2476_v37 = vadd.f32 %v2426_v40, %v2243_v42  ;;  %v3335_v16 = vpop.f32.mrb[181].mxu1  ;;  %v3383_v26 = vpop.f32.mrb[181].mxu0 }
 0x24f   :  { %v2204_v35 = vpop.f32.mrb[182].mxu1  ;;  %v2429_v45 = vpop.f32.mrb[182].mxu0 }
 0x250   :  { %v2504_v62 = vadd.f32 %v4655_v63, %v2476_v37  ;;  %v2246_v34 = vadd.f32 %v2204_v35, %v4635_v19  ;;  %v2477_v13 = vadd.f32 %v2429_v45, %v2244_v60  ;;  %v3384_v24 = vpop.f32.mrb[183].mxu0  ;;  %v3336_v54 = vpop.f32.mrb[183].mxu1 }
 0x252   :  { %v2525_v15 = vmax.f32 %v2504_v62, 0.0  ;;  %v2505_v1 = vadd.f32 %v4655_v63, %v2477_v13 }
 0x254   :  { %2546 = vst [vmem:[%s4763_s3 + $0x60] sm:$0xff] %v2525_v15  ;;  %v2526_v57 = vmax.f32 %v2505_v1, 0.0 }
 0x255   :  { %v2209_v59 = vpop.f32.mrb[184].mxu1  ;;  %v2434_v25 = vpop.f32.mrb[184].mxu0 }
 0x256   :  { %2547 = vst [vmem:[%s4763_s3 + $0x68] sm:$0xff] %v2526_v57  ;;  %v2247_v46 = vadd.f32 %v2209_v59, %v4638_v44  ;;  %v2478_v19 = vadd.f32 %v2434_v25, %v2245_v32  ;;  %v3339_v28 = vpop.f32.mrb[185].mxu1  ;;  %v3387_v7 = vpop.f32.mrb[185].mxu0 }
 0x257   :  { %v2212_v10 = vpop.f32.mrb[186].mxu1  ;;  %v2437_v39 = vpop.f32.mrb[186].mxu0 }
 0x258   :  { %v2506_v31 = vadd.f32 %v4655_v63, %v2478_v19  ;;  %v2248_v17 = vadd.f32 %v2212_v10, %v4641_v18  ;;  %v2479_v14 = vadd.f32 %v2437_v39, %v2246_v34  ;;  %v3388_v20 = vpop.f32.mrb[187].mxu0  ;;  %v3340_v36 = vpop.f32.mrb[187].mxu1 }
 0x25a   :  { %v2527_v56 = vmax.f32 %v2506_v31, 0.0  ;;  %v2507_v0 = vadd.f32 %v4655_v63, %v2479_v14 }
 0x25c   :  { %2548 = vst [vmem:[%s4763_s3 + $0x70] sm:$0xff] %v2527_v56  ;;  %v2528_v44 = vmax.f32 %v2507_v0, 0.0 }
 0x25d   :  { %v2217_v43 = vpop.f32.mrb[188].mxu1  ;;  %v2442_v11 = vpop.f32.mrb[188].mxu0 }
 0x25e   :  { %2549 = vst [vmem:[%s4763_s3 + $0x78] sm:$0xff] %v2528_v44  ;;  %v2249_v6 = vadd.f32 %v2217_v43, %v4644_v41  ;;  %v2480_v18 = vadd.f32 %v2442_v11, %v2247_v46  ;;  %v3343_v22 = vpop.f32.mrb[189].mxu1  ;;  %v3391_v38 = vpop.f32.mrb[189].mxu0 }
 0x25f   :  { %v2220_v23 = vpop.f32.mrb[190].mxu1  ;;  %v2445_v50 = vpop.f32.mrb[190].mxu0 }
 0x260   :  { %v2508_v21 = vadd.f32 %v4655_v63, %v2480_v18  ;;  %v2250_v12 = vadd.f32 %v2220_v23, %v4646_v47  ;;  %v2481_v9 = vadd.f32 %v2445_v50, %v2248_v17  ;;  %v3392_v30 = vpop.f32.mrb[191].mxu0  ;;  %v3344_v27 = vpop.f32.mrb[191].mxu1 }
 0x262   :  { %v2529_v5 = vmax.f32 %v2508_v21, 0.0  ;;  %v2509_v42 = vadd.f32 %v4655_v63, %v2481_v9 }
 0x264   :  { %2550 = vst [vmem:[%s4763_s3 + $0x80] sm:$0xff] %v2529_v5  ;;  %v2530_v41 = vmax.f32 %v2509_v42, 0.0 }
 0x265   :  { %v2225_v33 = vpop.f32.mrb[192].mxu1  ;;  %v2450_v29 = vpop.f32.mrb[192].mxu0 }
 0x266   :  { %2551 = vst [vmem:[%s4763_s3 + $0x88] sm:$0xff] %v2530_v41  ;;  %v2251_v61 = vadd.f32 %v2225_v33, %v4648_v48  ;;  %v2482_v47 = vadd.f32 %v2450_v29, %v2249_v6  ;;  %v3395_v49 = vpop.f32.mrb[193].mxu0  ;;  %v3347_v51 = vpop.f32.mrb[193].mxu1 }
 0x267   :  { %v2453_v2 = vpop.f32.mrb[194].mxu0  ;;  %v2228_v60 = vpop.f32.mrb[194].mxu1 }
 0x268   :  { %v2510_v52 = vadd.f32 %v4655_v63, %v2482_v47  ;;  %v2483_v55 = vadd.f32 %v2453_v2, %v2250_v12  ;;  %v3396_v58 = vpop.f32.mrb[195].mxu0  ;;  %v3348_v8 = vpop.f32.mrb[195].mxu1 }
 0x26a   :  { %v2531_v3 = vmax.f32 %v2510_v52, 0.0  ;;  %v2511_v53 = vadd.f32 %v4655_v63, %v2483_v55 }
 0x26c   :  { %2552 = vst [vmem:[%s4763_s3 + $0x90] sm:$0xff] %v2531_v3  ;;  %v2532_v4 = vmax.f32 %v2511_v53, 0.0 }
 0x26d   :  { %v2458_v40 = vpop.f32.mrb[196].mxu0 }
 0x26e   :  { %2553 = vst [vmem:[%s4763_s3 + $0x98] sm:$0xff] %v2532_v4  ;;  %v2484_v48 = vadd.f32 %v2458_v40, %v2251_v61  ;;  %v3399_v32 = vpop.f32.mrb[197].mxu0 }
 0x26f   :  { %v2461_v37 = vpop.f32.mrb[198].mxu0 }
 0x270   :  { %v2512_v16 = vadd.f32 %v4655_v63, %v2484_v48  ;;  %v3400_v26 = vpop.f32.mrb[199].mxu0 }
 0x272   :  { %v2533_v35 = vmax.f32 %v2512_v16, 0.0 }
 0x274   :  { %2554 = vst [vmem:[%s4763_s3 + $0xa0] sm:$0x3] %v2533_v35 }

</bundles_post_ra>
